<compile_context>
chip_gen: v6e
topology: v6e:2x2x1
jax: 0.10.0
libtpu: 0.0.40
codegen_flags: <defaults>
</compile_context>

<pallas_src>
import math
import functools

import jax
import jax.numpy as jnp
from jax.experimental import pallas as pl
from jax.experimental.pallas import tpu as pltpu


# ------------------------- in-kernel helpers -------------------------------

def _layer_norm(x, w, b, eps=1e-5):
    # x: (M, E) f32, w/b: (1, E) f32
    mu = jnp.mean(x, axis=-1, keepdims=True)
    xc = x - mu
    var = jnp.mean(xc * xc, axis=-1, keepdims=True)
    return xc * jax.lax.rsqrt(var + eps) * w + b


def _dot(a, w):
    # (M, K) @ (K, N) MXU dot; weight already host-cast to the compute dtype,
    # activation cast here, f32 accumulation.
    return jnp.dot(a.astype(w.dtype), w, preferred_element_type=jnp.float32)


def _mha_core(q, k, v, B, L, S, nhead, dt, approx_softmax):
    """Attention core.  q: (B*L, E) f32 (already q-scaled); k, v: (B*S, E) f32."""
    E = q.shape[-1]
    Dh = E // nhead
    outs = []
    # Small static loop over the batch tile (unrolled at trace time); each
    # element runs a head-batched 3-D dot_general pair (proven Mosaic path).
    for b in range(B):
        qh = q[b * L:(b + 1) * L].reshape(L, nhead, Dh).transpose(1, 0, 2)   # (H,L,Dh)
        kh = k[b * S:(b + 1) * S].reshape(S, nhead, Dh).transpose(1, 0, 2)   # (H,S,Dh)
        vh = v[b * S:(b + 1) * S].reshape(S, nhead, Dh).transpose(1, 0, 2)   # (H,S,Dh)

        s = jax.lax.dot_general(qh.astype(dt), kh.astype(dt),
                                (((2,), (2,)), ((0,), (0,))),
                                preferred_element_type=jnp.float32)          # (H,L,S)
        s = s - jnp.max(s, axis=-1, keepdims=True)
        p = jnp.exp(s)
        denom = jnp.sum(p, axis=-1, keepdims=True)
        if approx_softmax:
            p = p * pl.reciprocal(denom, approx=True)    # EUP slot, ~1e-3-level error
        else:
            p = p / denom                                # exact (default)

        o = jax.lax.dot_general(p.astype(dt), vh.astype(dt),
                                (((2,), (1,)), ((0,), (0,))),
                                preferred_element_type=jnp.float32)          # (H,L,Dh)
        outs.append(jnp.transpose(o, (1, 0, 2)).reshape(L, E))
    return outs[0] if B == 1 else jnp.concatenate(outs, axis=0)              # (B*L, E)


# ------------------------------ kernel --------------------------------------

def _decoder_layer_kernel(
        tgt_ref, mem_ref, qpos_ref, pos_ref,
        sa_wq_ref, sa_bq_ref, sa_wk_ref, sa_bk_ref, sa_wv_ref, sa_bv_ref,
        sa_wo_ref, sa_bo_ref,
        ca_wq_ref, ca_bq_ref, ca_wk_ref, ca_bk_ref, ca_wv_ref, ca_bv_ref,
        ca_wo_ref, ca_bo_ref,
        w1_ref, b1_ref, w2_ref, b2_ref,
        n1w_ref, n1b_ref, n2w_ref, n2b_ref, n3w_ref, n3b_ref,
        out_ref, *, nhead, approx_softmax):
    B, L, E = tgt_ref.shape
    S = mem_ref.shape[1]
    dt = sa_wq_ref.dtype   # compute dtype chosen host-side (bf16 default)

    # Flatten the batch tile into the row (sublane) dim so every projection /
    # FFN matmul is one (B*L, K) @ (K, N) MXU dot (free relayout when L, S are
    # multiples of 8).
    tgt = tgt_ref[...].reshape(B * L, E)
    mem = mem_ref[...].reshape(B * S, E)
    qpos = qpos_ref[...].reshape(B * L, E)
    pos = pos_ref[...].reshape(B * S, E)

    # --- self attention: q = k = tgt + query_pos, v = tgt -------------------
    qk_in = tgt + qpos
    q = _dot(qk_in, sa_wq_ref[...]) + sa_bq_ref[...]     # q-scale folded in
    k = _dot(qk_in, sa_wk_ref[...]) + sa_bk_ref[...]
    v = _dot(tgt, sa_wv_ref[...]) + sa_bv_ref[...]
    sa = _mha_core(q, k, v, B, L, L, nhead, dt, approx_softmax)
    sa = _dot(sa, sa_wo_ref[...]) + sa_bo_ref[...]
    x = _layer_norm(tgt + sa, n1w_ref[...], n1b_ref[...])

    # --- cross attention: q = x + query_pos, k = memory + pos, v = memory ---
    q = _dot(x + qpos, ca_wq_ref[...]) + ca_bq_ref[...]  # q-scale folded in
    k = _dot(mem + pos, ca_wk_ref[...]) + ca_bk_ref[...]
    v = _dot(mem, ca_wv_ref[...]) + ca_bv_ref[...]
    ca = _mha_core(q, k, v, B, L, S, nhead, dt, approx_softmax)
    ca = _dot(ca, ca_wo_ref[...]) + ca_bo_ref[...]
    x = _layer_norm(x + ca, n2w_ref[...], n2b_ref[...])

    # --- feed-forward: linear2(relu(linear1(x))) -----------------------------
    h = jnp.maximum(_dot(x, w1_ref[...]) + b1_ref[...], 0.0)   # (B*L, F)
    ff = _dot(h, w2_ref[...]) + b2_ref[...]                    # (B*L, E)
    x = _layer_norm(x + ff, n3w_ref[...], n3b_ref[...])

    out_ref[...] = x.reshape(B, L, E).astype(out_ref.dtype)


# ------------------------------ wrapper --------------------------------------

def _prep_weights(params, nhead, compute_dtype):
    """Host-side (one-time): transpose to (K, N), split QKV, fold the q-scale,
    and cast matmul weights to the compute dtype.  Biases / layernorm params
    stay f32 (they are applied to the f32 accumulator)."""
    E = params['sa_out_w'].shape[0]
    assert E % nhead == 0, "d_model must be divisible by nhead"
    Dh = E // nhead
    # NOTE: folding the 1/sqrt(Dh) q-scale into the Q projection (weight and
    # bias) is only valid while the scale is uniform across heads.
    scale = 1.0 / math.sqrt(Dh)

    def mm(w, s=1.0):
        # scale in f32, then cast to the compute dtype
        return (jnp.transpose(w) * s).astype(compute_dtype)

    sa_in_w, sa_in_b = params['sa_in_w'], params['sa_in_b']
    ca_in_w, ca_in_b = params['ca_in_w'], params['ca_in_b']

    return (
        mm(sa_in_w[:E], scale),        sa_in_b[:, :E] * scale,        # SA Q (scaled)
        mm(sa_in_w[E:2 * E]),          sa_in_b[:, E:2 * E],           # SA K
        mm(sa_in_w[2 * E:]),           sa_in_b[:, 2 * E:],            # SA V
        mm(params['sa_out_w']),        params['sa_out_b'],            # SA out proj
        mm(ca_in_w[:E], scale),        ca_in_b[:, :E] * scale,        # CA Q (scaled)
        mm(ca_in_w[E:2 * E]),          ca_in_b[:, E:2 * E],           # CA K
        mm(ca_in_w[2 * E:]),           ca_in_b[:, 2 * E:],            # CA V
        mm(params['ca_out_w']),        params['ca_out_b'],            # CA out proj
        mm(params['w1']),              params['b1'],                  # FFN 1
        mm(params['w2']),              params['b2'],                  # FFN 2
        params['n1_w'], params['n1_b'],
        params['n2_w'], params['n2_b'],
        params['n3_w'], params['n3_b'],
    )


def _choose_b_tile(n):
    divisors = [d for d in range(1, n + 1) if n % d == 0]
    # largest tile <= 8 that still leaves >= 2 grid steps (v7x has 2 TCs)
    cands = [d for d in divisors if d <= 8 and n // d >= 2]
    if not cands:
        cands = [d for d in divisors if d <= 8]
    return max(cands)


def _auto_vmem_limit(b_tile, L, S, E, F, nhead, weights):
    """Rough VMEM budget; only returned when it exceeds the default scoped
    limit of smaller chips (notably v5e's 16 MiB) at production-scale shapes."""
    f32 = 4
    wbytes = 2 * sum(int(w.size) * w.dtype.itemsize for w in weights)   # <= 2 buffers
    act_in = 2 * 2 * b_tile * (L + S) * E * f32                         # 4 blocks, 2 buffers
    act_out = 2 * b_tile * L * E * f32
    scores = b_tile * nhead * L * max(L, S) * f32
    ffn = b_tile * L * F * f32
    temps = 10 * b_tile * L * E * f32
    est = 2 * (wbytes + act_in + act_out + scores + ffn + temps)        # 2x headroom
    if est <= 12 * 2 ** 20:
        return None
    return min(est, 100 * 2 ** 20)


def transformer_decoder_layer(tgt, memory, query_pos, pos, params, *, nhead,
                              compute_dtype=jnp.bfloat16, b_tile=None,
                              batch_first=False, approx_softmax=False,
                              vmem_limit_bytes=None):
    """DETR TransformerDecoderLayer.forward_post (eval mode, no masks).

    tgt/query_pos: (L, N, E), memory/pos: (S, N, E) in PyTorch seq-first layout
    (default); pass batch_first=True with (N, L, E)/(N, S, E) inputs to skip
    the wrapper transposes.  Output matches the input layout, f32.
    """
    if batch_first:
        tgt_b, mem_b, qpos_b, pos_b = tgt, memory, query_pos, pos
        N, L, E = tgt_b.shape
        S = mem_b.shape[1]
    else:
        L, N, E = tgt.shape
        S = memory.shape[0]
        tgt_b = jnp.transpose(tgt, (1, 0, 2))
        mem_b = jnp.transpose(memory, (1, 0, 2))
        qpos_b = jnp.transpose(query_pos, (1, 0, 2))
        pos_b = jnp.transpose(pos, (1, 0, 2))

    if b_tile is None:
        b_tile = _choose_b_tile(N)
    assert N % b_tile == 0, "b_tile must divide the batch size"
    nb = N // b_tile

    weights = _prep_weights(params, nhead, compute_dtype)
    F_ff = params['w1'].shape[0]
    if vmem_limit_bytes is None:
        vmem_limit_bytes = _auto_vmem_limit(b_tile, L, S, E, F_ff, nhead, weights)

    kernel = functools.partial(_decoder_layer_kernel, nhead=nhead,
                               approx_softmax=approx_softmax)

    def act_spec(seq):
        return pl.BlockSpec((b_tile, seq, E), lambda n: (n, 0, 0))

    def build(single_buffer_weights):
        # constant-index weight blocks gain nothing from double buffering but
        # reserve 2x VMEM -> request single buffering when supported.
        wkw = ({'pipeline_mode': pl.Buffered(1)} if single_buffer_weights else {})
        w_specs = [pl.BlockSpec(w.shape, lambda n: (0, 0), **wkw) for w in weights]
        return pl.pallas_call(
            kernel,
            out_shape=jax.ShapeDtypeStruct((N, L, E), jnp.float32),
            grid=(nb,),
            in_specs=[act_spec(L), act_spec(S), act_spec(L), act_spec(S)] + w_specs,
            out_specs=pl.BlockSpec((b_tile, L, E), lambda n: (n, 0, 0)),
            compiler_params=pltpu.CompilerParams(
                dimension_semantics=("parallel",),
                vmem_limit_bytes=vmem_limit_bytes),
        )

    try:
        out_b = build(True)(tgt_b, mem_b, qpos_b, pos_b, *weights)
    except Exception:
        # pipeline_mode=pl.Buffered(1) not supported on this jax version;
        # fall back to default (double-buffered) weight blocks.
        out_b = build(False)(tgt_b, mem_b, qpos_b, pos_b, *weights)

    return out_b if batch_first else jnp.transpose(out_b, (1, 0, 2))


# --------------------------- pure-JAX reference -------------------------------

def _ref_mha(q, k, v, in_w, in_b, out_w, out_b, nhead):
    # batch-first: q (N, L, E), k/v (N, S, E)
    N, L, E = q.shape
    Dh = E // nhead
    scale = 1.0 / math.sqrt(Dh)
    wq, wk, wv = in_w[:E], in_w[E:2 * E], in_w[2 * E:]
    bq, bk, bv = in_b[0, :E], in_b[0, E:2 * E], in_b[0, 2 * E:]
    qp = (q @ wq.T + bq) * scale
    kp = k @ wk.T + bk
    vp = v @ wv.T + bv
    qp = qp.reshape(N, L, nhead, Dh)
    kp = kp.reshape(N, -1, nhead, Dh)
    vp = vp.reshape(N, -1, nhead, Dh)
    s = jnp.einsum('nlhd,nshd->nhls', qp, kp)
    p = jax.nn.softmax(s, axis=-1)
    o = jnp.einsum('nhls,nshd->nlhd', p, vp).reshape(N, L, E)
    return o @ out_w.T + out_b[0]


def _ref_ln(x, w, b, eps=1e-5):
    mu = jnp.mean(x, -1, keepdims=True)
    var = jnp.mean((x - mu) ** 2, -1, keepdims=True)
    return (x - mu) / jnp.sqrt(var + eps) * w[0] + b[0]


def ref_decoder_layer(tgt, memory, query_pos, pos, p, *, nhead):
    t = jnp.transpose(tgt, (1, 0, 2))
    m = jnp.transpose(memory, (1, 0, 2))
    qp = jnp.transpose(query_pos, (1, 0, 2))
    po = jnp.transpose(pos, (1, 0, 2))

    sa = _ref_mha(t + qp, t + qp, t, p['sa_in_w'], p['sa_in_b'],
                  p['sa_out_w'], p['sa_out_b'], nhead)
    x = _ref_ln(t + sa, p['n1_w'], p['n1_b'])
    ca = _ref_mha(x + qp, m + po, m, p['ca_in_w'], p['ca_in_b'],
                  p['ca_out_w'], p['ca_out_b'], nhead)
    x = _ref_ln(x + ca, p['n2_w'], p['n2_b'])
    ff = jnp.maximum(x @ p['w1'].T + p['b1'][0], 0.0) @ p['w2'].T + p['b2'][0]
    x = _ref_ln(x + ff, p['n3_w'], p['n3_b'])
    return jnp.transpose(x, (1, 0, 2))


# ------------------------------- main ----------------------------------------

if __name__ == "__main__":
    d_model, nhead, dim_ff = 32, 4, 64
    L, S, N = 8, 16, 4            # N=4 -> b_tile=2, grid=2 (both TCs busy on v7x)

    key = jax.random.PRNGKey(0)
    ks = jax.random.split(key, 20)

    def w(k, shape, s=0.05):
        return jax.random.normal(k, shape, jnp.float32) * s

    params = {
        'sa_in_w': w(ks[0], (3 * d_model, d_model)),
        'sa_in_b': w(ks[1], (1, 3 * d_model)),
        'sa_out_w': w(ks[2], (d_model, d_model)),
        'sa_out_b': jnp.zeros((1, d_model), jnp.float32),
        'ca_in_w': w(ks[3], (3 * d_model, d_model)),
        'ca_in_b': w(ks[4], (1, 3 * d_model)),
        'ca_out_w': w(ks[5], (d_model, d_model)),
        'ca_out_b': jnp.zeros((1, d_model), jnp.float32),
        'w1': w(ks[6], (dim_ff, d_model)),
        'b1': w(ks[7], (1, dim_ff)),
        'w2': w(ks[8], (d_model, dim_ff)),
        'b2': w(ks[9], (1, d_model)),
        'n1_w': jnp.ones((1, d_model), jnp.float32),
        'n1_b': jnp.zeros((1, d_model), jnp.float32),
        'n2_w': jnp.ones((1, d_model), jnp.float32),
        'n2_b': jnp.zeros((1, d_model), jnp.float32),
        'n3_w': jnp.ones((1, d_model), jnp.float32),
        'n3_b': jnp.zeros((1, d_model), jnp.float32),
    }

    tgt = w(ks[10], (L, N, d_model), 1.0)
    memory = w(ks[11], (S, N, d_model), 1.0)
    query_pos = w(ks[12], (L, N, d_model), 1.0)
    pos = w(ks[13], (S, N, d_model), 1.0)

    ref = ref_decoder_layer(tgt, memory, query_pos, pos, params, nhead=nhead)

    # Exactness check: f32 compute path, exact softmax divide.
    out_f32 = transformer_decoder_layer(tgt, memory, query_pos, pos, params,
                                        nhead=nhead, compute_dtype=jnp.float32)
    out_f32 = jax.block_until_ready(out_f32)
    assert out_f32.shape == (L, N, d_model)
    assert jnp.allclose(out_f32, ref, atol=3e-3, rtol=3e-3), \
        f"f32 max abs err {jnp.max(jnp.abs(out_f32 - ref))}"

    # Default path: bf16 MXU compute (f32 accumulation + f32 LN/softmax math).
    out_bf16 = transformer_decoder_layer(tgt, memory, query_pos, pos, params,
                                         nhead=nhead)
    out_bf16 = jax.block_until_ready(out_bf16)
    assert out_bf16.shape == (L, N, d_model)
    assert jnp.allclose(out_bf16, ref, atol=5e-2, rtol=5e-2), \
        f"bf16 max abs err {jnp.max(jnp.abs(out_bf16 - ref))}"

    print("KERNEL_OK")
</pallas_src>

<mosaic_0001>
module attributes {stable_mosaic.version = 11 : i64} {
  func.func @_decoder_layer_kernel(%arg0: i32, %arg1: memref<2x8x32xf32, #tpu.memory_space<vmem>>, %arg2: memref<2x16x32xf32, #tpu.memory_space<vmem>>, %arg3: memref<2x8x32xf32, #tpu.memory_space<vmem>>, %arg4: memref<2x16x32xf32, #tpu.memory_space<vmem>>, %arg5: memref<32x32xf32, #tpu.memory_space<vmem>>, %arg6: memref<1x32xf32, #tpu.memory_space<vmem>>, %arg7: memref<32x32xf32, #tpu.memory_space<vmem>>, %arg8: memref<1x32xf32, #tpu.memory_space<vmem>>, %arg9: memref<32x32xf32, #tpu.memory_space<vmem>>, %arg10: memref<1x32xf32, #tpu.memory_space<vmem>>, %arg11: memref<32x32xf32, #tpu.memory_space<vmem>>, %arg12: memref<1x32xf32, #tpu.memory_space<vmem>>, %arg13: memref<32x32xf32, #tpu.memory_space<vmem>>, %arg14: memref<1x32xf32, #tpu.memory_space<vmem>>, %arg15: memref<32x32xf32, #tpu.memory_space<vmem>>, %arg16: memref<1x32xf32, #tpu.memory_space<vmem>>, %arg17: memref<32x32xf32, #tpu.memory_space<vmem>>, %arg18: memref<1x32xf32, #tpu.memory_space<vmem>>, %arg19: memref<32x32xf32, #tpu.memory_space<vmem>>, %arg20: memref<1x32xf32, #tpu.memory_space<vmem>>, %arg21: memref<32x64xf32, #tpu.memory_space<vmem>>, %arg22: memref<1x64xf32, #tpu.memory_space<vmem>>, %arg23: memref<64x32xf32, #tpu.memory_space<vmem>>, %arg24: memref<1x32xf32, #tpu.memory_space<vmem>>, %arg25: memref<1x32xf32, #tpu.memory_space<vmem>>, %arg26: memref<1x32xf32, #tpu.memory_space<vmem>>, %arg27: memref<1x32xf32, #tpu.memory_space<vmem>>, %arg28: memref<1x32xf32, #tpu.memory_space<vmem>>, %arg29: memref<1x32xf32, #tpu.memory_space<vmem>>, %arg30: memref<1x32xf32, #tpu.memory_space<vmem>>, %arg31: memref<2x8x32xf32, #tpu.memory_space<vmem>>) attributes {dimension_semantics = [#tpu.dimension_semantics<parallel>], iteration_bounds = array<i64: 2>, scalar_prefetch = 0 : i64, scratch_operands = 0 : i64, tpu.core_type = #tpu.core_type<tc>, window_params = [{transform_indices = @transform_0, window_bounds = array<i64: 2, 8, 32>}, {transform_indices = @transform_1, window_bounds = array<i64: 2, 16, 32>}, {transform_indices = @transform_2, window_bounds = array<i64: 2, 8, 32>}, {transform_indices = @transform_3, window_bounds = array<i64: 2, 16, 32>}, {pipeline_mode = #tpu.pipeline_mode<synchronous>, transform_indices = @transform_4, window_bounds = array<i64: 32, 32>}, {pipeline_mode = #tpu.pipeline_mode<synchronous>, transform_indices = @transform_5, window_bounds = array<i64: 1, 32>}, {pipeline_mode = #tpu.pipeline_mode<synchronous>, transform_indices = @transform_6, window_bounds = array<i64: 32, 32>}, {pipeline_mode = #tpu.pipeline_mode<synchronous>, transform_indices = @transform_7, window_bounds = array<i64: 1, 32>}, {pipeline_mode = #tpu.pipeline_mode<synchronous>, transform_indices = @transform_8, window_bounds = array<i64: 32, 32>}, {pipeline_mode = #tpu.pipeline_mode<synchronous>, transform_indices = @transform_9, window_bounds = array<i64: 1, 32>}, {pipeline_mode = #tpu.pipeline_mode<synchronous>, transform_indices = @transform_10, window_bounds = array<i64: 32, 32>}, {pipeline_mode = #tpu.pipeline_mode<synchronous>, transform_indices = @transform_11, window_bounds = array<i64: 1, 32>}, {pipeline_mode = #tpu.pipeline_mode<synchronous>, transform_indices = @transform_12, window_bounds = array<i64: 32, 32>}, {pipeline_mode = #tpu.pipeline_mode<synchronous>, transform_indices = @transform_13, window_bounds = array<i64: 1, 32>}, {pipeline_mode = #tpu.pipeline_mode<synchronous>, transform_indices = @transform_14, window_bounds = array<i64: 32, 32>}, {pipeline_mode = #tpu.pipeline_mode<synchronous>, transform_indices = @transform_15, window_bounds = array<i64: 1, 32>}, {pipeline_mode = #tpu.pipeline_mode<synchronous>, transform_indices = @transform_16, window_bounds = array<i64: 32, 32>}, {pipeline_mode = #tpu.pipeline_mode<synchronous>, transform_indices = @transform_17, window_bounds = array<i64: 1, 32>}, {pipeline_mode = #tpu.pipeline_mode<synchronous>, transform_indices = @transform_18, window_bounds = array<i64: 32, 32>}, {pipeline_mode = #tpu.pipeline_mode<synchronous>, transform_indices = @transform_19, window_bounds = array<i64: 1, 32>}, {pipeline_mode = #tpu.pipeline_mode<synchronous>, transform_indices = @transform_20, window_bounds = array<i64: 32, 64>}, {pipeline_mode = #tpu.pipeline_mode<synchronous>, transform_indices = @transform_21, window_bounds = array<i64: 1, 64>}, {pipeline_mode = #tpu.pipeline_mode<synchronous>, transform_indices = @transform_22, window_bounds = array<i64: 64, 32>}, {pipeline_mode = #tpu.pipeline_mode<synchronous>, transform_indices = @transform_23, window_bounds = array<i64: 1, 32>}, {pipeline_mode = #tpu.pipeline_mode<synchronous>, transform_indices = @transform_24, window_bounds = array<i64: 1, 32>}, {pipeline_mode = #tpu.pipeline_mode<synchronous>, transform_indices = @transform_25, window_bounds = array<i64: 1, 32>}, {pipeline_mode = #tpu.pipeline_mode<synchronous>, transform_indices = @transform_26, window_bounds = array<i64: 1, 32>}, {pipeline_mode = #tpu.pipeline_mode<synchronous>, transform_indices = @transform_27, window_bounds = array<i64: 1, 32>}, {pipeline_mode = #tpu.pipeline_mode<synchronous>, transform_indices = @transform_28, window_bounds = array<i64: 1, 32>}, {pipeline_mode = #tpu.pipeline_mode<synchronous>, transform_indices = @transform_29, window_bounds = array<i64: 1, 32>}, {transform_indices = @transform_30, window_bounds = array<i64: 2, 8, 32>}]} {
    %c0 = arith.constant 0 : index
    %c0_0 = arith.constant 0 : index
    %c0_1 = arith.constant 0 : index
    %0 = vector.load %arg1[%c0, %c0_0, %c0_1] : memref<2x8x32xf32, #tpu.memory_space<vmem>>, vector<2x8x32xf32>
    %1 = vector.shape_cast %0 : vector<2x8x32xf32> to vector<16x32xf32>
    %c0_2 = arith.constant 0 : index
    %c0_3 = arith.constant 0 : index
    %c0_4 = arith.constant 0 : index
    %2 = vector.load %arg2[%c0_2, %c0_3, %c0_4] : memref<2x16x32xf32, #tpu.memory_space<vmem>>, vector<2x16x32xf32>
    %3 = vector.shape_cast %2 : vector<2x16x32xf32> to vector<32x32xf32>
    %c0_5 = arith.constant 0 : index
    %c0_6 = arith.constant 0 : index
    %c0_7 = arith.constant 0 : index
    %4 = vector.load %arg3[%c0_5, %c0_6, %c0_7] : memref<2x8x32xf32, #tpu.memory_space<vmem>>, vector<2x8x32xf32>
    %5 = vector.shape_cast %4 : vector<2x8x32xf32> to vector<16x32xf32>
    %c0_8 = arith.constant 0 : index
    %c0_9 = arith.constant 0 : index
    %c0_10 = arith.constant 0 : index
    %6 = vector.load %arg4[%c0_8, %c0_9, %c0_10] : memref<2x16x32xf32, #tpu.memory_space<vmem>>, vector<2x16x32xf32>
    %7 = vector.shape_cast %6 : vector<2x16x32xf32> to vector<32x32xf32>
    %8 = arith.addf %1, %5 : vector<16x32xf32>
    %c0_11 = arith.constant 0 : index
    %c0_12 = arith.constant 0 : index
    %9 = vector.load %arg5[%c0_11, %c0_12] : memref<32x32xf32, #tpu.memory_space<vmem>>, vector<32x32xf32>
    %cst = arith.constant dense<0.000000e+00> : vector<16x32xf32>
    %10 = tpu.matmul %8, %9, %cst {dimension_numbers = #tpu.dot_dimension_numbers<[1], [0], [0], [1], [0, 0, 1, 1], [], []>} : vector<16x32xf32>, vector<32x32xf32>, vector<16x32xf32> -> vector<16x32xf32>
    %c0_13 = arith.constant 0 : index
    %c0_14 = arith.constant 0 : index
    %11 = vector.load %arg6[%c0_13, %c0_14] : memref<1x32xf32, #tpu.memory_space<vmem>>, vector<1x32xf32>
    %12 = vector.broadcast %11 : vector<1x32xf32> to vector<16x32xf32>
    %13 = arith.addf %10, %12 : vector<16x32xf32>
    %c0_15 = arith.constant 0 : index
    %c0_16 = arith.constant 0 : index
    %14 = vector.load %arg7[%c0_15, %c0_16] : memref<32x32xf32, #tpu.memory_space<vmem>>, vector<32x32xf32>
    %cst_17 = arith.constant dense<0.000000e+00> : vector<16x32xf32>
    %15 = tpu.matmul %8, %14, %cst_17 {dimension_numbers = #tpu.dot_dimension_numbers<[1], [0], [0], [1], [0, 0, 1, 1], [], []>} : vector<16x32xf32>, vector<32x32xf32>, vector<16x32xf32> -> vector<16x32xf32>
    %c0_18 = arith.constant 0 : index
    %c0_19 = arith.constant 0 : index
    %16 = vector.load %arg8[%c0_18, %c0_19] : memref<1x32xf32, #tpu.memory_space<vmem>>, vector<1x32xf32>
    %17 = vector.broadcast %16 : vector<1x32xf32> to vector<16x32xf32>
    %18 = arith.addf %15, %17 : vector<16x32xf32>
    %c0_20 = arith.constant 0 : index
    %c0_21 = arith.constant 0 : index
    %19 = vector.load %arg9[%c0_20, %c0_21] : memref<32x32xf32, #tpu.memory_space<vmem>>, vector<32x32xf32>
    %cst_22 = arith.constant dense<0.000000e+00> : vector<16x32xf32>
    %20 = tpu.matmul %1, %19, %cst_22 {dimension_numbers = #tpu.dot_dimension_numbers<[1], [0], [0], [1], [0, 0, 1, 1], [], []>} : vector<16x32xf32>, vector<32x32xf32>, vector<16x32xf32> -> vector<16x32xf32>
    %c0_23 = arith.constant 0 : index
    %c0_24 = arith.constant 0 : index
    %21 = vector.load %arg10[%c0_23, %c0_24] : memref<1x32xf32, #tpu.memory_space<vmem>>, vector<1x32xf32>
    %22 = vector.broadcast %21 : vector<1x32xf32> to vector<16x32xf32>
    %23 = arith.addf %20, %22 : vector<16x32xf32>
    %24 = vector.extract_strided_slice %13 {offsets = [0, 0], sizes = [8, 32], strides = [1, 1]} : vector<16x32xf32> to vector<8x32xf32>
    %25 = vector.shape_cast %24 : vector<8x32xf32> to vector<8x4x8xf32>
    %26 = tpu.transpose %25, [1, 0, 2] : vector<8x4x8xf32> -> vector<4x8x8xf32>
    %27 = vector.extract_strided_slice %18 {offsets = [0, 0], sizes = [8, 32], strides = [1, 1]} : vector<16x32xf32> to vector<8x32xf32>
    %28 = vector.shape_cast %27 : vector<8x32xf32> to vector<8x4x8xf32>
    %29 = tpu.transpose %28, [1, 0, 2] : vector<8x4x8xf32> -> vector<4x8x8xf32>
    %30 = vector.extract_strided_slice %23 {offsets = [0, 0], sizes = [8, 32], strides = [1, 1]} : vector<16x32xf32> to vector<8x32xf32>
    %31 = vector.shape_cast %30 : vector<8x32xf32> to vector<8x4x8xf32>
    %32 = tpu.transpose %31, [1, 0, 2] : vector<8x4x8xf32> -> vector<4x8x8xf32>
    %cst_25 = arith.constant dense<0.000000e+00> : vector<4x8x8xf32>
    %33 = tpu.matmul %26, %29, %cst_25 {dimension_numbers = #tpu.dot_dimension_numbers<[2], [2], [1], [1], [0, 0, 0, 1, 1, 1], [0], [0]>} : vector<4x8x8xf32>, vector<4x8x8xf32>, vector<4x8x8xf32> -> vector<4x8x8xf32>
    %cst_26 = arith.constant dense<0xFF800000> : vector<4x8xf32>
    %34 = vector.multi_reduction <maximumf>, %33, %cst_26 [2] : vector<4x8x8xf32> to vector<4x8xf32>
    %35 = vector.shape_cast %34 : vector<4x8xf32> to vector<4x8x1xf32>
    %36 = vector.broadcast %35 : vector<4x8x1xf32> to vector<4x8x8xf32>
    %37 = arith.subf %33, %36 : vector<4x8x8xf32>
    %38 = math.exp %37 : vector<4x8x8xf32>
    %cst_27 = arith.constant dense<0.000000e+00> : vector<4x8xf32>
    %39 = vector.multi_reduction <add>, %38, %cst_27 [2] : vector<4x8x8xf32> to vector<4x8xf32>
    %40 = vector.shape_cast %39 : vector<4x8xf32> to vector<4x8x1xf32>
    %41 = vector.broadcast %40 : vector<4x8x1xf32> to vector<4x8x8xf32>
    %42 = arith.divf %38, %41 : vector<4x8x8xf32>
    %cst_28 = arith.constant dense<0.000000e+00> : vector<4x8x8xf32>
    %43 = tpu.matmul %42, %32, %cst_28 {dimension_numbers = #tpu.dot_dimension_numbers<[2], [1], [1], [2], [0, 0, 0, 1, 1, 2], [0], [0]>} : vector<4x8x8xf32>, vector<4x8x8xf32>, vector<4x8x8xf32> -> vector<4x8x8xf32>
    %44 = tpu.transpose %43, [1, 0, 2] : vector<4x8x8xf32> -> vector<8x4x8xf32>
    %45 = vector.shape_cast %44 : vector<8x4x8xf32> to vector<8x32xf32>
    %46 = vector.extract_strided_slice %13 {offsets = [8, 0], sizes = [8, 32], strides = [1, 1]} : vector<16x32xf32> to vector<8x32xf32>
    %47 = vector.shape_cast %46 : vector<8x32xf32> to vector<8x4x8xf32>
    %48 = tpu.transpose %47, [1, 0, 2] : vector<8x4x8xf32> -> vector<4x8x8xf32>
    %49 = vector.extract_strided_slice %18 {offsets = [8, 0], sizes = [8, 32], strides = [1, 1]} : vector<16x32xf32> to vector<8x32xf32>
    %50 = vector.shape_cast %49 : vector<8x32xf32> to vector<8x4x8xf32>
    %51 = tpu.transpose %50, [1, 0, 2] : vector<8x4x8xf32> -> vector<4x8x8xf32>
    %52 = vector.extract_strided_slice %23 {offsets = [8, 0], sizes = [8, 32], strides = [1, 1]} : vector<16x32xf32> to vector<8x32xf32>
    %53 = vector.shape_cast %52 : vector<8x32xf32> to vector<8x4x8xf32>
    %54 = tpu.transpose %53, [1, 0, 2] : vector<8x4x8xf32> -> vector<4x8x8xf32>
    %cst_29 = arith.constant dense<0.000000e+00> : vector<4x8x8xf32>
    %55 = tpu.matmul %48, %51, %cst_29 {dimension_numbers = #tpu.dot_dimension_numbers<[2], [2], [1], [1], [0, 0, 0, 1, 1, 1], [0], [0]>} : vector<4x8x8xf32>, vector<4x8x8xf32>, vector<4x8x8xf32> -> vector<4x8x8xf32>
    %cst_30 = arith.constant dense<0xFF800000> : vector<4x8xf32>
    %56 = vector.multi_reduction <maximumf>, %55, %cst_30 [2] : vector<4x8x8xf32> to vector<4x8xf32>
    %57 = vector.shape_cast %56 : vector<4x8xf32> to vector<4x8x1xf32>
    %58 = vector.broadcast %57 : vector<4x8x1xf32> to vector<4x8x8xf32>
    %59 = arith.subf %55, %58 : vector<4x8x8xf32>
    %60 = math.exp %59 : vector<4x8x8xf32>
    %cst_31 = arith.constant dense<0.000000e+00> : vector<4x8xf32>
    %61 = vector.multi_reduction <add>, %60, %cst_31 [2] : vector<4x8x8xf32> to vector<4x8xf32>
    %62 = vector.shape_cast %61 : vector<4x8xf32> to vector<4x8x1xf32>
    %63 = vector.broadcast %62 : vector<4x8x1xf32> to vector<4x8x8xf32>
    %64 = arith.divf %60, %63 : vector<4x8x8xf32>
    %cst_32 = arith.constant dense<0.000000e+00> : vector<4x8x8xf32>
    %65 = tpu.matmul %64, %54, %cst_32 {dimension_numbers = #tpu.dot_dimension_numbers<[2], [1], [1], [2], [0, 0, 0, 1, 1, 2], [0], [0]>} : vector<4x8x8xf32>, vector<4x8x8xf32>, vector<4x8x8xf32> -> vector<4x8x8xf32>
    %66 = tpu.transpose %65, [1, 0, 2] : vector<4x8x8xf32> -> vector<8x4x8xf32>
    %67 = vector.shape_cast %66 : vector<8x4x8xf32> to vector<8x32xf32>
    %68 = tpu.concatenate %45, %67 in 0 : vector<8x32xf32>, vector<8x32xf32> -> vector<16x32xf32>
    %c0_33 = arith.constant 0 : index
    %c0_34 = arith.constant 0 : index
    %69 = vector.load %arg11[%c0_33, %c0_34] : memref<32x32xf32, #tpu.memory_space<vmem>>, vector<32x32xf32>
    %cst_35 = arith.constant dense<0.000000e+00> : vector<16x32xf32>
    %70 = tpu.matmul %68, %69, %cst_35 {dimension_numbers = #tpu.dot_dimension_numbers<[1], [0], [0], [1], [0, 0, 1, 1], [], []>} : vector<16x32xf32>, vector<32x32xf32>, vector<16x32xf32> -> vector<16x32xf32>
    %c0_36 = arith.constant 0 : index
    %c0_37 = arith.constant 0 : index
    %71 = vector.load %arg12[%c0_36, %c0_37] : memref<1x32xf32, #tpu.memory_space<vmem>>, vector<1x32xf32>
    %72 = vector.broadcast %71 : vector<1x32xf32> to vector<16x32xf32>
    %73 = arith.addf %70, %72 : vector<16x32xf32>
    %74 = arith.addf %1, %73 : vector<16x32xf32>
    %c0_38 = arith.constant 0 : index
    %c0_39 = arith.constant 0 : index
    %75 = vector.load %arg25[%c0_38, %c0_39] : memref<1x32xf32, #tpu.memory_space<vmem>>, vector<1x32xf32>
    %c0_40 = arith.constant 0 : index
    %c0_41 = arith.constant 0 : index
    %76 = vector.load %arg26[%c0_40, %c0_41] : memref<1x32xf32, #tpu.memory_space<vmem>>, vector<1x32xf32>
    %cst_42 = arith.constant dense<0.000000e+00> : vector<16xf32>
    %77 = vector.multi_reduction <add>, %74, %cst_42 [1] : vector<16x32xf32> to vector<16xf32>
    %78 = vector.shape_cast %77 : vector<16xf32> to vector<16x1xf32>
    %cst_43 = arith.constant 3.200000e+01 : f32
    %79 = vector.broadcast %cst_43 : f32 to vector<16x1xf32>
    %80 = arith.divf %78, %79 : vector<16x1xf32>
    %81 = vector.broadcast %80 : vector<16x1xf32> to vector<16x32xf32>
    %82 = arith.subf %74, %81 : vector<16x32xf32>
    %83 = arith.mulf %82, %82 : vector<16x32xf32>
    %cst_44 = arith.constant dense<0.000000e+00> : vector<16xf32>
    %84 = vector.multi_reduction <add>, %83, %cst_44 [1] : vector<16x32xf32> to vector<16xf32>
    %85 = vector.shape_cast %84 : vector<16xf32> to vector<16x1xf32>
    %cst_45 = arith.constant 3.200000e+01 : f32
    %86 = vector.broadcast %cst_45 : f32 to vector<16x1xf32>
    %87 = arith.divf %85, %86 : vector<16x1xf32>
    %cst_46 = arith.constant 9.99999974E-6 : f32
    %88 = vector.broadcast %cst_46 : f32 to vector<16x1xf32>
    %89 = arith.addf %87, %88 : vector<16x1xf32>
    %90 = math.rsqrt %89 : vector<16x1xf32>
    %91 = vector.broadcast %90 : vector<16x1xf32> to vector<16x32xf32>
    %92 = arith.mulf %82, %91 : vector<16x32xf32>
    %93 = vector.broadcast %75 : vector<1x32xf32> to vector<16x32xf32>
    %94 = arith.mulf %92, %93 : vector<16x32xf32>
    %95 = vector.broadcast %76 : vector<1x32xf32> to vector<16x32xf32>
    %96 = arith.addf %94, %95 : vector<16x32xf32>
    %97 = arith.addf %96, %5 : vector<16x32xf32>
    %c0_47 = arith.constant 0 : index
    %c0_48 = arith.constant 0 : index
    %98 = vector.load %arg13[%c0_47, %c0_48] : memref<32x32xf32, #tpu.memory_space<vmem>>, vector<32x32xf32>
    %cst_49 = arith.constant dense<0.000000e+00> : vector<16x32xf32>
    %99 = tpu.matmul %97, %98, %cst_49 {dimension_numbers = #tpu.dot_dimension_numbers<[1], [0], [0], [1], [0, 0, 1, 1], [], []>} : vector<16x32xf32>, vector<32x32xf32>, vector<16x32xf32> -> vector<16x32xf32>
    %c0_50 = arith.constant 0 : index
    %c0_51 = arith.constant 0 : index
    %100 = vector.load %arg14[%c0_50, %c0_51] : memref<1x32xf32, #tpu.memory_space<vmem>>, vector<1x32xf32>
    %101 = vector.broadcast %100 : vector<1x32xf32> to vector<16x32xf32>
    %102 = arith.addf %99, %101 : vector<16x32xf32>
    %103 = arith.addf %3, %7 : vector<32x32xf32>
    %c0_52 = arith.constant 0 : index
    %c0_53 = arith.constant 0 : index
    %104 = vector.load %arg15[%c0_52, %c0_53] : memref<32x32xf32, #tpu.memory_space<vmem>>, vector<32x32xf32>
    %cst_54 = arith.constant dense<0.000000e+00> : vector<32x32xf32>
    %105 = tpu.matmul %103, %104, %cst_54 {dimension_numbers = #tpu.dot_dimension_numbers<[1], [0], [0], [1], [0, 0, 1, 1], [], []>} : vector<32x32xf32>, vector<32x32xf32>, vector<32x32xf32> -> vector<32x32xf32>
    %c0_55 = arith.constant 0 : index
    %c0_56 = arith.constant 0 : index
    %106 = vector.load %arg16[%c0_55, %c0_56] : memref<1x32xf32, #tpu.memory_space<vmem>>, vector<1x32xf32>
    %107 = vector.broadcast %106 : vector<1x32xf32> to vector<32x32xf32>
    %108 = arith.addf %105, %107 : vector<32x32xf32>
    %c0_57 = arith.constant 0 : index
    %c0_58 = arith.constant 0 : index
    %109 = vector.load %arg17[%c0_57, %c0_58] : memref<32x32xf32, #tpu.memory_space<vmem>>, vector<32x32xf32>
    %cst_59 = arith.constant dense<0.000000e+00> : vector<32x32xf32>
    %110 = tpu.matmul %3, %109, %cst_59 {dimension_numbers = #tpu.dot_dimension_numbers<[1], [0], [0], [1], [0, 0, 1, 1], [], []>} : vector<32x32xf32>, vector<32x32xf32>, vector<32x32xf32> -> vector<32x32xf32>
    %c0_60 = arith.constant 0 : index
    %c0_61 = arith.constant 0 : index
    %111 = vector.load %arg18[%c0_60, %c0_61] : memref<1x32xf32, #tpu.memory_space<vmem>>, vector<1x32xf32>
    %112 = vector.broadcast %111 : vector<1x32xf32> to vector<32x32xf32>
    %113 = arith.addf %110, %112 : vector<32x32xf32>
    %114 = vector.extract_strided_slice %102 {offsets = [0, 0], sizes = [8, 32], strides = [1, 1]} : vector<16x32xf32> to vector<8x32xf32>
    %115 = vector.shape_cast %114 : vector<8x32xf32> to vector<8x4x8xf32>
    %116 = tpu.transpose %115, [1, 0, 2] : vector<8x4x8xf32> -> vector<4x8x8xf32>
    %117 = vector.extract_strided_slice %108 {offsets = [0, 0], sizes = [16, 32], strides = [1, 1]} : vector<32x32xf32> to vector<16x32xf32>
    %118 = vector.shape_cast %117 : vector<16x32xf32> to vector<16x4x8xf32>
    %119 = tpu.transpose %118, [1, 0, 2] : vector<16x4x8xf32> -> vector<4x16x8xf32>
    %120 = vector.extract_strided_slice %113 {offsets = [0, 0], sizes = [16, 32], strides = [1, 1]} : vector<32x32xf32> to vector<16x32xf32>
    %121 = vector.shape_cast %120 : vector<16x32xf32> to vector<16x4x8xf32>
    %122 = tpu.transpose %121, [1, 0, 2] : vector<16x4x8xf32> -> vector<4x16x8xf32>
    %cst_62 = arith.constant dense<0.000000e+00> : vector<4x8x16xf32>
    %123 = tpu.matmul %116, %119, %cst_62 {dimension_numbers = #tpu.dot_dimension_numbers<[2], [2], [1], [1], [0, 0, 0, 1, 1, 1], [0], [0]>} : vector<4x8x8xf32>, vector<4x16x8xf32>, vector<4x8x16xf32> -> vector<4x8x16xf32>
    %cst_63 = arith.constant dense<0xFF800000> : vector<4x8xf32>
    %124 = vector.multi_reduction <maximumf>, %123, %cst_63 [2] : vector<4x8x16xf32> to vector<4x8xf32>
    %125 = vector.shape_cast %124 : vector<4x8xf32> to vector<4x8x1xf32>
    %126 = vector.broadcast %125 : vector<4x8x1xf32> to vector<4x8x16xf32>
    %127 = arith.subf %123, %126 : vector<4x8x16xf32>
    %128 = math.exp %127 : vector<4x8x16xf32>
    %cst_64 = arith.constant dense<0.000000e+00> : vector<4x8xf32>
    %129 = vector.multi_reduction <add>, %128, %cst_64 [2] : vector<4x8x16xf32> to vector<4x8xf32>
    %130 = vector.shape_cast %129 : vector<4x8xf32> to vector<4x8x1xf32>
    %131 = vector.broadcast %130 : vector<4x8x1xf32> to vector<4x8x16xf32>
    %132 = arith.divf %128, %131 : vector<4x8x16xf32>
    %cst_65 = arith.constant dense<0.000000e+00> : vector<4x8x8xf32>
    %133 = tpu.matmul %132, %122, %cst_65 {dimension_numbers = #tpu.dot_dimension_numbers<[2], [1], [1], [2], [0, 0, 0, 1, 1, 2], [0], [0]>} : vector<4x8x16xf32>, vector<4x16x8xf32>, vector<4x8x8xf32> -> vector<4x8x8xf32>
    %134 = tpu.transpose %133, [1, 0, 2] : vector<4x8x8xf32> -> vector<8x4x8xf32>
    %135 = vector.shape_cast %134 : vector<8x4x8xf32> to vector<8x32xf32>
    %136 = vector.extract_strided_slice %102 {offsets = [8, 0], sizes = [8, 32], strides = [1, 1]} : vector<16x32xf32> to vector<8x32xf32>
    %137 = vector.shape_cast %136 : vector<8x32xf32> to vector<8x4x8xf32>
    %138 = tpu.transpose %137, [1, 0, 2] : vector<8x4x8xf32> -> vector<4x8x8xf32>
    %139 = vector.extract_strided_slice %108 {offsets = [16, 0], sizes = [16, 32], strides = [1, 1]} : vector<32x32xf32> to vector<16x32xf32>
    %140 = vector.shape_cast %139 : vector<16x32xf32> to vector<16x4x8xf32>
    %141 = tpu.transpose %140, [1, 0, 2] : vector<16x4x8xf32> -> vector<4x16x8xf32>
    %142 = vector.extract_strided_slice %113 {offsets = [16, 0], sizes = [16, 32], strides = [1, 1]} : vector<32x32xf32> to vector<16x32xf32>
    %143 = vector.shape_cast %142 : vector<16x32xf32> to vector<16x4x8xf32>
    %144 = tpu.transpose %143, [1, 0, 2] : vector<16x4x8xf32> -> vector<4x16x8xf32>
    %cst_66 = arith.constant dense<0.000000e+00> : vector<4x8x16xf32>
    %145 = tpu.matmul %138, %141, %cst_66 {dimension_numbers = #tpu.dot_dimension_numbers<[2], [2], [1], [1], [0, 0, 0, 1, 1, 1], [0], [0]>} : vector<4x8x8xf32>, vector<4x16x8xf32>, vector<4x8x16xf32> -> vector<4x8x16xf32>
    %cst_67 = arith.constant dense<0xFF800000> : vector<4x8xf32>
    %146 = vector.multi_reduction <maximumf>, %145, %cst_67 [2] : vector<4x8x16xf32> to vector<4x8xf32>
    %147 = vector.shape_cast %146 : vector<4x8xf32> to vector<4x8x1xf32>
    %148 = vector.broadcast %147 : vector<4x8x1xf32> to vector<4x8x16xf32>
    %149 = arith.subf %145, %148 : vector<4x8x16xf32>
    %150 = math.exp %149 : vector<4x8x16xf32>
    %cst_68 = arith.constant dense<0.000000e+00> : vector<4x8xf32>
    %151 = vector.multi_reduction <add>, %150, %cst_68 [2] : vector<4x8x16xf32> to vector<4x8xf32>
    %152 = vector.shape_cast %151 : vector<4x8xf32> to vector<4x8x1xf32>
    %153 = vector.broadcast %152 : vector<4x8x1xf32> to vector<4x8x16xf32>
    %154 = arith.divf %150, %153 : vector<4x8x16xf32>
    %cst_69 = arith.constant dense<0.000000e+00> : vector<4x8x8xf32>
    %155 = tpu.matmul %154, %144, %cst_69 {dimension_numbers = #tpu.dot_dimension_numbers<[2], [1], [1], [2], [0, 0, 0, 1, 1, 2], [0], [0]>} : vector<4x8x16xf32>, vector<4x16x8xf32>, vector<4x8x8xf32> -> vector<4x8x8xf32>
    %156 = tpu.transpose %155, [1, 0, 2] : vector<4x8x8xf32> -> vector<8x4x8xf32>
    %157 = vector.shape_cast %156 : vector<8x4x8xf32> to vector<8x32xf32>
    %158 = tpu.concatenate %135, %157 in 0 : vector<8x32xf32>, vector<8x32xf32> -> vector<16x32xf32>
    %c0_70 = arith.constant 0 : index
    %c0_71 = arith.constant 0 : index
    %159 = vector.load %arg19[%c0_70, %c0_71] : memref<32x32xf32, #tpu.memory_space<vmem>>, vector<32x32xf32>
    %cst_72 = arith.constant dense<0.000000e+00> : vector<16x32xf32>
    %160 = tpu.matmul %158, %159, %cst_72 {dimension_numbers = #tpu.dot_dimension_numbers<[1], [0], [0], [1], [0, 0, 1, 1], [], []>} : vector<16x32xf32>, vector<32x32xf32>, vector<16x32xf32> -> vector<16x32xf32>
    %c0_73 = arith.constant 0 : index
    %c0_74 = arith.constant 0 : index
    %161 = vector.load %arg20[%c0_73, %c0_74] : memref<1x32xf32, #tpu.memory_space<vmem>>, vector<1x32xf32>
    %162 = vector.broadcast %161 : vector<1x32xf32> to vector<16x32xf32>
    %163 = arith.addf %160, %162 : vector<16x32xf32>
    %164 = arith.addf %96, %163 : vector<16x32xf32>
    %c0_75 = arith.constant 0 : index
    %c0_76 = arith.constant 0 : index
    %165 = vector.load %arg27[%c0_75, %c0_76] : memref<1x32xf32, #tpu.memory_space<vmem>>, vector<1x32xf32>
    %c0_77 = arith.constant 0 : index
    %c0_78 = arith.constant 0 : index
    %166 = vector.load %arg28[%c0_77, %c0_78] : memref<1x32xf32, #tpu.memory_space<vmem>>, vector<1x32xf32>
    %cst_79 = arith.constant dense<0.000000e+00> : vector<16xf32>
    %167 = vector.multi_reduction <add>, %164, %cst_79 [1] : vector<16x32xf32> to vector<16xf32>
    %168 = vector.shape_cast %167 : vector<16xf32> to vector<16x1xf32>
    %cst_80 = arith.constant 3.200000e+01 : f32
    %169 = vector.broadcast %cst_80 : f32 to vector<16x1xf32>
    %170 = arith.divf %168, %169 : vector<16x1xf32>
    %171 = vector.broadcast %170 : vector<16x1xf32> to vector<16x32xf32>
    %172 = arith.subf %164, %171 : vector<16x32xf32>
    %173 = arith.mulf %172, %172 : vector<16x32xf32>
    %cst_81 = arith.constant dense<0.000000e+00> : vector<16xf32>
    %174 = vector.multi_reduction <add>, %173, %cst_81 [1] : vector<16x32xf32> to vector<16xf32>
    %175 = vector.shape_cast %174 : vector<16xf32> to vector<16x1xf32>
    %cst_82 = arith.constant 3.200000e+01 : f32
    %176 = vector.broadcast %cst_82 : f32 to vector<16x1xf32>
    %177 = arith.divf %175, %176 : vector<16x1xf32>
    %cst_83 = arith.constant 9.99999974E-6 : f32
    %178 = vector.broadcast %cst_83 : f32 to vector<16x1xf32>
    %179 = arith.addf %177, %178 : vector<16x1xf32>
    %180 = math.rsqrt %179 : vector<16x1xf32>
    %181 = vector.broadcast %180 : vector<16x1xf32> to vector<16x32xf32>
    %182 = arith.mulf %172, %181 : vector<16x32xf32>
    %183 = vector.broadcast %165 : vector<1x32xf32> to vector<16x32xf32>
    %184 = arith.mulf %182, %183 : vector<16x32xf32>
    %185 = vector.broadcast %166 : vector<1x32xf32> to vector<16x32xf32>
    %186 = arith.addf %184, %185 : vector<16x32xf32>
    %c0_84 = arith.constant 0 : index
    %c0_85 = arith.constant 0 : index
    %187 = vector.load %arg21[%c0_84, %c0_85] : memref<32x64xf32, #tpu.memory_space<vmem>>, vector<32x64xf32>
    %cst_86 = arith.constant dense<0.000000e+00> : vector<16x64xf32>
    %188 = tpu.matmul %186, %187, %cst_86 {dimension_numbers = #tpu.dot_dimension_numbers<[1], [0], [0], [1], [0, 0, 1, 1], [], []>} : vector<16x32xf32>, vector<32x64xf32>, vector<16x64xf32> -> vector<16x64xf32>
    %c0_87 = arith.constant 0 : index
    %c0_88 = arith.constant 0 : index
    %189 = vector.load %arg22[%c0_87, %c0_88] : memref<1x64xf32, #tpu.memory_space<vmem>>, vector<1x64xf32>
    %190 = vector.broadcast %189 : vector<1x64xf32> to vector<16x64xf32>
    %191 = arith.addf %188, %190 : vector<16x64xf32>
    %cst_89 = arith.constant 0.000000e+00 : f32
    %192 = vector.broadcast %cst_89 : f32 to vector<16x64xf32>
    %193 = arith.maximumf %191, %192 : vector<16x64xf32>
    %c0_90 = arith.constant 0 : index
    %c0_91 = arith.constant 0 : index
    %194 = vector.load %arg23[%c0_90, %c0_91] : memref<64x32xf32, #tpu.memory_space<vmem>>, vector<64x32xf32>
    %cst_92 = arith.constant dense<0.000000e+00> : vector<16x32xf32>
    %195 = tpu.matmul %193, %194, %cst_92 {dimension_numbers = #tpu.dot_dimension_numbers<[1], [0], [0], [1], [0, 0, 1, 1], [], []>} : vector<16x64xf32>, vector<64x32xf32>, vector<16x32xf32> -> vector<16x32xf32>
    %c0_93 = arith.constant 0 : index
    %c0_94 = arith.constant 0 : index
    %196 = vector.load %arg24[%c0_93, %c0_94] : memref<1x32xf32, #tpu.memory_space<vmem>>, vector<1x32xf32>
    %197 = vector.broadcast %196 : vector<1x32xf32> to vector<16x32xf32>
    %198 = arith.addf %195, %197 : vector<16x32xf32>
    %199 = arith.addf %186, %198 : vector<16x32xf32>
    %c0_95 = arith.constant 0 : index
    %c0_96 = arith.constant 0 : index
    %200 = vector.load %arg29[%c0_95, %c0_96] : memref<1x32xf32, #tpu.memory_space<vmem>>, vector<1x32xf32>
    %c0_97 = arith.constant 0 : index
    %c0_98 = arith.constant 0 : index
    %201 = vector.load %arg30[%c0_97, %c0_98] : memref<1x32xf32, #tpu.memory_space<vmem>>, vector<1x32xf32>
    %cst_99 = arith.constant dense<0.000000e+00> : vector<16xf32>
    %202 = vector.multi_reduction <add>, %199, %cst_99 [1] : vector<16x32xf32> to vector<16xf32>
    %203 = vector.shape_cast %202 : vector<16xf32> to vector<16x1xf32>
    %cst_100 = arith.constant 3.200000e+01 : f32
    %204 = vector.broadcast %cst_100 : f32 to vector<16x1xf32>
    %205 = arith.divf %203, %204 : vector<16x1xf32>
    %206 = vector.broadcast %205 : vector<16x1xf32> to vector<16x32xf32>
    %207 = arith.subf %199, %206 : vector<16x32xf32>
    %208 = arith.mulf %207, %207 : vector<16x32xf32>
    %cst_101 = arith.constant dense<0.000000e+00> : vector<16xf32>
    %209 = vector.multi_reduction <add>, %208, %cst_101 [1] : vector<16x32xf32> to vector<16xf32>
    %210 = vector.shape_cast %209 : vector<16xf32> to vector<16x1xf32>
    %cst_102 = arith.constant 3.200000e+01 : f32
    %211 = vector.broadcast %cst_102 : f32 to vector<16x1xf32>
    %212 = arith.divf %210, %211 : vector<16x1xf32>
    %cst_103 = arith.constant 9.99999974E-6 : f32
    %213 = vector.broadcast %cst_103 : f32 to vector<16x1xf32>
    %214 = arith.addf %212, %213 : vector<16x1xf32>
    %215 = math.rsqrt %214 : vector<16x1xf32>
    %216 = vector.broadcast %215 : vector<16x1xf32> to vector<16x32xf32>
    %217 = arith.mulf %207, %216 : vector<16x32xf32>
    %218 = vector.broadcast %200 : vector<1x32xf32> to vector<16x32xf32>
    %219 = arith.mulf %217, %218 : vector<16x32xf32>
    %220 = vector.broadcast %201 : vector<1x32xf32> to vector<16x32xf32>
    %221 = arith.addf %219, %220 : vector<16x32xf32>
    %222 = vector.shape_cast %221 : vector<16x32xf32> to vector<2x8x32xf32>
    %c0_104 = arith.constant 0 : index
    %c0_105 = arith.constant 0 : index
    %c0_106 = arith.constant 0 : index
    %223 = vector.load %arg31[%c0_104, %c0_105, %c0_106] : memref<2x8x32xf32, #tpu.memory_space<vmem>>, vector<2x8x32xf32>
    tpu.vector_store %arg31[%c0_104, %c0_105, %c0_106], %222 {strides = array<i32>} : memref<2x8x32xf32, #tpu.memory_space<vmem>>, vector<2x8x32xf32>,
    return
  }
  func.func @transform_0(%arg0: i32) -> (i32, i32, i32) {
    %c0_i32 = arith.constant 0 : i32
    %c0_i32_0 = arith.constant 0 : i32
    %c0_i32_1 = arith.constant 0 : i32
    return %arg0, %c0_i32, %c0_i32_0 : i32, i32, i32
  }
  func.func @transform_1(%arg0: i32) -> (i32, i32, i32) {
    %c0_i32 = arith.constant 0 : i32
    %c0_i32_0 = arith.constant 0 : i32
    %c0_i32_1 = arith.constant 0 : i32
    return %arg0, %c0_i32, %c0_i32_0 : i32, i32, i32
  }
  func.func @transform_2(%arg0: i32) -> (i32, i32, i32) {
    %c0_i32 = arith.constant 0 : i32
    %c0_i32_0 = arith.constant 0 : i32
    %c0_i32_1 = arith.constant 0 : i32
    return %arg0, %c0_i32, %c0_i32_0 : i32, i32, i32
  }
  func.func @transform_3(%arg0: i32) -> (i32, i32, i32) {
    %c0_i32 = arith.constant 0 : i32
    %c0_i32_0 = arith.constant 0 : i32
    %c0_i32_1 = arith.constant 0 : i32
    return %arg0, %c0_i32, %c0_i32_0 : i32, i32, i32
  }
  func.func @transform_4(%arg0: i32) -> (i32, i32) {
    %c0_i32 = arith.constant 0 : i32
    %c0_i32_0 = arith.constant 0 : i32
    %c0_i32_1 = arith.constant 0 : i32
    return %c0_i32, %c0_i32_0 : i32, i32
  }
  func.func @transform_5(%arg0: i32) -> (i32, i32) {
    %c0_i32 = arith.constant 0 : i32
    %c0_i32_0 = arith.constant 0 : i32
    %c0_i32_1 = arith.constant 0 : i32
    return %c0_i32, %c0_i32_0 : i32, i32
  }
  func.func @transform_6(%arg0: i32) -> (i32, i32) {
    %c0_i32 = arith.constant 0 : i32
    %c0_i32_0 = arith.constant 0 : i32
    %c0_i32_1 = arith.constant 0 : i32
    return %c0_i32, %c0_i32_0 : i32, i32
  }
  func.func @transform_7(%arg0: i32) -> (i32, i32) {
    %c0_i32 = arith.constant 0 : i32
    %c0_i32_0 = arith.constant 0 : i32
    %c0_i32_1 = arith.constant 0 : i32
    return %c0_i32, %c0_i32_0 : i32, i32
  }
  func.func @transform_8(%arg0: i32) -> (i32, i32) {
    %c0_i32 = arith.constant 0 : i32
    %c0_i32_0 = arith.constant 0 : i32
    %c0_i32_1 = arith.constant 0 : i32
    return %c0_i32, %c0_i32_0 : i32, i32
  }
  func.func @transform_9(%arg0: i32) -> (i32, i32) {
    %c0_i32 = arith.constant 0 : i32
    %c0_i32_0 = arith.constant 0 : i32
    %c0_i32_1 = arith.constant 0 : i32
    return %c0_i32, %c0_i32_0 : i32, i32
  }
  func.func @transform_10(%arg0: i32) -> (i32, i32) {
    %c0_i32 = arith.constant 0 : i32
    %c0_i32_0 = arith.constant 0 : i32
    %c0_i32_1 = arith.constant 0 : i32
    return %c0_i32, %c0_i32_0 : i32, i32
  }
  func.func @transform_11(%arg0: i32) -> (i32, i32) {
    %c0_i32 = arith.constant 0 : i32
    %c0_i32_0 = arith.constant 0 : i32
    %c0_i32_1 = arith.constant 0 : i32
    return %c0_i32, %c0_i32_0 : i32, i32
  }
  func.func @transform_12(%arg0: i32) -> (i32, i32) {
    %c0_i32 = arith.constant 0 : i32
    %c0_i32_0 = arith.constant 0 : i32
    %c0_i32_1 = arith.constant 0 : i32
    return %c0_i32, %c0_i32_0 : i32, i32
  }
  func.func @transform_13(%arg0: i32) -> (i32, i32) {
    %c0_i32 = arith.constant 0 : i32
    %c0_i32_0 = arith.constant 0 : i32
    %c0_i32_1 = arith.constant 0 : i32
    return %c0_i32, %c0_i32_0 : i32, i32
  }
  func.func @transform_14(%arg0: i32) -> (i32, i32) {
    %c0_i32 = arith.constant 0 : i32
    %c0_i32_0 = arith.constant 0 : i32
    %c0_i32_1 = arith.constant 0 : i32
    return %c0_i32, %c0_i32_0 : i32, i32
  }
  func.func @transform_15(%arg0: i32) -> (i32, i32) {
    %c0_i32 = arith.constant 0 : i32
    %c0_i32_0 = arith.constant 0 : i32
    %c0_i32_1 = arith.constant 0 : i32
    return %c0_i32, %c0_i32_0 : i32, i32
  }
  func.func @transform_16(%arg0: i32) -> (i32, i32) {
    %c0_i32 = arith.constant 0 : i32
    %c0_i32_0 = arith.constant 0 : i32
    %c0_i32_1 = arith.constant 0 : i32
    return %c0_i32, %c0_i32_0 : i32, i32
  }
  func.func @transform_17(%arg0: i32) -> (i32, i32) {
    %c0_i32 = arith.constant 0 : i32
    %c0_i32_0 = arith.constant 0 : i32
    %c0_i32_1 = arith.constant 0 : i32
    return %c0_i32, %c0_i32_0 : i32, i32
  }
  func.func @transform_18(%arg0: i32) -> (i32, i32) {
    %c0_i32 = arith.constant 0 : i32
    %c0_i32_0 = arith.constant 0 : i32
    %c0_i32_1 = arith.constant 0 : i32
    return %c0_i32, %c0_i32_0 : i32, i32
  }
  func.func @transform_19(%arg0: i32) -> (i32, i32) {
    %c0_i32 = arith.constant 0 : i32
    %c0_i32_0 = arith.constant 0 : i32
    %c0_i32_1 = arith.constant 0 : i32
    return %c0_i32, %c0_i32_0 : i32, i32
  }
  func.func @transform_20(%arg0: i32) -> (i32, i32) {
    %c0_i32 = arith.constant 0 : i32
    %c0_i32_0 = arith.constant 0 : i32
    %c0_i32_1 = arith.constant 0 : i32
    return %c0_i32, %c0_i32_0 : i32, i32
  }
  func.func @transform_21(%arg0: i32) -> (i32, i32) {
    %c0_i32 = arith.constant 0 : i32
    %c0_i32_0 = arith.constant 0 : i32
    %c0_i32_1 = arith.constant 0 : i32
    return %c0_i32, %c0_i32_0 : i32, i32
  }
  func.func @transform_22(%arg0: i32) -> (i32, i32) {
    %c0_i32 = arith.constant 0 : i32
    %c0_i32_0 = arith.constant 0 : i32
    %c0_i32_1 = arith.constant 0 : i32
    return %c0_i32, %c0_i32_0 : i32, i32
  }
  func.func @transform_23(%arg0: i32) -> (i32, i32) {
    %c0_i32 = arith.constant 0 : i32
    %c0_i32_0 = arith.constant 0 : i32
    %c0_i32_1 = arith.constant 0 : i32
    return %c0_i32, %c0_i32_0 : i32, i32
  }
  func.func @transform_24(%arg0: i32) -> (i32, i32) {
    %c0_i32 = arith.constant 0 : i32
    %c0_i32_0 = arith.constant 0 : i32
    %c0_i32_1 = arith.constant 0 : i32
    return %c0_i32, %c0_i32_0 : i32, i32
  }
  func.func @transform_25(%arg0: i32) -> (i32, i32) {
    %c0_i32 = arith.constant 0 : i32
    %c0_i32_0 = arith.constant 0 : i32
    %c0_i32_1 = arith.constant 0 : i32
    return %c0_i32, %c0_i32_0 : i32, i32
  }
  func.func @transform_26(%arg0: i32) -> (i32, i32) {
    %c0_i32 = arith.constant 0 : i32
    %c0_i32_0 = arith.constant 0 : i32
    %c0_i32_1 = arith.constant 0 : i32
    return %c0_i32, %c0_i32_0 : i32, i32
  }
  func.func @transform_27(%arg0: i32) -> (i32, i32) {
    %c0_i32 = arith.constant 0 : i32
    %c0_i32_0 = arith.constant 0 : i32
    %c0_i32_1 = arith.constant 0 : i32
    return %c0_i32, %c0_i32_0 : i32, i32
  }
  func.func @transform_28(%arg0: i32) -> (i32, i32) {
    %c0_i32 = arith.constant 0 : i32
    %c0_i32_0 = arith.constant 0 : i32
    %c0_i32_1 = arith.constant 0 : i32
    return %c0_i32, %c0_i32_0 : i32, i32
  }
  func.func @transform_29(%arg0: i32) -> (i32, i32) {
    %c0_i32 = arith.constant 0 : i32
    %c0_i32_0 = arith.constant 0 : i32
    %c0_i32_1 = arith.constant 0 : i32
    return %c0_i32, %c0_i32_0 : i32, i32
  }
  func.func @transform_30(%arg0: i32) -> (i32, i32, i32) {
    %c0_i32 = arith.constant 0 : i32
    %c0_i32_0 = arith.constant 0 : i32
    %c0_i32_1 = arith.constant 0 : i32
    return %arg0, %c0_i32, %c0_i32_0 : i32, i32, i32
  }
}

module attributes {stable_mosaic.version = 11 : i64} {
  func.func @_decoder_layer_kernel(%arg0: i32, %arg1: memref<2x8x32xf32, #tpu.memory_space<vmem>>, %arg2: memref<2x16x32xf32, #tpu.memory_space<vmem>>, %arg3: memref<2x8x32xf32, #tpu.memory_space<vmem>>, %arg4: memref<2x16x32xf32, #tpu.memory_space<vmem>>, %arg5: memref<32x32xf32, #tpu.memory_space<vmem>>, %arg6: memref<1x32xf32, #tpu.memory_space<vmem>>, %arg7: memref<32x32xf32, #tpu.memory_space<vmem>>, %arg8: memref<1x32xf32, #tpu.memory_space<vmem>>, %arg9: memref<32x32xf32, #tpu.memory_space<vmem>>, %arg10: memref<1x32xf32, #tpu.memory_space<vmem>>, %arg11: memref<32x32xf32, #tpu.memory_space<vmem>>, %arg12: memref<1x32xf32, #tpu.memory_space<vmem>>, %arg13: memref<32x32xf32, #tpu.memory_space<vmem>>, %arg14: memref<1x32xf32, #tpu.memory_space<vmem>>, %arg15: memref<32x32xf32, #tpu.memory_space<vmem>>, %arg16: memref<1x32xf32, #tpu.memory_space<vmem>>, %arg17: memref<32x32xf32, #tpu.memory_space<vmem>>, %arg18: memref<1x32xf32, #tpu.memory_space<vmem>>, %arg19: memref<32x32xf32, #tpu.memory_space<vmem>>, %arg20: memref<1x32xf32, #tpu.memory_space<vmem>>, %arg21: memref<32x64xf32, #tpu.memory_space<vmem>>, %arg22: memref<1x64xf32, #tpu.memory_space<vmem>>, %arg23: memref<64x32xf32, #tpu.memory_space<vmem>>, %arg24: memref<1x32xf32, #tpu.memory_space<vmem>>, %arg25: memref<1x32xf32, #tpu.memory_space<vmem>>, %arg26: memref<1x32xf32, #tpu.memory_space<vmem>>, %arg27: memref<1x32xf32, #tpu.memory_space<vmem>>, %arg28: memref<1x32xf32, #tpu.memory_space<vmem>>, %arg29: memref<1x32xf32, #tpu.memory_space<vmem>>, %arg30: memref<1x32xf32, #tpu.memory_space<vmem>>, %arg31: memref<2x8x32xf32, #tpu.memory_space<vmem>>) attributes {dimension_semantics = [#tpu.dimension_semantics<parallel>], iteration_bounds = array<i64: 2>, scalar_prefetch = 0 : i64, scratch_operands = 0 : i64, tpu.core_type = #tpu.core_type<tc>, window_params = [{transform_indices = @transform_0, window_bounds = array<i64: 2, 8, 32>}, {transform_indices = @transform_1, window_bounds = array<i64: 2, 16, 32>}, {transform_indices = @transform_2, window_bounds = array<i64: 2, 8, 32>}, {transform_indices = @transform_3, window_bounds = array<i64: 2, 16, 32>}, {pipeline_mode = #tpu.pipeline_mode<synchronous>, transform_indices = @transform_4, window_bounds = array<i64: 32, 32>}, {pipeline_mode = #tpu.pipeline_mode<synchronous>, transform_indices = @transform_5, window_bounds = array<i64: 1, 32>}, {pipeline_mode = #tpu.pipeline_mode<synchronous>, transform_indices = @transform_6, window_bounds = array<i64: 32, 32>}, {pipeline_mode = #tpu.pipeline_mode<synchronous>, transform_indices = @transform_7, window_bounds = array<i64: 1, 32>}, {pipeline_mode = #tpu.pipeline_mode<synchronous>, transform_indices = @transform_8, window_bounds = array<i64: 32, 32>}, {pipeline_mode = #tpu.pipeline_mode<synchronous>, transform_indices = @transform_9, window_bounds = array<i64: 1, 32>}, {pipeline_mode = #tpu.pipeline_mode<synchronous>, transform_indices = @transform_10, window_bounds = array<i64: 32, 32>}, {pipeline_mode = #tpu.pipeline_mode<synchronous>, transform_indices = @transform_11, window_bounds = array<i64: 1, 32>}, {pipeline_mode = #tpu.pipeline_mode<synchronous>, transform_indices = @transform_12, window_bounds = array<i64: 32, 32>}, {pipeline_mode = #tpu.pipeline_mode<synchronous>, transform_indices = @transform_13, window_bounds = array<i64: 1, 32>}, {pipeline_mode = #tpu.pipeline_mode<synchronous>, transform_indices = @transform_14, window_bounds = array<i64: 32, 32>}, {pipeline_mode = #tpu.pipeline_mode<synchronous>, transform_indices = @transform_15, window_bounds = array<i64: 1, 32>}, {pipeline_mode = #tpu.pipeline_mode<synchronous>, transform_indices = @transform_16, window_bounds = array<i64: 32, 32>}, {pipeline_mode = #tpu.pipeline_mode<synchronous>, transform_indices = @transform_17, window_bounds = array<i64: 1, 32>}, {pipeline_mode = #tpu.pipeline_mode<synchronous>, transform_indices = @transform_18, window_bounds = array<i64: 32, 32>}, {pipeline_mode = #tpu.pipeline_mode<synchronous>, transform_indices = @transform_19, window_bounds = array<i64: 1, 32>}, {pipeline_mode = #tpu.pipeline_mode<synchronous>, transform_indices = @transform_20, window_bounds = array<i64: 32, 64>}, {pipeline_mode = #tpu.pipeline_mode<synchronous>, transform_indices = @transform_21, window_bounds = array<i64: 1, 64>}, {pipeline_mode = #tpu.pipeline_mode<synchronous>, transform_indices = @transform_22, window_bounds = array<i64: 64, 32>}, {pipeline_mode = #tpu.pipeline_mode<synchronous>, transform_indices = @transform_23, window_bounds = array<i64: 1, 32>}, {pipeline_mode = #tpu.pipeline_mode<synchronous>, transform_indices = @transform_24, window_bounds = array<i64: 1, 32>}, {pipeline_mode = #tpu.pipeline_mode<synchronous>, transform_indices = @transform_25, window_bounds = array<i64: 1, 32>}, {pipeline_mode = #tpu.pipeline_mode<synchronous>, transform_indices = @transform_26, window_bounds = array<i64: 1, 32>}, {pipeline_mode = #tpu.pipeline_mode<synchronous>, transform_indices = @transform_27, window_bounds = array<i64: 1, 32>}, {pipeline_mode = #tpu.pipeline_mode<synchronous>, transform_indices = @transform_28, window_bounds = array<i64: 1, 32>}, {pipeline_mode = #tpu.pipeline_mode<synchronous>, transform_indices = @transform_29, window_bounds = array<i64: 1, 32>}, {transform_indices = @transform_30, window_bounds = array<i64: 2, 8, 32>}]} {
    %c0 = arith.constant 0 : index
    %c0_0 = arith.constant 0 : index
    %c0_1 = arith.constant 0 : index
    %0 = vector.load %arg1[%c0, %c0_0, %c0_1] : memref<2x8x32xf32, #tpu.memory_space<vmem>>, vector<2x8x32xf32>
    %1 = vector.shape_cast %0 : vector<2x8x32xf32> to vector<16x32xf32>
    %c0_2 = arith.constant 0 : index
    %c0_3 = arith.constant 0 : index
    %c0_4 = arith.constant 0 : index
    %2 = vector.load %arg2[%c0_2, %c0_3, %c0_4] : memref<2x16x32xf32, #tpu.memory_space<vmem>>, vector<2x16x32xf32>
    %3 = vector.shape_cast %2 : vector<2x16x32xf32> to vector<32x32xf32>
    %c0_5 = arith.constant 0 : index
    %c0_6 = arith.constant 0 : index
    %c0_7 = arith.constant 0 : index
    %4 = vector.load %arg3[%c0_5, %c0_6, %c0_7] : memref<2x8x32xf32, #tpu.memory_space<vmem>>, vector<2x8x32xf32>
    %5 = vector.shape_cast %4 : vector<2x8x32xf32> to vector<16x32xf32>
    %c0_8 = arith.constant 0 : index
    %c0_9 = arith.constant 0 : index
    %c0_10 = arith.constant 0 : index
    %6 = vector.load %arg4[%c0_8, %c0_9, %c0_10] : memref<2x16x32xf32, #tpu.memory_space<vmem>>, vector<2x16x32xf32>
    %7 = vector.shape_cast %6 : vector<2x16x32xf32> to vector<32x32xf32>
    %8 = arith.addf %1, %5 : vector<16x32xf32>
    %c0_11 = arith.constant 0 : index
    %c0_12 = arith.constant 0 : index
    %9 = vector.load %arg5[%c0_11, %c0_12] : memref<32x32xf32, #tpu.memory_space<vmem>>, vector<32x32xf32>
    %cst = arith.constant dense<0.000000e+00> : vector<16x32xf32>
    %10 = tpu.matmul %8, %9, %cst {dimension_numbers = #tpu.dot_dimension_numbers<[1], [0], [0], [1], [0, 0, 1, 1], [], []>} : vector<16x32xf32>, vector<32x32xf32>, vector<16x32xf32> -> vector<16x32xf32>
    %c0_13 = arith.constant 0 : index
    %c0_14 = arith.constant 0 : index
    %11 = vector.load %arg6[%c0_13, %c0_14] : memref<1x32xf32, #tpu.memory_space<vmem>>, vector<1x32xf32>
    %12 = vector.broadcast %11 : vector<1x32xf32> to vector<16x32xf32>
    %13 = arith.addf %10, %12 : vector<16x32xf32>
    %c0_15 = arith.constant 0 : index
    %c0_16 = arith.constant 0 : index
    %14 = vector.load %arg7[%c0_15, %c0_16] : memref<32x32xf32, #tpu.memory_space<vmem>>, vector<32x32xf32>
    %cst_17 = arith.constant dense<0.000000e+00> : vector<16x32xf32>
    %15 = tpu.matmul %8, %14, %cst_17 {dimension_numbers = #tpu.dot_dimension_numbers<[1], [0], [0], [1], [0, 0, 1, 1], [], []>} : vector<16x32xf32>, vector<32x32xf32>, vector<16x32xf32> -> vector<16x32xf32>
    %c0_18 = arith.constant 0 : index
    %c0_19 = arith.constant 0 : index
    %16 = vector.load %arg8[%c0_18, %c0_19] : memref<1x32xf32, #tpu.memory_space<vmem>>, vector<1x32xf32>
    %17 = vector.broadcast %16 : vector<1x32xf32> to vector<16x32xf32>
    %18 = arith.addf %15, %17 : vector<16x32xf32>
    %c0_20 = arith.constant 0 : index
    %c0_21 = arith.constant 0 : index
    %19 = vector.load %arg9[%c0_20, %c0_21] : memref<32x32xf32, #tpu.memory_space<vmem>>, vector<32x32xf32>
    %cst_22 = arith.constant dense<0.000000e+00> : vector<16x32xf32>
    %20 = tpu.matmul %1, %19, %cst_22 {dimension_numbers = #tpu.dot_dimension_numbers<[1], [0], [0], [1], [0, 0, 1, 1], [], []>} : vector<16x32xf32>, vector<32x32xf32>, vector<16x32xf32> -> vector<16x32xf32>
    %c0_23 = arith.constant 0 : index
    %c0_24 = arith.constant 0 : index
    %21 = vector.load %arg10[%c0_23, %c0_24] : memref<1x32xf32, #tpu.memory_space<vmem>>, vector<1x32xf32>
    %22 = vector.broadcast %21 : vector<1x32xf32> to vector<16x32xf32>
    %23 = arith.addf %20, %22 : vector<16x32xf32>
    %24 = vector.extract_strided_slice %13 {offsets = [0, 0], sizes = [8, 32], strides = [1, 1]} : vector<16x32xf32> to vector<8x32xf32>
    %25 = vector.shape_cast %24 : vector<8x32xf32> to vector<8x4x8xf32>
    %26 = tpu.transpose %25, [1, 0, 2] : vector<8x4x8xf32> -> vector<4x8x8xf32>
    %27 = vector.extract_strided_slice %18 {offsets = [0, 0], sizes = [8, 32], strides = [1, 1]} : vector<16x32xf32> to vector<8x32xf32>
    %28 = vector.shape_cast %27 : vector<8x32xf32> to vector<8x4x8xf32>
    %29 = tpu.transpose %28, [1, 0, 2] : vector<8x4x8xf32> -> vector<4x8x8xf32>
    %30 = vector.extract_strided_slice %23 {offsets = [0, 0], sizes = [8, 32], strides = [1, 1]} : vector<16x32xf32> to vector<8x32xf32>
    %31 = vector.shape_cast %30 : vector<8x32xf32> to vector<8x4x8xf32>
    %32 = tpu.transpose %31, [1, 0, 2] : vector<8x4x8xf32> -> vector<4x8x8xf32>
    %cst_25 = arith.constant dense<0.000000e+00> : vector<4x8x8xf32>
    %33 = tpu.matmul %26, %29, %cst_25 {dimension_numbers = #tpu.dot_dimension_numbers<[2], [2], [1], [1], [0, 0, 0, 1, 1, 1], [0], [0]>} : vector<4x8x8xf32>, vector<4x8x8xf32>, vector<4x8x8xf32> -> vector<4x8x8xf32>
    %cst_26 = arith.constant dense<0xFF800000> : vector<4x8xf32>
    %34 = vector.multi_reduction <maximumf>, %33, %cst_26 [2] : vector<4x8x8xf32> to vector<4x8xf32>
    %35 = vector.shape_cast %34 : vector<4x8xf32> to vector<4x8x1xf32>
    %36 = vector.broadcast %35 : vector<4x8x1xf32> to vector<4x8x8xf32>
    %37 = arith.subf %33, %36 : vector<4x8x8xf32>
    %38 = math.exp %37 : vector<4x8x8xf32>
    %cst_27 = arith.constant dense<0.000000e+00> : vector<4x8xf32>
    %39 = vector.multi_reduction <add>, %38, %cst_27 [2] : vector<4x8x8xf32> to vector<4x8xf32>
    %40 = vector.shape_cast %39 : vector<4x8xf32> to vector<4x8x1xf32>
    %41 = vector.broadcast %40 : vector<4x8x1xf32> to vector<4x8x8xf32>
    %42 = arith.divf %38, %41 : vector<4x8x8xf32>
    %cst_28 = arith.constant dense<0.000000e+00> : vector<4x8x8xf32>
    %43 = tpu.matmul %42, %32, %cst_28 {dimension_numbers = #tpu.dot_dimension_numbers<[2], [1], [1], [2], [0, 0, 0, 1, 1, 2], [0], [0]>} : vector<4x8x8xf32>, vector<4x8x8xf32>, vector<4x8x8xf32> -> vector<4x8x8xf32>
    %44 = tpu.transpose %43, [1, 0, 2] : vector<4x8x8xf32> -> vector<8x4x8xf32>
    %45 = vector.shape_cast %44 : vector<8x4x8xf32> to vector<8x32xf32>
    %46 = vector.extract_strided_slice %13 {offsets = [8, 0], sizes = [8, 32], strides = [1, 1]} : vector<16x32xf32> to vector<8x32xf32>
    %47 = vector.shape_cast %46 : vector<8x32xf32> to vector<8x4x8xf32>
    %48 = tpu.transpose %47, [1, 0, 2] : vector<8x4x8xf32> -> vector<4x8x8xf32>
    %49 = vector.extract_strided_slice %18 {offsets = [8, 0], sizes = [8, 32], strides = [1, 1]} : vector<16x32xf32> to vector<8x32xf32>
    %50 = vector.shape_cast %49 : vector<8x32xf32> to vector<8x4x8xf32>
    %51 = tpu.transpose %50, [1, 0, 2] : vector<8x4x8xf32> -> vector<4x8x8xf32>
    %52 = vector.extract_strided_slice %23 {offsets = [8, 0], sizes = [8, 32], strides = [1, 1]} : vector<16x32xf32> to vector<8x32xf32>
    %53 = vector.shape_cast %52 : vector<8x32xf32> to vector<8x4x8xf32>
    %54 = tpu.transpose %53, [1, 0, 2] : vector<8x4x8xf32> -> vector<4x8x8xf32>
    %cst_29 = arith.constant dense<0.000000e+00> : vector<4x8x8xf32>
    %55 = tpu.matmul %48, %51, %cst_29 {dimension_numbers = #tpu.dot_dimension_numbers<[2], [2], [1], [1], [0, 0, 0, 1, 1, 1], [0], [0]>} : vector<4x8x8xf32>, vector<4x8x8xf32>, vector<4x8x8xf32> -> vector<4x8x8xf32>
    %cst_30 = arith.constant dense<0xFF800000> : vector<4x8xf32>
    %56 = vector.multi_reduction <maximumf>, %55, %cst_30 [2] : vector<4x8x8xf32> to vector<4x8xf32>
    %57 = vector.shape_cast %56 : vector<4x8xf32> to vector<4x8x1xf32>
    %58 = vector.broadcast %57 : vector<4x8x1xf32> to vector<4x8x8xf32>
    %59 = arith.subf %55, %58 : vector<4x8x8xf32>
    %60 = math.exp %59 : vector<4x8x8xf32>
    %cst_31 = arith.constant dense<0.000000e+00> : vector<4x8xf32>
    %61 = vector.multi_reduction <add>, %60, %cst_31 [2] : vector<4x8x8xf32> to vector<4x8xf32>
    %62 = vector.shape_cast %61 : vector<4x8xf32> to vector<4x8x1xf32>
    %63 = vector.broadcast %62 : vector<4x8x1xf32> to vector<4x8x8xf32>
    %64 = arith.divf %60, %63 : vector<4x8x8xf32>
    %cst_32 = arith.constant dense<0.000000e+00> : vector<4x8x8xf32>
    %65 = tpu.matmul %64, %54, %cst_32 {dimension_numbers = #tpu.dot_dimension_numbers<[2], [1], [1], [2], [0, 0, 0, 1, 1, 2], [0], [0]>} : vector<4x8x8xf32>, vector<4x8x8xf32>, vector<4x8x8xf32> -> vector<4x8x8xf32>
    %66 = tpu.transpose %65, [1, 0, 2] : vector<4x8x8xf32> -> vector<8x4x8xf32>
    %67 = vector.shape_cast %66 : vector<8x4x8xf32> to vector<8x32xf32>
    %68 = tpu.concatenate %45, %67 in 0 : vector<8x32xf32>, vector<8x32xf32> -> vector<16x32xf32>
    %c0_33 = arith.constant 0 : index
    %c0_34 = arith.constant 0 : index
    %69 = vector.load %arg11[%c0_33, %c0_34] : memref<32x32xf32, #tpu.memory_space<vmem>>, vector<32x32xf32>
    %cst_35 = arith.constant dense<0.000000e+00> : vector<16x32xf32>
    %70 = tpu.matmul %68, %69, %cst_35 {dimension_numbers = #tpu.dot_dimension_numbers<[1], [0], [0], [1], [0, 0, 1, 1], [], []>} : vector<16x32xf32>, vector<32x32xf32>, vector<16x32xf32> -> vector<16x32xf32>
    %c0_36 = arith.constant 0 : index
    %c0_37 = arith.constant 0 : index
    %71 = vector.load %arg12[%c0_36, %c0_37] : memref<1x32xf32, #tpu.memory_space<vmem>>, vector<1x32xf32>
    %72 = vector.broadcast %71 : vector<1x32xf32> to vector<16x32xf32>
    %73 = arith.addf %70, %72 : vector<16x32xf32>
    %74 = arith.addf %1, %73 : vector<16x32xf32>
    %c0_38 = arith.constant 0 : index
    %c0_39 = arith.constant 0 : index
    %75 = vector.load %arg25[%c0_38, %c0_39] : memref<1x32xf32, #tpu.memory_space<vmem>>, vector<1x32xf32>
    %c0_40 = arith.constant 0 : index
    %c0_41 = arith.constant 0 : index
    %76 = vector.load %arg26[%c0_40, %c0_41] : memref<1x32xf32, #tpu.memory_space<vmem>>, vector<1x32xf32>
    %cst_42 = arith.constant dense<0.000000e+00> : vector<16xf32>
    %77 = vector.multi_reduction <add>, %74, %cst_42 [1] : vector<16x32xf32> to vector<16xf32>
    %78 = vector.shape_cast %77 : vector<16xf32> to vector<16x1xf32>
    %cst_43 = arith.constant 3.200000e+01 : f32
    %79 = vector.broadcast %cst_43 : f32 to vector<16x1xf32>
    %80 = arith.divf %78, %79 : vector<16x1xf32>
    %81 = vector.broadcast %80 : vector<16x1xf32> to vector<16x32xf32>
    %82 = arith.subf %74, %81 : vector<16x32xf32>
    %83 = arith.mulf %82, %82 : vector<16x32xf32>
    %cst_44 = arith.constant dense<0.000000e+00> : vector<16xf32>
    %84 = vector.multi_reduction <add>, %83, %cst_44 [1] : vector<16x32xf32> to vector<16xf32>
    %85 = vector.shape_cast %84 : vector<16xf32> to vector<16x1xf32>
    %cst_45 = arith.constant 3.200000e+01 : f32
    %86 = vector.broadcast %cst_45 : f32 to vector<16x1xf32>
    %87 = arith.divf %85, %86 : vector<16x1xf32>
    %cst_46 = arith.constant 9.99999974E-6 : f32
    %88 = vector.broadcast %cst_46 : f32 to vector<16x1xf32>
    %89 = arith.addf %87, %88 : vector<16x1xf32>
    %90 = math.rsqrt %89 : vector<16x1xf32>
    %91 = vector.broadcast %90 : vector<16x1xf32> to vector<16x32xf32>
    %92 = arith.mulf %82, %91 : vector<16x32xf32>
    %93 = vector.broadcast %75 : vector<1x32xf32> to vector<16x32xf32>
    %94 = arith.mulf %92, %93 : vector<16x32xf32>
    %95 = vector.broadcast %76 : vector<1x32xf32> to vector<16x32xf32>
    %96 = arith.addf %94, %95 : vector<16x32xf32>
    %97 = arith.addf %96, %5 : vector<16x32xf32>
    %c0_47 = arith.constant 0 : index
    %c0_48 = arith.constant 0 : index
    %98 = vector.load %arg13[%c0_47, %c0_48] : memref<32x32xf32, #tpu.memory_space<vmem>>, vector<32x32xf32>
    %cst_49 = arith.constant dense<0.000000e+00> : vector<16x32xf32>
    %99 = tpu.matmul %97, %98, %cst_49 {dimension_numbers = #tpu.dot_dimension_numbers<[1], [0], [0], [1], [0, 0, 1, 1], [], []>} : vector<16x32xf32>, vector<32x32xf32>, vector<16x32xf32> -> vector<16x32xf32>
    %c0_50 = arith.constant 0 : index
    %c0_51 = arith.constant 0 : index
    %100 = vector.load %arg14[%c0_50, %c0_51] : memref<1x32xf32, #tpu.memory_space<vmem>>, vector<1x32xf32>
    %101 = vector.broadcast %100 : vector<1x32xf32> to vector<16x32xf32>
    %102 = arith.addf %99, %101 : vector<16x32xf32>
    %103 = arith.addf %3, %7 : vector<32x32xf32>
    %c0_52 = arith.constant 0 : index
    %c0_53 = arith.constant 0 : index
    %104 = vector.load %arg15[%c0_52, %c0_53] : memref<32x32xf32, #tpu.memory_space<vmem>>, vector<32x32xf32>
    %cst_54 = arith.constant dense<0.000000e+00> : vector<32x32xf32>
    %105 = tpu.matmul %103, %104, %cst_54 {dimension_numbers = #tpu.dot_dimension_numbers<[1], [0], [0], [1], [0, 0, 1, 1], [], []>} : vector<32x32xf32>, vector<32x32xf32>, vector<32x32xf32> -> vector<32x32xf32>
    %c0_55 = arith.constant 0 : index
    %c0_56 = arith.constant 0 : index
    %106 = vector.load %arg16[%c0_55, %c0_56] : memref<1x32xf32, #tpu.memory_space<vmem>>, vector<1x32xf32>
    %107 = vector.broadcast %106 : vector<1x32xf32> to vector<32x32xf32>
    %108 = arith.addf %105, %107 : vector<32x32xf32>
    %c0_57 = arith.constant 0 : index
    %c0_58 = arith.constant 0 : index
    %109 = vector.load %arg17[%c0_57, %c0_58] : memref<32x32xf32, #tpu.memory_space<vmem>>, vector<32x32xf32>
    %cst_59 = arith.constant dense<0.000000e+00> : vector<32x32xf32>
    %110 = tpu.matmul %3, %109, %cst_59 {dimension_numbers = #tpu.dot_dimension_numbers<[1], [0], [0], [1], [0, 0, 1, 1], [], []>} : vector<32x32xf32>, vector<32x32xf32>, vector<32x32xf32> -> vector<32x32xf32>
    %c0_60 = arith.constant 0 : index
    %c0_61 = arith.constant 0 : index
    %111 = vector.load %arg18[%c0_60, %c0_61] : memref<1x32xf32, #tpu.memory_space<vmem>>, vector<1x32xf32>
    %112 = vector.broadcast %111 : vector<1x32xf32> to vector<32x32xf32>
    %113 = arith.addf %110, %112 : vector<32x32xf32>
    %114 = vector.extract_strided_slice %102 {offsets = [0, 0], sizes = [8, 32], strides = [1, 1]} : vector<16x32xf32> to vector<8x32xf32>
    %115 = vector.shape_cast %114 : vector<8x32xf32> to vector<8x4x8xf32>
    %116 = tpu.transpose %115, [1, 0, 2] : vector<8x4x8xf32> -> vector<4x8x8xf32>
    %117 = vector.extract_strided_slice %108 {offsets = [0, 0], sizes = [16, 32], strides = [1, 1]} : vector<32x32xf32> to vector<16x32xf32>
    %118 = vector.shape_cast %117 : vector<16x32xf32> to vector<16x4x8xf32>
    %119 = tpu.transpose %118, [1, 0, 2] : vector<16x4x8xf32> -> vector<4x16x8xf32>
    %120 = vector.extract_strided_slice %113 {offsets = [0, 0], sizes = [16, 32], strides = [1, 1]} : vector<32x32xf32> to vector<16x32xf32>
    %121 = vector.shape_cast %120 : vector<16x32xf32> to vector<16x4x8xf32>
    %122 = tpu.transpose %121, [1, 0, 2] : vector<16x4x8xf32> -> vector<4x16x8xf32>
    %cst_62 = arith.constant dense<0.000000e+00> : vector<4x8x16xf32>
    %123 = tpu.matmul %116, %119, %cst_62 {dimension_numbers = #tpu.dot_dimension_numbers<[2], [2], [1], [1], [0, 0, 0, 1, 1, 1], [0], [0]>} : vector<4x8x8xf32>, vector<4x16x8xf32>, vector<4x8x16xf32> -> vector<4x8x16xf32>
    %cst_63 = arith.constant dense<0xFF800000> : vector<4x8xf32>
    %124 = vector.multi_reduction <maximumf>, %123, %cst_63 [2] : vector<4x8x16xf32> to vector<4x8xf32>
    %125 = vector.shape_cast %124 : vector<4x8xf32> to vector<4x8x1xf32>
    %126 = vector.broadcast %125 : vector<4x8x1xf32> to vector<4x8x16xf32>
    %127 = arith.subf %123, %126 : vector<4x8x16xf32>
    %128 = math.exp %127 : vector<4x8x16xf32>
    %cst_64 = arith.constant dense<0.000000e+00> : vector<4x8xf32>
    %129 = vector.multi_reduction <add>, %128, %cst_64 [2] : vector<4x8x16xf32> to vector<4x8xf32>
    %130 = vector.shape_cast %129 : vector<4x8xf32> to vector<4x8x1xf32>
    %131 = vector.broadcast %130 : vector<4x8x1xf32> to vector<4x8x16xf32>
    %132 = arith.divf %128, %131 : vector<4x8x16xf32>
    %cst_65 = arith.constant dense<0.000000e+00> : vector<4x8x8xf32>
    %133 = tpu.matmul %132, %122, %cst_65 {dimension_numbers = #tpu.dot_dimension_numbers<[2], [1], [1], [2], [0, 0, 0, 1, 1, 2], [0], [0]>} : vector<4x8x16xf32>, vector<4x16x8xf32>, vector<4x8x8xf32> -> vector<4x8x8xf32>
    %134 = tpu.transpose %133, [1, 0, 2] : vector<4x8x8xf32> -> vector<8x4x8xf32>
    %135 = vector.shape_cast %134 : vector<8x4x8xf32> to vector<8x32xf32>
    %136 = vector.extract_strided_slice %102 {offsets = [8, 0], sizes = [8, 32], strides = [1, 1]} : vector<16x32xf32> to vector<8x32xf32>
    %137 = vector.shape_cast %136 : vector<8x32xf32> to vector<8x4x8xf32>
    %138 = tpu.transpose %137, [1, 0, 2] : vector<8x4x8xf32> -> vector<4x8x8xf32>
    %139 = vector.extract_strided_slice %108 {offsets = [16, 0], sizes = [16, 32], strides = [1, 1]} : vector<32x32xf32> to vector<16x32xf32>
    %140 = vector.shape_cast %139 : vector<16x32xf32> to vector<16x4x8xf32>
    %141 = tpu.transpose %140, [1, 0, 2] : vector<16x4x8xf32> -> vector<4x16x8xf32>
    %142 = vector.extract_strided_slice %113 {offsets = [16, 0], sizes = [16, 32], strides = [1, 1]} : vector<32x32xf32> to vector<16x32xf32>
    %143 = vector.shape_cast %142 : vector<16x32xf32> to vector<16x4x8xf32>
    %144 = tpu.transpose %143, [1, 0, 2] : vector<16x4x8xf32> -> vector<4x16x8xf32>
    %cst_66 = arith.constant dense<0.000000e+00> : vector<4x8x16xf32>
    %145 = tpu.matmul %138, %141, %cst_66 {dimension_numbers = #tpu.dot_dimension_numbers<[2], [2], [1], [1], [0, 0, 0, 1, 1, 1], [0], [0]>} : vector<4x8x8xf32>, vector<4x16x8xf32>, vector<4x8x16xf32> -> vector<4x8x16xf32>
    %cst_67 = arith.constant dense<0xFF800000> : vector<4x8xf32>
    %146 = vector.multi_reduction <maximumf>, %145, %cst_67 [2] : vector<4x8x16xf32> to vector<4x8xf32>
    %147 = vector.shape_cast %146 : vector<4x8xf32> to vector<4x8x1xf32>
    %148 = vector.broadcast %147 : vector<4x8x1xf32> to vector<4x8x16xf32>
    %149 = arith.subf %145, %148 : vector<4x8x16xf32>
    %150 = math.exp %149 : vector<4x8x16xf32>
    %cst_68 = arith.constant dense<0.000000e+00> : vector<4x8xf32>
    %151 = vector.multi_reduction <add>, %150, %cst_68 [2] : vector<4x8x16xf32> to vector<4x8xf32>
    %152 = vector.shape_cast %151 : vector<4x8xf32> to vector<4x8x1xf32>
    %153 = vector.broadcast %152 : vector<4x8x1xf32> to vector<4x8x16xf32>
    %154 = arith.divf %150, %153 : vector<4x8x16xf32>
    %cst_69 = arith.constant dense<0.000000e+00> : vector<4x8x8xf32>
    %155 = tpu.matmul %154, %144, %cst_69 {dimension_numbers = #tpu.dot_dimension_numbers<[2], [1], [1], [2], [0, 0, 0, 1, 1, 2], [0], [0]>} : vector<4x8x16xf32>, vector<4x16x8xf32>, vector<4x8x8xf32> -> vector<4x8x8xf32>
    %156 = tpu.transpose %155, [1, 0, 2] : vector<4x8x8xf32> -> vector<8x4x8xf32>
    %157 = vector.shape_cast %156 : vector<8x4x8xf32> to vector<8x32xf32>
    %158 = tpu.concatenate %135, %157 in 0 : vector<8x32xf32>, vector<8x32xf32> -> vector<16x32xf32>
    %c0_70 = arith.constant 0 : index
    %c0_71 = arith.constant 0 : index
    %159 = vector.load %arg19[%c0_70, %c0_71] : memref<32x32xf32, #tpu.memory_space<vmem>>, vector<32x32xf32>
    %cst_72 = arith.constant dense<0.000000e+00> : vector<16x32xf32>
    %160 = tpu.matmul %158, %159, %cst_72 {dimension_numbers = #tpu.dot_dimension_numbers<[1], [0], [0], [1], [0, 0, 1, 1], [], []>} : vector<16x32xf32>, vector<32x32xf32>, vector<16x32xf32> -> vector<16x32xf32>
    %c0_73 = arith.constant 0 : index
    %c0_74 = arith.constant 0 : index
    %161 = vector.load %arg20[%c0_73, %c0_74] : memref<1x32xf32, #tpu.memory_space<vmem>>, vector<1x32xf32>
    %162 = vector.broadcast %161 : vector<1x32xf32> to vector<16x32xf32>
    %163 = arith.addf %160, %162 : vector<16x32xf32>
    %164 = arith.addf %96, %163 : vector<16x32xf32>
    %c0_75 = arith.constant 0 : index
    %c0_76 = arith.constant 0 : index
    %165 = vector.load %arg27[%c0_75, %c0_76] : memref<1x32xf32, #tpu.memory_space<vmem>>, vector<1x32xf32>
    %c0_77 = arith.constant 0 : index
    %c0_78 = arith.constant 0 : index
    %166 = vector.load %arg28[%c0_77, %c0_78] : memref<1x32xf32, #tpu.memory_space<vmem>>, vector<1x32xf32>
    %cst_79 = arith.constant dense<0.000000e+00> : vector<16xf32>
    %167 = vector.multi_reduction <add>, %164, %cst_79 [1] : vector<16x32xf32> to vector<16xf32>
    %168 = vector.shape_cast %167 : vector<16xf32> to vector<16x1xf32>
    %cst_80 = arith.constant 3.200000e+01 : f32
    %169 = vector.broadcast %cst_80 : f32 to vector<16x1xf32>
    %170 = arith.divf %168, %169 : vector<16x1xf32>
    %171 = vector.broadcast %170 : vector<16x1xf32> to vector<16x32xf32>
    %172 = arith.subf %164, %171 : vector<16x32xf32>
    %173 = arith.mulf %172, %172 : vector<16x32xf32>
    %cst_81 = arith.constant dense<0.000000e+00> : vector<16xf32>
    %174 = vector.multi_reduction <add>, %173, %cst_81 [1] : vector<16x32xf32> to vector<16xf32>
    %175 = vector.shape_cast %174 : vector<16xf32> to vector<16x1xf32>
    %cst_82 = arith.constant 3.200000e+01 : f32
    %176 = vector.broadcast %cst_82 : f32 to vector<16x1xf32>
    %177 = arith.divf %175, %176 : vector<16x1xf32>
    %cst_83 = arith.constant 9.99999974E-6 : f32
    %178 = vector.broadcast %cst_83 : f32 to vector<16x1xf32>
    %179 = arith.addf %177, %178 : vector<16x1xf32>
    %180 = math.rsqrt %179 : vector<16x1xf32>
    %181 = vector.broadcast %180 : vector<16x1xf32> to vector<16x32xf32>
    %182 = arith.mulf %172, %181 : vector<16x32xf32>
    %183 = vector.broadcast %165 : vector<1x32xf32> to vector<16x32xf32>
    %184 = arith.mulf %182, %183 : vector<16x32xf32>
    %185 = vector.broadcast %166 : vector<1x32xf32> to vector<16x32xf32>
    %186 = arith.addf %184, %185 : vector<16x32xf32>
    %c0_84 = arith.constant 0 : index
    %c0_85 = arith.constant 0 : index
    %187 = vector.load %arg21[%c0_84, %c0_85] : memref<32x64xf32, #tpu.memory_space<vmem>>, vector<32x64xf32>
    %cst_86 = arith.constant dense<0.000000e+00> : vector<16x64xf32>
    %188 = tpu.matmul %186, %187, %cst_86 {dimension_numbers = #tpu.dot_dimension_numbers<[1], [0], [0], [1], [0, 0, 1, 1], [], []>} : vector<16x32xf32>, vector<32x64xf32>, vector<16x64xf32> -> vector<16x64xf32>
    %c0_87 = arith.constant 0 : index
    %c0_88 = arith.constant 0 : index
    %189 = vector.load %arg22[%c0_87, %c0_88] : memref<1x64xf32, #tpu.memory_space<vmem>>, vector<1x64xf32>
    %190 = vector.broadcast %189 : vector<1x64xf32> to vector<16x64xf32>
    %191 = arith.addf %188, %190 : vector<16x64xf32>
    %cst_89 = arith.constant 0.000000e+00 : f32
    %192 = vector.broadcast %cst_89 : f32 to vector<16x64xf32>
    %193 = arith.maximumf %191, %192 : vector<16x64xf32>
    %c0_90 = arith.constant 0 : index
    %c0_91 = arith.constant 0 : index
    %194 = vector.load %arg23[%c0_90, %c0_91] : memref<64x32xf32, #tpu.memory_space<vmem>>, vector<64x32xf32>
    %cst_92 = arith.constant dense<0.000000e+00> : vector<16x32xf32>
    %195 = tpu.matmul %193, %194, %cst_92 {dimension_numbers = #tpu.dot_dimension_numbers<[1], [0], [0], [1], [0, 0, 1, 1], [], []>} : vector<16x64xf32>, vector<64x32xf32>, vector<16x32xf32> -> vector<16x32xf32>
    %c0_93 = arith.constant 0 : index
    %c0_94 = arith.constant 0 : index
    %196 = vector.load %arg24[%c0_93, %c0_94] : memref<1x32xf32, #tpu.memory_space<vmem>>, vector<1x32xf32>
    %197 = vector.broadcast %196 : vector<1x32xf32> to vector<16x32xf32>
    %198 = arith.addf %195, %197 : vector<16x32xf32>
    %199 = arith.addf %186, %198 : vector<16x32xf32>
    %c0_95 = arith.constant 0 : index
    %c0_96 = arith.constant 0 : index
    %200 = vector.load %arg29[%c0_95, %c0_96] : memref<1x32xf32, #tpu.memory_space<vmem>>, vector<1x32xf32>
    %c0_97 = arith.constant 0 : index
    %c0_98 = arith.constant 0 : index
    %201 = vector.load %arg30[%c0_97, %c0_98] : memref<1x32xf32, #tpu.memory_space<vmem>>, vector<1x32xf32>
    %cst_99 = arith.constant dense<0.000000e+00> : vector<16xf32>
    %202 = vector.multi_reduction <add>, %199, %cst_99 [1] : vector<16x32xf32> to vector<16xf32>
    %203 = vector.shape_cast %202 : vector<16xf32> to vector<16x1xf32>
    %cst_100 = arith.constant 3.200000e+01 : f32
    %204 = vector.broadcast %cst_100 : f32 to vector<16x1xf32>
    %205 = arith.divf %203, %204 : vector<16x1xf32>
    %206 = vector.broadcast %205 : vector<16x1xf32> to vector<16x32xf32>
    %207 = arith.subf %199, %206 : vector<16x32xf32>
    %208 = arith.mulf %207, %207 : vector<16x32xf32>
    %cst_101 = arith.constant dense<0.000000e+00> : vector<16xf32>
    %209 = vector.multi_reduction <add>, %208, %cst_101 [1] : vector<16x32xf32> to vector<16xf32>
    %210 = vector.shape_cast %209 : vector<16xf32> to vector<16x1xf32>
    %cst_102 = arith.constant 3.200000e+01 : f32
    %211 = vector.broadcast %cst_102 : f32 to vector<16x1xf32>
    %212 = arith.divf %210, %211 : vector<16x1xf32>
    %cst_103 = arith.constant 9.99999974E-6 : f32
    %213 = vector.broadcast %cst_103 : f32 to vector<16x1xf32>
    %214 = arith.addf %212, %213 : vector<16x1xf32>
    %215 = math.rsqrt %214 : vector<16x1xf32>
    %216 = vector.broadcast %215 : vector<16x1xf32> to vector<16x32xf32>
    %217 = arith.mulf %207, %216 : vector<16x32xf32>
    %218 = vector.broadcast %200 : vector<1x32xf32> to vector<16x32xf32>
    %219 = arith.mulf %217, %218 : vector<16x32xf32>
    %220 = vector.broadcast %201 : vector<1x32xf32> to vector<16x32xf32>
    %221 = arith.addf %219, %220 : vector<16x32xf32>
    %222 = vector.shape_cast %221 : vector<16x32xf32> to vector<2x8x32xf32>
    %c0_104 = arith.constant 0 : index
    %c0_105 = arith.constant 0 : index
    %c0_106 = arith.constant 0 : index
    %223 = vector.load %arg31[%c0_104, %c0_105, %c0_106] : memref<2x8x32xf32, #tpu.memory_space<vmem>>, vector<2x8x32xf32>
    tpu.vector_store %arg31[%c0_104, %c0_105, %c0_106], %222 {strides = array<i32>} : memref<2x8x32xf32, #tpu.memory_space<vmem>>, vector<2x8x32xf32>,
    return
  }
  func.func @transform_0(%arg0: i32) -> (i32, i32, i32) {
    %c0_i32 = arith.constant 0 : i32
    %c0_i32_0 = arith.constant 0 : i32
    %c0_i32_1 = arith.constant 0 : i32
    return %arg0, %c0_i32, %c0_i32_0 : i32, i32, i32
  }
  func.func @transform_1(%arg0: i32) -> (i32, i32, i32) {
    %c0_i32 = arith.constant 0 : i32
    %c0_i32_0 = arith.constant 0 : i32
    %c0_i32_1 = arith.constant 0 : i32
    return %arg0, %c0_i32, %c0_i32_0 : i32, i32, i32
  }
  func.func @transform_2(%arg0: i32) -> (i32, i32, i32) {
    %c0_i32 = arith.constant 0 : i32
    %c0_i32_0 = arith.constant 0 : i32
    %c0_i32_1 = arith.constant 0 : i32
    return %arg0, %c0_i32, %c0_i32_0 : i32, i32, i32
  }
  func.func @transform_3(%arg0: i32) -> (i32, i32, i32) {
    %c0_i32 = arith.constant 0 : i32
    %c0_i32_0 = arith.constant 0 : i32
    %c0_i32_1 = arith.constant 0 : i32
    return %arg0, %c0_i32, %c0_i32_0 : i32, i32, i32
  }
  func.func @transform_4(%arg0: i32) -> (i32, i32) {
    %c0_i32 = arith.constant 0 : i32
    %c0_i32_0 = arith.constant 0 : i32
    %c0_i32_1 = arith.constant 0 : i32
    return %c0_i32, %c0_i32_0 : i32, i32
  }
  func.func @transform_5(%arg0: i32) -> (i32, i32) {
    %c0_i32 = arith.constant 0 : i32
    %c0_i32_0 = arith.constant 0 : i32
    %c0_i32_1 = arith.constant 0 : i32
    return %c0_i32, %c0_i32_0 : i32, i32
  }
  func.func @transform_6(%arg0: i32) -> (i32, i32) {
    %c0_i32 = arith.constant 0 : i32
    %c0_i32_0 = arith.constant 0 : i32
    %c0_i32_1 = arith.constant 0 : i32
    return %c0_i32, %c0_i32_0 : i32, i32
  }
  func.func @transform_7(%arg0: i32) -> (i32, i32) {
    %c0_i32 = arith.constant 0 : i32
    %c0_i32_0 = arith.constant 0 : i32
    %c0_i32_1 = arith.constant 0 : i32
    return %c0_i32, %c0_i32_0 : i32, i32
  }
  func.func @transform_8(%arg0: i32) -> (i32, i32) {
    %c0_i32 = arith.constant 0 : i32
    %c0_i32_0 = arith.constant 0 : i32
    %c0_i32_1 = arith.constant 0 : i32
    return %c0_i32, %c0_i32_0 : i32, i32
  }
  func.func @transform_9(%arg0: i32) -> (i32, i32) {
    %c0_i32 = arith.constant 0 : i32
    %c0_i32_0 = arith.constant 0 : i32
    %c0_i32_1 = arith.constant 0 : i32
    return %c0_i32, %c0_i32_0 : i32, i32
  }
  func.func @transform_10(%arg0: i32) -> (i32, i32) {
    %c0_i32 = arith.constant 0 : i32
    %c0_i32_0 = arith.constant 0 : i32
    %c0_i32_1 = arith.constant 0 : i32
    return %c0_i32, %c0_i32_0 : i32, i32
  }
  func.func @transform_11(%arg0: i32) -> (i32, i32) {
    %c0_i32 = arith.constant 0 : i32
    %c0_i32_0 = arith.constant 0 : i32
    %c0_i32_1 = arith.constant 0 : i32
    return %c0_i32, %c0_i32_0 : i32, i32
  }
  func.func @transform_12(%arg0: i32) -> (i32, i32) {
    %c0_i32 = arith.constant 0 : i32
    %c0_i32_0 = arith.constant 0 : i32
    %c0_i32_1 = arith.constant 0 : i32
    return %c0_i32, %c0_i32_0 : i32, i32
  }
  func.func @transform_13(%arg0: i32) -> (i32, i32) {
    %c0_i32 = arith.constant 0 : i32
    %c0_i32_0 = arith.constant 0 : i32
    %c0_i32_1 = arith.constant 0 : i32
    return %c0_i32, %c0_i32_0 : i32, i32
  }
  func.func @transform_14(%arg0: i32) -> (i32, i32) {
    %c0_i32 = arith.constant 0 : i32
    %c0_i32_0 = arith.constant 0 : i32
    %c0_i32_1 = arith.constant 0 : i32
    return %c0_i32, %c0_i32_0 : i32, i32
  }
  func.func @transform_15(%arg0: i32) -> (i32, i32) {
    %c0_i32 = arith.constant 0 : i32
    %c0_i32_0 = arith.constant 0 : i32
    %c0_i32_1 = arith.constant 0 : i32
    return %c0_i32, %c0_i32_0 : i32, i32
  }
  func.func @transform_16(%arg0: i32) -> (i32, i32) {
    %c0_i32 = arith.constant 0 : i32
    %c0_i32_0 = arith.constant 0 : i32
    %c0_i32_1 = arith.constant 0 : i32
    return %c0_i32, %c0_i32_0 : i32, i32
  }
  func.func @transform_17(%arg0: i32) -> (i32, i32) {
    %c0_i32 = arith.constant 0 : i32
    %c0_i32_0 = arith.constant 0 : i32
    %c0_i32_1 = arith.constant 0 : i32
    return %c0_i32, %c0_i32_0 : i32, i32
  }
  func.func @transform_18(%arg0: i32) -> (i32, i32) {
    %c0_i32 = arith.constant 0 : i32
    %c0_i32_0 = arith.constant 0 : i32
    %c0_i32_1 = arith.constant 0 : i32
    return %c0_i32, %c0_i32_0 : i32, i32
  }
  func.func @transform_19(%arg0: i32) -> (i32, i32) {
    %c0_i32 = arith.constant 0 : i32
    %c0_i32_0 = arith.constant 0 : i32
    %c0_i32_1 = arith.constant 0 : i32
    return %c0_i32, %c0_i32_0 : i32, i32
  }
  func.func @transform_20(%arg0: i32) -> (i32, i32) {
    %c0_i32 = arith.constant 0 : i32
    %c0_i32_0 = arith.constant 0 : i32
    %c0_i32_1 = arith.constant 0 : i32
    return %c0_i32, %c0_i32_0 : i32, i32
  }
  func.func @transform_21(%arg0: i32) -> (i32, i32) {
    %c0_i32 = arith.constant 0 : i32
    %c0_i32_0 = arith.constant 0 : i32
    %c0_i32_1 = arith.constant 0 : i32
    return %c0_i32, %c0_i32_0 : i32, i32
  }
  func.func @transform_22(%arg0: i32) -> (i32, i32) {
    %c0_i32 = arith.constant 0 : i32
    %c0_i32_0 = arith.constant 0 : i32
    %c0_i32_1 = arith.constant 0 : i32
    return %c0_i32, %c0_i32_0 : i32, i32
  }
  func.func @transform_23(%arg0: i32) -> (i32, i32) {
    %c0_i32 = arith.constant 0 : i32
    %c0_i32_0 = arith.constant 0 : i32
    %c0_i32_1 = arith.constant 0 : i32
    return %c0_i32, %c0_i32_0 : i32, i32
  }
  func.func @transform_24(%arg0: i32) -> (i32, i32) {
    %c0_i32 = arith.constant 0 : i32
    %c0_i32_0 = arith.constant 0 : i32
    %c0_i32_1 = arith.constant 0 : i32
    return %c0_i32, %c0_i32_0 : i32, i32
  }
  func.func @transform_25(%arg0: i32) -> (i32, i32) {
    %c0_i32 = arith.constant 0 : i32
    %c0_i32_0 = arith.constant 0 : i32
    %c0_i32_1 = arith.constant 0 : i32
    return %c0_i32, %c0_i32_0 : i32, i32
  }
  func.func @transform_26(%arg0: i32) -> (i32, i32) {
    %c0_i32 = arith.constant 0 : i32
    %c0_i32_0 = arith.constant 0 : i32
    %c0_i32_1 = arith.constant 0 : i32
    return %c0_i32, %c0_i32_0 : i32, i32
  }
  func.func @transform_27(%arg0: i32) -> (i32, i32) {
    %c0_i32 = arith.constant 0 : i32
    %c0_i32_0 = arith.constant 0 : i32
    %c0_i32_1 = arith.constant 0 : i32
    return %c0_i32, %c0_i32_0 : i32, i32
  }
  func.func @transform_28(%arg0: i32) -> (i32, i32) {
    %c0_i32 = arith.constant 0 : i32
    %c0_i32_0 = arith.constant 0 : i32
    %c0_i32_1 = arith.constant 0 : i32
    return %c0_i32, %c0_i32_0 : i32, i32
  }
  func.func @transform_29(%arg0: i32) -> (i32, i32) {
    %c0_i32 = arith.constant 0 : i32
    %c0_i32_0 = arith.constant 0 : i32
    %c0_i32_1 = arith.constant 0 : i32
    return %c0_i32, %c0_i32_0 : i32, i32
  }
  func.func @transform_30(%arg0: i32) -> (i32, i32, i32) {
    %c0_i32 = arith.constant 0 : i32
    %c0_i32_0 = arith.constant 0 : i32
    %c0_i32_1 = arith.constant 0 : i32
    return %arg0, %c0_i32, %c0_i32_0 : i32, i32, i32
  }
}

</mosaic_0001>

<bundles_post_ra>
// kernel: tpu_custom_call.1
= control target key start
LH: loop header
LB: loop body
LE: loop exit
PB: predicated region body
PF: predicated region fallthrough
CT: control target
= control target key end

     0   :  { %s9723_s6 = smov 1   ;;  %s9724_s10 = smov 2   ;;  %s11335_s0 = inlined_call_operand.smem [shape: u32[31], index: -1, kind: input, shape index: {}] }
   0x1   :  { %s9792_s5 = sld [smem:[%s11335_s0]]   ;;  %s9725_s14 = smov 3  }
   0x2   :  { %s9797_s9 = sld [smem:[%s11335_s0 + %s9723_s6]]   ;;  %s9726_s18 = smov 4  }
   0x3   :  { %s9802_s13 = sld [smem:[%s11335_s0 + %s9724_s10]]   ;;  %s9727_s22 = smov 5  }
   0x4   :  { %s9807_s17 = sld [smem:[%s11335_s0 + %s9725_s14]]   ;;  %s9728_s26 = smov 6  }
   0x5   :  { %s9812_s21 = sld [smem:[%s11335_s0 + %s9726_s18]]   ;;  %s9729_s30 = smov 7  }
   0x6   :  { %s9817_s25 = sld [smem:[%s11335_s0 + %s9727_s22]]   ;;  %s9730_s4 = smov 8  }
   0x7   :  { %11349 = sst [smem:[#allocation41_spill]] %s9792_s5  ;;  %s9731_s10 = smov 9  }
   0x8   :  { %11350 = sst [smem:[#allocation42_spill]] %s9797_s9  ;;  %s9732_s15 = smov 10  }
   0x9   :  { %11351 = sst [smem:[#allocation43_spill]] %s9802_s13  ;;  %s9733_s20 = smov 11  }
   0xa   :  { %11352 = sst [smem:[#allocation44_spill]] %s9807_s17  ;;  %s9735_s1 = smov 13  }
   0xb   :  { %11353 = sst [smem:[#allocation45_spill]] %s9812_s21  ;;  %s9736_s7 = smov 14  }
   0xc   :  { %11354 = sst [smem:[#allocation46_spill]] %s9817_s25  ;;  %s9738_s22 = smov 16  }
   0xd   :  { %s9822_s29 = sld [smem:[%s11335_s0 + %s9728_s26]]   ;;  %s9734_s26 = smov 12  }
   0xe   :  { %s9827_s3 = sld [smem:[%s11335_s0 + %s9729_s30]]   ;;  %s9739_s28 = smov 17  }
   0xf   :  { %s9832_s8 = sld [smem:[%s11335_s0 + %s9730_s4]]  }
  0x10   :  { %s9837_s14 = sld [smem:[%s11335_s0 + %s9731_s10]]  }
  0x11   :  { %s9842_s19 = sld [smem:[%s11335_s0 + %s9732_s15]]   ;;  %s9737_s15 = smov 15  }
  0x12   :  { %s9847_s24 = sld [smem:[%s11335_s0 + %s9733_s20]]  }
  0x13   :  { %s9852_s30 = sld [smem:[%s11335_s0 + %s9734_s26]]  }
  0x14   :  { %11355 = sst [smem:[#allocation47_spill]] %s9827_s3 }
  0x15   :  { %11356 = sst [smem:[#allocation48_spill]] %s9832_s8 }
  0x16   :  { %11357 = sst [smem:[#allocation49_spill]] %s9837_s14 }
  0x17   :  { %11358 = sst [smem:[#allocation50_spill]] %s9842_s19 }
  0x18   :  { %11359 = sst [smem:[#allocation51_spill]] %s9847_s24 }
  0x19   :  { %s9857_s6 = sld [smem:[%s11335_s0 + %s9735_s1]]  }
  0x1a   :  { %s9862_s12 = sld [smem:[%s11335_s0 + %s9736_s7]]   ;;  %s9740_s7 = smov 18  }
  0x1b   :  { %s9867_s20 = sld [smem:[%s11335_s0 + %s9737_s15]]   ;;  %s9741_s15 = smov 19  }
  0x1c   :  { %s9872_s27 = sld [smem:[%s11335_s0 + %s9738_s22]]   ;;  %s9742_s22 = smov 20  }
  0x1d   :  { %s9877_s4 = sld [smem:[%s11335_s0 + %s9739_s28]]   ;;  %s9743_s28 = smov 21  }
  0x1e   :  { %s9882_s9 = sld [smem:[%s11335_s0 + %s9740_s7]]   ;;  %s9744_s7 = smov 22  }
  0x1f   :  { %11360 = sst [smem:[#allocation52_spill]] %s9857_s6 }
  0x20   :  { %11361 = sst [smem:[#allocation53_spill]] %s9862_s12 }
  0x21   :  { %11362 = sst [smem:[#allocation54_spill]] %s9867_s20 }
  0x22   :  { %s9887_s5 = sld [smem:[%s11335_s0 + %s9741_s15]]   ;;  %s9745_s15 = smov 23  }
  0x23   :  { %11363 = sst [smem:[#allocation55_spill]] %s9877_s4 }
  0x24   :  { %11364 = sst [smem:[#allocation56_spill]] %s9882_s9 }
  0x25   :  { %s9892_s17 = sld [smem:[%s11335_s0 + %s9742_s22]]   ;;  %s9746_s22 = smov 24  }
  0x26   :  { %s9897_s13 = sld [smem:[%s11335_s0 + %s9743_s28]]   ;;  %s9747_s28 = smov 25  }
  0x27   :  { %s9902_s9 = sld [smem:[%s11335_s0 + %s9744_s7]]   ;;  %s9748_s7 = smov 26  }
  0x28   :  { %11365 = sst [smem:[#allocation57_spill]] %s9887_s5 }
  0x29   :  { %s9907_s5 = sld [smem:[%s11335_s0 + %s9745_s15]]   ;;  %s9749_s15 = smov 27  }
  0x2b   :  { %11366 = sst [smem:[#allocation58_spill]] %s9892_s17 }
  0x2c   :  { %11367 = sst [smem:[#allocation59_spill]] %s9897_s13 }
  0x2d   :  { %11368 = sst [smem:[#allocation60_spill]] %s9902_s9 }
  0x2e   :  { %s9912_s17 = sld [smem:[%s11335_s0 + %s9746_s22]]   ;;  %s9750_s22 = smov 28  }
  0x2f   :  { %11369 = sst [smem:[#allocation61_spill]] %s9907_s5 }
  0x30   :  { %s9917_s13 = sld [smem:[%s11335_s0 + %s9747_s28]]   ;;  %s9751_s28 = smov 29  }
  0x31   :  { %s9922_s9 = sld [smem:[%s11335_s0 + %s9748_s7]]   ;;  %s9752_s7 = smov 30  }
  0x32   :  { %s9927_s5 = sld [smem:[%s11335_s0 + %s9749_s15]]  }
  0x34   :  { %11370 = sst [smem:[#allocation62_spill]] %s9912_s17 }
  0x35   :  { %s9932_s17 = sld [smem:[%s11335_s0 + %s9750_s22]]  }
  0x36   :  { %11371 = sst [smem:[#allocation63_spill]] %s9917_s13 }
  0x37   :  { %11372 = sst [smem:[#allocation64_spill]] %s9922_s9 }
  0x38   :  { %s9937_s13 = sld [smem:[%s11335_s0 + %s9751_s28]]  }
  0x39   :  { %s9942_s9 = sld [smem:[%s11335_s0 + %s9752_s7]]  }
  0x3b   :  { %11373 = sst [smem:[#allocation65_spill]] %s9932_s17 }
  0x3e   :  { %11374 = sst [smem:[#allocation66_spill]] %s9937_s13 }
  0x3f   :  { %11375 = sst [smem:[#allocation67_spill]] %s9942_s9 }
  0x40   :  { %66 = vsyncpa [#allocation3], 0 }
  0x41   :  { %68 = vsyncpa [#allocation3 + $0x1], 0 }
  0x42   :  { %69 = vsyncpa [#allocation6], 0 }
  0x43   :  { %71 = vsyncpa [#allocation6 + $0x1], 0 }
  0x44   :  { %72 = vsyncpa [#allocation9], 0 }
  0x45   :  { %73 = vsyncpa [#allocation12], 0 }
  0x46   :  { %74 = vsyncpa [#allocation15], 0 }
  0x47   :  { %75 = vsyncpa [#allocation18], 0 }
  0x48   :  { %76 = vsyncpa [#allocation21], 0 }
  0x49   :  { %77 = vsyncpa [#allocation24], 0 }
  0x4a   :  { %78 = vsyncpa [#allocation27], 0 }
  0x4b   :  { %79 = vsyncpa [#allocation4], 0 }
  0x4c   :  { %81 = vsyncpa [#allocation4 + $0x1], 0  ;;  %s9944_s15 = smov 0   ;;  %s9946_s16 = smov 0  }
  0x4d   :  { %s9948_s18 = smov 0   ;;  %s9950_s0 = smov 0  }
  0x4e LB: > { %s9753_s22 = smov [#allocation7]   ;;  %s9965_s26 = sadd.s32 4294967295, %s9721_s0   ;;  %s9721_s0 = sphi %s9950_s0, %s11438_s0   ;;  %s9717_s18 = sphi %s9948_s18, %s11437_s18   ;;  %s9713_s16 = sphi %s9946_s16, %s11436_s16   ;;  %s9709_s15 = sphi %s9944_s15, %s11435_s15  }
  0x4f   : > { %s780_s23 = sshll.u32 %s9753_s22, 4  ;;  %p8192_p0 = scmp.ge.s32.totalorder %s9721_s0, 1  ;;  %s781_s23 = int_to_ptr.vmem [resolvable:$true] %s780_s23 }
  0x50   : > { %p11345_p1 = scmp.eq.s32.totalorder %s9965_s26, 0  ;;  %p768_p2 = scmp.lt.s32.totalorder %s9721_s0, 3 }
  0x51   : > { %s9754_s1 = smov [#allocation8]   ;;  %s9755_s10 = smov [#allocation11]  }
  0x52   : > { %p9970_p3 = pnand %p8192_p0, %p768_p2  ;;  %s794_s2 = sshll.u32 %s9754_s1, 4  ;;  %s795_s2 = int_to_ptr.vmem [resolvable:$true] %s794_s2 }
  0x53   : > { %s818_s11 = sshll.u32 %s9755_s10, 4  ;;  %s9186_s9 = scalar_lea.vmem %s781_s23, 512  ;;  %s9983_s11 = int_to_ptr.vmem [resolvable:$true] %s818_s11 }
  0x54   : > { %s11376_s28 = scalar_select %p9970_p3, 1, 0 }
  0x55   : > { %p8916_p5 = pneg %p9970_p3  ;;  %p9187_p8 = scmp.ne.s32.totalorder %s781_s23, %s9186_s9 }
  0x56   : > { %p9194_p11 = scmp.lt.s32.totalorder %s781_s23, %s781_s23  ;;  %p9195_p12 = scmp.lt.s32.totalorder %s9186_s9, %s9186_s9 }
  0x57   : > { %p9979_p6 = pnand %p8916_p5, %p11345_p1 }
  0x58   : > { %p9196_p13 = por %p9195_p12, %p9194_p11 }
  0x59   : > { %p9987_p7 = pneg %p9979_p6 }
  0x5b   : > { %p9189_p9 = pnand %p9187_p8, %p9987_p7 }
  0x5d   : > { %p9190_p10 = pneg %p9189_p9 }
  0x5f   : > { %p9197_p0 = pnand %p9196_p13, %p9190_p10 }
  0x61   : > { %9200 = shalt.err (!%p9197_p0)
}
  0x62   : > { %s11341_s1 = smov 128   ;;  %s11379_s21 = sld [smem:[#allocation45_spill]] }
  0x63   : > { %s11343_s10 = smov 8   ;;  %s9212_s13 = scalar_lea.vmem %s795_s2, 16 }
  0x64   : > { %p9213_p2 = scmp.ne.s32.totalorder %s795_s2, %s9212_s13  ;;  %s9219_s17 = scalar_lea.vmem %s795_s2, 32 }
  0x65   : > { %p9220_p9 = scmp.lt.s32.totalorder %s795_s2, %s795_s2  ;;  %p9221_p11 = scmp.lt.s32.totalorder %s9219_s17, %s9212_s13 }
  0x66   : > { %p9215_p5 = pnand %p9213_p2, %p9987_p7 }
  0x67   : > { %p9222_p10 = por %p9221_p11, %p9220_p9 }
  0x68   : > { %8919 = dma.hbm_to_vmem [thread:$0]  (!%p9979_p6), %s11379_s21, 512, %s781_s23, [#allocation6], %s11341_s1, %s11341_s1, %s11343_s10  }
  0x69   : > { %p9216_p8 = pneg %p9215_p5 }
  0x6b   : > { %p9223_p12 = pnand %p9222_p10, %p9216_p8 }
  0x6d   : > { %9226 = shalt.err (!%p9223_p12)
}
  0x6e   : > { %s11380_s25 = sld [smem:[#allocation46_spill]]  ;;  %s9238_s9 = scalar_lea.vmem %s9983_s11, 16 }
  0x6f   : > { %p9239_p13 = scmp.ne.s32.totalorder %s9983_s11, %s9238_s9  ;;  %s9245_s23 = scalar_lea.vmem %s9983_s11, 32 }
  0x70   : > { %p9246_p5 = scmp.lt.s32.totalorder %s9983_s11, %s9983_s11  ;;  %p9247_p9 = scmp.lt.s32.totalorder %s9245_s23, %s9238_s9 }
  0x71   : > { %p9241_p0 = pnand %p9239_p13, %p9987_p7 }
  0x72   : > { %p9248_p8 = por %p9247_p9, %p9246_p5 }
  0x73   : > { %p9242_p2 = pneg %p9241_p0 }
  0x74   : > { %8922 = dma.hbm_to_vmem [thread:$0]  (!%p9979_p6), %s11380_s25, 16, %s795_s2, [#allocation9]  }
  0x75   : > { %p9249_p11 = pnand %p9248_p8, %p9242_p2 }
  0x77   : > { %9252 = shalt.err (!%p9249_p11)
}
  0x78   : > { %s11381_s3 = sld [smem:[#allocation47_spill]]  ;;  %s9758_s13 = smov [#allocation14]  }
  0x79   : > { %s842_s17 = sshll.u32 %s9758_s13, 4  ;;  %s9759_s2 = smov [#allocation17]   ;;  %s843_s17 = int_to_ptr.vmem [resolvable:$true] %s842_s17 }
  0x7a   : > { %s866_s1 = sshll.u32 %s9759_s2, 4  ;;  %s9264_s10 = scalar_lea.vmem %s843_s17, 16  ;;  %s867_s1 = int_to_ptr.vmem [resolvable:$true] %s866_s1 }
  0x7b   : > { %p9265_p10 = scmp.ne.s32.totalorder %s843_s17, %s9264_s10  ;;  %s9271_s9 = scalar_lea.vmem %s843_s17, 32 }
  0x7c   : > { %p9272_p0 = scmp.lt.s32.totalorder %s843_s17, %s843_s17  ;;  %p9273_p2 = scmp.lt.s32.totalorder %s9271_s9, %s9264_s10 }
  0x7d   : > { %p9267_p12 = pnand %p9265_p10, %p9987_p7 }
  0x7e   : > { %8928 = dma.hbm_to_vmem [thread:$0]  (!%p9979_p6), %s11381_s3, 16, %s9983_s11, [#allocation12]  }
  0x7f   : > { %p9268_p13 = pneg %p9267_p12  ;;  %p9274_p5 = por %p9273_p2, %p9272_p0 }
  0x81   : > { %p9275_p9 = pnand %p9274_p5, %p9268_p13 }
  0x83   : > { %9278 = shalt.err (!%p9275_p9)
}
  0x84   : > { %s11382_s14 = sld [smem:[#allocation49_spill]]  ;;  %s9290_s11 = scalar_lea.vmem %s867_s1, 16 }
  0x85   : > { %p9291_p8 = scmp.ne.s32.totalorder %s867_s1, %s9290_s11  ;;  %s9297_s23 = scalar_lea.vmem %s867_s1, 32 }
  0x86   : > { %p9298_p10 = scmp.lt.s32.totalorder %s867_s1, %s867_s1  ;;  %p9299_p12 = scmp.lt.s32.totalorder %s9297_s23, %s9290_s11 }
  0x87   : > { %p9293_p11 = pnand %p9291_p8, %p9987_p7 }
  0x88   : > { %p9300_p1 = por %p9299_p12, %p9298_p10 }
  0x89   : > { %p9294_p4 = pneg %p9293_p11 }
  0x8a   : > { %8934 = dma.hbm_to_vmem [thread:$0]  (!%p9979_p6), %s11382_s14, 16, %s843_s17, [#allocation15]  }
  0x8b   : > { %p9301_p3 = pnand %p9300_p1, %p9294_p4 }
  0x8d   : > { %9304 = shalt.err (!%p9301_p3)
}
  0x8e   : > { %s11383_s24 = sld [smem:[#allocation51_spill]]  ;;  %s9760_s10 = smov [#allocation20]  }
  0x8f   : > { %s890_s13 = sshll.u32 %s9760_s10, 4  ;;  %s9761_s17 = smov [#allocation23]   ;;  %s891_s13 = int_to_ptr.vmem [resolvable:$true] %s890_s13 }
  0x90   : > { %s914_s2 = sshll.u32 %s9761_s17, 4  ;;  %s9316_s9 = scalar_lea.vmem %s891_s13, 16  ;;  %s915_s2 = int_to_ptr.vmem [resolvable:$true] %s914_s2 }
  0x91   : > { %p9317_p13 = scmp.ne.s32.totalorder %s891_s13, %s9316_s9  ;;  %s9323_s3 = scalar_lea.vmem %s891_s13, 32 }
  0x92   : > { %p9324_p5 = scmp.lt.s32.totalorder %s891_s13, %s891_s13  ;;  %p9325_p9 = scmp.lt.s32.totalorder %s9323_s3, %s9316_s9 }
  0x93   : > { %p9319_p0 = pnand %p9317_p13, %p9987_p7 }
  0x94   : > { %8940 = dma.hbm_to_vmem [thread:$0]  (!%p9979_p6), %s11383_s24, 16, %s867_s1, [#allocation18]  }
  0x95   : > { %p9320_p2 = pneg %p9319_p0  ;;  %p9326_p1 = por %p9325_p9, %p9324_p5 }
  0x97   : > { %p9327_p3 = pnand %p9326_p1, %p9320_p2 }
  0x99   : > { %9330 = shalt.err (!%p9327_p3)
}
  0x9a   : > { %s11384_s6 = sld [smem:[#allocation52_spill]]  ;;  %s9342_s1 = scalar_lea.vmem %s915_s2, 16 }
  0x9b   : > { %p9343_p4 = scmp.ne.s32.totalorder %s915_s2, %s9342_s1  ;;  %s9349_s11 = scalar_lea.vmem %s915_s2, 32 }
  0x9c   : > { %p9350_p10 = scmp.lt.s32.totalorder %s915_s2, %s915_s2  ;;  %p9351_p12 = scmp.lt.s32.totalorder %s9349_s11, %s9342_s1 }
  0x9d   : > { %p9345_p8 = pnand %p9343_p4, %p9987_p7 }
  0x9e   : > { %p9352_p13 = por %p9351_p12, %p9350_p10 }
  0x9f   : > { %p9346_p11 = pneg %p9345_p8 }
  0xa0   : > { %8946 = dma.hbm_to_vmem [thread:$0]  (!%p9979_p6), %s11384_s6, 16, %s891_s13, [#allocation21]  }
  0xa1   : > { %p9353_p0 = pnand %p9352_p13, %p9346_p11 }
  0xa3   : > { %9356 = shalt.err (!%p9353_p0)
}
  0xa4   : > { %s11385_s20 = sld [smem:[#allocation54_spill]]  ;;  %s9762_s3 = smov [#allocation26]  }
  0xa5   : > { %s938_s23 = sshll.u32 %s9762_s3, 4  ;;  %s9763_s10 = smov [#allocation10]   ;;  %s939_s23 = int_to_ptr.vmem [resolvable:$true] %s938_s23 }
  0xa6   : > { %s804_s13 = sshll.u32 %s9763_s10, 4  ;;  %s9368_s17 = scalar_lea.vmem %s939_s23, 16  ;;  %s805_s13 = int_to_ptr.vmem [resolvable:$true] %s804_s13 }
  0xa7   : > { %p9369_p2 = scmp.ne.s32.totalorder %s939_s23, %s9368_s17  ;;  %s9375_s9 = scalar_lea.vmem %s939_s23, 32 }
  0xa8   : > { %p9376_p1 = scmp.lt.s32.totalorder %s939_s23, %s939_s23  ;;  %p9377_p3 = scmp.lt.s32.totalorder %s9375_s9, %s9368_s17 }
  0xa9   : > { %p9371_p5 = pnand %p9369_p2, %p9987_p7 }
  0xaa   : > { %8952 = dma.hbm_to_vmem [thread:$0]  (!%p9979_p6), %s11385_s20, 16, %s915_s2, [#allocation24]  }
  0xab   : > { %p9372_p9 = pneg %p9371_p5  ;;  %p9378_p4 = por %p9377_p3, %p9376_p1 }
  0xad   : > { %p9379_p8 = pnand %p9378_p4, %p9372_p9 }
  0xaf   : > { %9382 = shalt.err (!%p9379_p8)
}
  0xb0   : > { %s11386_s4 = sld [smem:[#allocation55_spill]]  ;;  %s9394_s2 = scalar_lea.vmem %s805_s13, 512 }
  0xb1   : > { %p9395_p11 = scmp.ne.s32.totalorder %s805_s13, %s9394_s2  ;;  %p9402_p13 = scmp.lt.s32.totalorder %s805_s13, %s805_s13 }
  0xb2   : > { %p9403_p0 = scmp.lt.s32.totalorder %s9394_s2, %s9394_s2 }
  0xb3   : > { %p9397_p10 = pnand %p9395_p11, %p9987_p7 }
  0xb4   : > { %p9404_p2 = por %p9403_p0, %p9402_p13 }
  0xb5   : > { %p9398_p12 = pneg %p9397_p10 }
  0xb6   : > { %8958 = dma.hbm_to_vmem [thread:$0]  (!%p9979_p6), %s11386_s4, 16, %s939_s23, [#allocation27]  }
  0xb7   : > { %p9405_p5 = pnand %p9404_p2, %p9398_p12 }
  0xb9   : > { %9408 = shalt.err (!%p9405_p5)
}
  0xba   : > { %s11387_s1 = smov 8   ;;  %s11388_s11 = smov 128  }
  0xbb   : > { %8925 = dma.hbm_to_vmem [thread:$0]  (!%p9979_p6), %s9822_s29, 512, %s805_s13, [#allocation9], %s11388_s11, %s11388_s11, %s11387_s1  }
  0xbc   : > { %s9764_s3 = smov [#allocation13]   ;;  %s9765_s10 = smov [#allocation16]  }
  0xbd   : > { %s828_s23 = sshll.u32 %s9764_s3, 4  ;;  %s852_s17 = sshll.u32 %s9765_s10, 4  ;;  %s829_s23 = int_to_ptr.vmem [resolvable:$true] %s828_s23  ;;  %s853_s17 = int_to_ptr.vmem [resolvable:$true] %s852_s17 }
  0xbe   : > { %s9420_s9 = scalar_lea.vmem %s829_s23, 512  ;;  %p9428_p4 = scmp.lt.s32.totalorder %s829_s23, %s829_s23 }
  0xbf   : > { %p9421_p9 = scmp.ne.s32.totalorder %s829_s23, %s9420_s9  ;;  %p9429_p8 = scmp.lt.s32.totalorder %s9420_s9, %s9420_s9 }
  0xc1   : > { %p9423_p1 = pnand %p9421_p9, %p9987_p7  ;;  %p9430_p11 = por %p9429_p8, %p9428_p4 }
  0xc3   : > { %p9424_p3 = pneg %p9423_p1 }
  0xc5   : > { %p9431_p10 = pnand %p9430_p11, %p9424_p3 }
  0xc7   : > { %9434 = shalt.err (!%p9431_p10)
}
  0xc8   : > { %s11389_s8 = sld [smem:[#allocation48_spill]]  ;;  %s9446_s13 = scalar_lea.vmem %s853_s17, 512 }
  0xc9   : > { %p9447_p12 = scmp.ne.s32.totalorder %s853_s17, %s9446_s13  ;;  %p9454_p2 = scmp.lt.s32.totalorder %s853_s17, %s853_s17 }
  0xca   : > { %p9455_p5 = scmp.lt.s32.totalorder %s9446_s13, %s9446_s13 }
  0xcb   : > { %p9449_p13 = pnand %p9447_p12, %p9987_p7 }
  0xcc   : > { %p9456_p9 = por %p9455_p5, %p9454_p2 }
  0xcd   : > { %p9450_p0 = pneg %p9449_p13 }
  0xce   : > { %8931 = dma.hbm_to_vmem [thread:$0]  (!%p9979_p6), %s11389_s8, 512, %s829_s23, [#allocation12], %s11388_s11, %s11388_s11, %s11387_s1  }
  0xcf   : > { %p9457_p1 = pnand %p9456_p9, %p9450_p0 }
  0xd1   : > { %9460 = shalt.err (!%p9457_p1)
}
  0xd2   : > { %s11390_s19 = sld [smem:[#allocation50_spill]]  ;;  %s9766_s2 = smov [#allocation19]  }
  0xd3   : > { %s876_s3 = sshll.u32 %s9766_s2, 4  ;;  %s9767_s23 = smov [#allocation22]   ;;  %s877_s3 = int_to_ptr.vmem [resolvable:$true] %s876_s3 }
  0xd4   : > { %s900_s10 = sshll.u32 %s9767_s23, 4  ;;  %s9472_s9 = scalar_lea.vmem %s877_s3, 512  ;;  %s901_s10 = int_to_ptr.vmem [resolvable:$true] %s900_s10 }
  0xd5   : > { %p9473_p3 = scmp.ne.s32.totalorder %s877_s3, %s9472_s9  ;;  %p9480_p11 = scmp.lt.s32.totalorder %s877_s3, %s877_s3 }
  0xd6   : > { %p9481_p10 = scmp.lt.s32.totalorder %s9472_s9, %s9472_s9 }
  0xd7   : > { %p9475_p4 = pnand %p9473_p3, %p9987_p7 }
  0xd8   : > { %8937 = dma.hbm_to_vmem [thread:$0]  (!%p9979_p6), %s11390_s19, 512, %s853_s17, [#allocation15], %s11388_s11, %s11388_s11, %s11387_s1  }
  0xd9   : > { %p9476_p8 = pneg %p9475_p4  ;;  %p9482_p12 = por %p9481_p10, %p9480_p11 }
  0xdb   : > { %p9483_p13 = pnand %p9482_p12, %p9476_p8 }
  0xdd   : > { %9486 = shalt.err (!%p9483_p13)
}
  0xde   : > { %8943 = dma.hbm_to_vmem [thread:$0]  (!%p9979_p6), %s9852_s30, 512, %s877_s3, [#allocation18], %s11388_s11, %s11388_s11, %s11387_s1  }
  0xdf   : > { %s9498_s17 = scalar_lea.vmem %s901_s10, 512  ;;  %p9506_p9 = scmp.lt.s32.totalorder %s901_s10, %s901_s10 }
  0xe0   : > { %p9499_p0 = scmp.ne.s32.totalorder %s901_s10, %s9498_s17  ;;  %p9507_p1 = scmp.lt.s32.totalorder %s9498_s17, %s9498_s17 }
  0xe2   : > { %p9501_p2 = pnand %p9499_p0, %p9987_p7  ;;  %p9508_p3 = por %p9507_p1, %p9506_p9 }
  0xe4   : > { %p9502_p5 = pneg %p9501_p2 }
  0xe6   : > { %p9509_p4 = pnand %p9508_p3, %p9502_p5 }
  0xe8   : > { %9512 = shalt.err (!%p9509_p4)
}
  0xe9   : > { %s11391_s12 = sld [smem:[#allocation53_spill]]  ;;  %s9768_s13 = smov [#allocation25]  }
  0xea   : > { %s924_s2 = sshll.u32 %s9768_s13, 4  ;;  %s9769_s3 = smov [#allocation28]   ;;  %s925_s2 = int_to_ptr.vmem [resolvable:$true] %s924_s2 }
  0xeb   : > { %s954_s23 = sshll.u32 %s9769_s3, 4  ;;  %s9524_s9 = scalar_lea.vmem %s925_s2, 512  ;;  %s955_s23 = int_to_ptr.vmem [resolvable:$true] %s954_s23 }
  0xec   : > { %p9525_p8 = scmp.ne.s32.totalorder %s925_s2, %s9524_s9  ;;  %p9532_p12 = scmp.lt.s32.totalorder %s925_s2, %s925_s2 }
  0xed   : > { %p9533_p13 = scmp.lt.s32.totalorder %s9524_s9, %s9524_s9 }
  0xee   : > { %p9527_p11 = pnand %p9525_p8, %p9987_p7 }
  0xef   : > { %8949 = dma.hbm_to_vmem [thread:$0]  (!%p9979_p6), %s11391_s12, 512, %s901_s10, [#allocation21], %s11388_s11, %s11388_s11, %s11387_s1  }
  0xf0   : > { %p9528_p10 = pneg %p9527_p11  ;;  %p9534_p0 = por %p9533_p13, %p9532_p12 }
  0xf2   : > { %p9535_p2 = pnand %p9534_p0, %p9528_p10 }
  0xf4   : > { %9538 = shalt.err (!%p9535_p2)
}
  0xf5   : > { %8955 = dma.hbm_to_vmem [thread:$0]  (!%p9979_p6), %s9872_s27, 512, %s925_s2, [#allocation24], %s11388_s11, %s11388_s11, %s11387_s1  }
  0xf6   : > { %s9550_s10 = scalar_lea.vmem %s955_s23, 512  ;;  %p9558_p3 = scmp.lt.s32.totalorder %s955_s23, %s955_s23 }
  0xf7   : > { %p9551_p5 = scmp.ne.s32.totalorder %s955_s23, %s9550_s10  ;;  %p9559_p4 = scmp.lt.s32.totalorder %s9550_s10, %s9550_s10 }
  0xf9   : > { %p9553_p9 = pnand %p9551_p5, %p9987_p7  ;;  %p9560_p8 = por %p9559_p4, %p9558_p3 }
  0xfb   : > { %p9554_p1 = pneg %p9553_p9 }
  0xfd   : > { %p9561_p11 = pnand %p9560_p8, %p9554_p1 }
  0xff   : > { %9564 = shalt.err (!%p9561_p11)
}
 0x100   : > { %s11392_s17 = sld [smem:[#allocation58_spill]]  ;;  %s8191_s7 = sadd.s32 4294967294, %s9721_s0  }
 0x101   : > { %s10098_s22 = sadd.s32 1, %s9721_s0   ;;  %s146_s13 = sadd.s32 1, %s9717_s18 }
 0x102   : > { %s143_s2 = ssub.s32 %s9721_s0, %s10098_s22  ;;  %s11393_s3 = sld [smem:[#allocation43_spill]] }
 0x103   : > { %p153_p7 = scmp.ne.s32.totalorder %s9717_s18, %s9713_s16  ;;  %p144_p10 = scmp.eq.s32.totalorder %s143_s2, 0 }
 0x104   : > { %p154_p12 = scmp.eq.s32.totalorder %s9721_s0, 0  ;;  %p159_p13 = scmp.ne.s32.totalorder %s9713_s16, %s9709_s15 }
 0x105   : > { %p755_p0 = scmp.eq.s32.totalorder %s9965_s26, 1  ;;  %p11394_p5 = scmp.eq.s32.totalorder %s9965_s26, 0 }
 0x106   : > { %8961 = dma.hbm_to_vmem [thread:$0]  (!%p9979_p6), %s11392_s17, 512, %s955_s23, [#allocation27], %s11388_s11, %s11388_s11, %s11387_s1  }
 0x107   : > { %s10110_s9 = scalar_select %p144_p10, %s9717_s18, %s146_s13  }
 0x108   : > { %p155_p2 = por %p154_p12, %p153_p7  ;;  %p10114_p6 = por %p11394_p5, %p159_p13 }
 0x109   : > { %p10118_p9 = por %p755_p0, %p153_p7  ;;  %p761_p1 = scmp.eq.s32.totalorder %s8191_s7, 1 }
 0x10a   : > { %p8988_p3 = scmp.lt.s32.totalorder %s9721_s0, 2  ;;  %s10124_s17 = sand.u32 1, %s9717_s18  }
 0x10b   : > { %s11396_s10 = scalar_select %p10118_p9, 1, 0 }
 0x10c   : > { %p10126_p4 = por %p761_p1, %p159_p13  ;;  %s8209_s2 = sshll.u32 %s10124_s17, 4 }
 0x10d   : > { %s8381_s4 = sshll.u32 %s9721_s0, 8  ;;  %s1018_s8 = scalar_lea.vmem [#allocation2], %s8209_s2 }
 0x10e   : > { %s11397_s13 = scalar_select %p10126_p4, 1, 0 }
 0x10f   : > { %s10133_s6 = scalar_lea.hbm %s11393_s3, %s8381_s4  ;;  %s1025_s7 = sshll.u32 %s1018_s8, 4  ;;  %s10139_s7 = int_to_ptr.vmem [resolvable:$true] %s1025_s7 }
 0x110   : > { %p10135_p8 = pnand %p8988_p3, %p155_p2  ;;  %s9565_s20 = scalar_lea.hbm %s10133_s6, 256 }
 0x111   : > { %p9566_p11 = scmp.ne.s32.totalorder %s10133_s6, %s9565_s20  ;;  %s9570_s4 = scalar_lea.hbm %s11393_s3, 512 }
 0x112   : > { %p9567_p7 = pneg %p10135_p8  ;;  %p9571_p13 = scmp.lt.s32.totalorder %s10133_s6, %s11393_s3 }
 0x113   : > { %p9572_p0 = scmp.lt.s32.totalorder %s9570_s4, %s9565_s20 }
 0x114   : > { %p9568_p10 = pnand %p9567_p7, %p9566_p11 }
 0x115   : > { %p9573_p2 = por %p9572_p0, %p9571_p13 }
 0x116   : > { %p9569_p12 = pneg %p9568_p10 }
 0x118   : > { %p9574_p5 = pnand %p9573_p2, %p9569_p12 }
 0x11a   : > { %9577 = shalt.err (!%p9574_p5)
}
 0x11b   : > { %s9578_s8 = scalar_lea.vmem %s10139_s7, 256  ;;  %s9770_s2 = smov [#allocation2]  }
 0x11c   : > { %p9579_p1 = scmp.ne.s32.totalorder %s10139_s7, %s9578_s8  ;;  %s9583_s14 = sshll.u32 %s9770_s2, 4  ;;  %s9584_s14 = int_to_ptr.vmem [resolvable:$false] %s9583_s14 }
 0x11d   : > { %s9585_s19 = scalar_lea.vmem %s9584_s14, 512  ;;  %p9586_p11 = scmp.lt.s32.totalorder %s10139_s7, %s9584_s14 }
 0x11e   : > { %p9581_p3 = pnand %p9579_p1, %p9567_p7  ;;  %p9587_p10 = scmp.lt.s32.totalorder %s9585_s19, %s9578_s8 }
 0x120   : > { %p9582_p4 = pneg %p9581_p3  ;;  %p9588_p9 = por %p9587_p10, %p9586_p11 }
 0x122   : > { %p9589_p13 = pnand %p9588_p9, %p9582_p4 }
 0x124   : > { %9592 = shalt.err (!%p9589_p13)
}
 0x125   : > { %s11399_s20 = scalar_lea.sflag [#allocation3], %s10124_s17  ;;  %s11400_s4 = sld [smem:[#allocation44_spill]] }
 0x126   : > { %8965 = dma.hbm_to_vmem [thread:$0]  (!%p10135_p8), %s10133_s6, 256, %s10139_s7, %s11399_s20, %s11388_s11, %s11388_s11, %s11387_s1  }
 0x127   : > { %s8212_s14 = sshll.u32 %s10124_s17, 5  ;;  %s8383_s19 = sshll.u32 %s9721_s0, 9 }
 0x128   : > { %s1039_s2 = scalar_lea.vmem [#allocation5], %s8212_s14  ;;  %s11401_s21 = sand.u32 1, %s9721_s0  }
 0x129   : > { %s1047_s3 = sshll.u32 %s1039_s2, 4  ;;  %s1036_s24 = scalar_lea.sflag [#allocation6], %s11401_s21  ;;  %s10173_s3 = int_to_ptr.vmem [resolvable:$true] %s1047_s3 }
 0x12b   : > { %s10171_s8 = scalar_lea.hbm %s11400_s4, %s8383_s19  ;;  %s9598_s6 = scalar_lea.hbm %s11400_s4, 1024 }
 0x12c   : > { %s9593_s25 = scalar_lea.hbm %s10171_s8, 512  ;;  %p9599_p0 = scmp.lt.s32.totalorder %s10171_s8, %s11400_s4 }
 0x12d   : > { %p9594_p9 = scmp.ne.s32.totalorder %s10171_s8, %s9593_s25  ;;  %p9600_p2 = scmp.lt.s32.totalorder %s9598_s6, %s9593_s25 }
 0x12f   : > { %p9596_p4 = pnand %p9594_p9, %p9567_p7  ;;  %p9601_p5 = por %p9600_p2, %p9599_p0 }
 0x131   : > { %p9597_p12 = pneg %p9596_p4 }
 0x133   : > { %p9602_p1 = pnand %p9601_p5, %p9597_p12 }
 0x135   : > { %9605 = shalt.err (!%p9602_p1)
}
 0x136   : > { %s9606_s17 = scalar_lea.vmem %s10173_s3, 512  ;;  %s9771_s21 = smov [#allocation5]  }
 0x137   : > { %p9607_p3 = scmp.ne.s32.totalorder %s10173_s3, %s9606_s17  ;;  %s9611_s7 = sshll.u32 %s9771_s21, 4  ;;  %s9612_s7 = int_to_ptr.vmem [resolvable:$false] %s9611_s7 }
 0x138   : > { %s9613_s20 = scalar_lea.vmem %s9612_s7, 1024  ;;  %p9614_p13 = scmp.lt.s32.totalorder %s10173_s3, %s9612_s7 }
 0x139   : > { %p9609_p11 = pnand %p9607_p3, %p9567_p7  ;;  %p9615_p9 = scmp.lt.s32.totalorder %s9613_s20, %s9606_s17 }
 0x13b   : > { %p9610_p10 = pneg %p9609_p11  ;;  %p9616_p4 = por %p9615_p9, %p9614_p13 }
 0x13d   : > { %p9617_p0 = pnand %p9616_p4, %p9610_p10 }
 0x13f   : > { %9620 = shalt.err (!%p9617_p0)
}
 0x140   : > { %8968 = dma.hbm_to_vmem [thread:$0]  (!%p10135_p8), %s10171_s8, 512, %s10173_s3, %s1036_s24, %s11388_s11, %s11388_s11, %s11387_s1  }
 0x141   : > { %p11402_p7 = scmp.ne.s32.totalorder %s11376_s28, 0 }
 0x142   : > { %s10201_s25 = sand.u32 (!%p11402_p7), 1, %s9713_s16  }
 0x143   : > { %1059 = sbr.rel (%p11402_p7) target bundleno = 5645 (0x160d), region = 140  ;;  %s8217_s14 = sshll.u32 (!%p11402_p7), %s10201_s25, 4 }
 0x144   : > { %s1062_s19 = scalar_lea.sflag (!%p11402_p7), [#allocation3], %s10201_s25  ;;  %s10207_s12 = scalar_lea.vmem (!%p11402_p7), [#allocation2], %s8217_s14 }
 0x148   : > { %9664 = dma.done.wait (%p10114_p6), %s1062_s19, 256  }
 0x149   : > { %9666 = vsyncadd (%p10114_p6), %s1062_s19, 4294967040  ;;  %s1070_s24 = sand.u32 1, %s9965_s26   ;;  %s8218_s28 = sshll.u32 %s10201_s25, 5 }
 0x14a   : > { %s1071_s1 = scalar_lea.sflag [#allocation6], %s1070_s24  ;;  %s10215_s11 = scalar_lea.vmem [#allocation5], %s8218_s28 }
 0x14b   : > { %9668 = dma.done.wait (%p10114_p6), %s1071_s1, 512  }
 0x14c   : > { %9670 = vsyncadd (%p10114_p6), %s1071_s1, 4294966784  ;;  %p11403_p8 = scmp.eq.s32.totalorder %s9965_s26, 0 }
 0x14e   : > { %9672 = dma.done.wait (%p11403_p8), [#allocation6], 512   ;;  %p11404_p12 = pmov %p11403_p8 }
 0x14f   : > { %p11405_p2 = pmov %p11403_p8 }
 0x150   : > { %9674 = vsyncadd (%p11404_p12), [#allocation6], 4294966784 }
 0x151   : > { %9676 = dma.done.wait (%p11405_p2), [#allocation9], 528   ;;  %p11406_p5 = pmov %p11405_p2 }
 0x152   : > { %p11407_p1 = pmov %p11405_p2 }
 0x153   : > { %9678 = vsyncadd (%p11406_p5), [#allocation9], 4294966768 }
 0x154   : > { %9680 = dma.done.wait (%p11407_p1), [#allocation12], 528   ;;  %p11408_p3 = pmov %p11407_p1 }
 0x155   : > { %p11409_p6 = pmov %p11407_p1 }
 0x156   : > { %9682 = vsyncadd (%p11408_p3), [#allocation12], 4294966768 }
 0x157   : > { %9684 = dma.done.wait (%p11409_p6), [#allocation15], 528   ;;  %p11410_p11 = pmov %p11407_p1 }
 0x158   : > { %p11411_p10 = pmov %p11407_p1 }
 0x159   : > { %9686 = vsyncadd (%p11410_p11), [#allocation15], 4294966768 }
 0x15a   : > { %9688 = dma.done.wait (%p11411_p10), [#allocation18], 528   ;;  %p11412_p13 = pmov %p11407_p1 }
 0x15b   : > { %p11413_p9 = pmov %p11407_p1 }
 0x15c   : > { %9690 = vsyncadd (%p11412_p13), [#allocation18], 4294966768 }
 0x15d   : > { %9692 = dma.done.wait (%p11413_p9), [#allocation21], 528   ;;  %p11414_p4 = pmov %p11407_p1 }
 0x15e   : > { %p11415_p0 = pmov %p11407_p1 }
 0x15f   : > { %9694 = vsyncadd (%p11414_p4), [#allocation21], 4294966768 }
 0x160   : > { %9696 = dma.done.wait (%p11415_p0), [#allocation24], 528   ;;  %p11416_p7 = pmov %p11415_p0 }
 0x161   : > { %p11417_p8 = pmov %p11415_p0 }
 0x162   : > { %9698 = vsyncadd (%p11416_p7), [#allocation24], 4294966768 }
 0x163   : > { %9700 = dma.done.wait (%p11417_p8), [#allocation27], 528   ;;  %p11418_p12 = pmov %p11415_p0 }
 0x164   : > { %s11419_s3 = sld [smem:[#allocation41_spill]]  ;;  %s8235_s23 = sshll.u32 %s9965_s26, 1  ;;  %v1260_v0 = vld [vmem:[#allocation7 + $0x18] sm:$0xff]  ;;  %v1259_v1 = vld [vmem:[#allocation7 + $0x10] sm:$0xff]  ;;  %v1258_v2 = vld [vmem:[#allocation7 + $0x8] sm:$0xff]  ;;  %vm1268_vm0 = vcmask 261120   ;;  %v1543_v31 = vlaneseq }
 0x165   : > { %9702 = vsyncadd (%p11418_p12), [#allocation27], 4294966768  ;;  %p1228_p2 = scmp.lt.s32.totalorder %s8235_s23, 3  ;;  %8534 = vmatprep.subr.mxu1 %v1260_v0  ;;  %v1249_v5 = vld [vmem:[%s10207_s12] sm:$0xff]  ;;  %v1250_v6 = vld [vmem:[%s10207_s12 + $0x8] sm:$0xff]  ;;  %s9772_s6 = smov 120  }
 0x166   : > { %8535 = vmatpush3.msra.mxu1 %v1260_v0  ;;  %v1257_v8 = vld [vmem:[#allocation7] sm:$0xff]  ;;  %v1352_v11 = vld [vmem:[#allocation10 + $0x10] sm:$0xff]  ;;  %v1351_v12 = vld [vmem:[#allocation10 + $0x8] sm:$0xff]  ;;  %s9773_s17 = smov 104   ;;  %s9774_s21 = smov 112   ;;  %v9775_v28 = vmov 0.0  }
 0x167   : > { %s11440_s23 = smov (!%p1228_p2, %s8235_s23), 3  ;;  %8536 = vmatprep.subr.mxu1 %v1259_v1  ;;  %v1353_v10 = vld [vmem:[#allocation10 + $0x18] sm:$0xff]  ;;  %v1350_v13 = vld [vmem:[#allocation10] sm:$0xff]  ;;  %v1437_v26 = vld [vmem:[#allocation13 + $0x8] sm:$0xff]  ;;  %vm9776_vm1 = vmmov 0   ;;  %v1544_v36 = vshrl.u32 %v1543_v31, 7 }
 0x168   : > { %s8236_s8 = sshll.u32 %s11440_s23, 3  ;;  %8537 = vmatpush3.msra.mxu1 %v1259_v1  ;;  %v8240_v14 = vld [vmem:[#allocation8] ss:$0 sm:$0xff]  ;;  %v8243_v19 = vld [vmem:[#allocation11] ss:$0 sm:$0xff]  ;;  %v1438_v25 = vld [vmem:[#allocation13 + $0x10] sm:$0xff] }
 0x169   : > { %8538 = vmatprep.subr.mxu1 %v1258_v2  ;;  %v1439_v24 = vld [vmem:[#allocation13 + $0x18] sm:$0xff]  ;;  %v1436_v27 = vld [vmem:[#allocation13] sm:$0xff]  ;;  %v9777_v29 = vmov 1983009808   ;;  %v9778_v33 = vmov 1934713408  }
 0x16a   : > { %s10258_s2 = scalar_lea.vmem %s11419_s3, %s8236_s8  ;;  %8539 = vmatpush3.msra.mxu1 %v1258_v2  ;;  %8556 = vmatprep.subr.mxu0 %v1439_v24  ;;  %v1541_v30 = vunpack.c.l.s4 %v9777_v29  ;;  %v1573_v34 = vunpack.c.l.s4 %v9778_v33  ;;  %vm1966_vm2 = vcmask 64512   ;;  %s9779_s7 = smov 8   ;;  %vm2756_vm3 = vcmask 130048  }
 0x16b   : > { %v1243_v3 = vld [vmem:[%s10258_s2] sm:$0xff]  ;;  %v10262_v4 = vld [vmem:[%s10258_s2 + $0x8] sm:$0xff]  ;;  %8540 = vmatprep.subr.mxu1 %v1257_v8  ;;  %8557 = vmatpush3.msra.mxu0 %v1439_v24  ;;  %s9780_s20 = smov 16   ;;  %s9781_s19 = smov 24   ;;  %vm2758_vm4 = vcmask 195584   ;;  %vm7755_vm5 = vcmask 523264  }
 0x16c   : > { %8564 = vmatprep.mubr.msk.f32.mxu0 %vm1268_vm0, %v1243_v3  ;;  %v1255_v7 = vadd.f32 %v1249_v5, %v1243_v3  ;;  %v1256_v9 = vadd.f32 %v1250_v6, %v10262_v4  ;;  %8541 = vmatpush3.msra.mxu1 %v1257_v8  ;;  %v1542_v35 = vunpack.c.0.s8 %v1541_v30  ;;  %v1574_v39 = vunpack.c.0.s8 %v1573_v34  ;;  %s11420_s24 = sld [smem:[#allocation42_spill]]  ;;  %s8384_s28 = sshll.u32 %s11440_s23, 4 }
 0x16d   : > { %8545 = vmatprep.subr.mxu1 %v1353_v10  ;;  %8558 = vmatprep.subr.mxu0 %v1438_v25  ;;  %s11421_s3 = sld [smem:[#allocation62_spill]]  ;;  %p11432_p1 = scmp.ne.s32.totalorder %s11396_s10, 0 }
 0x16e   : > { %8542 = vmatprep.mubr.msk.f32.mxu1 %vm1268_vm0, %v1255_v7  ;;  %8559 = vmatpush3.msra.mxu0 %v1438_v25  ;;  %v10295_v40 = vsub.s32 %v1542_v35, %v1544_v36  ;;  %v10297_v47 = vsub.s32 %v1574_v39, %v1544_v36  ;;  %s11422_s23 = sld [smem:[#allocation63_spill]] }
 0x16f   : > { %8543 = vmatmul.mubr.msk.f32.vlgmr.msra.gmra.mxu1 %vm1268_vm0, %v1256_v9  ;;  %8560 = vmatprep.subr.mxu0 %v1437_v26  ;;  %s11425_s8 = sld [smem:[#allocation60_spill]] }
 0x170   : > { %8546 = vmatpush3.msra.mxu1 %v1353_v10  ;;  %8553 = vmatprep.mubr.msk.f32.mxu1 %vm1268_vm0, %v1255_v7 }
 0x171   : > { %8547 = vmatprep.subr.mxu1 %v1352_v11  ;;  %8561 = vmatpush3.msra.mxu0 %v1437_v26 }
 0x172   : > { %8548 = vmatpush3.msra.mxu1 %v1352_v11  ;;  %8562 = vmatprep.subr.mxu0 %v1436_v27  ;;  %s10633_s1 = scalar_lea.vmem %s11420_s24, %s8384_s28  ;;  %s8385_s24 = sshll.u32 %s9965_s26, 8 }
 0x173   : > { %8549 = vmatprep.subr.mxu1 %v1351_v12  ;;  %8563 = vmatpush3.msra.mxu0 %v1436_v27  ;;  %s1226_s28 = scalar_lea.vmem [#allocation29], %s8217_s14  ;;  %s9782_s26 = smov [#allocation29]  }
 0x174   : > { %8550 = vmatpush3.msra.mxu1 %v1351_v12  ;;  %8577 = vmatprep.subr.mxu0 %v9775_v28  ;;  %s9625_s14 = sshll.u32 %s9782_s26, 4  ;;  %s9626_s14 = int_to_ptr.vmem [resolvable:$false] %s9625_s14 }
 0x175   : > { %8551 = vmatprep.subr.mxu1 %v1350_v13  ;;  %8565 = vmatmul.mubr.msk.f32.vlgmr.msra.gmra.mxu0 %vm1268_vm0, %v10262_v4 }
 0x176   : > { %8552 = vmatpush3.msra.mxu1 %v1350_v13  ;;  %8579 = vmatprep.mubr.msk.f32.mxu0 %vm9776_vm1, %v9775_v28 }
 0x177   : > { %8554 = vmatmul.mubr.msk.f32.vlgmr.msra.gmra.mxu1 %vm1268_vm0, %v1256_v9  ;;  %8567 = vmatprep.subr.mxu1 %v9775_v28 }
 0x178   : > { %8569 = vmatprep.mubr.msk.f32.mxu1 %vm9776_vm1, %v9775_v28 }
 0x22f   : > { %v8544_v15 = vpop.f32.mrf.mxu1 }
 0x230   : > { %v10272_v16 = vadd.f32 %v8544_v15, %v8240_v14 }
 0x231   : > { %v1341_v17 = vpop.f32.mrf.mxu1 }
 0x232   : > { %v10274_v18 = vadd.f32 %v8240_v14, %v1341_v17 }
 0x234   : > { %1529 = vrot.lane.b32.xlu1 %v10274_v18, %s9772_s6 }
 0x237   : > { %v8555_v20 = vpop.f32.mrf.mxu1 }
 0x238   : > { %v10278_v21 = vadd.f32 %v8555_v20, %v8243_v19 }
 0x239   : > { %v1427_v22 = vpop.f32.mrf.mxu1 }
 0x23a   : > { %v1428_v23 = vadd.f32 %v8243_v19, %v1427_v22 }
 0x23c   : > { %1675 = vrot.lane.b32.xlu0 %v1428_v23, %s9772_s6  ;;  %1681 = vrot.lane.b32.xlu1 %v1428_v23, %s9773_s17 }
 0x240   : > { %1678 = vrot.lane.b32.xlu0 %v1428_v23, %s9774_s21  ;;  %1535 = vrot.lane.b32.xlu1 %v10274_v18, %s9773_s17 }
 0x244   : > { %1532 = vrot.lane.b32.xlu0 %v10274_v18, %s9774_s21 }
 0x2a6   : > { %v1530_v32 = vpop.permute.xlu1 %1529 }
 0x2ae   : > { %v1676_v37 = vpop.permute.xlu0 %1675  ;;  %v1682_v38 = vpop.permute.xlu1 %1681 }
 0x2af   : > { %v1700_v41 = vcombine.low %v1676_v37, %v1682_v38  ;;  %v1701_v42 = vcombine.high %v1676_v37, %v1682_v38 }
 0x2b1   : > { %v1708_v48 = vrot.slane %v1700_v41, %v10295_v40  ;;  %v1715_v49 = vrot.slane %v1701_v42, %v10295_v40 }
 0x2b2   : > { %v1679_v43 = vpop.permute.xlu0 %1678  ;;  %v1536_v46 = vpop.permute.xlu1 %1535 }
 0x2b3   : > { %v1684_v44 = vcombine.low %v1428_v23, %v1679_v43  ;;  %v1685_v45 = vcombine.high %v1428_v23, %v1679_v43  ;;  %v1554_v52 = vcombine.low %v1530_v32, %v1536_v46  ;;  %v1555_v53 = vcombine.high %v1530_v32, %v1536_v46 }
 0x2b5   : > { %v1692_v50 = vrot.slane %v1684_v44, %v10295_v40  ;;  %v1699_v51 = vrot.slane %v1685_v45, %v10295_v40  ;;  %v1562_v1 = vrot.slane %v1554_v52, %v10295_v40  ;;  %v1569_v2 = vrot.slane %v1555_v53, %v10295_v40 }
 0x2b6   : > { %v1533_v54 = vpop.permute.xlu0 %1532 }
 0x2b7   : > { %v1716_v55 = vcombine.low %v1692_v50, %v1708_v48  ;;  %v1717_v56 = vcombine.high %v1692_v50, %v1708_v48  ;;  %v1732_v57 = vcombine.low %v1699_v51, %v1715_v49  ;;  %v1733_v58 = vcombine.high %v1699_v51, %v1715_v49 }
 0x2b8   : > { %v1538_v59 = vcombine.low %v10274_v18, %v1533_v54  ;;  %v1539_v60 = vcombine.high %v10274_v18, %v1533_v54 }
 0x2b9   : > { %v1724_v61 = vrot.slane %v1716_v55, %v10297_v47  ;;  %v1731_v62 = vrot.slane %v1717_v56, %v10297_v47  ;;  %v1740_v63 = vrot.slane %v1732_v57, %v10297_v47  ;;  %v1747_v0 = vrot.slane %v1733_v58, %v10297_v47  ;;  %v8246_v58 = vld [vmem:[#allocation14] ss:$0 sm:$0xff] }
 0x2ba   : > { %v1546_v3 = vrot.slane %v1538_v59, %v10295_v40  ;;  %v1553_v4 = vrot.slane %v1539_v60, %v10295_v40  ;;  %v8566_v59 = vpop.f32.mrf.mxu0 }
 0x2bb   : > { %v1752_v5 = vcombine.low %v1724_v61, %v1731_v62  ;;  %v8251_v6 = vcombine.high %v1724_v61, %v1731_v62  ;;  %v1768_v7 = vcombine.low %v1740_v63, %v1747_v0  ;;  %v8252_v8 = vcombine.high %v1740_v63, %v1747_v0 }
 0x2bc   : > { %v1570_v9 = vcombine.low %v1546_v3, %v1562_v1  ;;  %v1571_v10 = vcombine.high %v1546_v3, %v1562_v1  ;;  %v1586_v11 = vcombine.low %v1553_v4, %v1569_v2  ;;  %v1587_v12 = vcombine.high %v1553_v4, %v1569_v2  ;;  %v1519_v61 = vpop.f32.mrf.mxu0 }
 0x2bd   : > { %v1759_v13 = vrot.slane %v1752_v5, %v10295_v40  ;;  %v1767_v14 = vrot.slane %v8251_v6, %v10295_v40  ;;  %v1775_v15 = vrot.slane %v1768_v7, %v10295_v40  ;;  %v1783_v17 = vrot.slane %v8252_v8, %v10295_v40 }
 0x2be   : > { %v1578_v18 = vrot.slane %v1570_v9, %v10297_v47  ;;  %v1585_v19 = vrot.slane %v1571_v10, %v10297_v47  ;;  %v1594_v20 = vrot.slane %v1586_v11, %v10297_v47  ;;  %v1601_v22 = vrot.slane %v1587_v12, %v10297_v47 }
 0x2bf   : > { %v1784_v23 = vcombine.low %v1759_v13, %v1767_v14  ;;  %v1785_v24 = vcombine.high %v1759_v13, %v1767_v14  ;;  %v1800_v25 = vcombine.low %v1775_v15, %v1783_v17  ;;  %v1801_v26 = vcombine.high %v1775_v15, %v1783_v17 }
 0x2c0   : > { %v1606_v27 = vcombine.low %v1578_v18, %v1585_v19  ;;  %v8249_v29 = vcombine.high %v1578_v18, %v1585_v19  ;;  %v1622_v30 = vcombine.low %v1594_v20, %v1601_v22  ;;  %v8250_v31 = vcombine.high %v1594_v20, %v1601_v22 }
 0x2c1   : > { %v1792_v32 = vrot.slane %v1784_v23, %v10297_v47  ;;  %v1808_v33 = vrot.slane %v1800_v25, %v10297_v47  ;;  %v1799_v34 = vrot.slane %v1785_v24, %v10297_v47  ;;  %v1815_v35 = vrot.slane %v1801_v26, %v10297_v47 }
 0x2c2   : > { %v1613_v36 = vrot.slane %v1606_v27, %v10295_v40  ;;  %v1621_v37 = vrot.slane %v8249_v29, %v10295_v40  ;;  %v1629_v38 = vrot.slane %v1622_v30, %v10295_v40  ;;  %v1637_v39 = vrot.slane %v8250_v31, %v10295_v40 }
 0x2c3   : > { %v1816_v41 = vcombine.low %v1792_v32, %v1808_v33  ;;  %v1818_v42 = vcombine.low %v1799_v34, %v1815_v35  ;;  %v1817_v54 = vcombine.high %v1792_v32, %v1808_v33  ;;  %v1819_v56 = vcombine.high %v1799_v34, %v1815_v35 }
 0x2c4   : > { %v1638_v43 = vcombine.low %v1613_v36, %v1621_v37  ;;  %v1639_v44 = vcombine.high %v1613_v36, %v1621_v37  ;;  %v1654_v45 = vcombine.low %v1629_v38, %v1637_v39  ;;  %v1655_v46 = vcombine.high %v1629_v38, %v1637_v39 }
 0x2c5   : > { %8568 = vmatpush3.xpose.msk.msra.mxu1 %vm1966_vm2, %v1816_v41  ;;  %8578 = vmatpush3.xpose.msk.msra.mxu0 %vm1966_vm2, %v1818_v42  ;;  %v10353_v60 = vadd.f32 %v8566_v59, %v8246_v58  ;;  %v1520_v10 = vadd.f32 %v8246_v58, %v1519_v61 }
 0x2c6   : > { %8572 = vmatprep.subr.mxu1 %v9775_v28  ;;  %v1646_v48 = vrot.slane %v1638_v43, %v10297_v47  ;;  %v1662_v49 = vrot.slane %v1654_v45, %v10297_v47  ;;  %v1653_v50 = vrot.slane %v1639_v44, %v10297_v47  ;;  %v1669_v51 = vrot.slane %v1655_v46, %v10297_v47 }
 0x2c7   : > { %8587 = vmatprep.subr.mxu0 %v9775_v28 }
 0x2c8   : > { %v1670_v52 = vcombine.low %v1646_v48, %v1662_v49  ;;  %v1672_v53 = vcombine.low %v1653_v50, %v1669_v51  ;;  %v1671_v55 = vcombine.high %v1646_v48, %v1662_v49  ;;  %v1673_v57 = vcombine.high %v1653_v50, %v1669_v51 }
 0x2ca   : > { %8570 = vmatmul.mubr.msk.f32.vlgmr.msra.gmra.mxu1 %vm1966_vm2, %v1670_v52  ;;  %8580 = vmatmul.mubr.msk.f32.vlgmr.msra.gmra.mxu0 %vm1966_vm2, %v1672_v53 }
 0x2cb   : > { %8573 = vmatpush3.xpose.msk.msra.mxu1 %vm1966_vm2, %v1817_v54  ;;  %8574 = vmatprep.mubr.msk.f32.mxu1 %vm9776_vm1, %v9775_v28 }
 0x2cc   : > { %8582 = vmatprep.subr.mxu1 %v9775_v28  ;;  %8589 = vmatprep.mubr.msk.f32.mxu0 %vm9776_vm1, %v9775_v28 }
 0x2ce   : > { %8575 = vmatmul.mubr.msk.f32.vlgmr.msra.gmra.mxu1 %vm1966_vm2, %v1671_v55 }
 0x2cf   : > { %8583 = vmatpush3.xpose.msk.msra.mxu1 %vm1966_vm2, %v1819_v56  ;;  %8584 = vmatprep.mubr.msk.f32.mxu1 %vm9776_vm1, %v9775_v28 }
 0x2d0   : > { %8592 = vmatprep.subr.mxu1 %v9775_v28 }
 0x2d2   : > { %8585 = vmatmul.mubr.msk.f32.vlgmr.msra.gmra.mxu1 %vm1966_vm2, %v1673_v57 }
 0x2d3   : > { %8594 = vmatprep.mubr.msk.f32.mxu1 %vm9776_vm1, %v9775_v28 }
 0x38a   : > { %v2039_v62 = vpop.f32.mrf.mxu1  ;;  %v2191_v63 = vpop.f32.mrf.mxu0 }
 0x38b   : > { %v2271_v0 = vsel %vm1966_vm2, %v2039_v62, -inf  ;;  %v2277_v4 = vsel %vm1966_vm2, %v2191_v63, -inf }
 0x38c   : > { %v8581_v1 = vpop.f32.mrf.mxu0  ;;  %2272 = vmax.xlane.f32.xlu0 %v2271_v0  ;;  %v8571_v2 = vpop.f32.mrf.mxu1 }
 0x38e   : > { %v2115_v3 = vpop.f32.mrf.mxu1 }
 0x38f   : > { %v2274_v5 = vsel %vm1966_vm2, %v2115_v3, -inf }
 0x390   : > { %2278 = vmax.xlane.f32.xlu0 %v2277_v4  ;;  %2275 = vmax.xlane.f32.xlu1 %v2274_v5  ;;  %v8576_v6 = vpop.f32.mrf.mxu1 }
 0x392   : > { %v2267_v7 = vpop.f32.mrf.mxu1 }
 0x393   : > { %v2280_v8 = vsel %vm1966_vm2, %v2267_v7, -inf }
 0x394   : > { %2281 = vmax.xlane.f32.xlu0 %v2280_v8  ;;  %v8586_v9 = vpop.f32.mrf.mxu1 }
 0x3a1   : > { %1821 = vrot.lane.b32.xlu1 %v1520_v10, %s9772_s6 }
 0x3a5   : > { %1827 = vrot.lane.b32.xlu1 %v1520_v10, %s9773_s17 }
 0x3a9   : > { %2907 = vrot.lane.b32.xlu1 %v10278_v21, %s9772_s6 }
 0x3aa   : > { %1824 = vrot.lane.b32.xlu0 %v1520_v10, %s9774_s21 }
 0x3ad   : > { %2913 = vrot.lane.b32.xlu1 %v10278_v21, %s9773_s17 }
 0x3ae   : > { %2910 = vrot.lane.b32.xlu0 %v10278_v21, %s9774_s21 }
 0x3b2   : > { %2761 = vrot.lane.b32.xlu0 %v10272_v16, %s9772_s6 }
 0x415   : > { %v2273_v11 = vpop.xlane.xlu0 %2272 }
 0x416   : > { %v2283_v12 = vsub.f32 %v2039_v62, %v2273_v11 }
 0x418   : > { %v2287_v13 = vmul.f32 1.442695, %v2283_v12 }
 0x419   : > { %v2279_v14 = vpop.xlane.xlu0 %2278  ;;  %v2276_v15 = vpop.xlane.xlu1 %2275 }
 0x41a   : > { %9095 = vpow2.f32 %v2287_v13  ;;  %v2285_v17 = vsub.f32 %v2191_v63, %v2279_v14  ;;  %v2284_v18 = vsub.f32 %v2115_v3, %v2276_v15 }
 0x41c   : > { %v2291_v19 = vmul.f32 1.442695, %v2285_v17  ;;  %v2289_v20 = vmul.f32 1.442695, %v2284_v18 }
 0x41d   : > { %v1822_v22 = vpop.permute.xlu1 %1821  ;;  %v2282_v23 = vpop.xlane.xlu0 %2281 }
 0x41e   : > { %9097 = vpow2.f32 %v2291_v19  ;;  %v2286_v24 = vsub.f32 %v2267_v7, %v2282_v23 }
 0x41f   : > { %9099 = vpow2.f32 %v2289_v20 }
 0x420   : > { %v2293_v25 = vmul.f32 1.442695, %v2286_v24 }
 0x421   : > { %v1828_v26 = vpop.permute.xlu1 %1827  ;;  %v1825_v27 = vpop.permute.xlu0 %1824 }
 0x422   : > { %9101 = vpow2.f32 %v2293_v25  ;;  %v1846_v29 = vcombine.low %v1822_v22, %v1828_v26  ;;  %v1847_v30 = vcombine.high %v1822_v22, %v1828_v26  ;;  %v1830_v31 = vcombine.low %v1520_v10, %v1825_v27 }
 0x423   : > { %v1831_v32 = vcombine.high %v1520_v10, %v1825_v27 }
 0x424   : > { %v1854_v33 = vrot.slane %v1846_v29, %v10295_v40  ;;  %v1861_v34 = vrot.slane %v1847_v30, %v10295_v40  ;;  %v1838_v35 = vrot.slane %v1830_v31, %v10295_v40 }
 0x425   : > { %v1845_v36 = vrot.slane %v1831_v32, %v10295_v40  ;;  %v2908_v12 = vpop.permute.xlu1 %2907  ;;  %v2911_v14 = vpop.permute.xlu0 %2910 }
 0x426   : > { %v1862_v37 = vcombine.low %v1838_v35, %v1854_v33  ;;  %v1863_v38 = vcombine.high %v1838_v35, %v1854_v33  ;;  %v2916_v18 = vcombine.low %v10278_v21, %v2911_v14  ;;  %v2917_v19 = vcombine.high %v10278_v21, %v2911_v14 }
 0x427   : > { %v10374_v39 = vpop.eup %9095  ;;  %v1878_v41 = vcombine.low %v1845_v36, %v1861_v34  ;;  %v1879_v42 = vcombine.high %v1845_v36, %v1861_v34 }
 0x428   : > { %v1870_v43 = vrot.slane %v1862_v37, %v10297_v47  ;;  %v1877_v44 = vrot.slane %v1863_v38, %v10297_v47  ;;  %v2295_v48 = vsel %vm1966_vm2, %v10374_v39, 0.0  ;;  %v2924_v23 = vrot.slane %v2916_v18, %v10295_v40 }
 0x429   : > { %v1886_v45 = vrot.slane %v1878_v41, %v10297_v47  ;;  %v1893_v46 = vrot.slane %v1879_v42, %v10297_v47  ;;  %2296 = vadd.xlane.f32.xlu1 %v2295_v48  ;;  %v2914_v13 = vpop.permute.xlu1 %2913  ;;  %v2931_v24 = vrot.slane %v2917_v19, %v10295_v40  ;;  %v2762_v34 = vpop.permute.xlu0 %2761 }
 0x42a   : > { %v1898_v49 = vcombine.low %v1870_v43, %v1877_v44  ;;  %v8253_v50 = vcombine.high %v1870_v43, %v1877_v44  ;;  %v2932_v15 = vcombine.low %v2908_v12, %v2914_v13  ;;  %v2933_v17 = vcombine.high %v2908_v12, %v2914_v13 }
 0x42b   : > { %v10382_v51 = vpop.eup %9097  ;;  %v1914_v52 = vcombine.low %v1886_v45, %v1893_v46  ;;  %v8254_v53 = vcombine.high %v1886_v45, %v1893_v46 }
 0x42c   : > { %v10384_v54 = vpop.eup %9099  ;;  %v1905_v55 = vrot.slane %v1898_v49, %v10295_v40  ;;  %v1913_v56 = vrot.slane %v8253_v50, %v10295_v40  ;;  %v2301_v59 = vsel %vm1966_vm2, %v10382_v51, 0.0  ;;  %v2940_v20 = vrot.slane %v2932_v15, %v10295_v40 }
 0x42d   : > { %v1921_v57 = vrot.slane %v1914_v52, %v10295_v40  ;;  %v1929_v58 = vrot.slane %v8254_v53, %v10295_v40  ;;  %v2298_v61 = vsel %vm1966_vm2, %v10384_v54, 0.0  ;;  %2302 = vadd.xlane.f32.xlu1 %v2301_v59  ;;  %v2947_v22 = vrot.slane %v2933_v17, %v10295_v40 }
 0x42e   : > { %2299 = vadd.xlane.f32.xlu0 %v2298_v61  ;;  %v1930_v63 = vcombine.low %v1905_v55, %v1913_v56  ;;  %v1931_v1 = vcombine.high %v1905_v55, %v1913_v56  ;;  %v2948_v25 = vcombine.low %v2924_v23, %v2940_v20  ;;  %v2949_v26 = vcombine.high %v2924_v23, %v2940_v20 }
 0x42f   : > { %v10394_v62 = vpop.eup %9101  ;;  %v1946_v0 = vcombine.low %v1921_v57, %v1929_v58  ;;  %v1947_v2 = vcombine.high %v1921_v57, %v1929_v58  ;;  %v2964_v27 = vcombine.low %v2931_v24, %v2947_v22  ;;  %v2965_v29 = vcombine.high %v2931_v24, %v2947_v22 }
 0x430   : > { %v2304_v3 = vsel %vm1966_vm2, %v10394_v62, 0.0  ;;  %v1938_v4 = vrot.slane %v1930_v63, %v10297_v47  ;;  %v10401_v6 = vrot.slane %v1931_v1, %v10297_v47  ;;  %v2956_v30 = vrot.slane %v2948_v25, %v10297_v47 }
 0x431   : > { %v1954_v5 = vrot.slane %v1946_v0, %v10297_v47  ;;  %v10404_v9 = vrot.slane %v1947_v2, %v10297_v47  ;;  %v2963_v31 = vrot.slane %v2949_v26, %v10297_v47  ;;  %v2972_v32 = vrot.slane %v2964_v27, %v10297_v47 }
 0x432   : > { %2305 = vadd.xlane.f32.xlu0 %v2304_v3  ;;  %v2979_v21 = vrot.slane %v2965_v29, %v10297_v47 }
 0x433   : > { %v1962_v7 = vcombine.low %v1938_v4, %v1954_v5  ;;  %v1963_v8 = vcombine.high %v1938_v4, %v1954_v5  ;;  %v1964_v10 = vcombine.low %v10401_v6, %v10404_v9  ;;  %v1965_v11 = vcombine.high %v10401_v6, %v10404_v9 }
 0x434   : > { %v2984_v35 = vcombine.low %v2956_v30, %v2963_v31  ;;  %v8271_v36 = vcombine.high %v2956_v30, %v2963_v31  ;;  %v3000_v37 = vcombine.low %v2972_v32, %v2979_v21  ;;  %v8272_v38 = vcombine.high %v2972_v32, %v2979_v21 }
 0x435   : > { %8588 = vmatpush3.msra.mxu0 %v1962_v7  ;;  %8593 = vmatpush3.msra.mxu1 %v1963_v8 }
 0x436   : > { %8597 = vmatprep.subr.mxu0 %v9775_v28  ;;  %8602 = vmatprep.subr.mxu1 %v9775_v28  ;;  %v10427_v43 = vrot.slane %v2984_v35, %v10295_v40  ;;  %v10430_v44 = vrot.slane %v8271_v36, %v10295_v40  ;;  %v10433_v45 = vrot.slane %v3000_v37, %v10295_v40 }
 0x437   : > { %v10436_v46 = vrot.slane %v8272_v38, %v10295_v40 }
 0x438   : > { %v3016_v50 = vcombine.low %v10427_v43, %v10430_v44  ;;  %v3017_v25 = vcombine.high %v10427_v43, %v10430_v44 }
 0x439   : > { %v3032_v52 = vcombine.low %v10433_v45, %v10436_v46  ;;  %v3033_v26 = vcombine.high %v10433_v45, %v10436_v46 }
 0x43a   : > { %v3024_v63 = vrot.slane %v3016_v50, %v10297_v47  ;;  %v3031_v36 = vrot.slane %v3017_v25, %v10297_v47 }
 0x43b   : > { %v3040_v0 = vrot.slane %v3032_v52, %v10297_v47  ;;  %v3047_v6 = vrot.slane %v3033_v26, %v10297_v47 }
 0x43d   : > { %v3048_v14 = vcombine.low %v3024_v63, %v3040_v0  ;;  %v3049_v32 = vcombine.high %v3024_v63, %v3040_v0  ;;  %v3051_v43 = vcombine.high %v3031_v36, %v3047_v6 }
 0x43e   : > { %2764 = vrot.lane.b32.xlu1 %v10272_v16, %s9774_s21 }
 0x448   : > { %2767 = vrot.lane.b32.xlu0 %v10272_v16, %s9773_s17 }
 0x4b2   : > { %v2297_v33 = vpop.xlane.xlu1 %2296 }
 0x4b3   : > { %9103 = vrcp.f32 %v2297_v33 }
 0x4b6   : > { %v2303_v41 = vpop.xlane.xlu1 %2302 }
 0x4b7   : > { %9105 = vrcp.f32 %v2303_v41  ;;  %v2300_v42 = vpop.xlane.xlu0 %2299 }
 0x4b8   : > { %9107 = vrcp.f32 %v2300_v42  ;;  %v3050_v42 = vcombine.low %v3031_v36, %v3047_v6 }
 0x4ba   : > { %v2765_v48 = vpop.permute.xlu1 %2764 }
 0x4bb   : > { %v2306_v49 = vpop.xlane.xlu0 %2305  ;;  %v2770_v53 = vcombine.low %v10272_v16, %v2765_v48  ;;  %v2771_v55 = vcombine.high %v10272_v16, %v2765_v48 }
 0x4bc   : > { %9109 = vrcp.f32 %v2306_v49 }
 0x4bd   : > { %v2778_v1 = vrot.slane %v2770_v53, %v10295_v40  ;;  %v2785_v2 = vrot.slane %v2771_v55, %v10295_v40 }
 0x4bf   : > { %v2768_v56 = vpop.permute.xlu0 %2767 }
 0x4c0   : > { %v9104_v57 = vpop.eup %9103  ;;  %v2786_v58 = vcombine.low %v2762_v34, %v2768_v56  ;;  %v2787_v59 = vcombine.high %v2762_v34, %v2768_v56 }
 0x4c1   : > { %v2308_v61 = vmul.f32 %v9104_v57, %v10374_v39 }
 0x4c2   : > { %v2794_v3 = vrot.slane %v2786_v58, %v10295_v40  ;;  %v2801_v4 = vrot.slane %v2787_v59, %v10295_v40 }
 0x4c3   : > { %8590 = vmatmul.mubr.msk.f32.vlgmr.msra.gmra.mxu0 %vm1966_vm2, %v2308_v61 }
 0x4c4   : > { %v9106_v16 = vpop.eup %9105  ;;  %v2802_v5 = vcombine.low %v2778_v1, %v2794_v3  ;;  %v2803_v7 = vcombine.high %v2778_v1, %v2794_v3  ;;  %v2818_v8 = vcombine.low %v2785_v2, %v2801_v4  ;;  %v2819_v12 = vcombine.high %v2785_v2, %v2801_v4  ;;  %8598 = vmatpush3.msra.mxu0 %v1964_v10 }
 0x4c5   : > { %v9108_v39 = vpop.eup %9107  ;;  %8599 = vmatprep.mubr.msk.f32.mxu0 %vm9776_vm1, %v9775_v28  ;;  %8607 = vmatprep.subr.mxu0 %v9775_v28  ;;  %v2312_v13 = vmul.f32 %v9106_v16, %v10382_v51 }
 0x4c6   : > { %v2810_v15 = vrot.slane %v2802_v5, %v10297_v47  ;;  %v2817_v17 = vrot.slane %v2803_v7, %v10297_v47  ;;  %v2826_v18 = vrot.slane %v2818_v8, %v10297_v47  ;;  %v2833_v19 = vrot.slane %v2819_v12, %v10297_v47 }
 0x4c7   : > { %v2310_v20 = vmul.f32 %v9108_v39, %v10384_v54  ;;  %8600 = vmatmul.mubr.msk.f32.vlgmr.msra.gmra.mxu0 %vm1966_vm2, %v2312_v13 }
 0x4c8   : > { %v2838_v10 = vcombine.low %v2810_v15, %v2817_v17  ;;  %v8269_v22 = vcombine.high %v2810_v15, %v2817_v17  ;;  %v2854_v23 = vcombine.low %v2826_v18, %v2833_v19  ;;  %v8270_v24 = vcombine.high %v2826_v18, %v2833_v19  ;;  %8608 = vmatpush3.xpose.msk.msra.mxu0 %vm1966_vm2, %v3048_v14 }
 0x4c9   : > { %v9110_v51 = vpop.eup %9109  ;;  %8595 = vmatmul.mubr.msk.f32.vlgmr.msra.gmra.mxu1 %vm1966_vm2, %v2310_v20  ;;  %8609 = vmatprep.mubr.msk.f32.mxu0 %vm9776_vm1, %v9775_v28 }
 0x4ca   : > { %v2845_v54 = vrot.slane %v2838_v10, %v10295_v40  ;;  %v2853_v27 = vrot.slane %v8269_v22, %v10295_v40  ;;  %v2861_v29 = vrot.slane %v2854_v23, %v10295_v40  ;;  %v2869_v30 = vrot.slane %v8270_v24, %v10295_v40  ;;  %8603 = vmatpush3.msra.mxu1 %v1965_v11 }
 0x4cb   : > { %8604 = vmatprep.mubr.msk.f32.mxu1 %vm9776_vm1, %v9775_v28  ;;  %8612 = vmatprep.subr.mxu1 %v9775_v28  ;;  %v2314_v31 = vmul.f32 %v9110_v51, %v10394_v62 }
 0x4cc   : > { %v2870_v21 = vcombine.low %v2845_v54, %v2853_v27  ;;  %v2871_v33 = vcombine.high %v2845_v54, %v2853_v27  ;;  %v2886_v34 = vcombine.low %v2861_v29, %v2869_v30  ;;  %v2887_v35 = vcombine.high %v2861_v29, %v2869_v30  ;;  %8617 = vmatprep.subr.mxu0 %v9775_v28 }
 0x4cd   : > { %8605 = vmatmul.mubr.msk.f32.vlgmr.msra.gmra.mxu1 %vm1966_vm2, %v2314_v31 }
 0x4ce   : > { %8613 = vmatpush3.xpose.msk.msra.mxu1 %vm1966_vm2, %v3049_v32  ;;  %8614 = vmatprep.mubr.msk.f32.mxu1 %vm9776_vm1, %v9775_v28  ;;  %v2878_v62 = vrot.slane %v2870_v21, %v10297_v47  ;;  %v2894_v9 = vrot.slane %v2886_v34, %v10297_v47  ;;  %v2885_v38 = vrot.slane %v2871_v33, %v10297_v47 }
 0x4cf   : > { %8622 = vmatprep.subr.mxu1 %v9775_v28  ;;  %v2901_v41 = vrot.slane %v2887_v35, %v10297_v47 }
 0x4d0   : > { %v2902_v11 = vcombine.low %v2878_v62, %v2894_v9  ;;  %v2903_v37 = vcombine.high %v2878_v62, %v2894_v9 }
 0x4d1   : > { %v2904_v44 = vcombine.low %v2885_v38, %v2901_v41  ;;  %v2905_v45 = vcombine.high %v2885_v38, %v2901_v41 }
 0x4d2   : > { %8610 = vmatmul.mubr.msk.f32.vlgmr.msra.gmra.mxu0 %vm1966_vm2, %v2902_v11  ;;  %8615 = vmatmul.mubr.msk.f32.vlgmr.msra.gmra.mxu1 %vm1966_vm2, %v2903_v37 }
 0x4d3   : > { %8618 = vmatpush3.xpose.msk.msra.mxu0 %vm1966_vm2, %v3050_v42  ;;  %8623 = vmatpush3.xpose.msk.msra.mxu1 %vm1966_vm2, %v3051_v43 }
 0x4d4   : > { %8619 = vmatprep.mubr.msk.f32.mxu0 %vm9776_vm1, %v9775_v28  ;;  %8624 = vmatprep.mubr.msk.f32.mxu1 %vm9776_vm1, %v9775_v28 }
 0x4d5   : > { %8627 = vmatprep.subr.mxu0 %v9775_v28  ;;  %8632 = vmatprep.subr.mxu1 %v9775_v28 }
 0x4d6   : > { %8620 = vmatmul.mubr.msk.f32.vlgmr.msra.gmra.mxu0 %vm1966_vm2, %v2904_v44  ;;  %8625 = vmatmul.mubr.msk.f32.vlgmr.msra.gmra.mxu1 %vm1966_vm2, %v2905_v45 }
 0x4d7   : > { %8629 = vmatprep.mubr.msk.f32.mxu0 %vm9776_vm1, %v9775_v28  ;;  %8634 = vmatprep.mubr.msk.f32.mxu1 %vm9776_vm1, %v9775_v28 }
 0x583   : > { %v2384_v46 = vpop.f32.mrf.mxu0 }
 0x585   : > { %v8591_v48 = vpop.f32.mrf.mxu0 }
 0x587   : > { %v2530_v49 = vpop.f32.mrf.mxu0 }
 0x588   : > { %v2607_v50 = vcombine.low %v2384_v46, %v2530_v49  ;;  %v2608_v52 = vcombine.high %v2384_v46, %v2530_v49 }
 0x589   : > { %v2457_v53 = vpop.f32.mrf.mxu1  ;;  %v8601_v55 = vpop.f32.mrf.mxu0 }
 0x58a   : > { %v2615_v63 = vrot.slane %v2607_v50, %v10295_v40  ;;  %v2622_v0 = vrot.slane %v2608_v52, %v10295_v40 }
 0x58b   : > { %v8596_v56 = vpop.f32.mrf.mxu1 }
 0x58d   : > { %v2603_v57 = vpop.f32.mrf.mxu1 }
 0x58e   : > { %v2623_v58 = vcombine.low %v2457_v53, %v2603_v57  ;;  %v2624_v59 = vcombine.high %v2457_v53, %v2603_v57 }
 0x58f   : > { %v8606_v61 = vpop.f32.mrf.mxu1 }
 0x590   : > { %v2631_v1 = vrot.slane %v2623_v58, %v10295_v40  ;;  %v2638_v2 = vrot.slane %v2624_v59, %v10295_v40 }
 0x592   : > { %v2639_v3 = vcombine.low %v2615_v63, %v2631_v1  ;;  %v2640_v4 = vcombine.high %v2615_v63, %v2631_v1  ;;  %v2655_v16 = vcombine.low %v2622_v0, %v2638_v2  ;;  %v2656_v5 = vcombine.high %v2622_v0, %v2638_v2  ;;  %v3270_v7 = vpop.f32.mrf.mxu0  ;;  %v3346_v8 = vpop.f32.mrf.mxu1 }
 0x593   : > { %v3502_v12 = vsel %vm1966_vm2, %v3270_v7, -inf  ;;  %v3505_v39 = vsel %vm1966_vm2, %v3346_v8, -inf }
 0x594   : > { %v2647_v13 = vrot.slane %v2639_v3, %v10297_v47  ;;  %v2654_v14 = vrot.slane %v2640_v4, %v10297_v47  ;;  %v2663_v15 = vrot.slane %v2655_v16, %v10297_v47  ;;  %v2670_v17 = vrot.slane %v2656_v5, %v10297_v47  ;;  %3503 = vmax.xlane.f32.xlu1 %v3502_v12  ;;  %v8611_v18 = vpop.f32.mrf.mxu0  ;;  %v8616_v19 = vpop.f32.mrf.mxu1 }
 0x595   : > { %3506 = vmax.xlane.f32.xlu0 %v3505_v39 }
 0x596   : > { %v2675_v20 = vcombine.low %v2647_v13, %v2654_v14  ;;  %v8267_v10 = vcombine.high %v2647_v13, %v2654_v14  ;;  %v2691_v22 = vcombine.low %v2663_v15, %v2670_v17  ;;  %v8268_v23 = vcombine.high %v2663_v15, %v2670_v17  ;;  %v3422_v24 = vpop.f32.mrf.mxu0  ;;  %v3498_v51 = vpop.f32.mrf.mxu1 }
 0x597   : > { %v3508_v25 = vsel %vm1966_vm2, %v3422_v24, -inf  ;;  %v3511_v26 = vsel %vm1966_vm2, %v3498_v51, -inf }
 0x598   : > { %v8621_v54 = vpop.f32.mrf.mxu0  ;;  %3512 = vmax.xlane.f32.xlu1 %v3511_v26  ;;  %v8626_v27 = vpop.f32.mrf.mxu1  ;;  %v2682_v29 = vrot.slane %v2675_v20, %v10295_v40  ;;  %v2690_v30 = vrot.slane %v8267_v10, %v10295_v40  ;;  %v2698_v31 = vrot.slane %v2691_v22, %v10295_v40  ;;  %v2706_v32 = vrot.slane %v8268_v23, %v10295_v40 }
 0x599   : > { %3509 = vmax.xlane.f32.xlu0 %v3508_v25 }
 0x59a   : > { %v2707_v21 = vcombine.low %v2682_v29, %v2690_v30  ;;  %v2723_v33 = vcombine.low %v2698_v31, %v2706_v32  ;;  %v2708_v34 = vcombine.high %v2682_v29, %v2690_v30  ;;  %v2724_v35 = vcombine.high %v2698_v31, %v2706_v32 }
 0x59c   : > { %v10529_v36 = vrot.slane %v2707_v21, %v10297_v47  ;;  %v10532_v6 = vrot.slane %v2723_v33, %v10297_v47  ;;  %v2722_v62 = vrot.slane %v2708_v34, %v10297_v47  ;;  %v2738_v9 = vrot.slane %v2724_v35, %v10297_v47 }
 0x59e   : > { %v2740_v11 = vcombine.high %v10529_v36, %v10532_v6  ;;  %v2741_v37 = vcombine.low %v2722_v62, %v2738_v9  ;;  %v2742_v38 = vcombine.high %v2722_v62, %v2738_v9  ;;  %v2739_v41 = vcombine.low %v10529_v36, %v10532_v6  ;;  %v3992_v36 = vld [vmem:[#allocation16 + $0x18] sm:$0xff] }
 0x61d   : > { %v3504_v42 = vpop.xlane.xlu1 %3503 }
 0x61e   : > { %v3514_v43 = vsub.f32 %v3270_v7, %v3504_v42  ;;  %v3507_v44 = vpop.xlane.xlu0 %3506 }
 0x61f   : > { %v3515_v45 = vsub.f32 %v3346_v8, %v3507_v44 }
 0x620   : > { %v3518_v46 = vmul.f32 1.442695, %v3514_v43 }
 0x621   : > { %v3520_v48 = vmul.f32 1.442695, %v3515_v45  ;;  %v3513_v61 = vpop.xlane.xlu1 %3512 }
 0x622   : > { %9111 = vpow2.f32 %v3518_v46  ;;  %v3510_v49 = vpop.xlane.xlu0 %3509  ;;  %v3517_v63 = vsub.f32 %v3498_v51, %v3513_v61 }
 0x623   : > { %9113 = vpow2.f32 %v3520_v48  ;;  %v3516_v50 = vsub.f32 %v3422_v24, %v3510_v49 }
 0x624   : > { %v3524_v0 = vmul.f32 1.442695, %v3517_v63 }
 0x625   : > { %v3522_v52 = vmul.f32 1.442695, %v3516_v50 }
 0x627   : > { %9115 = vpow2.f32 %v3522_v52 }
 0x628   : > { %9117 = vpow2.f32 %v3524_v0 }
 0x62f   : > { %v10540_v53 = vpop.eup %9111 }
 0x630   : > { %v10542_v55 = vpop.eup %9113  ;;  %v3526_v56 = vsel %vm1966_vm2, %v10540_v53, 0.0 }
 0x631   : > { %3527 = vadd.xlane.f32.xlu0 %v3526_v56  ;;  %v3529_v57 = vsel %vm1966_vm2, %v10542_v55, 0.0 }
 0x632   : > { %3530 = vadd.xlane.f32.xlu1 %v3529_v57 }
 0x634   : > { %v10548_v58 = vpop.eup %9115 }
 0x635   : > { %v3532_v59 = vsel %vm1966_vm2, %v10548_v58, 0.0  ;;  %v10557_v1 = vpop.eup %9117 }
 0x636   : > { %3533 = vadd.xlane.f32.xlu0 %v3532_v59  ;;  %v3535_v2 = vsel %vm1966_vm2, %v10557_v1, 0.0 }
 0x643   : > { %3056 = vrot.lane.b32.xlu1 %v10353_v60, %s9774_s21 }
 0x64c   : > { %3053 = vrot.lane.b32.xlu0 %v10353_v60, %s9772_s6 }
 0x650   : > { %2744 = vrot.lane.b32.xlu0 %v2740_v11, %s9779_s7 }
 0x667   : > { %3536 = vadd.xlane.f32.xlu1 %v3535_v2 }
 0x678   : > { %3059 = vrot.lane.b32.xlu1 %v10353_v60, %s9773_s17 }
 0x67c   : > { %2748 = vrot.lane.b32.xlu1 %v2741_v37, %s9780_s20 }
 0x680   : > { %2752 = vrot.lane.b32.xlu1 %v2742_v38, %s9781_s19 }
 0x6ba   : > { %v3528_v4 = vpop.xlane.xlu0 %3527 }
 0x6bb   : > { %v3531_v3 = vpop.xlane.xlu1 %3530  ;;  %9119 = vrcp.f32 %v3528_v4 }
 0x6bc   : > { %9121 = vrcp.f32 %v3531_v3 }
 0x6bf   : > { %v3057_v16 = vpop.permute.xlu1 %3056  ;;  %v3534_v5 = vpop.xlane.xlu0 %3533 }
 0x6c0   : > { %v3062_v8 = vcombine.low %v10353_v60, %v3057_v16  ;;  %v3063_v12 = vcombine.high %v10353_v60, %v3057_v16  ;;  %9123 = vrcp.f32 %v3534_v5 }
 0x6c2   : > { %v3070_v17 = vrot.slane %v3062_v8, %v10295_v40  ;;  %v3077_v18 = vrot.slane %v3063_v12, %v10295_v40 }
 0x6c3   : > { %v3054_v39 = vpop.permute.xlu0 %3053 }
 0x6c7   : > { %v2745_v57 = vpop.permute.xlu0 %2744 }
 0x6c8   : > { %v9120_v11 = vpop.eup %9119 }
 0x6c9   : > { %v9122_v37 = vpop.eup %9121  ;;  %v3539_v50 = vmul.f32 %v9120_v11, %v10540_v53  ;;  %v2755_v53 = vsel %vm1966_vm2, %v2739_v41, %v2745_v57 }
 0x6ca   : > { %v3541_v52 = vmul.f32 %v9122_v37, %v10542_v55 }
 0x6cd   : > { %v9124_v46 = vpop.eup %9123 }
 0x6ce   : > { %v3543_v55 = vmul.f32 %v9124_v46, %v10548_v58 }
 0x6f0   : > { %v3537_v7 = vpop.xlane.xlu1 %3536 }
 0x6f1   : > { %9125 = vrcp.f32 %v3537_v7 }
 0x6f4   : > { %v3060_v13 = vpop.permute.xlu1 %3059 }
 0x6f5   : > { %v3078_v14 = vcombine.low %v3054_v39, %v3060_v13  ;;  %v3079_v15 = vcombine.high %v3054_v39, %v3060_v13 }
 0x6f7   : > { %v3086_v19 = vrot.slane %v3078_v14, %v10295_v40  ;;  %v3093_v20 = vrot.slane %v3079_v15, %v10295_v40 }
 0x6f8   : > { %v2749_v38 = vpop.permute.xlu1 %2748 }
 0x6f9   : > { %v3094_v10 = vcombine.low %v3070_v17, %v3086_v19  ;;  %v3095_v22 = vcombine.high %v3070_v17, %v3086_v19  ;;  %v3110_v23 = vcombine.low %v3077_v18, %v3093_v20  ;;  %v3111_v24 = vcombine.high %v3077_v18, %v3093_v20 }
 0x6fa   : > { %v2757_v2 = vsel %vm2756_vm3, %v2755_v53, %v2749_v38 }
 0x6fb   : > { %v3102_v60 = vrot.slane %v3094_v10, %v10297_v47  ;;  %v3109_v51 = vrot.slane %v3095_v22, %v10297_v47  ;;  %v3118_v25 = vrot.slane %v3110_v23, %v10297_v47  ;;  %v3125_v26 = vrot.slane %v3111_v24, %v10297_v47  ;;  %v3991_v23 = vld [vmem:[#allocation16 + $0x10] sm:$0xff]  ;;  %v3990_v24 = vld [vmem:[#allocation16 + $0x8] sm:$0xff] }
 0x6fc   : > { %v2753_v63 = vpop.permute.xlu1 %2752 }
 0x6fd   : > { %v3130_v54 = vcombine.low %v3102_v60, %v3109_v51  ;;  %v8273_v27 = vcombine.high %v3102_v60, %v3109_v51  ;;  %v3146_v29 = vcombine.low %v3118_v25, %v3125_v26  ;;  %v8274_v30 = vcombine.high %v3118_v25, %v3125_v26 }
 0x6fe   : > { %v9126_v56 = vpop.eup %9125  ;;  %v2759_v3 = vsel %vm2758_vm4, %v2757_v2, %v2753_v63  ;;  %v9171_v2 = vld [vmem:[%s10258_s2 + $0x8] sm:$0xff] }
 0x6ff   : > { %v3137_v31 = vrot.slane %v3130_v54, %v10295_v40  ;;  %v3145_v32 = vrot.slane %v8273_v27, %v10295_v40  ;;  %v3153_v21 = vrot.slane %v3146_v29, %v10295_v40  ;;  %v3161_v33 = vrot.slane %v8274_v30, %v10295_v40 }
 0x700   : > { %v3545_v0 = vmul.f32 %v9126_v56, %v10557_v1 }
 0x701   : > { %v3162_v34 = vcombine.low %v3137_v31, %v3145_v32  ;;  %v3178_v35 = vcombine.low %v3153_v21, %v3161_v33  ;;  %v3163_v62 = vcombine.high %v3137_v31, %v3145_v32  ;;  %v3179_v9 = vcombine.high %v3153_v21, %v3161_v33  ;;  %v3989_v31 = vld [vmem:[#allocation16] sm:$0xff] }
 0x703   : > { %v3170_v42 = vrot.slane %v3162_v34, %v10297_v47  ;;  %v3186_v43 = vrot.slane %v3178_v35, %v10297_v47  ;;  %v3177_v44 = vrot.slane %v3163_v62, %v10297_v47  ;;  %v3193_v45 = vrot.slane %v3179_v9, %v10297_v47 }
 0x705   : > { %v3194_v48 = vcombine.low %v3170_v42, %v3186_v43  ;;  %v3195_v49 = vcombine.high %v3170_v42, %v3186_v43  ;;  %v3196_v59 = vcombine.low %v3177_v44, %v3193_v45  ;;  %v3197_v61 = vcombine.high %v3177_v44, %v3193_v45 }
 0x707   : > { %8628 = vmatpush3.msra.mxu0 %v3194_v48  ;;  %8633 = vmatpush3.msra.mxu1 %v3195_v49 }
 0x708   : > { %8630 = vmatmul.mubr.msk.f32.vlgmr.msra.gmra.mxu0 %vm1966_vm2, %v3539_v50  ;;  %8635 = vmatmul.mubr.msk.f32.vlgmr.msra.gmra.mxu1 %vm1966_vm2, %v3541_v52 }
 0x709   : > { %8637 = vmatprep.subr.mxu0 %v9775_v28  ;;  %8642 = vmatprep.subr.mxu1 %v9775_v28 }
 0x70a   : > { %8638 = vmatpush3.msra.mxu0 %v3196_v59  ;;  %8643 = vmatpush3.msra.mxu1 %v3197_v61  ;;  %v8289_v61 = vld [vmem:[#allocation17] ss:$0 sm:$0xff] }
 0x70b   : > { %8639 = vmatprep.mubr.msk.f32.mxu0 %vm9776_vm1, %v9775_v28  ;;  %8644 = vmatprep.mubr.msk.f32.mxu1 %vm9776_vm1, %v9775_v28 }
 0x70c   : > { %8640 = vmatmul.mubr.msk.f32.vlgmr.msra.gmra.mxu0 %vm1966_vm2, %v3543_v55  ;;  %8645 = vmatmul.mubr.msk.f32.vlgmr.msra.gmra.mxu1 %vm1966_vm2, %v3545_v0 }
 0x70d   : > { %8655 = vmatprep.mubr.msk.f32.mxu0 %vm1268_vm0, %v2759_v3  ;;  %8647 = vmatprep.subr.mxu0 %v3992_v36 }
 0x70e   : > { %8648 = vmatpush3.msra.mxu0 %v3992_v36 }
 0x70f   : > { %8649 = vmatprep.subr.mxu0 %v3991_v23 }
 0x710   : > { %8650 = vmatpush3.msra.mxu0 %v3991_v23 }
 0x711   : > { %8651 = vmatprep.subr.mxu0 %v3990_v24 }
 0x712   : > { %8652 = vmatpush3.msra.mxu0 %v3990_v24 }
 0x713   : > { %8653 = vmatprep.subr.mxu0 %v3989_v31 }
 0x714   : > { %8654 = vmatpush3.msra.mxu0 %v3989_v31 }
 0x7c8   : > { %v3615_v6 = vpop.f32.mrf.mxu0  ;;  %v3688_v41 = vpop.f32.mrf.mxu1 }
 0x7ca   : > { %v8631_v58 = vpop.f32.mrf.mxu0  ;;  %v8636_v1 = vpop.f32.mrf.mxu1 }
 0x7cb   : > { %v4229_v1 = vld [vmem:[#allocation22 + $0x18] sm:$0xff] }
 0x7cc   : > { %v3761_v4 = vpop.f32.mrf.mxu0  ;;  %v3834_v16 = vpop.f32.mrf.mxu1  ;;  %8669 = vmatprep.subr.mxu0 %v4229_v1 }
 0x7cd   : > { %v3838_v5 = vcombine.low %v3615_v6, %v3761_v4  ;;  %v3839_v7 = vcombine.high %v3615_v6, %v3761_v4  ;;  %v3854_v8 = vcombine.low %v3688_v41, %v3834_v16  ;;  %v3855_v12 = vcombine.high %v3688_v41, %v3834_v16  ;;  %v9172_v6 = vld [vmem:[%s10258_s2] sm:$0xff]  ;;  %s11426_s2 = sld [smem:[#allocation64_spill]] }
 0x7ce   : > { %v8641_v39 = vpop.f32.mrf.mxu0  ;;  %v8646_v13 = vpop.f32.mrf.mxu1  ;;  %v4228_v4 = vld [vmem:[#allocation22 + $0x10] sm:$0xff] }
 0x7cf   : > { %v3846_v14 = vrot.slane %v3838_v5, %v10295_v40  ;;  %v3853_v15 = vrot.slane %v3839_v7, %v10295_v40  ;;  %v3862_v17 = vrot.slane %v3854_v8, %v10295_v40  ;;  %v3869_v18 = vrot.slane %v3855_v12, %v10295_v40  ;;  %v10636_v16 = vld [vmem:[%s10633_s1] sm:$0xff]  ;;  %v4227_v7 = vld [vmem:[#allocation22 + $0x8] sm:$0xff]  ;;  %v10641_v12 = vld [vmem:[%s10633_s1 + $0x8] sm:$0xff] }
 0x7d0   : > { %v1251_v5 = vld [vmem:[%s10215_s11] sm:$0xff]  ;;  %v1252_v39 = vld [vmem:[%s10215_s11 + $0x8] sm:$0xff] }
 0x7d1   : > { %v3870_v19 = vcombine.low %v3846_v14, %v3862_v17  ;;  %v3871_v20 = vcombine.high %v3846_v14, %v3862_v17  ;;  %v3886_v10 = vcombine.low %v3853_v15, %v3869_v18  ;;  %v3887_v22 = vcombine.high %v3853_v15, %v3869_v18  ;;  %v4226_v13 = vld [vmem:[#allocation22] sm:$0xff] }
 0x7d2   : > { %v4222_v8 = vadd.f32 %v1251_v5, %v10636_v16  ;;  %v4223_v14 = vadd.f32 %v1252_v39, %v10641_v12 }
 0x7d3   : > { %v3878_v60 = vrot.slane %v3870_v19, %v10297_v47  ;;  %v3885_v51 = vrot.slane %v3871_v20, %v10297_v47  ;;  %v3894_v25 = vrot.slane %v3886_v10, %v10297_v47  ;;  %v3901_v26 = vrot.slane %v3887_v22, %v10297_v47 }
 0x7d5   : > { %v3906_v54 = vcombine.low %v3878_v60, %v3885_v51  ;;  %v8287_v27 = vcombine.high %v3878_v60, %v3885_v51  ;;  %v3922_v29 = vcombine.low %v3894_v25, %v3901_v26  ;;  %v8288_v30 = vcombine.high %v3894_v25, %v3901_v26  ;;  %v4133_v51 = vld [vmem:[#allocation19 + $0x18] sm:$0xff]  ;;  %v4132_v25 = vld [vmem:[#allocation19 + $0x10] sm:$0xff]  ;;  %v4131_v26 = vld [vmem:[#allocation19 + $0x8] sm:$0xff] }
 0x7d6   : > { %8658 = vmatprep.subr.mxu1 %v4133_v51 }
 0x7d7   : > { %v3913_v32 = vrot.slane %v3906_v54, %v10295_v40  ;;  %v3921_v21 = vrot.slane %v8287_v27, %v10295_v40  ;;  %v3929_v33 = vrot.slane %v3922_v29, %v10295_v40  ;;  %v3937_v34 = vrot.slane %v8288_v30, %v10295_v40  ;;  %8659 = vmatpush3.msra.mxu1 %v4133_v51  ;;  %v4130_v54 = vld [vmem:[#allocation19] sm:$0xff] }
 0x7d8   : > { %8660 = vmatprep.subr.mxu1 %v4132_v25  ;;  %v10650_v27 = vld [vmem:[#allocation23] ss:$0 sm:$0xff] }
 0x7d9   : > { %v3939_v35 = vcombine.high %v3913_v32, %v3921_v21  ;;  %v3955_v62 = vcombine.high %v3929_v33, %v3937_v34  ;;  %v3938_v9 = vcombine.low %v3913_v32, %v3921_v21  ;;  %v3954_v11 = vcombine.low %v3929_v33, %v3937_v34  ;;  %8661 = vmatpush3.msra.mxu1 %v4132_v25 }
 0x7da   : > { %8662 = vmatprep.subr.mxu1 %v4131_v26 }
 0x7db   : > { %v3953_v37 = vrot.slane %v3939_v35, %v10297_v47  ;;  %v3969_v38 = vrot.slane %v3955_v62, %v10297_v47  ;;  %v3946_v42 = vrot.slane %v3938_v9, %v10297_v47  ;;  %v3962_v43 = vrot.slane %v3954_v11, %v10297_v47  ;;  %8663 = vmatpush3.msra.mxu1 %v4131_v26 }
 0x7dc   : > { %8664 = vmatprep.subr.mxu1 %v4130_v54 }
 0x7dd   : > { %v3973_v44 = vcombine.high %v3953_v37, %v3969_v38  ;;  %v3971_v45 = vcombine.high %v3946_v42, %v3962_v43  ;;  %v3970_v46 = vcombine.low %v3946_v42, %v3962_v43  ;;  %v3972_v48 = vcombine.low %v3953_v37, %v3969_v38  ;;  %8665 = vmatpush3.msra.mxu1 %v4130_v54  ;;  %v8292_v37 = vld [vmem:[%s11421_s3] ss:$0 sm:$0xff] }
 0x7de   : > { %v8293_v42 = vld [vmem:[%s11422_s23] ss:$0 sm:$0xff]  ;;  %s7886_s23 = scalar_lea.sflag [#allocation4], %s10201_s25 }
 0x7df   : > { %3983 = vrot.lane.b32.xlu1 %v3973_v44, %s9781_s19  ;;  %3975 = vrot.lane.b32.xlu0 %v3971_v45, %s9779_s7 }
 0x7e3   : > { %3979 = vrot.lane.b32.xlu0 %v3972_v48, %s9780_s20 }
 0x851   : > { %v3976_v49 = vpop.permute.xlu0 %3975  ;;  %v3984_v56 = vpop.permute.xlu1 %3983 }
 0x852   : > { %v3986_v50 = vsel %vm1966_vm2, %v3970_v46, %v3976_v49  ;;  %v9173_v49 = vld [vmem:[%s10207_s12] sm:$0xff] }
 0x855   : > { %v3980_v52 = vpop.permute.xlu0 %3979 }
 0x856   : > { %v3987_v57 = vsel %vm2756_vm3, %v3986_v50, %v3980_v52 }
 0x857   : > { %v3988_v59 = vsel %vm2758_vm4, %v3987_v57, %v3984_v56  ;;  %v9174_v56 = vld [vmem:[%s10207_s12 + $0x8] sm:$0xff]  ;;  %s11423_s12 = sld [smem:[#allocation56_spill]] }
 0x858   : > { %8656 = vmatmul.mubr.msk.f32.vlgmr.msra.gmra.mxu0 %vm1268_vm0, %v3988_v59 }
 0x859   : > { %8670 = vmatpush3.msra.mxu0 %v4229_v1  ;;  %8677 = vmatprep.mubr.msk.f32.mxu0 %vm1268_vm0, %v4222_v8 }
 0x85a   : > { %8671 = vmatprep.subr.mxu0 %v4228_v4 }
 0x85b   : > { %8672 = vmatpush3.msra.mxu0 %v4228_v4 }
 0x85c   : > { %8673 = vmatprep.subr.mxu0 %v4227_v7 }
 0x85d   : > { %8674 = vmatpush3.msra.mxu0 %v4227_v7 }
 0x85e   : > { %8675 = vmatprep.subr.mxu0 %v4226_v13 }
 0x85f   : > { %8676 = vmatpush3.msra.mxu0 %v4226_v13 }
 0x860   : > { %8678 = vmatmul.mubr.msk.f32.vlgmr.msra.gmra.mxu0 %vm1268_vm0, %v4223_v14  ;;  %8697 = vmatprep.subr.mxu0 %v9775_v28 }
 0x918   : > { %v8657_v63 = vpop.f32.mrf.mxu0 }
 0x919   : > { %v4078_v53 = vadd.f32 %v8657_v63, %v8289_v61 }
 0x91a   : > { %v4072_v55 = vpop.f32.mrf.mxu0 }
 0x91b   : > { %v4073_v0 = vadd.f32 %v8289_v61, %v4072_v55  ;;  %v4082_v3 = vadd.f32 %v9171_v2, %v4078_v53 }
 0x91d   : > { %v4088_v36 = vsel %vm1268_vm0, %v4082_v3, 0.0  ;;  %v4081_v41 = vadd.f32 %v9172_v6, %v4073_v0 }
 0x91e   : > { %4089 = vadd.xlane.f32.xlu1 %v4088_v36 }
 0x91f   : > { %v4085_v58 = vsel %vm1268_vm0, %v4081_v41, 0.0 }
 0x920   : > { %4086 = vadd.xlane.f32.xlu0 %v4085_v58  ;;  %v8679_v29 = vpop.f32.mrf.mxu0 }
 0x921   : > { %v4321_v30 = vadd.f32 %v8679_v29, %v10650_v27 }
 0x922   : > { %v4315_v31 = vpop.f32.mrf.mxu0 }
 0x923   : > { %v4316_v32 = vadd.f32 %v10650_v27, %v4315_v31 }
 0x92f   : > { %4592 = vrot.lane.b32.xlu1 %v4321_v30, %s9772_s6 }
 0x933   : > { %4604 = vrot.lane.b32.xlu1 %v4321_v30, %s9773_s17 }
 0x937   : > { %4590 = vrot.lane.b32.xlu1 %v4316_v32, %s9772_s6 }
 0x93b   : > { %4602 = vrot.lane.b32.xlu1 %v4316_v32, %s9773_s17 }
 0x9a7   : > { %v4090_v15 = vpop.xlane.xlu1 %4089 }
 0x9a8   : > { %v4093_v17 = vmul.f32 0.03125, %v4090_v15 }
 0x9a9   : > { %v4087_v18 = vpop.xlane.xlu0 %4086 }
 0x9aa   : > { %v4092_v19 = vmul.f32 0.03125, %v4087_v18  ;;  %v4095_v20 = vsub.f32 %v4082_v3, %v4093_v17 }
 0x9ab   : > { %v4593_v59 = vpop.permute.xlu1 %4592 }
 0x9ac   : > { %v4094_v10 = vsub.f32 %v4081_v41, %v4092_v19  ;;  %v4097_v24 = vmul.f32 %v4095_v20, %v4095_v20 }
 0x9ae   : > { %v4096_v22 = vmul.f32 %v4094_v10, %v4094_v10  ;;  %v4101_v60 = vsel %vm1268_vm0, %v4097_v24, 0.0 }
 0x9af   : > { %v4605_v55 = vpop.permute.xlu1 %4604 }
 0x9b0   : > { %v4098_v23 = vsel %vm1268_vm0, %v4096_v22, 0.0  ;;  %v4692_v0 = vcombine.low %v4593_v59, %v4605_v55  ;;  %v4693_v2 = vcombine.high %v4593_v59, %v4605_v55  ;;  %v4336_v55 = vld [vmem:[#allocation25 + $0x10] sm:$0xff] }
 0x9b1   : > { %4099 = vadd.xlane.f32.xlu0 %v4098_v23 }
 0x9b2   : > { %v4700_v6 = vrot.slane %v4692_v0, %v10295_v40  ;;  %v4707_v41 = vrot.slane %v4693_v2, %v10295_v40  ;;  %v4335_v0 = vld [vmem:[#allocation25 + $0x8] sm:$0xff] }
 0x9b3   : > { %v4591_v1 = vpop.permute.xlu1 %4590 }
 0x9b5   : > { %4102 = vadd.xlane.f32.xlu0 %v4101_v60 }
 0x9b7   : > { %v4603_v18 = vpop.permute.xlu1 %4602 }
 0x9b8   : > { %v4624_v23 = vcombine.low %v4591_v1, %v4603_v18  ;;  %v4625_v24 = vcombine.high %v4591_v1, %v4603_v18 }
 0x9ba   : > { %v4639_v31 = vrot.slane %v4625_v24, %v10295_v40  ;;  %v1247_v24 = vld [vmem:[%s10633_s1 + $0x10] sm:$0xff] }
 0x9cb   : > { %4598 = vrot.lane.b32.xlu0 %v4321_v30, %s9774_s21 }
 0x9cf   : > { %4596 = vrot.lane.b32.xlu0 %v4316_v32, %s9774_s21 }
 0xa3a   : > { %v4100_v21 = vpop.xlane.xlu0 %4099 }
 0xa3b   : > { %v4104_v33 = vmul.f32 0.03125, %v4100_v21 }
 0xa3d   : > { %v4106_v34 = vadd.f32 1e-05, %v4104_v33 }
 0xa3e   : > { %v4103_v35 = vpop.xlane.xlu0 %4102 }
 0xa3f   : > { %9127 = vrsqrt.f32 %v4106_v34  ;;  %v4105_v62 = vmul.f32 0.03125, %v4103_v35 }
 0xa41   : > { %v4107_v9 = vadd.f32 1e-05, %v4105_v62 }
 0xa42   : > { %v4599_v61 = vpop.permute.xlu0 %4598 }
 0xa43   : > { %9129 = vrsqrt.f32 %v4107_v9  ;;  %v4676_v63 = vcombine.low %v4321_v30, %v4599_v61  ;;  %v4677_v53 = vcombine.high %v4321_v30, %v4599_v61  ;;  %v4632_v30 = vrot.slane %v4624_v23, %v10295_v40  ;;  %v4337_v61 = vld [vmem:[#allocation25 + $0x18] sm:$0xff] }
 0xa44   : > { %8683 = vmatprep.subr.mxu1 %v4337_v61 }
 0xa45   : > { %v4684_v3 = vrot.slane %v4676_v63, %v10295_v40  ;;  %v4691_v36 = vrot.slane %v4677_v53, %v10295_v40 }
 0xa46   : > { %v4597_v58 = vpop.permute.xlu0 %4596 }
 0xa47   : > { %v4708_v4 = vcombine.low %v4684_v3, %v4700_v6  ;;  %v4709_v5 = vcombine.high %v4684_v3, %v4700_v6  ;;  %v4725_v7 = vcombine.high %v4691_v36, %v4707_v41  ;;  %v4608_v8 = vcombine.low %v4316_v32, %v4597_v58 }
 0xa48   : > { %v4609_v39 = vcombine.high %v4316_v32, %v4597_v58 }
 0xa49   : > { %v4716_v13 = vrot.slane %v4708_v4, %v10297_v47  ;;  %v4723_v14 = vrot.slane %v4709_v5, %v10297_v47  ;;  %v4739_v17 = vrot.slane %v4725_v7, %v10297_v47  ;;  %v4616_v60 = vrot.slane %v4608_v8, %v10295_v40 }
 0xa4a   : > { %v4623_v51 = vrot.slane %v4609_v39, %v10295_v40 }
 0xa4b   : > { %v4812_v19 = vcombine.low %v4716_v13, %v4723_v14  ;;  %v4640_v33 = vcombine.low %v4616_v60, %v4632_v30  ;;  %v4641_v34 = vcombine.high %v4616_v60, %v4632_v30  ;;  %v1253_v60 = vld [vmem:[%s10215_s11 + $0x10] sm:$0xff] }
 0xa4c   : > { %v9128_v11 = vpop.eup %9127  ;;  %v4656_v35 = vcombine.low %v4623_v51, %v4639_v31  ;;  %v4657_v62 = vcombine.high %v4623_v51, %v4639_v31  ;;  %v4224_v51 = vadd.f32 %v1253_v60, %v1247_v24 }
 0xa4d   : > { %v4110_v38 = vmul.f32 %v9128_v11, %v4094_v10  ;;  %v4819_v25 = vrot.slane %v4812_v19, %v10295_v40  ;;  %v4648_v9 = vrot.slane %v4640_v33, %v10297_v47  ;;  %v4655_v11 = vrot.slane %v4641_v34, %v10297_v47  ;;  %v8294_v19 = vld [vmem:[#allocation20] ss:$0 sm:$0xff] }
 0xa4e   : > { %8680 = vmatprep.mubr.msk.f32.mxu0 %vm1268_vm0, %v4224_v51 }
 0xa4f   : > { %v4118_v43 = vmul.f32 %v8292_v37, %v4110_v38  ;;  %v4671_v38 = vrot.slane %v4657_v62, %v10297_v47 }
 0xa50   : > { %v9130_v44 = vpop.eup %9129 }
 0xa51   : > { %v4111_v45 = vmul.f32 %v9130_v44, %v4095_v20  ;;  %v10662_v46 = vadd.f32 %v8293_v42, %v4118_v43  ;;  %v8311_v20 = vcombine.high %v4716_v13, %v4723_v14  ;;  %v8309_v43 = vcombine.high %v4648_v9, %v4655_v11 }
 0xa53   : > { %v4119_v48 = vmul.f32 %v8292_v37, %v4111_v45  ;;  %v4128_v50 = vadd.f32 %v9173_v49, %v10662_v46  ;;  %v4827_v26 = vrot.slane %v8311_v20, %v10295_v40  ;;  %v4664_v37 = vrot.slane %v4656_v35, %v10297_v47 }
 0xa54   : > { %v4759_v49 = vrot.slane %v8309_v43, %v10295_v40 }
 0xa55   : > { %v10666_v52 = vadd.f32 %v8293_v42, %v4119_v48  ;;  %8666 = vmatprep.mubr.msk.f32.mxu1 %vm1268_vm0, %v4128_v50  ;;  %v4845_v32 = vcombine.high %v4819_v25, %v4827_v26  ;;  %v4744_v42 = vcombine.low %v4648_v9, %v4655_v11  ;;  %v4760_v44 = vcombine.low %v4664_v37, %v4671_v38 }
 0xa56   : > { %v8310_v45 = vcombine.high %v4664_v37, %v4671_v38  ;;  %v4844_v63 = vcombine.low %v4819_v25, %v4827_v26  ;;  %v1248_v25 = vld [vmem:[%s10633_s1 + $0x18] sm:$0xff]  ;;  %s7899_s1 = sshll.u32 %s1226_s28, 4  ;;  %s11294_s1 = int_to_ptr.vmem [resolvable:$true] %s7899_s1 }
 0xa57   : > { %v4129_v57 = vadd.f32 %v9174_v56, %v10666_v52  ;;  %v4751_v48 = vrot.slane %v4744_v42, %v10295_v40  ;;  %v4767_v50 = vrot.slane %v4760_v44, %v10295_v40  ;;  %v1254_v26 = vld [vmem:[%s10215_s11 + $0x18] sm:$0xff]  ;;  %s11424_s11 = sld [smem:[#allocation57_spill]]  ;;  %p9628_p11 = scmp.lt.s32.totalorder %s11294_s1, %s9626_s14 }
 0xa58   : > { %v4775_v56 = vrot.slane %v8310_v45, %v10295_v40  ;;  %v4852_v6 = vrot.slane %v4844_v63, %v10297_v47 }
 0xa59   : > { %8667 = vmatmul.mubr.msk.f32.vlgmr.msra.gmra.mxu1 %vm1268_vm0, %v4129_v57  ;;  %v4777_v57 = vcombine.high %v4751_v48, %v4759_v49  ;;  %v4776_v2 = vcombine.low %v4751_v48, %v4759_v49 }
 0xa5a   : > { %8691 = vmatprep.mubr.msk.f32.mxu1 %vm1268_vm0, %v10636_v16  ;;  %v4724_v16 = vcombine.low %v4691_v36, %v4707_v41  ;;  %v4793_v59 = vcombine.high %v4767_v50, %v4775_v56  ;;  %8684 = vmatpush3.msra.mxu1 %v4337_v61  ;;  %v4792_v3 = vcombine.low %v4767_v50, %v4775_v56  ;;  %v4334_v36 = vld [vmem:[#allocation25] sm:$0xff] }
 0xa5b   : > { %8685 = vmatprep.subr.mxu1 %v4336_v55  ;;  %v4784_v4 = vrot.slane %v4776_v2, %v10297_v47 }
 0xa5c   : > { %v4732_v15 = vrot.slane %v4724_v16, %v10297_v47  ;;  %8686 = vmatpush3.msra.mxu1 %v4336_v55  ;;  %v4800_v5 = vrot.slane %v4792_v3, %v10297_v47  ;;  %v10708_v16 = vrot.slane %v4845_v32, %v10297_v47  ;;  %v10719_v8 = vrot.slane %v4793_v59, %v10297_v47 }
 0xa5d   : > { %8687 = vmatprep.subr.mxu1 %v4335_v0 }
 0xa5e   : > { %v4828_v10 = vcombine.low %v4732_v15, %v4739_v17  ;;  %v8312_v22 = vcombine.high %v4732_v15, %v4739_v17  ;;  %8688 = vmatpush3.msra.mxu1 %v4335_v0  ;;  %v4808_v39 = vcombine.low %v4784_v4, %v4800_v5  ;;  %v4809_v13 = vcombine.high %v4784_v4, %v4800_v5 }
 0xa5f   : > { %8689 = vmatprep.subr.mxu1 %v4334_v36 }
 0xa60   : > { %v4835_v54 = vrot.slane %v4828_v10, %v10295_v40  ;;  %v4843_v29 = vrot.slane %v8312_v22, %v10295_v40  ;;  %8690 = vmatpush3.msra.mxu1 %v4334_v36 }
 0xa61   : > { %8704 = vmatprep.subr.mxu1 %v9775_v28  ;;  %8692 = vmatmul.mubr.msk.f32.vlgmr.msra.gmra.mxu1 %vm1268_vm0, %v10641_v12  ;;  %v10716_v12 = vrot.slane %v4777_v57, %v10297_v47 }
 0xa62   : > { %v4861_v21 = vcombine.high %v4835_v54, %v4843_v29  ;;  %v4860_v53 = vcombine.low %v4835_v54, %v4843_v29  ;;  %8694 = vmatprep.mubr.msk.f32.mxu1 %vm1268_vm0, %v1247_v24  ;;  %v4225_v54 = vadd.f32 %v1254_v26, %v1248_v25 }
 0xa63   : > { %v4810_v17 = vcombine.low %v10716_v12, %v10719_v8  ;;  %v4811_v18 = vcombine.high %v10716_v12, %v10719_v8 }
 0xa64   : > { %v4868_v41 = vrot.slane %v4860_v53, %v10297_v47  ;;  %v10713_v7 = vrot.slane %v4861_v21, %v10297_v47  ;;  %8681 = vmatmul.mubr.msk.f32.gmra.mxu0 %vm1268_vm0, %v4225_v54  ;;  %v10807_v54 = vld [vmem:[#allocation26] ss:$0 sm:$0xff] }
 0xa65   : > { %8695 = vmatmul.mubr.msk.f32.gmra.mxu1 %vm1268_vm0, %v1248_v25  ;;  %8701 = vmatprep.mubr.msk.f32.mxu0 %vm9776_vm1, %v9775_v28 }
 0xa66   : > { %v4876_v58 = vcombine.low %v4852_v6, %v4868_v41  ;;  %v4877_v1 = vcombine.high %v4852_v6, %v4868_v41  ;;  %v4878_v14 = vcombine.low %v10708_v16, %v10713_v7  ;;  %v4879_v15 = vcombine.high %v10708_v16, %v10713_v7  ;;  %8708 = vmatprep.mubr.msk.f32.mxu1 %vm9776_vm1, %v9775_v28 }
 0xa68   : > { %8698 = vmatpush3.xpose.msk.msra.mxu0 %vm1966_vm2, %v4876_v58  ;;  %8705 = vmatpush3.xpose.msk.msra.mxu1 %vm1966_vm2, %v4877_v1 }
 0xa69   : > { %8699 = vmatprep.subr.mxu0 %v9775_v28  ;;  %8706 = vmatprep.subr.mxu1 %v9775_v28 }
 0xa6c   : > { %8700 = vmatpush3.xpose.msk.msra.mxu0 %vm1966_vm2, %v4808_v39  ;;  %8707 = vmatpush3.xpose.msk.msra.mxu1 %vm1966_vm2, %v4809_v13 }
 0xa6d   : > { %8711 = vmatprep.subr.mxu0 %v9775_v28  ;;  %8718 = vmatprep.subr.mxu1 %v9775_v28 }
 0xb19   : > { %v8668_v20 = vpop.f32.mrf.mxu1 }
 0xb1a   : > { %v10733_v10 = vadd.f32 %v8668_v20, %v8294_v19 }
 0xb1b   : > { %v4213_v22 = vpop.f32.mrf.mxu1 }
 0xb1c   : > { %v4214_v23 = vadd.f32 %v8294_v19, %v4213_v22 }
 0xb1e   : > { %4446 = vrot.lane.b32.xlu1 %v4214_v23, %s9774_s21  ;;  %4443 = vrot.lane.b32.xlu0 %v4214_v23, %s9772_s6 }
 0xb21   : > { %v8693_v39 = vpop.f32.mrf.mxu1 }
 0xb22   : > { %4449 = vrot.lane.b32.xlu0 %v4214_v23, %s9773_s17 }
 0xb23   : > { %v4423_v12 = vpop.f32.mrf.mxu1 }
 0xb24   : > { %v8682_v13 = vpop.f32.mrf.mxu0 }
 0xb25   : > { %v10798_v8 = vpop.f32.mrf.mxu1 }
 0xb90   : > { %v4447_v29 = vpop.permute.xlu1 %4446  ;;  %v4444_v30 = vpop.permute.xlu0 %4443 }
 0xb91   : > { %v4452_v31 = vcombine.low %v4214_v23, %v4447_v29  ;;  %v4453_v32 = vcombine.high %v4214_v23, %v4447_v29  ;;  %v4429_v29 = vadd.f32 %v8693_v39, %v10807_v54 }
 0xb93   : > { %v4460_v35 = vrot.slane %v4452_v31, %v10295_v40  ;;  %v4467_v62 = vrot.slane %v4453_v32, %v10295_v40  ;;  %v10821_v31 = vadd.f32 %v8682_v13, %v10650_v27 }
 0xb94   : > { %v4450_v21 = vpop.permute.xlu0 %4449 }
 0xb95   : > { %v4468_v33 = vcombine.low %v4444_v30, %v4450_v21  ;;  %v4469_v34 = vcombine.high %v4444_v30, %v4450_v21  ;;  %v10814_v30 = vadd.f32 %v10807_v54, %v4423_v12 }
 0xb97   : > { %v4476_v9 = vrot.slane %v4468_v33, %v10295_v40  ;;  %v4483_v11 = vrot.slane %v4469_v34, %v10295_v40 }
 0xb99   : > { %v4484_v37 = vcombine.low %v4460_v35, %v4476_v9  ;;  %v4485_v38 = vcombine.high %v4460_v35, %v4476_v9  ;;  %v4500_v42 = vcombine.low %v4467_v62, %v4483_v11  ;;  %v4501_v43 = vcombine.high %v4467_v62, %v4483_v11 }
 0xb9b   : > { %v4492_v44 = vrot.slane %v4484_v37, %v10297_v47  ;;  %v4499_v45 = vrot.slane %v4485_v38, %v10297_v47  ;;  %v4508_v48 = vrot.slane %v4500_v42, %v10297_v47  ;;  %v4515_v49 = vrot.slane %v4501_v43, %v10297_v47 }
 0xb9d   : > { %v4520_v50 = vcombine.low %v4492_v44, %v4499_v45  ;;  %v8307_v56 = vcombine.high %v4492_v44, %v4499_v45  ;;  %v4536_v57 = vcombine.low %v4508_v48, %v4515_v49  ;;  %v8308_v59 = vcombine.high %v4508_v48, %v4515_v49 }
 0xb9f   : > { %v4527_v61 = vrot.slane %v4520_v50, %v10295_v40  ;;  %v4535_v63 = vrot.slane %v8307_v56, %v10295_v40  ;;  %v4543_v53 = vrot.slane %v4536_v57, %v10295_v40  ;;  %v4551_v55 = vrot.slane %v8308_v59, %v10295_v40 }
 0xba1   : > { %v4552_v0 = vcombine.low %v4527_v61, %v4535_v63  ;;  %v4568_v2 = vcombine.low %v4543_v53, %v4551_v55  ;;  %v4553_v6 = vcombine.high %v4527_v61, %v4535_v63  ;;  %v4569_v41 = vcombine.high %v4543_v53, %v4551_v55 }
 0xba3   : > { %v4560_v3 = vrot.slane %v4552_v0, %v10297_v47  ;;  %v4576_v36 = vrot.slane %v4568_v2, %v10297_v47  ;;  %v4567_v4 = vrot.slane %v4553_v6, %v10297_v47  ;;  %v4583_v5 = vrot.slane %v4569_v41, %v10297_v47 }
 0xba5   : > { %v4584_v58 = vcombine.low %v4560_v3, %v4576_v36  ;;  %v4585_v1 = vcombine.high %v4560_v3, %v4576_v36  ;;  %v4586_v16 = vcombine.low %v4567_v4, %v4583_v5  ;;  %v4587_v7 = vcombine.high %v4567_v4, %v4583_v5 }
 0xba7   : > { %8702 = vmatmul.mubr.msk.f32.vlgmr.msra.gmra.mxu0 %vm1966_vm2, %v4584_v58  ;;  %8709 = vmatmul.mubr.msk.f32.vlgmr.msra.gmra.mxu1 %vm1966_vm2, %v4585_v1 }
 0xba8   : > { %8712 = vmatpush3.xpose.msk.msra.mxu0 %vm1966_vm2, %v4878_v14  ;;  %8719 = vmatpush3.xpose.msk.msra.mxu1 %vm1966_vm2, %v4879_v15  ;;  %v10800_v14 = vpop.f32.mrf.mxu1  ;;  %v4325_v15 = vpop.f32.mrf.mxu0 }
 0xba9   : > { %8713 = vmatprep.subr.mxu0 %v9775_v28  ;;  %8720 = vmatprep.subr.mxu1 %v9775_v28  ;;  %v10826_v32 = vadd.f32 %v10650_v27, %v4325_v15 }
 0xbaa   : > { %8715 = vmatprep.mubr.msk.f32.mxu0 %vm9776_vm1, %v9775_v28  ;;  %8722 = vmatprep.mubr.msk.f32.mxu1 %vm9776_vm1, %v9775_v28 }
 0xbac   : > { %8714 = vmatpush3.xpose.msk.msra.mxu0 %vm1966_vm2, %v4810_v17  ;;  %8721 = vmatpush3.xpose.msk.msra.mxu1 %vm1966_vm2, %v4811_v18 }
 0xbad   : > { %8725 = vmatprep.subr.mxu0 %v9775_v28  ;;  %8732 = vmatprep.subr.mxu1 %v9775_v28 }
 0xbaf   : > { %8716 = vmatmul.mubr.msk.f32.vlgmr.msra.gmra.mxu0 %vm1966_vm2, %v4586_v16  ;;  %8723 = vmatmul.mubr.msk.f32.vlgmr.msra.gmra.mxu1 %vm1966_vm2, %v4587_v7 }
 0xbb0   : > { %8729 = vmatprep.mubr.msk.f32.mxu0 %vm9776_vm1, %v9775_v28  ;;  %8736 = vmatprep.mubr.msk.f32.mxu1 %vm9776_vm1, %v9775_v28 }
 0xc67   : > { %v5247_v17 = vpop.f32.mrf.mxu0  ;;  %v5326_v18 = vpop.f32.mrf.mxu1 }
 0xc68   : > { %v5491_v19 = vsel %vm2756_vm3, %v5326_v18, -inf  ;;  %v5488_v20 = vsel %vm2756_vm3, %v5247_v17, -inf }
 0xc69   : > { %5492 = vmax.xlane.f32.xlu0 %v5491_v19  ;;  %v8710_v22 = vpop.f32.mrf.mxu1  ;;  %5489 = vmax.xlane.f32.xlu1 %v5488_v20  ;;  %v8703_v23 = vpop.f32.mrf.mxu0 }
 0xc6f   : > { %v5405_v24 = vpop.f32.mrf.mxu0  ;;  %v10804_v60 = vpop.f32.mrf.mxu1 }
 0xc70   : > { %v5494_v51 = vsel %vm2756_vm3, %v5405_v24, -inf  ;;  %v5497_v21 = vsel %vm2756_vm3, %v10804_v60, -inf }
 0xc71   : > { %v8724_v25 = vpop.f32.mrf.mxu1  ;;  %5495 = vmax.xlane.f32.xlu0 %v5494_v51  ;;  %v8717_v26 = vpop.f32.mrf.mxu0 }
 0xc7a   : > { %4890 = vrot.lane.b32.xlu1 %v4429_v29, %s9774_s21 }
 0xc7e   : > { %4896 = vrot.lane.b32.xlu1 %v4429_v29, %s9773_s17 }
 0xc87   : > { %4884 = vrot.lane.b32.xlu0 %v4429_v29, %s9772_s6 }
 0xc8b   : > { %4882 = vrot.lane.b32.xlu0 %v10814_v30, %s9772_s6 }
 0xc8f   : > { %4894 = vrot.lane.b32.xlu0 %v10814_v30, %s9773_s17 }
 0xc93   : > { %6131 = vrot.lane.b32.xlu0 %v10821_v31, %s9774_s21 }
 0xc97   : > { %6123 = vrot.lane.b32.xlu0 %v10826_v32, %s9772_s6 }
 0xc9b   : > { %6135 = vrot.lane.b32.xlu0 %v10826_v32, %s9773_s17 }
 0xca2   : > { %5498 = vmax.xlane.f32.xlu1 %v5497_v21 }
 0xcb3   : > { %4888 = vrot.lane.b32.xlu1 %v10814_v30, %s9774_s21 }
 0xcb7   : > { %6125 = vrot.lane.b32.xlu1 %v10821_v31, %s9772_s6 }
 0xcbb   : > { %6137 = vrot.lane.b32.xlu1 %v10821_v31, %s9773_s17 }
 0xcbf   : > { %6129 = vrot.lane.b32.xlu1 %v10826_v32, %s9774_s21 }
 0xcc3   : > { %5976 = vrot.lane.b32.xlu1 %v10733_v10, %s9772_s6 }
 0xcf2   : > { %v5493_v27 = vpop.xlane.xlu0 %5492  ;;  %v5490_v33 = vpop.xlane.xlu1 %5489 }
 0xcf3   : > { %v5501_v34 = vsub.f32 %v5326_v18, %v5493_v27  ;;  %v5500_v35 = vsub.f32 %v5247_v17, %v5490_v33 }
 0xcf5   : > { %v5506_v62 = vmul.f32 1.442695, %v5501_v34  ;;  %v5504_v9 = vmul.f32 1.442695, %v5500_v35 }
 0xcf6   : > { %v4891_v11 = vpop.permute.xlu1 %4890 }
 0xcf7   : > { %9131 = vpow2.f32 %v5506_v62  ;;  %v4968_v42 = vcombine.low %v4429_v29, %v4891_v11  ;;  %v4969_v43 = vcombine.high %v4429_v29, %v4891_v11 }
 0xcf8   : > { %9133 = vpow2.f32 %v5504_v9 }
 0xcf9   : > { %v4976_v56 = vrot.slane %v4968_v42, %v10295_v40  ;;  %v4983_v57 = vrot.slane %v4969_v43, %v10295_v40 }
 0xcfa   : > { %v5496_v37 = vpop.xlane.xlu0 %5495  ;;  %v4897_v45 = vpop.permute.xlu1 %4896 }
 0xcfb   : > { %v5502_v38 = vsub.f32 %v5405_v24, %v5496_v37 }
 0xcfd   : > { %v5508_v44 = vmul.f32 1.442695, %v5502_v38 }
 0xcfe   : > { %v4885_v48 = vpop.permute.xlu0 %4884 }
 0xcff   : > { %9135 = vpow2.f32 %v5508_v44  ;;  %v4984_v49 = vcombine.low %v4885_v48, %v4897_v45  ;;  %v4985_v50 = vcombine.high %v4885_v48, %v4897_v45 }
 0xd01   : > { %v4992_v59 = vrot.slane %v4984_v49, %v10295_v40  ;;  %v4999_v61 = vrot.slane %v4985_v50, %v10295_v40 }
 0xd02   : > { %v4883_v35 = vpop.permute.xlu0 %4882 }
 0xd03   : > { %v5000_v63 = vcombine.low %v4976_v56, %v4992_v59  ;;  %v5001_v53 = vcombine.high %v4976_v56, %v4992_v59  ;;  %v5016_v55 = vcombine.low %v4983_v57, %v4999_v61  ;;  %v5017_v0 = vcombine.high %v4983_v57, %v4999_v61 }
 0xd04   : > { %v10848_v2 = vpop.eup %9131 }
 0xd05   : > { %v10850_v3 = vpop.eup %9133  ;;  %v5008_v36 = vrot.slane %v5000_v63, %v10297_v47  ;;  %v5015_v6 = vrot.slane %v5001_v53, %v10297_v47  ;;  %v5024_v41 = vrot.slane %v5016_v55, %v10297_v47  ;;  %v5031_v58 = vrot.slane %v5017_v0, %v10297_v47 }
 0xd06   : > { %v5515_v1 = vsel %vm2756_vm3, %v10848_v2, 0.0  ;;  %v5512_v4 = vsel %vm2756_vm3, %v10850_v3, 0.0  ;;  %v4895_v62 = vpop.permute.xlu0 %4894 }
 0xd07   : > { %v5104_v5 = vcombine.low %v5008_v36, %v5015_v6  ;;  %v8315_v16 = vcombine.high %v5008_v36, %v5015_v6  ;;  %v5120_v7 = vcombine.low %v5024_v41, %v5031_v58  ;;  %v8316_v39 = vcombine.high %v5024_v41, %v5031_v58  ;;  %5516 = vadd.xlane.f32.xlu1 %v5515_v1 }
 0xd08   : > { %5513 = vadd.xlane.f32.xlu0 %v5512_v4  ;;  %v4916_v37 = vcombine.low %v4883_v35, %v4895_v62  ;;  %v4917_v38 = vcombine.high %v4883_v35, %v4895_v62 }
 0xd09   : > { %v5111_v12 = vrot.slane %v5104_v5, %v10295_v40  ;;  %v5119_v13 = vrot.slane %v8315_v16, %v10295_v40  ;;  %v5127_v15 = vrot.slane %v5120_v7, %v10295_v40  ;;  %v5135_v17 = vrot.slane %v8316_v39, %v10295_v40 }
 0xd0a   : > { %v4924_v48 = vrot.slane %v4916_v37, %v10295_v40  ;;  %v4931_v49 = vrot.slane %v4917_v38, %v10295_v40 }
 0xd0b   : > { %v5136_v18 = vcombine.low %v5111_v12, %v5119_v13  ;;  %v5152_v19 = vcombine.low %v5127_v15, %v5135_v17  ;;  %v5137_v22 = vcombine.high %v5111_v12, %v5119_v13  ;;  %v5153_v23 = vcombine.high %v5127_v15, %v5135_v17 }
 0xd0c   : > { %v10864_v20 = vpop.eup %9135 }
 0xd0d   : > { %v5518_v24 = vsel %vm2756_vm3, %v10864_v20, 0.0  ;;  %v5144_v51 = vrot.slane %v5136_v18, %v10297_v47  ;;  %v5160_v25 = vrot.slane %v5152_v19, %v10297_v47  ;;  %v10871_v26 = vrot.slane %v5137_v22, %v10297_v47 }
 0xd0e   : > { %5519 = vadd.xlane.f32.xlu0 %v5518_v24  ;;  %v10874_v29 = vrot.slane %v5153_v23, %v10297_v47 }
 0xd0f   : > { %v5168_v21 = vcombine.low %v5144_v51, %v5160_v25  ;;  %v5169_v27 = vcombine.high %v5144_v51, %v5160_v25 }
 0xd10   : > { %v5170_v33 = vcombine.low %v10871_v26, %v10874_v29  ;;  %v5171_v34 = vcombine.high %v10871_v26, %v10874_v29 }
 0xd11   : > { %8726 = vmatpush3.msra.mxu0 %v5168_v21  ;;  %8733 = vmatpush3.msra.mxu1 %v5169_v27  ;;  %v6132_v27 = vpop.permute.xlu0 %6131 }
 0xd12   : > { %8727 = vmatprep.subr.mxu0 %v9775_v28  ;;  %8734 = vmatprep.subr.mxu1 %v9775_v28  ;;  %v6209_v38 = vcombine.low %v10821_v31, %v6132_v27 }
 0xd15   : > { %v6124_v62 = vpop.permute.xlu0 %6123 }
 0xd24   : > { %5979 = vrot.lane.b32.xlu0 %v10733_v10, %s9774_s21 }
 0xd2b   : > { %v5499_v9 = vpop.xlane.xlu1 %5498 }
 0xd2c   : > { %v5503_v11 = vsub.f32 %v10804_v60, %v5499_v9 }
 0xd2e   : > { %v5510_v42 = vmul.f32 1.442695, %v5503_v11 }
 0xd2f   : > { %v4889_v43 = vpop.permute.xlu1 %4888 }
 0xd30   : > { %9137 = vpow2.f32 %v5510_v42  ;;  %v4900_v44 = vcombine.low %v10814_v30, %v4889_v43  ;;  %v4901_v45 = vcombine.high %v10814_v30, %v4889_v43  ;;  %v6210_v42 = vcombine.high %v10821_v31, %v6132_v27  ;;  %v6136_v43 = vpop.permute.xlu0 %6135 }
 0xd32   : > { %v4908_v50 = vrot.slane %v4900_v44, %v10295_v40  ;;  %v4915_v56 = vrot.slane %v4901_v45, %v10295_v40 }
 0xd33   : > { %v6126_v21 = vpop.permute.xlu1 %6125 }
 0xd34   : > { %v4932_v57 = vcombine.low %v4908_v50, %v4924_v48  ;;  %v4933_v59 = vcombine.high %v4908_v50, %v4924_v48  ;;  %v4948_v60 = vcombine.low %v4915_v56, %v4931_v49  ;;  %v4949_v61 = vcombine.high %v4915_v56, %v4931_v49 }
 0xd35   : > { %v6217_v49 = vrot.slane %v6209_v38, %v10295_v40  ;;  %v6224_v50 = vrot.slane %v6210_v42, %v10295_v40 }
 0xd36   : > { %v4940_v63 = vrot.slane %v4932_v57, %v10297_v47  ;;  %v4947_v53 = vrot.slane %v4933_v59, %v10297_v47  ;;  %v4956_v55 = vrot.slane %v4948_v60, %v10297_v47  ;;  %v4963_v30 = vrot.slane %v4949_v61, %v10297_v47 }
 0xd37   : > { %v6138_v35 = vpop.permute.xlu1 %6137  ;;  %v6157_v57 = vcombine.low %v6124_v62, %v6136_v43  ;;  %v6158_v59 = vcombine.high %v6124_v62, %v6136_v43 }
 0xd38   : > { %v5036_v0 = vcombine.low %v4940_v63, %v4947_v53  ;;  %v8313_v36 = vcombine.high %v4940_v63, %v4947_v53  ;;  %v5052_v6 = vcombine.low %v4956_v55, %v4963_v30  ;;  %v8314_v41 = vcombine.high %v4956_v55, %v4963_v30 }
 0xd39   : > { %v6225_v9 = vcombine.low %v6126_v21, %v6138_v35  ;;  %v6226_v11 = vcombine.high %v6126_v21, %v6138_v35 }
 0xd3a   : > { %v5043_v1 = vrot.slane %v5036_v0, %v10295_v40  ;;  %v5051_v4 = vrot.slane %v8313_v36, %v10295_v40  ;;  %v5059_v16 = vrot.slane %v5052_v6, %v10295_v40  ;;  %v5067_v7 = vrot.slane %v8314_v41, %v10295_v40 }
 0xd3b   : > { %v6130_v37 = vpop.permute.xlu1 %6129  ;;  %v6233_v44 = vrot.slane %v6225_v9, %v10295_v40  ;;  %v6240_v45 = vrot.slane %v6226_v11, %v10295_v40  ;;  %v6165_v0 = vrot.slane %v6157_v57, %v10295_v40  ;;  %v6172_v36 = vrot.slane %v6158_v59, %v10295_v40 }
 0xd3c   : > { %v5068_v39 = vcombine.low %v5043_v1, %v5051_v4  ;;  %v5084_v12 = vcombine.low %v5059_v16, %v5067_v7  ;;  %v5069_v17 = vcombine.high %v5043_v1, %v5051_v4  ;;  %v5085_v18 = vcombine.high %v5059_v16, %v5067_v7 }
 0xd3d   : > { %v10895_v58 = vpop.eup %9137  ;;  %v6141_v48 = vcombine.low %v10826_v32, %v6130_v37  ;;  %v6142_v56 = vcombine.high %v10826_v32, %v6130_v37  ;;  %v6241_v61 = vcombine.low %v6217_v49, %v6233_v44  ;;  %v6242_v63 = vcombine.high %v6217_v49, %v6233_v44 }
 0xd3e   : > { %v5521_v5 = vsel %vm2756_vm3, %v10895_v58, 0.0  ;;  %v5076_v13 = vrot.slane %v5068_v39, %v10297_v47  ;;  %v5092_v15 = vrot.slane %v5084_v12, %v10297_v47  ;;  %v10906_v23 = vrot.slane %v5069_v17, %v10297_v47 }
 0xd3f   : > { %5522 = vadd.xlane.f32.xlu1 %v5521_v5  ;;  %v10909_v24 = vrot.slane %v5085_v18, %v10297_v47  ;;  %v10927_v60 = vpop.permute.xlu1 %5976  ;;  %v6257_v31 = vcombine.low %v6224_v50, %v6240_v45  ;;  %v6258_v53 = vcombine.high %v6224_v50, %v6240_v45  ;;  %v6149_v55 = vrot.slane %v6141_v48, %v10295_v40 }
 0xd40   : > { %v5100_v19 = vcombine.low %v5076_v13, %v5092_v15  ;;  %v5101_v22 = vcombine.high %v5076_v13, %v5092_v15  ;;  %v6156_v30 = vrot.slane %v6142_v56, %v10295_v40  ;;  %v6249_v41 = vrot.slane %v6241_v61, %v10297_v47 }
 0xd41   : > { %v5102_v51 = vcombine.low %v10906_v23, %v10909_v24  ;;  %v5103_v25 = vcombine.high %v10906_v23, %v10909_v24  ;;  %v6256_v32 = vrot.slane %v6242_v63, %v10297_v47  ;;  %v6265_v1 = vrot.slane %v6257_v31, %v10297_v47 }
 0xd42   : > { %8728 = vmatpush3.msra.mxu0 %v5100_v19  ;;  %8735 = vmatpush3.msra.mxu1 %v5101_v22  ;;  %v6272_v5 = vrot.slane %v6258_v53, %v10297_v47  ;;  %v6173_v16 = vcombine.low %v6149_v55, %v6165_v0  ;;  %v6174_v7 = vcombine.high %v6149_v55, %v6165_v0 }
 0xd43   : > { %8739 = vmatprep.subr.mxu0 %v9775_v28  ;;  %8746 = vmatprep.subr.mxu1 %v9775_v28  ;;  %v6189_v39 = vcombine.low %v6156_v30, %v6172_v36  ;;  %v6190_v12 = vcombine.high %v6156_v30, %v6172_v36  ;;  %v6345_v13 = vcombine.low %v6249_v41, %v6256_v32 }
 0xd44   : > { %v8339_v15 = vcombine.high %v6249_v41, %v6256_v32  ;;  %v6361_v17 = vcombine.low %v6265_v1, %v6272_v5  ;;  %v8340_v18 = vcombine.high %v6265_v1, %v6272_v5  ;;  %v6181_v19 = vrot.slane %v6173_v16, %v10297_v47 }
 0xd45   : > { %v6188_v22 = vrot.slane %v6174_v7, %v10297_v47  ;;  %v6197_v21 = vrot.slane %v6189_v39, %v10297_v47  ;;  %v6204_v27 = vrot.slane %v6190_v12, %v10297_v47  ;;  %v10942_v62 = vrot.slane %v6345_v13, %v10295_v40 }
 0xd46   : > { %v10945_v9 = vrot.slane %v8339_v15, %v10295_v40  ;;  %v10948_v11 = vrot.slane %v6361_v17, %v10295_v40  ;;  %v10951_v37 = vrot.slane %v8340_v18, %v10295_v40 }
 0xd47   : > { %v6277_v38 = vcombine.low %v6181_v19, %v6188_v22  ;;  %v8337_v42 = vcombine.high %v6181_v19, %v6188_v22  ;;  %v6293_v43 = vcombine.low %v6197_v21, %v6204_v27  ;;  %v8338_v44 = vcombine.high %v6197_v21, %v6204_v27 }
 0xd48   : > { %v6377_v48 = vcombine.low %v10942_v62, %v10945_v9  ;;  %v6393_v49 = vcombine.low %v10948_v11, %v10951_v37  ;;  %v6378_v21 = vcombine.high %v10942_v62, %v10945_v9  ;;  %v6394_v27 = vcombine.high %v10948_v11, %v10951_v37 }
 0xd49   : > { %v10958_v50 = vrot.slane %v6277_v38, %v10295_v40  ;;  %v10961_v57 = vrot.slane %v8337_v42, %v10295_v40  ;;  %v10964_v59 = vrot.slane %v6293_v43, %v10295_v40  ;;  %v10967_v61 = vrot.slane %v8338_v44, %v10295_v40 }
 0xd4a   : > { %v10977_v53 = vrot.slane %v6377_v48, %v10297_v47  ;;  %v6392_v11 = vrot.slane %v6378_v21, %v10297_v47  ;;  %v6408_v37 = vrot.slane %v6394_v27, %v10297_v47 }
 0xd4b   : > { %v6309_v55 = vcombine.low %v10958_v50, %v10961_v57  ;;  %v6325_v30 = vcombine.low %v10964_v59, %v10967_v61  ;;  %v6310_v62 = vcombine.high %v10958_v50, %v10961_v57  ;;  %v6326_v9 = vcombine.high %v10964_v59, %v10967_v61 }
 0xd50   : > { %5982 = vrot.lane.b32.xlu1 %v10733_v10, %s9773_s17 }
 0xd90   : > { %v5517_v6 = vpop.xlane.xlu1 %5516 }
 0xd91   : > { %9139 = vrcp.f32 %v5517_v6  ;;  %v5514_v4 = vpop.xlane.xlu0 %5513 }
 0xd92   : > { %9141 = vrcp.f32 %v5514_v4 }
 0xd97   : > { %v5520_v35 = vpop.xlane.xlu0 %5519 }
 0xd98   : > { %9143 = vrcp.f32 %v5520_v35 }
 0xd9b   : > { %v5980_v23 = vpop.permute.xlu0 %5979 }
 0xd9e   : > { %v9140_v45 = vpop.eup %9139 }
 0xd9f   : > { %v9142_v56 = vpop.eup %9141  ;;  %v5527_v63 = vmul.f32 %v9140_v45, %v10848_v2  ;;  %v6401_v2 = vrot.slane %v6393_v49, %v10297_v47 }
 0xda0   : > { %v5525_v31 = vmul.f32 %v9142_v56, %v10850_v3 }
 0xda1   : > { %8737 = vmatmul.mubr.msk.f32.vlgmr.msra.gmra.mxu1 %vm2756_vm3, %v5527_v63  ;;  %v6409_v29 = vcombine.low %v10977_v53, %v6401_v2  ;;  %v6410_v49 = vcombine.high %v10977_v53, %v6401_v2  ;;  %v6411_v63 = vcombine.low %v6392_v11, %v6408_v37  ;;  %v6324_v53 = vrot.slane %v6310_v62, %v10297_v47 }
 0xda2   : > { %8730 = vmatmul.mubr.msk.f32.vlgmr.msra.gmra.mxu0 %vm2756_vm3, %v5525_v31  ;;  %8747 = vmatpush3.msra.mxu1 %v5171_v34  ;;  %v11006_v34 = vrot.slane %v6325_v30, %v10297_v47  ;;  %v6412_v30 = vcombine.high %v6392_v11, %v6408_v37 }
 0xda3   : > { %8740 = vmatpush3.msra.mxu0 %v5170_v33  ;;  %8748 = vmatprep.subr.mxu1 %v9775_v28  ;;  %v11003_v33 = vrot.slane %v6309_v55, %v10297_v47  ;;  %v6340_v55 = vrot.slane %v6326_v9, %v10297_v47 }
 0xda4   : > { %8741 = vmatprep.subr.mxu0 %v9775_v28  ;;  %8749 = vmatpush3.msra.mxu1 %v5103_v25  ;;  %v5986_v25 = vcombine.high %v10733_v10, %v5980_v23 }
 0xda5   : > { %v9144_v3 = vpop.eup %9143  ;;  %8742 = vmatpush3.msra.mxu0 %v5102_v51  ;;  %8743 = vmatprep.mubr.msk.f32.mxu0 %vm9776_vm1, %v9775_v28  ;;  %v5985_v51 = vcombine.low %v10733_v10, %v5980_v23  ;;  %v6342_v59 = vcombine.high %v11003_v33, %v11006_v34 }
 0xda6   : > { %8753 = vmatprep.subr.mxu0 %v9775_v28  ;;  %v5529_v26 = vmul.f32 %v9144_v3, %v10864_v20  ;;  %8750 = vmatprep.mubr.msk.f32.mxu1 %vm9776_vm1, %v9775_v28  ;;  %v6341_v20 = vcombine.low %v11003_v33, %v11006_v34  ;;  %v6000_v32 = vrot.slane %v5986_v25, %v10295_v40 }
 0xda7   : > { %8760 = vmatprep.subr.mxu1 %v9775_v28  ;;  %v5993_v41 = vrot.slane %v5985_v51, %v10295_v40 }
 0xda8   : > { %8744 = vmatmul.mubr.msk.f32.vlgmr.msra.gmra.mxu0 %vm2756_vm3, %v5529_v26  ;;  %v6343_v26 = vcombine.low %v6324_v53, %v6340_v55 }
 0xda9   : > { %8754 = vmatpush3.xpose.msk.msra.mxu0 %vm1966_vm2, %v6409_v29  ;;  %8757 = vmatprep.mubr.msk.f32.mxu0 %vm9776_vm1, %v9775_v28  ;;  %v6344_v29 = vcombine.high %v6324_v53, %v6340_v55 }
 0xdaa   : > { %8755 = vmatprep.subr.mxu0 %v9775_v28 }
 0xdad   : > { %8756 = vmatpush3.xpose.msk.msra.mxu0 %vm1966_vm2, %v6341_v20 }
 0xdae   : > { %8767 = vmatprep.subr.mxu0 %v9775_v28 }
 0xdc8   : > { %v5523_v24 = vpop.xlane.xlu1 %5522 }
 0xdc9   : > { %9145 = vrcp.f32 %v5523_v24 }
 0xdcc   : > { %v5983_v0 = vpop.permute.xlu1 %5982 }
 0xdcd   : > { %v6001_v36 = vcombine.low %v10927_v60, %v5983_v0  ;;  %v6002_v6 = vcombine.high %v10927_v60, %v5983_v0 }
 0xdcf   : > { %v6009_v1 = vrot.slane %v6001_v36, %v10295_v40  ;;  %v6016_v4 = vrot.slane %v6002_v6, %v10295_v40 }
 0xdd1   : > { %v6017_v5 = vcombine.low %v5993_v41, %v6009_v1  ;;  %v6018_v16 = vcombine.high %v5993_v41, %v6009_v1  ;;  %v6033_v7 = vcombine.low %v6000_v32, %v6016_v4  ;;  %v6034_v39 = vcombine.high %v6000_v32, %v6016_v4 }
 0xdd3   : > { %v6025_v12 = vrot.slane %v6017_v5, %v10297_v47  ;;  %v6032_v10 = vrot.slane %v6018_v16, %v10297_v47  ;;  %v6041_v13 = vrot.slane %v6033_v7, %v10297_v47  ;;  %v6048_v60 = vrot.slane %v6034_v39, %v10297_v47 }
 0xdd5   : > { %v6053_v15 = vcombine.low %v6025_v12, %v6032_v10  ;;  %v8335_v17 = vcombine.high %v6025_v12, %v6032_v10  ;;  %v6069_v18 = vcombine.low %v6041_v13, %v6048_v60  ;;  %v8336_v19 = vcombine.high %v6041_v13, %v6048_v60 }
 0xdd6   : > { %v9146_v22 = vpop.eup %9145 }
 0xdd7   : > { %v6060_v35 = vrot.slane %v6053_v15, %v10295_v40  ;;  %v6068_v38 = vrot.slane %v8335_v17, %v10295_v40  ;;  %v6076_v42 = vrot.slane %v6069_v18, %v10295_v40  ;;  %v6084_v43 = vrot.slane %v8336_v19, %v10295_v40 }
 0xdd8   : > { %v5531_v44 = vmul.f32 %v9146_v22, %v10895_v58 }
 0xdd9   : > { %v6085_v45 = vcombine.low %v6060_v35, %v6068_v38  ;;  %v6101_v48 = vcombine.low %v6076_v42, %v6084_v43  ;;  %v6086_v50 = vcombine.high %v6060_v35, %v6068_v38  ;;  %v6102_v57 = vcombine.high %v6076_v42, %v6084_v43 }
 0xdda   : > { %8751 = vmatmul.mubr.msk.f32.vlgmr.msra.gmra.mxu1 %vm2756_vm3, %v5531_v44 }
 0xddb   : > { %8761 = vmatpush3.xpose.msk.msra.mxu1 %vm1966_vm2, %v6410_v49  ;;  %v6093_v58 = vrot.slane %v6085_v45, %v10297_v47  ;;  %v6109_v56 = vrot.slane %v6101_v48, %v10297_v47  ;;  %8764 = vmatprep.mubr.msk.f32.mxu1 %vm9776_vm1, %v9775_v28  ;;  %v6100_v2 = vrot.slane %v6086_v50, %v10297_v47 }
 0xddc   : > { %8762 = vmatprep.subr.mxu1 %v9775_v28  ;;  %v6116_v3 = vrot.slane %v6102_v57, %v10297_v47 }
 0xddd   : > { %v6117_v61 = vcombine.low %v6093_v58, %v6109_v56  ;;  %v6118_v31 = vcombine.high %v6093_v58, %v6109_v56 }
 0xdde   : > { %v6119_v33 = vcombine.low %v6100_v2, %v6116_v3  ;;  %v6120_v34 = vcombine.high %v6100_v2, %v6116_v3 }
 0xddf   : > { %8763 = vmatpush3.xpose.msk.msra.mxu1 %vm1966_vm2, %v6342_v59  ;;  %8758 = vmatmul.mubr.msk.f32.vlgmr.msra.gmra.mxu0 %vm1966_vm2, %v6117_v61 }
 0xde0   : > { %8768 = vmatpush3.xpose.msk.msra.mxu0 %vm1966_vm2, %v6411_v63  ;;  %8774 = vmatprep.subr.mxu1 %v9775_v28 }
 0xde1   : > { %8769 = vmatprep.subr.mxu0 %v9775_v28  ;;  %8771 = vmatprep.mubr.msk.f32.mxu0 %vm9776_vm1, %v9775_v28 }
 0xde2   : > { %8765 = vmatmul.mubr.msk.f32.vlgmr.msra.gmra.mxu1 %vm1966_vm2, %v6118_v31 }
 0xde3   : > { %8775 = vmatpush3.xpose.msk.msra.mxu1 %vm1966_vm2, %v6412_v30  ;;  %8778 = vmatprep.mubr.msk.f32.mxu1 %vm9776_vm1, %v9775_v28 }
 0xde4   : > { %8770 = vmatpush3.xpose.msk.msra.mxu0 %vm1966_vm2, %v6343_v26  ;;  %8776 = vmatprep.subr.mxu1 %v9775_v28 }
 0xde5   : > { %8781 = vmatprep.subr.mxu0 %v9775_v28 }
 0xde7   : > { %8777 = vmatpush3.xpose.msk.msra.mxu1 %vm1966_vm2, %v6344_v29  ;;  %8772 = vmatmul.mubr.msk.f32.vlgmr.msra.gmra.mxu0 %vm1966_vm2, %v6119_v33 }
 0xde8   : > { %8788 = vmatprep.subr.mxu1 %v9775_v28  ;;  %8785 = vmatprep.mubr.msk.f32.mxu0 %vm9776_vm1, %v9775_v28 }
 0xdea   : > { %8779 = vmatmul.mubr.msk.f32.vlgmr.msra.gmra.mxu1 %vm1966_vm2, %v6120_v34 }
 0xdeb   : > { %8792 = vmatprep.mubr.msk.f32.mxu1 %vm9776_vm1, %v9775_v28 }
 0xe61   : > { %v5674_v20 = vpop.f32.mrf.mxu1 }
 0xe62   : > { %v5601_v23 = vpop.f32.mrf.mxu0 }
 0xe63   : > { %v8738_v24 = vpop.f32.mrf.mxu1 }
 0xe64   : > { %v8731_v51 = vpop.f32.mrf.mxu0 }
 0xe68   : > { %v5747_v25 = vpop.f32.mrf.mxu0 }
 0xe69   : > { %v5824_v0 = vcombine.low %v5601_v23, %v5747_v25  ;;  %v5825_v36 = vcombine.high %v5601_v23, %v5747_v25  ;;  %v11123_v23 = vadd.f32 %v10807_v54, %v10800_v14 }
 0xe6a   : > { %v8745_v6 = vpop.f32.mrf.mxu0 }
 0xe6b   : > { %v5832_v5 = vrot.slane %v5824_v0, %v10295_v40  ;;  %v5839_v16 = vrot.slane %v5825_v36, %v10295_v40 }
 0xe9a   : > { %v5820_v41 = vpop.f32.mrf.mxu1 }
 0xe9b   : > { %v5840_v32 = vcombine.low %v5674_v20, %v5820_v41  ;;  %v5841_v1 = vcombine.high %v5674_v20, %v5820_v41  ;;  %v4439_v20 = vadd.f32 %v10798_v8, %v10807_v54 }
 0xe9c   : > { %v8752_v4 = vpop.f32.mrf.mxu1 }
 0xe9d   : > { %v5848_v7 = vrot.slane %v5840_v32, %v10295_v40  ;;  %v5855_v39 = vrot.slane %v5841_v1, %v10295_v40 }
 0xe9f   : > { %v5856_v12 = vcombine.low %v5832_v5, %v5848_v7  ;;  %v5857_v10 = vcombine.high %v5832_v5, %v5848_v7  ;;  %v5872_v13 = vcombine.low %v5839_v16, %v5855_v39  ;;  %v5873_v60 = vcombine.high %v5839_v16, %v5855_v39  ;;  %v6780_v15 = vpop.f32.mrf.mxu0 }
 0xea0   : > { %v7021_v17 = vsel %vm2756_vm3, %v6780_v15, -inf }
 0xea1   : > { %v5864_v18 = vrot.slane %v5856_v12, %v10297_v47  ;;  %v5871_v19 = vrot.slane %v5857_v10, %v10297_v47  ;;  %v5880_v22 = vrot.slane %v5872_v13, %v10297_v47  ;;  %v5887_v21 = vrot.slane %v5873_v60, %v10297_v47  ;;  %7022 = vmax.xlane.f32.xlu0 %v7021_v17  ;;  %v8759_v27 = vpop.f32.mrf.mxu0 }
 0xea2   : > { %v6859_v35 = vpop.f32.mrf.mxu1 }
 0xea3   : > { %v5892_v38 = vcombine.low %v5864_v18, %v5871_v19  ;;  %v8333_v42 = vcombine.high %v5864_v18, %v5871_v19  ;;  %v5908_v43 = vcombine.low %v5880_v22, %v5887_v21  ;;  %v8334_v44 = vcombine.high %v5880_v22, %v5887_v21 }
 0xea4   : > { %v7024_v45 = vsel %vm2756_vm3, %v6859_v35, -inf  ;;  %v8766_v48 = vpop.f32.mrf.mxu1 }
 0xea5   : > { %7025 = vmax.xlane.f32.xlu1 %v7024_v45  ;;  %v5899_v49 = vrot.slane %v5892_v38, %v10295_v40  ;;  %v5907_v62 = vrot.slane %v8333_v42, %v10295_v40  ;;  %v5915_v9 = vrot.slane %v5908_v43, %v10295_v40  ;;  %v5923_v11 = vrot.slane %v8334_v44, %v10295_v40 }
 0xea7   : > { %v6938_v37 = vpop.f32.mrf.mxu0  ;;  %v5925_v58 = vcombine.high %v5899_v49, %v5907_v62  ;;  %v5941_v56 = vcombine.high %v5915_v9, %v5923_v11  ;;  %v5924_v50 = vcombine.low %v5899_v49, %v5907_v62  ;;  %v5940_v57 = vcombine.low %v5915_v9, %v5923_v11 }
 0xea8   : > { %v7027_v59 = vsel %vm2756_vm3, %v6938_v37, -inf }
 0xea9   : > { %7028 = vmax.xlane.f32.xlu0 %v7027_v59  ;;  %v8773_v61 = vpop.f32.mrf.mxu0  ;;  %v11097_v63 = vrot.slane %v5925_v58, %v10297_v47  ;;  %v11100_v31 = vrot.slane %v5941_v56, %v10297_v47  ;;  %v11103_v53 = vrot.slane %v5924_v50, %v10297_v47  ;;  %v11106_v55 = vrot.slane %v5940_v57, %v10297_v47 }
 0xeaa   : > { %v7017_v30 = vpop.f32.mrf.mxu1 }
 0xeab   : > { %v5958_v2 = vcombine.low %v11097_v63, %v11100_v31  ;;  %v5959_v3 = vcombine.high %v11097_v63, %v11100_v31  ;;  %v5957_v26 = vcombine.high %v11103_v53, %v11106_v55  ;;  %v7030_v33 = vsel %vm2756_vm3, %v7017_v30, -inf }
 0xeac   : > { %v8780_v29 = vpop.f32.mrf.mxu1  ;;  %v5956_v34 = vcombine.low %v11103_v53, %v11106_v55 }
 0xead   : > { %7031 = vmax.xlane.f32.xlu0 %v7030_v33 }
 0xeb6   : > { %6417 = vrot.lane.b32.xlu1 %v4439_v20, %s9772_s6 }
 0xeba   : > { %6429 = vrot.lane.b32.xlu1 %v4439_v20, %s9773_s17 }
 0xebe   : > { %6415 = vrot.lane.b32.xlu1 %v11123_v23, %s9772_s6  ;;  %s11427_s6 = sld [smem:[#allocation59_spill]] }
 0xec3   : > { %6423 = vrot.lane.b32.xlu0 %v4439_v20, %s9774_s21 }
 0xf2a   : > { %v7023_v24 = vpop.xlane.xlu0 %7022 }
 0xf2b   : > { %v7033_v51 = vsub.f32 %v6780_v15, %v7023_v24 }
 0xf2d   : > { %v7037_v25 = vmul.f32 1.442695, %v7033_v51 }
 0xf2e   : > { %v7026_v0 = vpop.xlane.xlu1 %7025 }
 0xf2f   : > { %9147 = vpow2.f32 %v7037_v25  ;;  %v7034_v36 = vsub.f32 %v6859_v35, %v7026_v0 }
 0xf31   : > { %v7039_v8 = vmul.f32 1.442695, %v7034_v36 }
 0xf32   : > { %v6418_v6 = vpop.permute.xlu1 %6417  ;;  %v7029_v41 = vpop.xlane.xlu0 %7028 }
 0xf33   : > { %9149 = vpow2.f32 %v7039_v8  ;;  %v7035_v32 = vsub.f32 %v6938_v37, %v7029_v41 }
 0xf35   : > { %v7041_v1 = vmul.f32 1.442695, %v7035_v32 }
 0xf36   : > { %v6430_v4 = vpop.permute.xlu1 %6429  ;;  %v7032_v14 = vpop.xlane.xlu0 %7031 }
 0xf37   : > { %9151 = vpow2.f32 %v7041_v1  ;;  %v7036_v54 = vsub.f32 %v7017_v30, %v7032_v14  ;;  %v6517_v5 = vcombine.low %v6418_v6, %v6430_v4  ;;  %v6518_v16 = vcombine.high %v6418_v6, %v6430_v4 }
 0xf39   : > { %v7043_v7 = vmul.f32 1.442695, %v7036_v54  ;;  %v6525_v60 = vrot.slane %v6517_v5, %v10295_v40  ;;  %v6532_v15 = vrot.slane %v6518_v16, %v10295_v40 }
 0xf3a   : > { %v6424_v39 = vpop.permute.xlu0 %6423  ;;  %v6416_v1 = vpop.permute.xlu1 %6415 }
 0xf3b   : > { %9153 = vpow2.f32 %v7043_v7  ;;  %v6501_v12 = vcombine.low %v4439_v20, %v6424_v39  ;;  %v6502_v10 = vcombine.high %v4439_v20, %v6424_v39 }
 0xf3c   : > { %v11128_v13 = vpop.eup %9147 }
 0xf3d   : > { %v6509_v17 = vrot.slane %v6501_v12, %v10295_v40  ;;  %v6516_v18 = vrot.slane %v6502_v10, %v10295_v40  ;;  %v7045_v19 = vsel %vm2756_vm3, %v11128_v13, 0.0 }
 0xf3e   : > { %7046 = vadd.xlane.f32.xlu1 %v7045_v19 }
 0xf3f   : > { %v6533_v22 = vcombine.low %v6509_v17, %v6525_v60  ;;  %v6534_v21 = vcombine.high %v6509_v17, %v6525_v60  ;;  %v6549_v27 = vcombine.low %v6516_v18, %v6532_v15  ;;  %v6550_v35 = vcombine.high %v6516_v18, %v6532_v15 }
 0xf40   : > { %v11136_v38 = vpop.eup %9149 }
 0xf41   : > { %v6541_v42 = vrot.slane %v6533_v22, %v10297_v47  ;;  %v6548_v43 = vrot.slane %v6534_v21, %v10297_v47  ;;  %v6557_v44 = vrot.slane %v6549_v27, %v10297_v47  ;;  %v6564_v45 = vrot.slane %v6550_v35, %v10297_v47 }
 0xf42   : > { %v7048_v48 = vsel %vm2756_vm3, %v11136_v38, 0.0 }
 0xf43   : > { %v6637_v49 = vcombine.low %v6541_v42, %v6548_v43  ;;  %v8343_v62 = vcombine.high %v6541_v42, %v6548_v43  ;;  %v6653_v9 = vcombine.low %v6557_v44, %v6564_v45  ;;  %v8344_v11 = vcombine.high %v6557_v44, %v6564_v45  ;;  %7049 = vadd.xlane.f32.xlu0 %v7048_v48 }
 0xf44   : > { %v11144_v37 = vpop.eup %9151 }
 0xf45   : > { %v6644_v58 = vrot.slane %v6637_v49, %v10295_v40  ;;  %v6652_v56 = vrot.slane %v8343_v62, %v10295_v40  ;;  %v6660_v50 = vrot.slane %v6653_v9, %v10295_v40  ;;  %v6668_v57 = vrot.slane %v8344_v11, %v10295_v40 }
 0xf46   : > { %v7051_v59 = vsel %vm2756_vm3, %v11144_v37, 0.0 }
 0xf47   : > { %7052 = vadd.xlane.f32.xlu1 %v7051_v59  ;;  %v6669_v61 = vcombine.low %v6644_v58, %v6652_v56  ;;  %v6685_v30 = vcombine.low %v6660_v50, %v6668_v57  ;;  %v6670_v29 = vcombine.high %v6644_v58, %v6652_v56  ;;  %v6686_v33 = vcombine.high %v6660_v50, %v6668_v57 }
 0xf48   : > { %v11152_v20 = vpop.eup %9153 }
 0xf49   : > { %v7054_v24 = vsel %vm2756_vm3, %v11152_v20, 0.0  ;;  %v6677_v51 = vrot.slane %v6669_v61, %v10297_v47  ;;  %v6693_v25 = vrot.slane %v6685_v30, %v10297_v47  ;;  %v11159_v0 = vrot.slane %v6670_v29, %v10297_v47 }
 0xf4a   : > { %7055 = vadd.xlane.f32.xlu0 %v7054_v24  ;;  %v11162_v36 = vrot.slane %v6686_v33, %v10297_v47 }
 0xf4b   : > { %v6701_v8 = vcombine.low %v6677_v51, %v6693_v25  ;;  %v6702_v6 = vcombine.high %v6677_v51, %v6693_v25 }
 0xf4c   : > { %v6703_v41 = vcombine.low %v11159_v0, %v11162_v36  ;;  %v6704_v32 = vcombine.high %v11159_v0, %v11162_v36  ;;  %v7511_v36 = vld [vmem:[%s11423_s12 + $0x18] sm:$0xff] }
 0xf4d   : > { %8782 = vmatpush3.msra.mxu0 %v6701_v8  ;;  %8789 = vmatpush3.msra.mxu1 %v6702_v6 }
 0xf4e   : > { %8783 = vmatprep.subr.mxu0 %v9775_v28  ;;  %8790 = vmatprep.subr.mxu1 %v9775_v28 }
 0xf58   : > { %6427 = vrot.lane.b32.xlu1 %v11123_v23, %s9773_s17  ;;  %s11428_s17 = sld [smem:[#allocation61_spill]] }
 0xf5c   : > { %5965 = vrot.lane.b32.xlu1 %v5958_v2, %s9780_s20 }
 0xf60   : > { %5969 = vrot.lane.b32.xlu1 %v5959_v3, %s9781_s19  ;;  %6421 = vrot.lane.b32.xlu0 %v11123_v23, %s9774_s21  ;;  %s11429_s21 = sld [smem:[#allocation65_spill]] }
 0xf64   : > { %5961 = vrot.lane.b32.xlu0 %v5957_v26, %s9779_s7 }
 0xfc7   : > { %v7047_v4 = vpop.xlane.xlu1 %7046 }
 0xfc8   : > { %9155 = vrcp.f32 %v7047_v4 }
 0xfcc   : > { %v7050_v14 = vpop.xlane.xlu0 %7049 }
 0xfcd   : > { %9157 = vrcp.f32 %v7050_v14 }
 0xfd0   : > { %v7053_v54 = vpop.xlane.xlu1 %7052 }
 0xfd1   : > { %9159 = vrcp.f32 %v7053_v54 }
 0xfd3   : > { %v7056_v5 = vpop.xlane.xlu0 %7055 }
 0xfd4   : > { %v6428_v16 = vpop.permute.xlu1 %6427  ;;  %9161 = vrcp.f32 %v7056_v5 }
 0xfd5   : > { %v6449_v2 = vcombine.low %v6416_v1, %v6428_v16  ;;  %v6450_v7 = vcombine.high %v6416_v1, %v6428_v16  ;;  %v9156_v11 = vpop.eup %9155 }
 0xfd6   : > { %v7058_v33 = vmul.f32 %v9156_v11, %v11128_v13 }
 0xfd7   : > { %v6422_v39 = vpop.permute.xlu0 %6421  ;;  %v6457_v3 = vrot.slane %v6449_v2, %v10295_v40  ;;  %v6464_v12 = vrot.slane %v6450_v7, %v10295_v40 }
 0xfd8   : > { %v6433_v63 = vcombine.low %v11123_v23, %v6422_v39  ;;  %v6434_v31 = vcombine.high %v11123_v23, %v6422_v39  ;;  %v5966_v6 = vpop.permute.xlu1 %5965 }
 0xfda   : > { %v6441_v26 = vrot.slane %v6433_v63, %v10295_v40  ;;  %v6448_v10 = vrot.slane %v6434_v31, %v10295_v40  ;;  %v9158_v50 = vpop.eup %9157 }
 0xfdb   : > { %v5962_v61 = vpop.permute.xlu0 %5961  ;;  %v7060_v24 = vmul.f32 %v9158_v50, %v11136_v38 }
 0xfdc   : > { %v6465_v60 = vcombine.low %v6441_v26, %v6457_v3  ;;  %v6466_v15 = vcombine.high %v6441_v26, %v6457_v3  ;;  %v6481_v17 = vcombine.low %v6448_v10, %v6464_v12  ;;  %v6482_v18 = vcombine.high %v6448_v10, %v6464_v12  ;;  %v5970_v4 = vpop.permute.xlu1 %5969 }
 0xfdd   : > { %v5972_v1 = vsel %vm1966_vm2, %v5956_v34, %v5962_v61 }
 0xfde   : > { %v6473_v19 = vrot.slane %v6465_v60, %v10297_v47  ;;  %v6480_v22 = vrot.slane %v6466_v15, %v10297_v47  ;;  %v6489_v23 = vrot.slane %v6481_v17, %v10297_v47  ;;  %v6496_v21 = vrot.slane %v6482_v18, %v10297_v47  ;;  %v9160_v8 = vpop.eup %9159  ;;  %v7510_v18 = vld [vmem:[%s11423_s12 + $0x10] sm:$0xff] }
 0xfdf   : > { %v5973_v55 = vsel %vm2756_vm3, %v5972_v1, %v5966_v6  ;;  %v7062_v38 = vmul.f32 %v9160_v8, %v11144_v37 }
 0xfe0   : > { %v6569_v27 = vcombine.low %v6473_v19, %v6480_v22  ;;  %v8341_v35 = vcombine.high %v6473_v19, %v6480_v22  ;;  %v6585_v42 = vcombine.low %v6489_v23, %v6496_v21  ;;  %v8342_v43 = vcombine.high %v6489_v23, %v6496_v21  ;;  %v7509_v19 = vld [vmem:[%s11423_s12 + $0x8] sm:$0xff] }
 0xfe1   : > { %v9162_v13 = vpop.eup %9161  ;;  %v5974_v0 = vsel %vm2758_vm4, %v5973_v55, %v5970_v4 }
 0xfe2   : > { %v6576_v44 = vrot.slane %v6569_v27, %v10295_v40  ;;  %v6584_v45 = vrot.slane %v8341_v35, %v10295_v40  ;;  %v6592_v48 = vrot.slane %v6585_v42, %v10295_v40  ;;  %v6600_v49 = vrot.slane %v8342_v43, %v10295_v40 }
 0xfe4   : > { %v6601_v62 = vcombine.low %v6576_v44, %v6584_v45  ;;  %v6617_v9 = vcombine.low %v6592_v48, %v6600_v49  ;;  %v6602_v58 = vcombine.high %v6576_v44, %v6584_v45  ;;  %v6618_v56 = vcombine.high %v6592_v48, %v6600_v49 }
 0xfe6   : > { %v6609_v57 = vrot.slane %v6601_v62, %v10297_v47  ;;  %v6625_v59 = vrot.slane %v6617_v9, %v10297_v47  ;;  %v6616_v51 = vrot.slane %v6602_v58, %v10297_v47  ;;  %v6632_v25 = vrot.slane %v6618_v56, %v10297_v47  ;;  %v7508_v9 = vld [vmem:[%s11423_s12] sm:$0xff] }
 0xfe8   : > { %v6633_v30 = vcombine.low %v6609_v57, %v6625_v59  ;;  %v6634_v29 = vcombine.high %v6609_v57, %v6625_v59  ;;  %v6635_v53 = vcombine.low %v6616_v51, %v6632_v25  ;;  %v6636_v34 = vcombine.high %v6616_v51, %v6632_v25 }
 0xfea   : > { %8784 = vmatpush3.msra.mxu0 %v6633_v30  ;;  %8791 = vmatpush3.msra.mxu1 %v6634_v29 }
 0xfeb   : > { %8786 = vmatmul.mubr.msk.f32.vlgmr.msra.gmra.mxu0 %vm2756_vm3, %v7058_v33  ;;  %8793 = vmatmul.mubr.msk.f32.vlgmr.msra.gmra.mxu1 %vm2756_vm3, %v7060_v24 }
 0xfec   : > { %8795 = vmatprep.subr.mxu0 %v9775_v28  ;;  %8802 = vmatprep.subr.mxu1 %v9775_v28 }
 0xfed   : > { %8796 = vmatpush3.msra.mxu0 %v6703_v41  ;;  %8803 = vmatpush3.msra.mxu1 %v6704_v32  ;;  %v7064_v41 = vmul.f32 %v9162_v13, %v11152_v20 }
 0xfee   : > { %8797 = vmatprep.subr.mxu0 %v9775_v28  ;;  %8804 = vmatprep.subr.mxu1 %v9775_v28 }
 0xfef   : > { %8798 = vmatpush3.msra.mxu0 %v6635_v53  ;;  %8799 = vmatprep.mubr.msk.f32.mxu0 %vm9776_vm1, %v9775_v28 }
 0xff0   : > { %8805 = vmatpush3.msra.mxu1 %v6636_v34  ;;  %8806 = vmatprep.mubr.msk.f32.mxu1 %vm9776_vm1, %v9775_v28 }
 0xff1   : > { %8800 = vmatmul.mubr.msk.f32.vlgmr.msra.gmra.mxu0 %vm2756_vm3, %v7062_v38  ;;  %8807 = vmatmul.mubr.msk.f32.vlgmr.msra.gmra.mxu1 %vm2756_vm3, %v7064_v41 }
 0xff2   : > { %8817 = vmatprep.mubr.msk.f32.mxu0 %vm1268_vm0, %v5974_v0  ;;  %8809 = vmatprep.subr.mxu0 %v7511_v36 }
 0xff3   : > { %8810 = vmatpush3.msra.mxu0 %v7511_v36 }
 0xff4   : > { %8811 = vmatprep.subr.mxu0 %v7510_v18 }
 0xff5   : > { %8812 = vmatpush3.msra.mxu0 %v7510_v18 }
 0xff6   : > { %8813 = vmatprep.subr.mxu0 %v7509_v19 }
 0xff7   : > { %8814 = vmatpush3.msra.mxu0 %v7509_v19 }
 0xff8   : > { %8815 = vmatprep.subr.mxu0 %v7508_v9 }
 0xff9   : > { %8816 = vmatpush3.msra.mxu0 %v7508_v9  ;;  %v7741_v9 = vld [vmem:[%s11425_s8 + $0x8] sm:$0xff] }
0x10ab   : > { %v7134_v32 = vpop.f32.mrf.mxu0  ;;  %v7207_v37 = vpop.f32.mrf.mxu1 }
0x10ad   : > { %v8787_v14 = vpop.f32.mrf.mxu0  ;;  %v8794_v20 = vpop.f32.mrf.mxu1 }
0x10b1   : > { %v7280_v54 = vpop.f32.mrf.mxu0  ;;  %v7353_v5 = vpop.f32.mrf.mxu1 }
0x10b2   : > { %v7357_v28 = vcombine.low %v7134_v32, %v7280_v54  ;;  %v7358_v16 = vcombine.high %v7134_v32, %v7280_v54  ;;  %v7373_v2 = vcombine.low %v7207_v37, %v7353_v5  ;;  %v7374_v7 = vcombine.high %v7207_v37, %v7353_v5 }
0x10b3   : > { %v8801_v39 = vpop.f32.mrf.mxu0  ;;  %v8808_v63 = vpop.f32.mrf.mxu1 }
0x10b4   : > { %v7365_v31 = vrot.slane %v7357_v28, %v10295_v40  ;;  %v7372_v3 = vrot.slane %v7358_v16, %v10295_v40  ;;  %v7381_v12 = vrot.slane %v7373_v2, %v10295_v40  ;;  %v7388_v26 = vrot.slane %v7374_v7, %v10295_v40  ;;  %v7648_v7 = vld [vmem:[#allocation28 + $0x10] sm:$0xff]  ;;  %v7647_v39 = vld [vmem:[#allocation28 + $0x8] sm:$0xff]  ;;  %v7646_v63 = vld [vmem:[#allocation28] sm:$0xff] }
0x10b6   : > { %v7389_v10 = vcombine.low %v7365_v31, %v7381_v12  ;;  %v7390_v60 = vcombine.high %v7365_v31, %v7381_v12  ;;  %v7405_v15 = vcombine.low %v7372_v3, %v7388_v26  ;;  %v7406_v17 = vcombine.high %v7372_v3, %v7388_v26  ;;  %v7747_v31 = vld [vmem:[%s11425_s8 + $0x38] sm:$0xff]  ;;  %v7746_v3 = vld [vmem:[%s11425_s8 + $0x30] sm:$0xff]  ;;  %v7745_v12 = vld [vmem:[%s11425_s8 + $0x28] sm:$0xff] }
0x10b7   : > { %8831 = vmatprep.subr.mxu0 %v7747_v31  ;;  %v7744_v26 = vld [vmem:[%s11425_s8 + $0x20] sm:$0xff] }
0x10b8   : > { %v7397_v22 = vrot.slane %v7389_v10, %v10297_v47  ;;  %v7404_v23 = vrot.slane %v7390_v60, %v10297_v47  ;;  %v7413_v21 = vrot.slane %v7405_v15, %v10297_v47  ;;  %v7420_v27 = vrot.slane %v7406_v17, %v10297_v47 }
0x10ba   : > { %v7425_v35 = vcombine.low %v7397_v22, %v7404_v23  ;;  %v8361_v42 = vcombine.high %v7397_v22, %v7404_v23  ;;  %v7441_v43 = vcombine.low %v7413_v21, %v7420_v27  ;;  %v8362_v44 = vcombine.high %v7413_v21, %v7420_v27  ;;  %v8366_v23 = vld [vmem:[%s11426_s2] ss:$0 sm:$0xff]  ;;  %s9627_s2 = scalar_lea.vmem %s9626_s14, 512 }
0x10bb   : > { %v8367_v27 = vld [vmem:[%s9927_s5] ss:$0 sm:$0xff] }
0x10bc   : > { %v7432_v45 = vrot.slane %v7425_v35, %v10295_v40  ;;  %v7440_v48 = vrot.slane %v8361_v42, %v10295_v40  ;;  %v7448_v49 = vrot.slane %v7441_v43, %v10295_v40  ;;  %v7456_v62 = vrot.slane %v8362_v44, %v10295_v40 }
0x10be   : > { %v7458_v11 = vcombine.high %v7432_v45, %v7440_v48  ;;  %v7474_v58 = vcombine.high %v7448_v49, %v7456_v62  ;;  %v7457_v56 = vcombine.low %v7432_v45, %v7440_v48  ;;  %v7473_v50 = vcombine.low %v7448_v49, %v7456_v62  ;;  %v7743_v49 = vld [vmem:[%s11425_s8 + $0x18] sm:$0xff]  ;;  %v7742_v62 = vld [vmem:[%s11425_s8 + $0x10] sm:$0xff] }
0x10c0   : > { %v7472_v57 = vrot.slane %v7458_v11, %v10297_v47  ;;  %v7488_v59 = vrot.slane %v7474_v58, %v10297_v47  ;;  %v7465_v61 = vrot.slane %v7457_v56, %v10297_v47  ;;  %v7481_v30 = vrot.slane %v7473_v50, %v10297_v47  ;;  %v8363_v47 = vld [vmem:[%s11424_s11] ss:$0 sm:$0xff]  ;;  %s9621_s11 = scalar_lea.vmem %s11294_s1, 256 }
0x10c1   : > { %v7740_v11 = vld [vmem:[%s11425_s8] sm:$0xff]  ;;  %p9622_p5 = scmp.ne.s32.totalorder %s11294_s1, %s9621_s11  ;;  %p9629_p10 = scmp.lt.s32.totalorder %s9627_s2, %s9621_s11 }
0x10c2   : > { %v7492_v29 = vcombine.high %v7472_v57, %v7488_v59  ;;  %v7490_v33 = vcombine.high %v7465_v61, %v7481_v30  ;;  %v7489_v24 = vcombine.low %v7465_v61, %v7481_v30  ;;  %v7491_v40 = vcombine.low %v7472_v57, %v7488_v59  ;;  %v8368_v58 = vld [vmem:[%s11427_s6] ss:$0 sm:$0xff] }
0x10c3   : > { %p9623_p3 = pnand %p9622_p5, %p11432_p1  ;;  %p9630_p13 = por %p9629_p10, %p9628_p11 }
0x10c4   : > { %7502 = vrot.lane.b32.xlu1 %v7492_v29, %s9781_s19  ;;  %7494 = vrot.lane.b32.xlu0 %v7490_v33, %s9779_s7  ;;  %v8371_v29 = vld [vmem:[%s11428_s17] ss:$0 sm:$0xff]  ;;  %s11431_s19 = sld [smem:[#allocation67_spill]] }
0x10c5   : > { %p9624_p6 = pneg %p9623_p3 }
0x10c7   : > { %p9631_p9 = pnand %p9630_p13, %p9624_p6 }
0x10c8   : > { %7498 = vrot.lane.b32.xlu0 %v7491_v40, %s9780_s20  ;;  %s11430_s20 = sld [smem:[#allocation66_spill]] }
0x10ca   : > { %s11291_s3 = scalar_lea.hbm %s11431_s19, %s8385_s24 }
0x1136   : > { %v7495_v51 = vpop.permute.xlu0 %7494  ;;  %v7503_v6 = vpop.permute.xlu1 %7502 }
0x1137   : > { %v7505_v25 = vsel %vm1966_vm2, %v7489_v24, %v7495_v51 }
0x113a   : > { %v7499_v8 = vpop.permute.xlu0 %7498 }
0x113b   : > { %v7506_v1 = vsel %vm2756_vm3, %v7505_v25, %v7499_v8 }
0x113c   : > { %v7507_v13 = vsel %vm2758_vm4, %v7506_v1, %v7503_v6 }
0x113d   : > { %8818 = vmatmul.mubr.msk.f32.vlgmr.msra.gmra.mxu0 %vm1268_vm0, %v7507_v13 }
0x113e   : > { %8832 = vmatpush3.msra.mxu0 %v7747_v31 }
0x113f   : > { %8833 = vmatprep.subr.mxu0 %v7746_v3 }
0x1140   : > { %8834 = vmatpush3.msra.mxu0 %v7746_v3 }
0x1141   : > { %8835 = vmatprep.subr.mxu0 %v7745_v12 }
0x1142   : > { %8836 = vmatpush3.msra.mxu0 %v7745_v12 }
0x1143   : > { %8837 = vmatprep.subr.mxu0 %v7744_v26 }
0x1144   : > { %8838 = vmatpush3.msra.mxu0 %v7744_v26 }
0x1145   : > { %8839 = vmatprep.subr.mxu0 %v7743_v49 }
0x1146   : > { %8840 = vmatpush3.msra.mxu0 %v7743_v49 }
0x1147   : > { %8841 = vmatprep.subr.mxu0 %v7742_v62 }
0x1148   : > { %8842 = vmatpush3.msra.mxu0 %v7742_v62 }
0x1149   : > { %8843 = vmatprep.subr.mxu0 %v7741_v9 }
0x114a   : > { %8844 = vmatpush3.msra.mxu0 %v7741_v9 }
0x114b   : > { %8845 = vmatprep.subr.mxu0 %v7740_v11 }
0x114c   : > { %8846 = vmatpush3.msra.mxu0 %v7740_v11 }
0x11fd   : > { %v8819_v53 = vpop.f32.mrf.mxu0 }
0x11fe   : > { %v7597_v55 = vadd.f32 %v8819_v53, %v8363_v47 }
0x11ff   : > { %v7591_v34 = vpop.f32.mrf.mxu0 }
0x1200   : > { %v7592_v38 = vadd.f32 %v8363_v47, %v7591_v34  ;;  %v7601_v41 = vadd.f32 %v7597_v55, %v10666_v52 }
0x1202   : > { %v7607_v4 = vsel %vm1268_vm0, %v7601_v41, 0.0  ;;  %v7600_v0 = vadd.f32 %v7592_v38, %v10662_v46  ;;  %v7649_v46 = vld [vmem:[#allocation28 + $0x18] sm:$0xff] }
0x1203   : > { %7608 = vadd.xlane.f32.xlu1 %v7607_v4  ;;  %8820 = vmatprep.subr.mxu1 %v7649_v46 }
0x1204   : > { %v7604_v36 = vsel %vm1268_vm0, %v7600_v0, 0.0  ;;  %8821 = vmatpush3.msra.mxu1 %v7649_v46  ;;  %v8375_v46 = vld [vmem:[%s11430_s20] ss:$0 sm:$0xff] }
0x1205   : > { %7605 = vadd.xlane.f32.xlu0 %v7604_v36  ;;  %8822 = vmatprep.subr.mxu1 %v7648_v7 }
0x1206   : > { %8823 = vmatpush3.msra.mxu1 %v7648_v7 }
0x1207   : > { %8824 = vmatprep.subr.mxu1 %v7647_v39 }
0x1208   : > { %8825 = vmatpush3.msra.mxu1 %v7647_v39 }
0x1209   : > { %8826 = vmatprep.subr.mxu1 %v7646_v63 }
0x120a   : > { %8827 = vmatpush3.msra.mxu1 %v7646_v63 }
0x128c   : > { %v7609_v32 = vpop.xlane.xlu1 %7608 }
0x128d   : > { %v7611_v37 = vmul.f32 0.03125, %v7609_v32 }
0x128e   : > { %v7606_v14 = vpop.xlane.xlu0 %7605 }
0x128f   : > { %v7610_v20 = vmul.f32 0.03125, %v7606_v14  ;;  %v7613_v54 = vsub.f32 %v7601_v41, %v7611_v37 }
0x1291   : > { %v7612_v5 = vsub.f32 %v7600_v0, %v7610_v20  ;;  %v7615_v2 = vmul.f32 %v7613_v54, %v7613_v54 }
0x1293   : > { %v7614_v28 = vmul.f32 %v7612_v5, %v7612_v5  ;;  %v7619_v52 = vsel %vm1268_vm0, %v7615_v2, 0.0 }
0x1295   : > { %v7616_v16 = vsel %vm1268_vm0, %v7614_v28, 0.0 }
0x1296   : > { %7617 = vadd.xlane.f32.xlu0 %v7616_v16  ;;  %v8374_v16 = vld [vmem:[%s11429_s21] ss:$0 sm:$0xff] }
0x129a   : > { %7620 = vadd.xlane.f32.xlu0 %v7619_v52 }
0x131f   : > { %v7618_v10 = vpop.xlane.xlu0 %7617 }
0x1320   : > { %v7622_v60 = vmul.f32 0.03125, %v7618_v10 }
0x1322   : > { %v7624_v15 = vadd.f32 1e-05, %v7622_v60 }
0x1323   : > { %v7621_v17 = vpop.xlane.xlu0 %7620 }
0x1324   : > { %9163 = vrsqrt.f32 %v7624_v15  ;;  %v7623_v18 = vmul.f32 0.03125, %v7621_v17 }
0x1326   : > { %v7625_v19 = vadd.f32 1e-05, %v7623_v18 }
0x1328   : > { %9165 = vrsqrt.f32 %v7625_v19 }
0x1331   : > { %v9164_v22 = vpop.eup %9163 }
0x1332   : > { %v7628_v21 = vmul.f32 %v9164_v22, %v7612_v5 }
0x1334   : > { %v7636_v35 = vmul.f32 %v8366_v23, %v7628_v21 }
0x1335   : > { %v9166_v42 = vpop.eup %9165 }
0x1336   : > { %v7629_v43 = vmul.f32 %v9166_v42, %v7613_v54  ;;  %v7644_v44 = vadd.f32 %v8367_v27, %v7636_v35 }
0x1338   : > { %v7637_v45 = vmul.f32 %v8366_v23, %v7629_v43  ;;  %8828 = vmatprep.mubr.msk.f32.mxu1 %vm1268_vm0, %v7644_v44 }
0x133a   : > { %v7645_v48 = vadd.f32 %v8367_v27, %v7637_v45 }
0x133c   : > { %8829 = vmatmul.mubr.msk.f32.vlgmr.msra.gmra.mxu1 %vm1268_vm0, %v7645_v48 }
0x13fc   : > { %v8830_v56 = vpop.f32.mrf.mxu1 }
0x13fd   : > { %v7735_v50 = vadd.f32 %v8830_v56, %v8368_v58 }
0x13fe   : > { %v7729_v57 = vpop.f32.mrf.mxu1 }
0x13ff   : > { %v7730_v59 = vadd.f32 %v8368_v58, %v7729_v57  ;;  %v7739_v30 = vmax.f32 %v7735_v50, 0.0 }
0x1401   : > { %v7738_v61 = vmax.f32 %v7730_v59, 0.0 }
0x1403   : > { %8847 = vmatprep.mubr.msk.f32.mxu0 %vm7755_vm5, %v7738_v61 }
0x1404   : > { %8848 = vmatmul.mubr.msk.f32.vlgmr.msra.gmra.mxu0 %vm7755_vm5, %v7739_v30 }
0x14c4   : > { %v8849_v33 = vpop.f32.mrf.mxu0 }
0x14c5   : > { %v7834_v24 = vadd.f32 %v8849_v33, %v8371_v29 }
0x14c6   : > { %v7828_v40 = vpop.f32.mrf.mxu0 }
0x14c7   : > { %v7838_v51 = vadd.f32 %v7834_v24, %v7645_v48  ;;  %v7829_v25 = vadd.f32 %v8371_v29, %v7828_v40 }
0x14c9   : > { %v7837_v8 = vadd.f32 %v7829_v25, %v7644_v44  ;;  %v7844_v6 = vsel %vm1268_vm0, %v7838_v51, 0.0 }
0x14ca   : > { %7845 = vadd.xlane.f32.xlu0 %v7844_v6 }
0x14cb   : > { %v7841_v1 = vsel %vm1268_vm0, %v7837_v8, 0.0 }
0x14cc   : > { %7842 = vadd.xlane.f32.xlu1 %v7841_v1 }
0x1553   : > { %v7846_v13 = vpop.xlane.xlu0 %7845 }
0x1554   : > { %v7848_v47 = vmul.f32 0.03125, %v7846_v13 }
0x1555   : > { %v7843_v53 = vpop.xlane.xlu1 %7842 }
0x1556   : > { %v7850_v55 = vsub.f32 %v7838_v51, %v7848_v47  ;;  %v7847_v34 = vmul.f32 0.03125, %v7843_v53 }
0x1558   : > { %v7849_v38 = vsub.f32 %v7837_v8, %v7847_v34  ;;  %v7852_v41 = vmul.f32 %v7850_v55, %v7850_v55 }
0x155a   : > { %v7856_v4 = vsel %vm1268_vm0, %v7852_v41, 0.0  ;;  %v7851_v0 = vmul.f32 %v7849_v38, %v7849_v38 }
0x155b   : > { %7857 = vadd.xlane.f32.xlu0 %v7856_v4 }
0x155c   : > { %v7853_v36 = vsel %vm1268_vm0, %v7851_v0, 0.0 }
0x155d   : > { %7854 = vadd.xlane.f32.xlu1 %v7853_v36 }
0x15e4   : > { %v7858_v32 = vpop.xlane.xlu0 %7857 }
0x15e5   : > { %v7860_v37 = vmul.f32 0.03125, %v7858_v32 }
0x15e6   : > { %v7855_v14 = vpop.xlane.xlu1 %7854 }
0x15e7   : > { %v7862_v20 = vadd.f32 1e-05, %v7860_v37  ;;  %v7859_v54 = vmul.f32 0.03125, %v7855_v14 }
0x15e9   : > { %9167 = vrsqrt.f32 %v7862_v20  ;;  %v7861_v5 = vadd.f32 1e-05, %v7859_v54 }
0x15eb   : > { %9169 = vrsqrt.f32 %v7861_v5 }
0x15f6   : > { %v9168_v28 = vpop.eup %9167 }
0x15f7   : > { %v7866_v2 = vmul.f32 %v9168_v28, %v7850_v55 }
0x15f8   : > { %v9170_v52 = vpop.eup %9169 }
0x15f9   : > { %v7874_v7 = vmul.f32 %v8374_v16, %v7866_v2  ;;  %v7865_v39 = vmul.f32 %v9170_v52, %v7849_v38 }
0x15fb   : > { %v7882_v63 = vadd.f32 %v8375_v46, %v7874_v7  ;;  %v7873_v31 = vmul.f32 %v8374_v16, %v7865_v39 }
0x15fd   : > { %v7881_v3 = vadd.f32 %v8375_v46, %v7873_v31  ;;  %7884 = vst.msk [vmem:[%s1226_s28 + $0x8] sm:$0xff] %vm1268_vm0, %v7882_v63 }
0x15ff   : > { %7883 = vst.msk [vmem:[%s1226_s28] sm:$0xff] %vm1268_vm0, %v7881_v3 }
0x1600   : > { %9634 = shalt.err (!%p9631_p9)
}
0x1601   : > { %s9635_s6 = scalar_lea.hbm %s11291_s3, 256  ;;  %s9639_s17 = scalar_lea.hbm %s11431_s19, 512 }
0x1602   : > { %p9636_p4 = scmp.ne.s32.totalorder %s11291_s3, %s9635_s6  ;;  %p9640_p8 = scmp.lt.s32.totalorder %s11291_s3, %s11431_s19 }
0x1603   : > { %p9641_p12 = scmp.lt.s32.totalorder %s9639_s17, %s9635_s6 }
0x1604   : > { %p9637_p0 = pnand %p9636_p4, %p11432_p1 }
0x1605   : > { %p9642_p2 = por %p9641_p12, %p9640_p8 }
0x1606   : > { %p9638_p7 = pneg %p9637_p0 }
0x1608   : > { %p9643_p5 = pnand %p9642_p2, %p9638_p7 }
0x160a   : > { %9646 = shalt.err (!%p9643_p5)
}
0x160b   : > { %s9783_s21 = smov 128  }
0x160c   : > { %8914 = dma.vmem_to_hbm [thread:$0]  (%p11432_p1), %s11294_s1, 256, %s11291_s3, %s7886_s23, %s9783_s21, %s9783_s21, %s9779_s7  }
0x160d PF: > { %s7914_s20 = sand.u32 1, %s9709_s15   ;;  %p11433_p3 = scmp.ne.s32.totalorder %s11397_s13, 0 }
0x160e   : > { %p11434_p6 = scmp.ge.s32.totalorder %s9721_s0, 2  ;;  %s7915_s24 = scalar_lea.sflag [#allocation4], %s7914_s20 }
0x1610   : > { %p8970_p11 = pnand %p11434_p6, %p11433_p3 }
0x1612   : > { %p8971_p10 = pneg %p8970_p11 }
0x1614   : > { %9704 = dma.done.wait (%p8971_p10), %s7915_s24, 256  }
0x1615   : > { %9706 = vsyncadd (%p8971_p10), %s7915_s24, 4294967040  ;;  %p84_p13 = scmp.ge.s32.totalorder %s10098_s22, 4   ;;  %s11435_s15 = smov %s9713_s16 }
0x1616   : > { %s11436_s16 = smov %s9717_s18  ;;  %s11437_s18 = smov %s10110_s9 }
0x1617   : > { %s11438_s0 = smov %s10098_s22  ;;  %86 = sbr.rel (!%p84_p13) target bundleno = 78 (0x4e), region = 294 }
0x161c   :  { %7920 = vsyncpa [#allocation3], 1 }
0x161d   :  { %7922 = vsyncpa [#allocation3 + $0x1], 1 }
0x161e   :  { %7923 = vsyncpa [#allocation6], 1 }
0x161f   :  { %7925 = vsyncpa [#allocation6 + $0x1], 1 }
0x1620   :  { %7926 = vsyncpa [#allocation9], 1 }
0x1621   :  { %7927 = vsyncpa [#allocation12], 1 }
0x1622   :  { %7928 = vsyncpa [#allocation15], 1 }
0x1623   :  { %7929 = vsyncpa [#allocation18], 1 }
0x1624   :  { %7930 = vsyncpa [#allocation21], 1 }
0x1625   :  { %7931 = vsyncpa [#allocation24], 1 }
0x1626   :  { %7932 = vsyncpa [#allocation27], 1 }
0x1627   :  { %7933 = vsyncpa [#allocation4], 1 }
0x1628   :  { %7935 = vsyncpa [#allocation4 + $0x1], 1 }

// kernel: tpu_custom_call.1
= control target key start
LH: loop header
LB: loop body
LE: loop exit
PB: predicated region body
PF: predicated region fallthrough
CT: control target
= control target key end

     0   :  { %s9723_s6 = smov 1   ;;  %s9724_s10 = smov 2   ;;  %s11335_s0 = inlined_call_operand.smem [shape: u32[31], index: -1, kind: input, shape index: {}] }
   0x1   :  { %s9792_s5 = sld [smem:[%s11335_s0]]   ;;  %s9725_s14 = smov 3  }
   0x2   :  { %s9797_s9 = sld [smem:[%s11335_s0 + %s9723_s6]]   ;;  %s9726_s18 = smov 4  }
   0x3   :  { %s9802_s13 = sld [smem:[%s11335_s0 + %s9724_s10]]   ;;  %s9727_s22 = smov 5  }
   0x4   :  { %s9807_s17 = sld [smem:[%s11335_s0 + %s9725_s14]]   ;;  %s9728_s26 = smov 6  }
   0x5   :  { %s9812_s21 = sld [smem:[%s11335_s0 + %s9726_s18]]   ;;  %s9729_s30 = smov 7  }
   0x6   :  { %s9817_s25 = sld [smem:[%s11335_s0 + %s9727_s22]]   ;;  %s9730_s4 = smov 8  }
   0x7   :  { %11349 = sst [smem:[#allocation41_spill]] %s9792_s5  ;;  %s9731_s10 = smov 9  }
   0x8   :  { %11350 = sst [smem:[#allocation42_spill]] %s9797_s9  ;;  %s9732_s15 = smov 10  }
   0x9   :  { %11351 = sst [smem:[#allocation43_spill]] %s9802_s13  ;;  %s9733_s20 = smov 11  }
   0xa   :  { %11352 = sst [smem:[#allocation44_spill]] %s9807_s17  ;;  %s9735_s1 = smov 13  }
   0xb   :  { %11353 = sst [smem:[#allocation45_spill]] %s9812_s21  ;;  %s9736_s7 = smov 14  }
   0xc   :  { %11354 = sst [smem:[#allocation46_spill]] %s9817_s25  ;;  %s9738_s22 = smov 16  }
   0xd   :  { %s9822_s29 = sld [smem:[%s11335_s0 + %s9728_s26]]   ;;  %s9734_s26 = smov 12  }
   0xe   :  { %s9827_s3 = sld [smem:[%s11335_s0 + %s9729_s30]]   ;;  %s9739_s28 = smov 17  }
   0xf   :  { %s9832_s8 = sld [smem:[%s11335_s0 + %s9730_s4]]  }
  0x10   :  { %s9837_s14 = sld [smem:[%s11335_s0 + %s9731_s10]]  }
  0x11   :  { %s9842_s19 = sld [smem:[%s11335_s0 + %s9732_s15]]   ;;  %s9737_s15 = smov 15  }
  0x12   :  { %s9847_s24 = sld [smem:[%s11335_s0 + %s9733_s20]]  }
  0x13   :  { %s9852_s30 = sld [smem:[%s11335_s0 + %s9734_s26]]  }
  0x14   :  { %11355 = sst [smem:[#allocation47_spill]] %s9827_s3 }
  0x15   :  { %11356 = sst [smem:[#allocation48_spill]] %s9832_s8 }
  0x16   :  { %11357 = sst [smem:[#allocation49_spill]] %s9837_s14 }
  0x17   :  { %11358 = sst [smem:[#allocation50_spill]] %s9842_s19 }
  0x18   :  { %11359 = sst [smem:[#allocation51_spill]] %s9847_s24 }
  0x19   :  { %s9857_s6 = sld [smem:[%s11335_s0 + %s9735_s1]]  }
  0x1a   :  { %s9862_s12 = sld [smem:[%s11335_s0 + %s9736_s7]]   ;;  %s9740_s7 = smov 18  }
  0x1b   :  { %s9867_s20 = sld [smem:[%s11335_s0 + %s9737_s15]]   ;;  %s9741_s15 = smov 19  }
  0x1c   :  { %s9872_s27 = sld [smem:[%s11335_s0 + %s9738_s22]]   ;;  %s9742_s22 = smov 20  }
  0x1d   :  { %s9877_s4 = sld [smem:[%s11335_s0 + %s9739_s28]]   ;;  %s9743_s28 = smov 21  }
  0x1e   :  { %s9882_s9 = sld [smem:[%s11335_s0 + %s9740_s7]]   ;;  %s9744_s7 = smov 22  }
  0x1f   :  { %11360 = sst [smem:[#allocation52_spill]] %s9857_s6 }
  0x20   :  { %11361 = sst [smem:[#allocation53_spill]] %s9862_s12 }
  0x21   :  { %11362 = sst [smem:[#allocation54_spill]] %s9867_s20 }
  0x22   :  { %s9887_s5 = sld [smem:[%s11335_s0 + %s9741_s15]]   ;;  %s9745_s15 = smov 23  }
  0x23   :  { %11363 = sst [smem:[#allocation55_spill]] %s9877_s4 }
  0x24   :  { %11364 = sst [smem:[#allocation56_spill]] %s9882_s9 }
  0x25   :  { %s9892_s17 = sld [smem:[%s11335_s0 + %s9742_s22]]   ;;  %s9746_s22 = smov 24  }
  0x26   :  { %s9897_s13 = sld [smem:[%s11335_s0 + %s9743_s28]]   ;;  %s9747_s28 = smov 25  }
  0x27   :  { %s9902_s9 = sld [smem:[%s11335_s0 + %s9744_s7]]   ;;  %s9748_s7 = smov 26  }
  0x28   :  { %11365 = sst [smem:[#allocation57_spill]] %s9887_s5 }
  0x29   :  { %s9907_s5 = sld [smem:[%s11335_s0 + %s9745_s15]]   ;;  %s9749_s15 = smov 27  }
  0x2b   :  { %11366 = sst [smem:[#allocation58_spill]] %s9892_s17 }
  0x2c   :  { %11367 = sst [smem:[#allocation59_spill]] %s9897_s13 }
  0x2d   :  { %11368 = sst [smem:[#allocation60_spill]] %s9902_s9 }
  0x2e   :  { %s9912_s17 = sld [smem:[%s11335_s0 + %s9746_s22]]   ;;  %s9750_s22 = smov 28  }
  0x2f   :  { %11369 = sst [smem:[#allocation61_spill]] %s9907_s5 }
  0x30   :  { %s9917_s13 = sld [smem:[%s11335_s0 + %s9747_s28]]   ;;  %s9751_s28 = smov 29  }
  0x31   :  { %s9922_s9 = sld [smem:[%s11335_s0 + %s9748_s7]]   ;;  %s9752_s7 = smov 30  }
  0x32   :  { %s9927_s5 = sld [smem:[%s11335_s0 + %s9749_s15]]  }
  0x34   :  { %11370 = sst [smem:[#allocation62_spill]] %s9912_s17 }
  0x35   :  { %s9932_s17 = sld [smem:[%s11335_s0 + %s9750_s22]]  }
  0x36   :  { %11371 = sst [smem:[#allocation63_spill]] %s9917_s13 }
  0x37   :  { %11372 = sst [smem:[#allocation64_spill]] %s9922_s9 }
  0x38   :  { %s9937_s13 = sld [smem:[%s11335_s0 + %s9751_s28]]  }
  0x39   :  { %s9942_s9 = sld [smem:[%s11335_s0 + %s9752_s7]]  }
  0x3b   :  { %11373 = sst [smem:[#allocation65_spill]] %s9932_s17 }
  0x3e   :  { %11374 = sst [smem:[#allocation66_spill]] %s9937_s13 }
  0x3f   :  { %11375 = sst [smem:[#allocation67_spill]] %s9942_s9 }
  0x40   :  { %66 = vsyncpa [#allocation3], 0 }
  0x41   :  { %68 = vsyncpa [#allocation3 + $0x1], 0 }
  0x42   :  { %69 = vsyncpa [#allocation6], 0 }
  0x43   :  { %71 = vsyncpa [#allocation6 + $0x1], 0 }
  0x44   :  { %72 = vsyncpa [#allocation9], 0 }
  0x45   :  { %73 = vsyncpa [#allocation12], 0 }
  0x46   :  { %74 = vsyncpa [#allocation15], 0 }
  0x47   :  { %75 = vsyncpa [#allocation18], 0 }
  0x48   :  { %76 = vsyncpa [#allocation21], 0 }
  0x49   :  { %77 = vsyncpa [#allocation24], 0 }
  0x4a   :  { %78 = vsyncpa [#allocation27], 0 }
  0x4b   :  { %79 = vsyncpa [#allocation4], 0 }
  0x4c   :  { %81 = vsyncpa [#allocation4 + $0x1], 0  ;;  %s9944_s15 = smov 0   ;;  %s9946_s16 = smov 0  }
  0x4d   :  { %s9948_s18 = smov 0   ;;  %s9950_s0 = smov 0  }
  0x4e LB: > { %s9753_s22 = smov [#allocation7]   ;;  %s9965_s26 = sadd.s32 4294967295, %s9721_s0   ;;  %s9721_s0 = sphi %s9950_s0, %s11438_s0   ;;  %s9717_s18 = sphi %s9948_s18, %s11437_s18   ;;  %s9713_s16 = sphi %s9946_s16, %s11436_s16   ;;  %s9709_s15 = sphi %s9944_s15, %s11435_s15  }
  0x4f   : > { %s780_s23 = sshll.u32 %s9753_s22, 4  ;;  %p8192_p0 = scmp.ge.s32.totalorder %s9721_s0, 1  ;;  %s781_s23 = int_to_ptr.vmem [resolvable:$true] %s780_s23 }
  0x50   : > { %p11345_p1 = scmp.eq.s32.totalorder %s9965_s26, 0  ;;  %p768_p2 = scmp.lt.s32.totalorder %s9721_s0, 3 }
  0x51   : > { %s9754_s1 = smov [#allocation8]   ;;  %s9755_s10 = smov [#allocation11]  }
  0x52   : > { %p9970_p3 = pnand %p8192_p0, %p768_p2  ;;  %s794_s2 = sshll.u32 %s9754_s1, 4  ;;  %s795_s2 = int_to_ptr.vmem [resolvable:$true] %s794_s2 }
  0x53   : > { %s818_s11 = sshll.u32 %s9755_s10, 4  ;;  %s9186_s9 = scalar_lea.vmem %s781_s23, 512  ;;  %s9983_s11 = int_to_ptr.vmem [resolvable:$true] %s818_s11 }
  0x54   : > { %s11376_s28 = scalar_select %p9970_p3, 1, 0 }
  0x55   : > { %p8916_p5 = pneg %p9970_p3  ;;  %p9187_p8 = scmp.ne.s32.totalorder %s781_s23, %s9186_s9 }
  0x56   : > { %p9194_p11 = scmp.lt.s32.totalorder %s781_s23, %s781_s23  ;;  %p9195_p12 = scmp.lt.s32.totalorder %s9186_s9, %s9186_s9 }
  0x57   : > { %p9979_p6 = pnand %p8916_p5, %p11345_p1 }
  0x58   : > { %p9196_p13 = por %p9195_p12, %p9194_p11 }
  0x59   : > { %p9987_p7 = pneg %p9979_p6 }
  0x5b   : > { %p9189_p9 = pnand %p9187_p8, %p9987_p7 }
  0x5d   : > { %p9190_p10 = pneg %p9189_p9 }
  0x5f   : > { %p9197_p0 = pnand %p9196_p13, %p9190_p10 }
  0x61   : > { %9200 = shalt.err (!%p9197_p0)
}
  0x62   : > { %s11341_s1 = smov 128   ;;  %s11379_s21 = sld [smem:[#allocation45_spill]] }
  0x63   : > { %s11343_s10 = smov 8   ;;  %s9212_s13 = scalar_lea.vmem %s795_s2, 16 }
  0x64   : > { %p9213_p2 = scmp.ne.s32.totalorder %s795_s2, %s9212_s13  ;;  %s9219_s17 = scalar_lea.vmem %s795_s2, 32 }
  0x65   : > { %p9220_p9 = scmp.lt.s32.totalorder %s795_s2, %s795_s2  ;;  %p9221_p11 = scmp.lt.s32.totalorder %s9219_s17, %s9212_s13 }
  0x66   : > { %p9215_p5 = pnand %p9213_p2, %p9987_p7 }
  0x67   : > { %p9222_p10 = por %p9221_p11, %p9220_p9 }
  0x68   : > { %8919 = dma.hbm_to_vmem [thread:$0]  (!%p9979_p6), %s11379_s21, 512, %s781_s23, [#allocation6], %s11341_s1, %s11341_s1, %s11343_s10  }
  0x69   : > { %p9216_p8 = pneg %p9215_p5 }
  0x6b   : > { %p9223_p12 = pnand %p9222_p10, %p9216_p8 }
  0x6d   : > { %9226 = shalt.err (!%p9223_p12)
}
  0x6e   : > { %s11380_s25 = sld [smem:[#allocation46_spill]]  ;;  %s9238_s9 = scalar_lea.vmem %s9983_s11, 16 }
  0x6f   : > { %p9239_p13 = scmp.ne.s32.totalorder %s9983_s11, %s9238_s9  ;;  %s9245_s23 = scalar_lea.vmem %s9983_s11, 32 }
  0x70   : > { %p9246_p5 = scmp.lt.s32.totalorder %s9983_s11, %s9983_s11  ;;  %p9247_p9 = scmp.lt.s32.totalorder %s9245_s23, %s9238_s9 }
  0x71   : > { %p9241_p0 = pnand %p9239_p13, %p9987_p7 }
  0x72   : > { %p9248_p8 = por %p9247_p9, %p9246_p5 }
  0x73   : > { %p9242_p2 = pneg %p9241_p0 }
  0x74   : > { %8922 = dma.hbm_to_vmem [thread:$0]  (!%p9979_p6), %s11380_s25, 16, %s795_s2, [#allocation9]  }
  0x75   : > { %p9249_p11 = pnand %p9248_p8, %p9242_p2 }
  0x77   : > { %9252 = shalt.err (!%p9249_p11)
}
  0x78   : > { %s11381_s3 = sld [smem:[#allocation47_spill]]  ;;  %s9758_s13 = smov [#allocation14]  }
  0x79   : > { %s842_s17 = sshll.u32 %s9758_s13, 4  ;;  %s9759_s2 = smov [#allocation17]   ;;  %s843_s17 = int_to_ptr.vmem [resolvable:$true] %s842_s17 }
  0x7a   : > { %s866_s1 = sshll.u32 %s9759_s2, 4  ;;  %s9264_s10 = scalar_lea.vmem %s843_s17, 16  ;;  %s867_s1 = int_to_ptr.vmem [resolvable:$true] %s866_s1 }
  0x7b   : > { %p9265_p10 = scmp.ne.s32.totalorder %s843_s17, %s9264_s10  ;;  %s9271_s9 = scalar_lea.vmem %s843_s17, 32 }
  0x7c   : > { %p9272_p0 = scmp.lt.s32.totalorder %s843_s17, %s843_s17  ;;  %p9273_p2 = scmp.lt.s32.totalorder %s9271_s9, %s9264_s10 }
  0x7d   : > { %p9267_p12 = pnand %p9265_p10, %p9987_p7 }
  0x7e   : > { %8928 = dma.hbm_to_vmem [thread:$0]  (!%p9979_p6), %s11381_s3, 16, %s9983_s11, [#allocation12]  }
  0x7f   : > { %p9268_p13 = pneg %p9267_p12  ;;  %p9274_p5 = por %p9273_p2, %p9272_p0 }
  0x81   : > { %p9275_p9 = pnand %p9274_p5, %p9268_p13 }
  0x83   : > { %9278 = shalt.err (!%p9275_p9)
}
  0x84   : > { %s11382_s14 = sld [smem:[#allocation49_spill]]  ;;  %s9290_s11 = scalar_lea.vmem %s867_s1, 16 }
  0x85   : > { %p9291_p8 = scmp.ne.s32.totalorder %s867_s1, %s9290_s11  ;;  %s9297_s23 = scalar_lea.vmem %s867_s1, 32 }
  0x86   : > { %p9298_p10 = scmp.lt.s32.totalorder %s867_s1, %s867_s1  ;;  %p9299_p12 = scmp.lt.s32.totalorder %s9297_s23, %s9290_s11 }
  0x87   : > { %p9293_p11 = pnand %p9291_p8, %p9987_p7 }
  0x88   : > { %p9300_p1 = por %p9299_p12, %p9298_p10 }
  0x89   : > { %p9294_p4 = pneg %p9293_p11 }
  0x8a   : > { %8934 = dma.hbm_to_vmem [thread:$0]  (!%p9979_p6), %s11382_s14, 16, %s843_s17, [#allocation15]  }
  0x8b   : > { %p9301_p3 = pnand %p9300_p1, %p9294_p4 }
  0x8d   : > { %9304 = shalt.err (!%p9301_p3)
}
  0x8e   : > { %s11383_s24 = sld [smem:[#allocation51_spill]]  ;;  %s9760_s10 = smov [#allocation20]  }
  0x8f   : > { %s890_s13 = sshll.u32 %s9760_s10, 4  ;;  %s9761_s17 = smov [#allocation23]   ;;  %s891_s13 = int_to_ptr.vmem [resolvable:$true] %s890_s13 }
  0x90   : > { %s914_s2 = sshll.u32 %s9761_s17, 4  ;;  %s9316_s9 = scalar_lea.vmem %s891_s13, 16  ;;  %s915_s2 = int_to_ptr.vmem [resolvable:$true] %s914_s2 }
  0x91   : > { %p9317_p13 = scmp.ne.s32.totalorder %s891_s13, %s9316_s9  ;;  %s9323_s3 = scalar_lea.vmem %s891_s13, 32 }
  0x92   : > { %p9324_p5 = scmp.lt.s32.totalorder %s891_s13, %s891_s13  ;;  %p9325_p9 = scmp.lt.s32.totalorder %s9323_s3, %s9316_s9 }
  0x93   : > { %p9319_p0 = pnand %p9317_p13, %p9987_p7 }
  0x94   : > { %8940 = dma.hbm_to_vmem [thread:$0]  (!%p9979_p6), %s11383_s24, 16, %s867_s1, [#allocation18]  }
  0x95   : > { %p9320_p2 = pneg %p9319_p0  ;;  %p9326_p1 = por %p9325_p9, %p9324_p5 }
  0x97   : > { %p9327_p3 = pnand %p9326_p1, %p9320_p2 }
  0x99   : > { %9330 = shalt.err (!%p9327_p3)
}
  0x9a   : > { %s11384_s6 = sld [smem:[#allocation52_spill]]  ;;  %s9342_s1 = scalar_lea.vmem %s915_s2, 16 }
  0x9b   : > { %p9343_p4 = scmp.ne.s32.totalorder %s915_s2, %s9342_s1  ;;  %s9349_s11 = scalar_lea.vmem %s915_s2, 32 }
  0x9c   : > { %p9350_p10 = scmp.lt.s32.totalorder %s915_s2, %s915_s2  ;;  %p9351_p12 = scmp.lt.s32.totalorder %s9349_s11, %s9342_s1 }
  0x9d   : > { %p9345_p8 = pnand %p9343_p4, %p9987_p7 }
  0x9e   : > { %p9352_p13 = por %p9351_p12, %p9350_p10 }
  0x9f   : > { %p9346_p11 = pneg %p9345_p8 }
  0xa0   : > { %8946 = dma.hbm_to_vmem [thread:$0]  (!%p9979_p6), %s11384_s6, 16, %s891_s13, [#allocation21]  }
  0xa1   : > { %p9353_p0 = pnand %p9352_p13, %p9346_p11 }
  0xa3   : > { %9356 = shalt.err (!%p9353_p0)
}
  0xa4   : > { %s11385_s20 = sld [smem:[#allocation54_spill]]  ;;  %s9762_s3 = smov [#allocation26]  }
  0xa5   : > { %s938_s23 = sshll.u32 %s9762_s3, 4  ;;  %s9763_s10 = smov [#allocation10]   ;;  %s939_s23 = int_to_ptr.vmem [resolvable:$true] %s938_s23 }
  0xa6   : > { %s804_s13 = sshll.u32 %s9763_s10, 4  ;;  %s9368_s17 = scalar_lea.vmem %s939_s23, 16  ;;  %s805_s13 = int_to_ptr.vmem [resolvable:$true] %s804_s13 }
  0xa7   : > { %p9369_p2 = scmp.ne.s32.totalorder %s939_s23, %s9368_s17  ;;  %s9375_s9 = scalar_lea.vmem %s939_s23, 32 }
  0xa8   : > { %p9376_p1 = scmp.lt.s32.totalorder %s939_s23, %s939_s23  ;;  %p9377_p3 = scmp.lt.s32.totalorder %s9375_s9, %s9368_s17 }
  0xa9   : > { %p9371_p5 = pnand %p9369_p2, %p9987_p7 }
  0xaa   : > { %8952 = dma.hbm_to_vmem [thread:$0]  (!%p9979_p6), %s11385_s20, 16, %s915_s2, [#allocation24]  }
  0xab   : > { %p9372_p9 = pneg %p9371_p5  ;;  %p9378_p4 = por %p9377_p3, %p9376_p1 }
  0xad   : > { %p9379_p8 = pnand %p9378_p4, %p9372_p9 }
  0xaf   : > { %9382 = shalt.err (!%p9379_p8)
}
  0xb0   : > { %s11386_s4 = sld [smem:[#allocation55_spill]]  ;;  %s9394_s2 = scalar_lea.vmem %s805_s13, 512 }
  0xb1   : > { %p9395_p11 = scmp.ne.s32.totalorder %s805_s13, %s9394_s2  ;;  %p9402_p13 = scmp.lt.s32.totalorder %s805_s13, %s805_s13 }
  0xb2   : > { %p9403_p0 = scmp.lt.s32.totalorder %s9394_s2, %s9394_s2 }
  0xb3   : > { %p9397_p10 = pnand %p9395_p11, %p9987_p7 }
  0xb4   : > { %p9404_p2 = por %p9403_p0, %p9402_p13 }
  0xb5   : > { %p9398_p12 = pneg %p9397_p10 }
  0xb6   : > { %8958 = dma.hbm_to_vmem [thread:$0]  (!%p9979_p6), %s11386_s4, 16, %s939_s23, [#allocation27]  }
  0xb7   : > { %p9405_p5 = pnand %p9404_p2, %p9398_p12 }
  0xb9   : > { %9408 = shalt.err (!%p9405_p5)
}
  0xba   : > { %s11387_s1 = smov 8   ;;  %s11388_s11 = smov 128  }
  0xbb   : > { %8925 = dma.hbm_to_vmem [thread:$0]  (!%p9979_p6), %s9822_s29, 512, %s805_s13, [#allocation9], %s11388_s11, %s11388_s11, %s11387_s1  }
  0xbc   : > { %s9764_s3 = smov [#allocation13]   ;;  %s9765_s10 = smov [#allocation16]  }
  0xbd   : > { %s828_s23 = sshll.u32 %s9764_s3, 4  ;;  %s852_s17 = sshll.u32 %s9765_s10, 4  ;;  %s829_s23 = int_to_ptr.vmem [resolvable:$true] %s828_s23  ;;  %s853_s17 = int_to_ptr.vmem [resolvable:$true] %s852_s17 }
  0xbe   : > { %s9420_s9 = scalar_lea.vmem %s829_s23, 512  ;;  %p9428_p4 = scmp.lt.s32.totalorder %s829_s23, %s829_s23 }
  0xbf   : > { %p9421_p9 = scmp.ne.s32.totalorder %s829_s23, %s9420_s9  ;;  %p9429_p8 = scmp.lt.s32.totalorder %s9420_s9, %s9420_s9 }
  0xc1   : > { %p9423_p1 = pnand %p9421_p9, %p9987_p7  ;;  %p9430_p11 = por %p9429_p8, %p9428_p4 }
  0xc3   : > { %p9424_p3 = pneg %p9423_p1 }
  0xc5   : > { %p9431_p10 = pnand %p9430_p11, %p9424_p3 }
  0xc7   : > { %9434 = shalt.err (!%p9431_p10)
}
  0xc8   : > { %s11389_s8 = sld [smem:[#allocation48_spill]]  ;;  %s9446_s13 = scalar_lea.vmem %s853_s17, 512 }
  0xc9   : > { %p9447_p12 = scmp.ne.s32.totalorder %s853_s17, %s9446_s13  ;;  %p9454_p2 = scmp.lt.s32.totalorder %s853_s17, %s853_s17 }
  0xca   : > { %p9455_p5 = scmp.lt.s32.totalorder %s9446_s13, %s9446_s13 }
  0xcb   : > { %p9449_p13 = pnand %p9447_p12, %p9987_p7 }
  0xcc   : > { %p9456_p9 = por %p9455_p5, %p9454_p2 }
  0xcd   : > { %p9450_p0 = pneg %p9449_p13 }
  0xce   : > { %8931 = dma.hbm_to_vmem [thread:$0]  (!%p9979_p6), %s11389_s8, 512, %s829_s23, [#allocation12], %s11388_s11, %s11388_s11, %s11387_s1  }
  0xcf   : > { %p9457_p1 = pnand %p9456_p9, %p9450_p0 }
  0xd1   : > { %9460 = shalt.err (!%p9457_p1)
}
  0xd2   : > { %s11390_s19 = sld [smem:[#allocation50_spill]]  ;;  %s9766_s2 = smov [#allocation19]  }
  0xd3   : > { %s876_s3 = sshll.u32 %s9766_s2, 4  ;;  %s9767_s23 = smov [#allocation22]   ;;  %s877_s3 = int_to_ptr.vmem [resolvable:$true] %s876_s3 }
  0xd4   : > { %s900_s10 = sshll.u32 %s9767_s23, 4  ;;  %s9472_s9 = scalar_lea.vmem %s877_s3, 512  ;;  %s901_s10 = int_to_ptr.vmem [resolvable:$true] %s900_s10 }
  0xd5   : > { %p9473_p3 = scmp.ne.s32.totalorder %s877_s3, %s9472_s9  ;;  %p9480_p11 = scmp.lt.s32.totalorder %s877_s3, %s877_s3 }
  0xd6   : > { %p9481_p10 = scmp.lt.s32.totalorder %s9472_s9, %s9472_s9 }
  0xd7   : > { %p9475_p4 = pnand %p9473_p3, %p9987_p7 }
  0xd8   : > { %8937 = dma.hbm_to_vmem [thread:$0]  (!%p9979_p6), %s11390_s19, 512, %s853_s17, [#allocation15], %s11388_s11, %s11388_s11, %s11387_s1  }
  0xd9   : > { %p9476_p8 = pneg %p9475_p4  ;;  %p9482_p12 = por %p9481_p10, %p9480_p11 }
  0xdb   : > { %p9483_p13 = pnand %p9482_p12, %p9476_p8 }
  0xdd   : > { %9486 = shalt.err (!%p9483_p13)
}
  0xde   : > { %8943 = dma.hbm_to_vmem [thread:$0]  (!%p9979_p6), %s9852_s30, 512, %s877_s3, [#allocation18], %s11388_s11, %s11388_s11, %s11387_s1  }
  0xdf   : > { %s9498_s17 = scalar_lea.vmem %s901_s10, 512  ;;  %p9506_p9 = scmp.lt.s32.totalorder %s901_s10, %s901_s10 }
  0xe0   : > { %p9499_p0 = scmp.ne.s32.totalorder %s901_s10, %s9498_s17  ;;  %p9507_p1 = scmp.lt.s32.totalorder %s9498_s17, %s9498_s17 }
  0xe2   : > { %p9501_p2 = pnand %p9499_p0, %p9987_p7  ;;  %p9508_p3 = por %p9507_p1, %p9506_p9 }
  0xe4   : > { %p9502_p5 = pneg %p9501_p2 }
  0xe6   : > { %p9509_p4 = pnand %p9508_p3, %p9502_p5 }
  0xe8   : > { %9512 = shalt.err (!%p9509_p4)
}
  0xe9   : > { %s11391_s12 = sld [smem:[#allocation53_spill]]  ;;  %s9768_s13 = smov [#allocation25]  }
  0xea   : > { %s924_s2 = sshll.u32 %s9768_s13, 4  ;;  %s9769_s3 = smov [#allocation28]   ;;  %s925_s2 = int_to_ptr.vmem [resolvable:$true] %s924_s2 }
  0xeb   : > { %s954_s23 = sshll.u32 %s9769_s3, 4  ;;  %s9524_s9 = scalar_lea.vmem %s925_s2, 512  ;;  %s955_s23 = int_to_ptr.vmem [resolvable:$true] %s954_s23 }
  0xec   : > { %p9525_p8 = scmp.ne.s32.totalorder %s925_s2, %s9524_s9  ;;  %p9532_p12 = scmp.lt.s32.totalorder %s925_s2, %s925_s2 }
  0xed   : > { %p9533_p13 = scmp.lt.s32.totalorder %s9524_s9, %s9524_s9 }
  0xee   : > { %p9527_p11 = pnand %p9525_p8, %p9987_p7 }
  0xef   : > { %8949 = dma.hbm_to_vmem [thread:$0]  (!%p9979_p6), %s11391_s12, 512, %s901_s10, [#allocation21], %s11388_s11, %s11388_s11, %s11387_s1  }
  0xf0   : > { %p9528_p10 = pneg %p9527_p11  ;;  %p9534_p0 = por %p9533_p13, %p9532_p12 }
  0xf2   : > { %p9535_p2 = pnand %p9534_p0, %p9528_p10 }
  0xf4   : > { %9538 = shalt.err (!%p9535_p2)
}
  0xf5   : > { %8955 = dma.hbm_to_vmem [thread:$0]  (!%p9979_p6), %s9872_s27, 512, %s925_s2, [#allocation24], %s11388_s11, %s11388_s11, %s11387_s1  }
  0xf6   : > { %s9550_s10 = scalar_lea.vmem %s955_s23, 512  ;;  %p9558_p3 = scmp.lt.s32.totalorder %s955_s23, %s955_s23 }
  0xf7   : > { %p9551_p5 = scmp.ne.s32.totalorder %s955_s23, %s9550_s10  ;;  %p9559_p4 = scmp.lt.s32.totalorder %s9550_s10, %s9550_s10 }
  0xf9   : > { %p9553_p9 = pnand %p9551_p5, %p9987_p7  ;;  %p9560_p8 = por %p9559_p4, %p9558_p3 }
  0xfb   : > { %p9554_p1 = pneg %p9553_p9 }
  0xfd   : > { %p9561_p11 = pnand %p9560_p8, %p9554_p1 }
  0xff   : > { %9564 = shalt.err (!%p9561_p11)
}
 0x100   : > { %s11392_s17 = sld [smem:[#allocation58_spill]]  ;;  %s8191_s7 = sadd.s32 4294967294, %s9721_s0  }
 0x101   : > { %s10098_s22 = sadd.s32 1, %s9721_s0   ;;  %s146_s13 = sadd.s32 1, %s9717_s18 }
 0x102   : > { %s143_s2 = ssub.s32 %s9721_s0, %s10098_s22  ;;  %s11393_s3 = sld [smem:[#allocation43_spill]] }
 0x103   : > { %p153_p7 = scmp.ne.s32.totalorder %s9717_s18, %s9713_s16  ;;  %p144_p10 = scmp.eq.s32.totalorder %s143_s2, 0 }
 0x104   : > { %p154_p12 = scmp.eq.s32.totalorder %s9721_s0, 0  ;;  %p159_p13 = scmp.ne.s32.totalorder %s9713_s16, %s9709_s15 }
 0x105   : > { %p755_p0 = scmp.eq.s32.totalorder %s9965_s26, 1  ;;  %p11394_p5 = scmp.eq.s32.totalorder %s9965_s26, 0 }
 0x106   : > { %8961 = dma.hbm_to_vmem [thread:$0]  (!%p9979_p6), %s11392_s17, 512, %s955_s23, [#allocation27], %s11388_s11, %s11388_s11, %s11387_s1  }
 0x107   : > { %s10110_s9 = scalar_select %p144_p10, %s9717_s18, %s146_s13  }
 0x108   : > { %p155_p2 = por %p154_p12, %p153_p7  ;;  %p10114_p6 = por %p11394_p5, %p159_p13 }
 0x109   : > { %p10118_p9 = por %p755_p0, %p153_p7  ;;  %p761_p1 = scmp.eq.s32.totalorder %s8191_s7, 1 }
 0x10a   : > { %p8988_p3 = scmp.lt.s32.totalorder %s9721_s0, 2  ;;  %s10124_s17 = sand.u32 1, %s9717_s18  }
 0x10b   : > { %s11396_s10 = scalar_select %p10118_p9, 1, 0 }
 0x10c   : > { %p10126_p4 = por %p761_p1, %p159_p13  ;;  %s8209_s2 = sshll.u32 %s10124_s17, 4 }
 0x10d   : > { %s8381_s4 = sshll.u32 %s9721_s0, 8  ;;  %s1018_s8 = scalar_lea.vmem [#allocation2], %s8209_s2 }
 0x10e   : > { %s11397_s13 = scalar_select %p10126_p4, 1, 0 }
 0x10f   : > { %s10133_s6 = scalar_lea.hbm %s11393_s3, %s8381_s4  ;;  %s1025_s7 = sshll.u32 %s1018_s8, 4  ;;  %s10139_s7 = int_to_ptr.vmem [resolvable:$true] %s1025_s7 }
 0x110   : > { %p10135_p8 = pnand %p8988_p3, %p155_p2  ;;  %s9565_s20 = scalar_lea.hbm %s10133_s6, 256 }
 0x111   : > { %p9566_p11 = scmp.ne.s32.totalorder %s10133_s6, %s9565_s20  ;;  %s9570_s4 = scalar_lea.hbm %s11393_s3, 512 }
 0x112   : > { %p9567_p7 = pneg %p10135_p8  ;;  %p9571_p13 = scmp.lt.s32.totalorder %s10133_s6, %s11393_s3 }
 0x113   : > { %p9572_p0 = scmp.lt.s32.totalorder %s9570_s4, %s9565_s20 }
 0x114   : > { %p9568_p10 = pnand %p9567_p7, %p9566_p11 }
 0x115   : > { %p9573_p2 = por %p9572_p0, %p9571_p13 }
 0x116   : > { %p9569_p12 = pneg %p9568_p10 }
 0x118   : > { %p9574_p5 = pnand %p9573_p2, %p9569_p12 }
 0x11a   : > { %9577 = shalt.err (!%p9574_p5)
}
 0x11b   : > { %s9578_s8 = scalar_lea.vmem %s10139_s7, 256  ;;  %s9770_s2 = smov [#allocation2]  }
 0x11c   : > { %p9579_p1 = scmp.ne.s32.totalorder %s10139_s7, %s9578_s8  ;;  %s9583_s14 = sshll.u32 %s9770_s2, 4  ;;  %s9584_s14 = int_to_ptr.vmem [resolvable:$false] %s9583_s14 }
 0x11d   : > { %s9585_s19 = scalar_lea.vmem %s9584_s14, 512  ;;  %p9586_p11 = scmp.lt.s32.totalorder %s10139_s7, %s9584_s14 }
 0x11e   : > { %p9581_p3 = pnand %p9579_p1, %p9567_p7  ;;  %p9587_p10 = scmp.lt.s32.totalorder %s9585_s19, %s9578_s8 }
 0x120   : > { %p9582_p4 = pneg %p9581_p3  ;;  %p9588_p9 = por %p9587_p10, %p9586_p11 }
 0x122   : > { %p9589_p13 = pnand %p9588_p9, %p9582_p4 }
 0x124   : > { %9592 = shalt.err (!%p9589_p13)
}
 0x125   : > { %s11399_s20 = scalar_lea.sflag [#allocation3], %s10124_s17  ;;  %s11400_s4 = sld [smem:[#allocation44_spill]] }
 0x126   : > { %8965 = dma.hbm_to_vmem [thread:$0]  (!%p10135_p8), %s10133_s6, 256, %s10139_s7, %s11399_s20, %s11388_s11, %s11388_s11, %s11387_s1  }
 0x127   : > { %s8212_s14 = sshll.u32 %s10124_s17, 5  ;;  %s8383_s19 = sshll.u32 %s9721_s0, 9 }
 0x128   : > { %s1039_s2 = scalar_lea.vmem [#allocation5], %s8212_s14  ;;  %s11401_s21 = sand.u32 1, %s9721_s0  }
 0x129   : > { %s1047_s3 = sshll.u32 %s1039_s2, 4  ;;  %s1036_s24 = scalar_lea.sflag [#allocation6], %s11401_s21  ;;  %s10173_s3 = int_to_ptr.vmem [resolvable:$true] %s1047_s3 }
 0x12b   : > { %s10171_s8 = scalar_lea.hbm %s11400_s4, %s8383_s19  ;;  %s9598_s6 = scalar_lea.hbm %s11400_s4, 1024 }
 0x12c   : > { %s9593_s25 = scalar_lea.hbm %s10171_s8, 512  ;;  %p9599_p0 = scmp.lt.s32.totalorder %s10171_s8, %s11400_s4 }
 0x12d   : > { %p9594_p9 = scmp.ne.s32.totalorder %s10171_s8, %s9593_s25  ;;  %p9600_p2 = scmp.lt.s32.totalorder %s9598_s6, %s9593_s25 }
 0x12f   : > { %p9596_p4 = pnand %p9594_p9, %p9567_p7  ;;  %p9601_p5 = por %p9600_p2, %p9599_p0 }
 0x131   : > { %p9597_p12 = pneg %p9596_p4 }
 0x133   : > { %p9602_p1 = pnand %p9601_p5, %p9597_p12 }
 0x135   : > { %9605 = shalt.err (!%p9602_p1)
}
 0x136   : > { %s9606_s17 = scalar_lea.vmem %s10173_s3, 512  ;;  %s9771_s21 = smov [#allocation5]  }
 0x137   : > { %p9607_p3 = scmp.ne.s32.totalorder %s10173_s3, %s9606_s17  ;;  %s9611_s7 = sshll.u32 %s9771_s21, 4  ;;  %s9612_s7 = int_to_ptr.vmem [resolvable:$false] %s9611_s7 }
 0x138   : > { %s9613_s20 = scalar_lea.vmem %s9612_s7, 1024  ;;  %p9614_p13 = scmp.lt.s32.totalorder %s10173_s3, %s9612_s7 }
 0x139   : > { %p9609_p11 = pnand %p9607_p3, %p9567_p7  ;;  %p9615_p9 = scmp.lt.s32.totalorder %s9613_s20, %s9606_s17 }
 0x13b   : > { %p9610_p10 = pneg %p9609_p11  ;;  %p9616_p4 = por %p9615_p9, %p9614_p13 }
 0x13d   : > { %p9617_p0 = pnand %p9616_p4, %p9610_p10 }
 0x13f   : > { %9620 = shalt.err (!%p9617_p0)
}
 0x140   : > { %8968 = dma.hbm_to_vmem [thread:$0]  (!%p10135_p8), %s10171_s8, 512, %s10173_s3, %s1036_s24, %s11388_s11, %s11388_s11, %s11387_s1  }
 0x141   : > { %p11402_p7 = scmp.ne.s32.totalorder %s11376_s28, 0 }
 0x142   : > { %s10201_s25 = sand.u32 (!%p11402_p7), 1, %s9713_s16  }
 0x143   : > { %1059 = sbr.rel (%p11402_p7) target bundleno = 5645 (0x160d), region = 140  ;;  %s8217_s14 = sshll.u32 (!%p11402_p7), %s10201_s25, 4 }
 0x144   : > { %s1062_s19 = scalar_lea.sflag (!%p11402_p7), [#allocation3], %s10201_s25  ;;  %s10207_s12 = scalar_lea.vmem (!%p11402_p7), [#allocation2], %s8217_s14 }
 0x148   : > { %9664 = dma.done.wait (%p10114_p6), %s1062_s19, 256  }
 0x149   : > { %9666 = vsyncadd (%p10114_p6), %s1062_s19, 4294967040  ;;  %s1070_s24 = sand.u32 1, %s9965_s26   ;;  %s8218_s28 = sshll.u32 %s10201_s25, 5 }
 0x14a   : > { %s1071_s1 = scalar_lea.sflag [#allocation6], %s1070_s24  ;;  %s10215_s11 = scalar_lea.vmem [#allocation5], %s8218_s28 }
 0x14b   : > { %9668 = dma.done.wait (%p10114_p6), %s1071_s1, 512  }
 0x14c   : > { %9670 = vsyncadd (%p10114_p6), %s1071_s1, 4294966784  ;;  %p11403_p8 = scmp.eq.s32.totalorder %s9965_s26, 0 }
 0x14e   : > { %9672 = dma.done.wait (%p11403_p8), [#allocation6], 512   ;;  %p11404_p12 = pmov %p11403_p8 }
 0x14f   : > { %p11405_p2 = pmov %p11403_p8 }
 0x150   : > { %9674 = vsyncadd (%p11404_p12), [#allocation6], 4294966784 }
 0x151   : > { %9676 = dma.done.wait (%p11405_p2), [#allocation9], 528   ;;  %p11406_p5 = pmov %p11405_p2 }
 0x152   : > { %p11407_p1 = pmov %p11405_p2 }
 0x153   : > { %9678 = vsyncadd (%p11406_p5), [#allocation9], 4294966768 }
 0x154   : > { %9680 = dma.done.wait (%p11407_p1), [#allocation12], 528   ;;  %p11408_p3 = pmov %p11407_p1 }
 0x155   : > { %p11409_p6 = pmov %p11407_p1 }
 0x156   : > { %9682 = vsyncadd (%p11408_p3), [#allocation12], 4294966768 }
 0x157   : > { %9684 = dma.done.wait (%p11409_p6), [#allocation15], 528   ;;  %p11410_p11 = pmov %p11407_p1 }
 0x158   : > { %p11411_p10 = pmov %p11407_p1 }
 0x159   : > { %9686 = vsyncadd (%p11410_p11), [#allocation15], 4294966768 }
 0x15a   : > { %9688 = dma.done.wait (%p11411_p10), [#allocation18], 528   ;;  %p11412_p13 = pmov %p11407_p1 }
 0x15b   : > { %p11413_p9 = pmov %p11407_p1 }
 0x15c   : > { %9690 = vsyncadd (%p11412_p13), [#allocation18], 4294966768 }
 0x15d   : > { %9692 = dma.done.wait (%p11413_p9), [#allocation21], 528   ;;  %p11414_p4 = pmov %p11407_p1 }
 0x15e   : > { %p11415_p0 = pmov %p11407_p1 }
 0x15f   : > { %9694 = vsyncadd (%p11414_p4), [#allocation21], 4294966768 }
 0x160   : > { %9696 = dma.done.wait (%p11415_p0), [#allocation24], 528   ;;  %p11416_p7 = pmov %p11415_p0 }
 0x161   : > { %p11417_p8 = pmov %p11415_p0 }
 0x162   : > { %9698 = vsyncadd (%p11416_p7), [#allocation24], 4294966768 }
 0x163   : > { %9700 = dma.done.wait (%p11417_p8), [#allocation27], 528   ;;  %p11418_p12 = pmov %p11415_p0 }
 0x164   : > { %s11419_s3 = sld [smem:[#allocation41_spill]]  ;;  %s8235_s23 = sshll.u32 %s9965_s26, 1  ;;  %v1260_v0 = vld [vmem:[#allocation7 + $0x18] sm:$0xff]  ;;  %v1259_v1 = vld [vmem:[#allocation7 + $0x10] sm:$0xff]  ;;  %v1258_v2 = vld [vmem:[#allocation7 + $0x8] sm:$0xff]  ;;  %vm1268_vm0 = vcmask 261120   ;;  %v1543_v31 = vlaneseq }
 0x165   : > { %9702 = vsyncadd (%p11418_p12), [#allocation27], 4294966768  ;;  %p1228_p2 = scmp.lt.s32.totalorder %s8235_s23, 3  ;;  %8534 = vmatprep.subr.mxu1 %v1260_v0  ;;  %v1249_v5 = vld [vmem:[%s10207_s12] sm:$0xff]  ;;  %v1250_v6 = vld [vmem:[%s10207_s12 + $0x8] sm:$0xff]  ;;  %s9772_s6 = smov 120  }
 0x166   : > { %8535 = vmatpush3.msra.mxu1 %v1260_v0  ;;  %v1257_v8 = vld [vmem:[#allocation7] sm:$0xff]  ;;  %v1352_v11 = vld [vmem:[#allocation10 + $0x10] sm:$0xff]  ;;  %v1351_v12 = vld [vmem:[#allocation10 + $0x8] sm:$0xff]  ;;  %s9773_s17 = smov 104   ;;  %s9774_s21 = smov 112   ;;  %v9775_v28 = vmov 0.0  }
 0x167   : > { %s11440_s23 = smov (!%p1228_p2, %s8235_s23), 3  ;;  %8536 = vmatprep.subr.mxu1 %v1259_v1  ;;  %v1353_v10 = vld [vmem:[#allocation10 + $0x18] sm:$0xff]  ;;  %v1350_v13 = vld [vmem:[#allocation10] sm:$0xff]  ;;  %v1437_v26 = vld [vmem:[#allocation13 + $0x8] sm:$0xff]  ;;  %vm9776_vm1 = vmmov 0   ;;  %v1544_v36 = vshrl.u32 %v1543_v31, 7 }
 0x168   : > { %s8236_s8 = sshll.u32 %s11440_s23, 3  ;;  %8537 = vmatpush3.msra.mxu1 %v1259_v1  ;;  %v8240_v14 = vld [vmem:[#allocation8] ss:$0 sm:$0xff]  ;;  %v8243_v19 = vld [vmem:[#allocation11] ss:$0 sm:$0xff]  ;;  %v1438_v25 = vld [vmem:[#allocation13 + $0x10] sm:$0xff] }
 0x169   : > { %8538 = vmatprep.subr.mxu1 %v1258_v2  ;;  %v1439_v24 = vld [vmem:[#allocation13 + $0x18] sm:$0xff]  ;;  %v1436_v27 = vld [vmem:[#allocation13] sm:$0xff]  ;;  %v9777_v29 = vmov 1983009808   ;;  %v9778_v33 = vmov 1934713408  }
 0x16a   : > { %s10258_s2 = scalar_lea.vmem %s11419_s3, %s8236_s8  ;;  %8539 = vmatpush3.msra.mxu1 %v1258_v2  ;;  %8556 = vmatprep.subr.mxu0 %v1439_v24  ;;  %v1541_v30 = vunpack.c.l.s4 %v9777_v29  ;;  %v1573_v34 = vunpack.c.l.s4 %v9778_v33  ;;  %vm1966_vm2 = vcmask 64512   ;;  %s9779_s7 = smov 8   ;;  %vm2756_vm3 = vcmask 130048  }
 0x16b   : > { %v1243_v3 = vld [vmem:[%s10258_s2] sm:$0xff]  ;;  %v10262_v4 = vld [vmem:[%s10258_s2 + $0x8] sm:$0xff]  ;;  %8540 = vmatprep.subr.mxu1 %v1257_v8  ;;  %8557 = vmatpush3.msra.mxu0 %v1439_v24  ;;  %s9780_s20 = smov 16   ;;  %s9781_s19 = smov 24   ;;  %vm2758_vm4 = vcmask 195584   ;;  %vm7755_vm5 = vcmask 523264  }
 0x16c   : > { %8564 = vmatprep.mubr.msk.f32.mxu0 %vm1268_vm0, %v1243_v3  ;;  %v1255_v7 = vadd.f32 %v1249_v5, %v1243_v3  ;;  %v1256_v9 = vadd.f32 %v1250_v6, %v10262_v4  ;;  %8541 = vmatpush3.msra.mxu1 %v1257_v8  ;;  %v1542_v35 = vunpack.c.0.s8 %v1541_v30  ;;  %v1574_v39 = vunpack.c.0.s8 %v1573_v34  ;;  %s11420_s24 = sld [smem:[#allocation42_spill]]  ;;  %s8384_s28 = sshll.u32 %s11440_s23, 4 }
 0x16d   : > { %8545 = vmatprep.subr.mxu1 %v1353_v10  ;;  %8558 = vmatprep.subr.mxu0 %v1438_v25  ;;  %s11421_s3 = sld [smem:[#allocation62_spill]]  ;;  %p11432_p1 = scmp.ne.s32.totalorder %s11396_s10, 0 }
 0x16e   : > { %8542 = vmatprep.mubr.msk.f32.mxu1 %vm1268_vm0, %v1255_v7  ;;  %8559 = vmatpush3.msra.mxu0 %v1438_v25  ;;  %v10295_v40 = vsub.s32 %v1542_v35, %v1544_v36  ;;  %v10297_v47 = vsub.s32 %v1574_v39, %v1544_v36  ;;  %s11422_s23 = sld [smem:[#allocation63_spill]] }
 0x16f   : > { %8543 = vmatmul.mubr.msk.f32.vlgmr.msra.gmra.mxu1 %vm1268_vm0, %v1256_v9  ;;  %8560 = vmatprep.subr.mxu0 %v1437_v26  ;;  %s11425_s8 = sld [smem:[#allocation60_spill]] }
 0x170   : > { %8546 = vmatpush3.msra.mxu1 %v1353_v10  ;;  %8553 = vmatprep.mubr.msk.f32.mxu1 %vm1268_vm0, %v1255_v7 }
 0x171   : > { %8547 = vmatprep.subr.mxu1 %v1352_v11  ;;  %8561 = vmatpush3.msra.mxu0 %v1437_v26 }
 0x172   : > { %8548 = vmatpush3.msra.mxu1 %v1352_v11  ;;  %8562 = vmatprep.subr.mxu0 %v1436_v27  ;;  %s10633_s1 = scalar_lea.vmem %s11420_s24, %s8384_s28  ;;  %s8385_s24 = sshll.u32 %s9965_s26, 8 }
 0x173   : > { %8549 = vmatprep.subr.mxu1 %v1351_v12  ;;  %8563 = vmatpush3.msra.mxu0 %v1436_v27  ;;  %s1226_s28 = scalar_lea.vmem [#allocation29], %s8217_s14  ;;  %s9782_s26 = smov [#allocation29]  }
 0x174   : > { %8550 = vmatpush3.msra.mxu1 %v1351_v12  ;;  %8577 = vmatprep.subr.mxu0 %v9775_v28  ;;  %s9625_s14 = sshll.u32 %s9782_s26, 4  ;;  %s9626_s14 = int_to_ptr.vmem [resolvable:$false] %s9625_s14 }
 0x175   : > { %8551 = vmatprep.subr.mxu1 %v1350_v13  ;;  %8565 = vmatmul.mubr.msk.f32.vlgmr.msra.gmra.mxu0 %vm1268_vm0, %v10262_v4 }
 0x176   : > { %8552 = vmatpush3.msra.mxu1 %v1350_v13  ;;  %8579 = vmatprep.mubr.msk.f32.mxu0 %vm9776_vm1, %v9775_v28 }
 0x177   : > { %8554 = vmatmul.mubr.msk.f32.vlgmr.msra.gmra.mxu1 %vm1268_vm0, %v1256_v9  ;;  %8567 = vmatprep.subr.mxu1 %v9775_v28 }
 0x178   : > { %8569 = vmatprep.mubr.msk.f32.mxu1 %vm9776_vm1, %v9775_v28 }
 0x22f   : > { %v8544_v15 = vpop.f32.mrf.mxu1 }
 0x230   : > { %v10272_v16 = vadd.f32 %v8544_v15, %v8240_v14 }
 0x231   : > { %v1341_v17 = vpop.f32.mrf.mxu1 }
 0x232   : > { %v10274_v18 = vadd.f32 %v8240_v14, %v1341_v17 }
 0x234   : > { %1529 = vrot.lane.b32.xlu1 %v10274_v18, %s9772_s6 }
 0x237   : > { %v8555_v20 = vpop.f32.mrf.mxu1 }
 0x238   : > { %v10278_v21 = vadd.f32 %v8555_v20, %v8243_v19 }
 0x239   : > { %v1427_v22 = vpop.f32.mrf.mxu1 }
 0x23a   : > { %v1428_v23 = vadd.f32 %v8243_v19, %v1427_v22 }
 0x23c   : > { %1675 = vrot.lane.b32.xlu0 %v1428_v23, %s9772_s6  ;;  %1681 = vrot.lane.b32.xlu1 %v1428_v23, %s9773_s17 }
 0x240   : > { %1678 = vrot.lane.b32.xlu0 %v1428_v23, %s9774_s21  ;;  %1535 = vrot.lane.b32.xlu1 %v10274_v18, %s9773_s17 }
 0x244   : > { %1532 = vrot.lane.b32.xlu0 %v10274_v18, %s9774_s21 }
 0x2a6   : > { %v1530_v32 = vpop.permute.xlu1 %1529 }
 0x2ae   : > { %v1676_v37 = vpop.permute.xlu0 %1675  ;;  %v1682_v38 = vpop.permute.xlu1 %1681 }
 0x2af   : > { %v1700_v41 = vcombine.low %v1676_v37, %v1682_v38  ;;  %v1701_v42 = vcombine.high %v1676_v37, %v1682_v38 }
 0x2b1   : > { %v1708_v48 = vrot.slane %v1700_v41, %v10295_v40  ;;  %v1715_v49 = vrot.slane %v1701_v42, %v10295_v40 }
 0x2b2   : > { %v1679_v43 = vpop.permute.xlu0 %1678  ;;  %v1536_v46 = vpop.permute.xlu1 %1535 }
 0x2b3   : > { %v1684_v44 = vcombine.low %v1428_v23, %v1679_v43  ;;  %v1685_v45 = vcombine.high %v1428_v23, %v1679_v43  ;;  %v1554_v52 = vcombine.low %v1530_v32, %v1536_v46  ;;  %v1555_v53 = vcombine.high %v1530_v32, %v1536_v46 }
 0x2b5   : > { %v1692_v50 = vrot.slane %v1684_v44, %v10295_v40  ;;  %v1699_v51 = vrot.slane %v1685_v45, %v10295_v40  ;;  %v1562_v1 = vrot.slane %v1554_v52, %v10295_v40  ;;  %v1569_v2 = vrot.slane %v1555_v53, %v10295_v40 }
 0x2b6   : > { %v1533_v54 = vpop.permute.xlu0 %1532 }
 0x2b7   : > { %v1716_v55 = vcombine.low %v1692_v50, %v1708_v48  ;;  %v1717_v56 = vcombine.high %v1692_v50, %v1708_v48  ;;  %v1732_v57 = vcombine.low %v1699_v51, %v1715_v49  ;;  %v1733_v58 = vcombine.high %v1699_v51, %v1715_v49 }
 0x2b8   : > { %v1538_v59 = vcombine.low %v10274_v18, %v1533_v54  ;;  %v1539_v60 = vcombine.high %v10274_v18, %v1533_v54 }
 0x2b9   : > { %v1724_v61 = vrot.slane %v1716_v55, %v10297_v47  ;;  %v1731_v62 = vrot.slane %v1717_v56, %v10297_v47  ;;  %v1740_v63 = vrot.slane %v1732_v57, %v10297_v47  ;;  %v1747_v0 = vrot.slane %v1733_v58, %v10297_v47  ;;  %v8246_v58 = vld [vmem:[#allocation14] ss:$0 sm:$0xff] }
 0x2ba   : > { %v1546_v3 = vrot.slane %v1538_v59, %v10295_v40  ;;  %v1553_v4 = vrot.slane %v1539_v60, %v10295_v40  ;;  %v8566_v59 = vpop.f32.mrf.mxu0 }
 0x2bb   : > { %v1752_v5 = vcombine.low %v1724_v61, %v1731_v62  ;;  %v8251_v6 = vcombine.high %v1724_v61, %v1731_v62  ;;  %v1768_v7 = vcombine.low %v1740_v63, %v1747_v0  ;;  %v8252_v8 = vcombine.high %v1740_v63, %v1747_v0 }
 0x2bc   : > { %v1570_v9 = vcombine.low %v1546_v3, %v1562_v1  ;;  %v1571_v10 = vcombine.high %v1546_v3, %v1562_v1  ;;  %v1586_v11 = vcombine.low %v1553_v4, %v1569_v2  ;;  %v1587_v12 = vcombine.high %v1553_v4, %v1569_v2  ;;  %v1519_v61 = vpop.f32.mrf.mxu0 }
 0x2bd   : > { %v1759_v13 = vrot.slane %v1752_v5, %v10295_v40  ;;  %v1767_v14 = vrot.slane %v8251_v6, %v10295_v40  ;;  %v1775_v15 = vrot.slane %v1768_v7, %v10295_v40  ;;  %v1783_v17 = vrot.slane %v8252_v8, %v10295_v40 }
 0x2be   : > { %v1578_v18 = vrot.slane %v1570_v9, %v10297_v47  ;;  %v1585_v19 = vrot.slane %v1571_v10, %v10297_v47  ;;  %v1594_v20 = vrot.slane %v1586_v11, %v10297_v47  ;;  %v1601_v22 = vrot.slane %v1587_v12, %v10297_v47 }
 0x2bf   : > { %v1784_v23 = vcombine.low %v1759_v13, %v1767_v14  ;;  %v1785_v24 = vcombine.high %v1759_v13, %v1767_v14  ;;  %v1800_v25 = vcombine.low %v1775_v15, %v1783_v17  ;;  %v1801_v26 = vcombine.high %v1775_v15, %v1783_v17 }
 0x2c0   : > { %v1606_v27 = vcombine.low %v1578_v18, %v1585_v19  ;;  %v8249_v29 = vcombine.high %v1578_v18, %v1585_v19  ;;  %v1622_v30 = vcombine.low %v1594_v20, %v1601_v22  ;;  %v8250_v31 = vcombine.high %v1594_v20, %v1601_v22 }
 0x2c1   : > { %v1792_v32 = vrot.slane %v1784_v23, %v10297_v47  ;;  %v1808_v33 = vrot.slane %v1800_v25, %v10297_v47  ;;  %v1799_v34 = vrot.slane %v1785_v24, %v10297_v47  ;;  %v1815_v35 = vrot.slane %v1801_v26, %v10297_v47 }
 0x2c2   : > { %v1613_v36 = vrot.slane %v1606_v27, %v10295_v40  ;;  %v1621_v37 = vrot.slane %v8249_v29, %v10295_v40  ;;  %v1629_v38 = vrot.slane %v1622_v30, %v10295_v40  ;;  %v1637_v39 = vrot.slane %v8250_v31, %v10295_v40 }
 0x2c3   : > { %v1816_v41 = vcombine.low %v1792_v32, %v1808_v33  ;;  %v1818_v42 = vcombine.low %v1799_v34, %v1815_v35  ;;  %v1817_v54 = vcombine.high %v1792_v32, %v1808_v33  ;;  %v1819_v56 = vcombine.high %v1799_v34, %v1815_v35 }
 0x2c4   : > { %v1638_v43 = vcombine.low %v1613_v36, %v1621_v37  ;;  %v1639_v44 = vcombine.high %v1613_v36, %v1621_v37  ;;  %v1654_v45 = vcombine.low %v1629_v38, %v1637_v39  ;;  %v1655_v46 = vcombine.high %v1629_v38, %v1637_v39 }
 0x2c5   : > { %8568 = vmatpush3.xpose.msk.msra.mxu1 %vm1966_vm2, %v1816_v41  ;;  %8578 = vmatpush3.xpose.msk.msra.mxu0 %vm1966_vm2, %v1818_v42  ;;  %v10353_v60 = vadd.f32 %v8566_v59, %v8246_v58  ;;  %v1520_v10 = vadd.f32 %v8246_v58, %v1519_v61 }
 0x2c6   : > { %8572 = vmatprep.subr.mxu1 %v9775_v28  ;;  %v1646_v48 = vrot.slane %v1638_v43, %v10297_v47  ;;  %v1662_v49 = vrot.slane %v1654_v45, %v10297_v47  ;;  %v1653_v50 = vrot.slane %v1639_v44, %v10297_v47  ;;  %v1669_v51 = vrot.slane %v1655_v46, %v10297_v47 }
 0x2c7   : > { %8587 = vmatprep.subr.mxu0 %v9775_v28 }
 0x2c8   : > { %v1670_v52 = vcombine.low %v1646_v48, %v1662_v49  ;;  %v1672_v53 = vcombine.low %v1653_v50, %v1669_v51  ;;  %v1671_v55 = vcombine.high %v1646_v48, %v1662_v49  ;;  %v1673_v57 = vcombine.high %v1653_v50, %v1669_v51 }
 0x2ca   : > { %8570 = vmatmul.mubr.msk.f32.vlgmr.msra.gmra.mxu1 %vm1966_vm2, %v1670_v52  ;;  %8580 = vmatmul.mubr.msk.f32.vlgmr.msra.gmra.mxu0 %vm1966_vm2, %v1672_v53 }
 0x2cb   : > { %8573 = vmatpush3.xpose.msk.msra.mxu1 %vm1966_vm2, %v1817_v54  ;;  %8574 = vmatprep.mubr.msk.f32.mxu1 %vm9776_vm1, %v9775_v28 }
 0x2cc   : > { %8582 = vmatprep.subr.mxu1 %v9775_v28  ;;  %8589 = vmatprep.mubr.msk.f32.mxu0 %vm9776_vm1, %v9775_v28 }
 0x2ce   : > { %8575 = vmatmul.mubr.msk.f32.vlgmr.msra.gmra.mxu1 %vm1966_vm2, %v1671_v55 }
 0x2cf   : > { %8583 = vmatpush3.xpose.msk.msra.mxu1 %vm1966_vm2, %v1819_v56  ;;  %8584 = vmatprep.mubr.msk.f32.mxu1 %vm9776_vm1, %v9775_v28 }
 0x2d0   : > { %8592 = vmatprep.subr.mxu1 %v9775_v28 }
 0x2d2   : > { %8585 = vmatmul.mubr.msk.f32.vlgmr.msra.gmra.mxu1 %vm1966_vm2, %v1673_v57 }
 0x2d3   : > { %8594 = vmatprep.mubr.msk.f32.mxu1 %vm9776_vm1, %v9775_v28 }
 0x38a   : > { %v2039_v62 = vpop.f32.mrf.mxu1  ;;  %v2191_v63 = vpop.f32.mrf.mxu0 }
 0x38b   : > { %v2271_v0 = vsel %vm1966_vm2, %v2039_v62, -inf  ;;  %v2277_v4 = vsel %vm1966_vm2, %v2191_v63, -inf }
 0x38c   : > { %v8581_v1 = vpop.f32.mrf.mxu0  ;;  %2272 = vmax.xlane.f32.xlu0 %v2271_v0  ;;  %v8571_v2 = vpop.f32.mrf.mxu1 }
 0x38e   : > { %v2115_v3 = vpop.f32.mrf.mxu1 }
 0x38f   : > { %v2274_v5 = vsel %vm1966_vm2, %v2115_v3, -inf }
 0x390   : > { %2278 = vmax.xlane.f32.xlu0 %v2277_v4  ;;  %2275 = vmax.xlane.f32.xlu1 %v2274_v5  ;;  %v8576_v6 = vpop.f32.mrf.mxu1 }
 0x392   : > { %v2267_v7 = vpop.f32.mrf.mxu1 }
 0x393   : > { %v2280_v8 = vsel %vm1966_vm2, %v2267_v7, -inf }
 0x394   : > { %2281 = vmax.xlane.f32.xlu0 %v2280_v8  ;;  %v8586_v9 = vpop.f32.mrf.mxu1 }
 0x3a1   : > { %1821 = vrot.lane.b32.xlu1 %v1520_v10, %s9772_s6 }
 0x3a5   : > { %1827 = vrot.lane.b32.xlu1 %v1520_v10, %s9773_s17 }
 0x3a9   : > { %2907 = vrot.lane.b32.xlu1 %v10278_v21, %s9772_s6 }
 0x3aa   : > { %1824 = vrot.lane.b32.xlu0 %v1520_v10, %s9774_s21 }
 0x3ad   : > { %2913 = vrot.lane.b32.xlu1 %v10278_v21, %s9773_s17 }
 0x3ae   : > { %2910 = vrot.lane.b32.xlu0 %v10278_v21, %s9774_s21 }
 0x3b2   : > { %2761 = vrot.lane.b32.xlu0 %v10272_v16, %s9772_s6 }
 0x415   : > { %v2273_v11 = vpop.xlane.xlu0 %2272 }
 0x416   : > { %v2283_v12 = vsub.f32 %v2039_v62, %v2273_v11 }
 0x418   : > { %v2287_v13 = vmul.f32 1.442695, %v2283_v12 }
 0x419   : > { %v2279_v14 = vpop.xlane.xlu0 %2278  ;;  %v2276_v15 = vpop.xlane.xlu1 %2275 }
 0x41a   : > { %9095 = vpow2.f32 %v2287_v13  ;;  %v2285_v17 = vsub.f32 %v2191_v63, %v2279_v14  ;;  %v2284_v18 = vsub.f32 %v2115_v3, %v2276_v15 }
 0x41c   : > { %v2291_v19 = vmul.f32 1.442695, %v2285_v17  ;;  %v2289_v20 = vmul.f32 1.442695, %v2284_v18 }
 0x41d   : > { %v1822_v22 = vpop.permute.xlu1 %1821  ;;  %v2282_v23 = vpop.xlane.xlu0 %2281 }
 0x41e   : > { %9097 = vpow2.f32 %v2291_v19  ;;  %v2286_v24 = vsub.f32 %v2267_v7, %v2282_v23 }
 0x41f   : > { %9099 = vpow2.f32 %v2289_v20 }
 0x420   : > { %v2293_v25 = vmul.f32 1.442695, %v2286_v24 }
 0x421   : > { %v1828_v26 = vpop.permute.xlu1 %1827  ;;  %v1825_v27 = vpop.permute.xlu0 %1824 }
 0x422   : > { %9101 = vpow2.f32 %v2293_v25  ;;  %v1846_v29 = vcombine.low %v1822_v22, %v1828_v26  ;;  %v1847_v30 = vcombine.high %v1822_v22, %v1828_v26  ;;  %v1830_v31 = vcombine.low %v1520_v10, %v1825_v27 }
 0x423   : > { %v1831_v32 = vcombine.high %v1520_v10, %v1825_v27 }
 0x424   : > { %v1854_v33 = vrot.slane %v1846_v29, %v10295_v40  ;;  %v1861_v34 = vrot.slane %v1847_v30, %v10295_v40  ;;  %v1838_v35 = vrot.slane %v1830_v31, %v10295_v40 }
 0x425   : > { %v1845_v36 = vrot.slane %v1831_v32, %v10295_v40  ;;  %v2908_v12 = vpop.permute.xlu1 %2907  ;;  %v2911_v14 = vpop.permute.xlu0 %2910 }
 0x426   : > { %v1862_v37 = vcombine.low %v1838_v35, %v1854_v33  ;;  %v1863_v38 = vcombine.high %v1838_v35, %v1854_v33  ;;  %v2916_v18 = vcombine.low %v10278_v21, %v2911_v14  ;;  %v2917_v19 = vcombine.high %v10278_v21, %v2911_v14 }
 0x427   : > { %v10374_v39 = vpop.eup %9095  ;;  %v1878_v41 = vcombine.low %v1845_v36, %v1861_v34  ;;  %v1879_v42 = vcombine.high %v1845_v36, %v1861_v34 }
 0x428   : > { %v1870_v43 = vrot.slane %v1862_v37, %v10297_v47  ;;  %v1877_v44 = vrot.slane %v1863_v38, %v10297_v47  ;;  %v2295_v48 = vsel %vm1966_vm2, %v10374_v39, 0.0  ;;  %v2924_v23 = vrot.slane %v2916_v18, %v10295_v40 }
 0x429   : > { %v1886_v45 = vrot.slane %v1878_v41, %v10297_v47  ;;  %v1893_v46 = vrot.slane %v1879_v42, %v10297_v47  ;;  %2296 = vadd.xlane.f32.xlu1 %v2295_v48  ;;  %v2914_v13 = vpop.permute.xlu1 %2913  ;;  %v2931_v24 = vrot.slane %v2917_v19, %v10295_v40  ;;  %v2762_v34 = vpop.permute.xlu0 %2761 }
 0x42a   : > { %v1898_v49 = vcombine.low %v1870_v43, %v1877_v44  ;;  %v8253_v50 = vcombine.high %v1870_v43, %v1877_v44  ;;  %v2932_v15 = vcombine.low %v2908_v12, %v2914_v13  ;;  %v2933_v17 = vcombine.high %v2908_v12, %v2914_v13 }
 0x42b   : > { %v10382_v51 = vpop.eup %9097  ;;  %v1914_v52 = vcombine.low %v1886_v45, %v1893_v46  ;;  %v8254_v53 = vcombine.high %v1886_v45, %v1893_v46 }
 0x42c   : > { %v10384_v54 = vpop.eup %9099  ;;  %v1905_v55 = vrot.slane %v1898_v49, %v10295_v40  ;;  %v1913_v56 = vrot.slane %v8253_v50, %v10295_v40  ;;  %v2301_v59 = vsel %vm1966_vm2, %v10382_v51, 0.0  ;;  %v2940_v20 = vrot.slane %v2932_v15, %v10295_v40 }
 0x42d   : > { %v1921_v57 = vrot.slane %v1914_v52, %v10295_v40  ;;  %v1929_v58 = vrot.slane %v8254_v53, %v10295_v40  ;;  %v2298_v61 = vsel %vm1966_vm2, %v10384_v54, 0.0  ;;  %2302 = vadd.xlane.f32.xlu1 %v2301_v59  ;;  %v2947_v22 = vrot.slane %v2933_v17, %v10295_v40 }
 0x42e   : > { %2299 = vadd.xlane.f32.xlu0 %v2298_v61  ;;  %v1930_v63 = vcombine.low %v1905_v55, %v1913_v56  ;;  %v1931_v1 = vcombine.high %v1905_v55, %v1913_v56  ;;  %v2948_v25 = vcombine.low %v2924_v23, %v2940_v20  ;;  %v2949_v26 = vcombine.high %v2924_v23, %v2940_v20 }
 0x42f   : > { %v10394_v62 = vpop.eup %9101  ;;  %v1946_v0 = vcombine.low %v1921_v57, %v1929_v58  ;;  %v1947_v2 = vcombine.high %v1921_v57, %v1929_v58  ;;  %v2964_v27 = vcombine.low %v2931_v24, %v2947_v22  ;;  %v2965_v29 = vcombine.high %v2931_v24, %v2947_v22 }
 0x430   : > { %v2304_v3 = vsel %vm1966_vm2, %v10394_v62, 0.0  ;;  %v1938_v4 = vrot.slane %v1930_v63, %v10297_v47  ;;  %v10401_v6 = vrot.slane %v1931_v1, %v10297_v47  ;;  %v2956_v30 = vrot.slane %v2948_v25, %v10297_v47 }
 0x431   : > { %v1954_v5 = vrot.slane %v1946_v0, %v10297_v47  ;;  %v10404_v9 = vrot.slane %v1947_v2, %v10297_v47  ;;  %v2963_v31 = vrot.slane %v2949_v26, %v10297_v47  ;;  %v2972_v32 = vrot.slane %v2964_v27, %v10297_v47 }
 0x432   : > { %2305 = vadd.xlane.f32.xlu0 %v2304_v3  ;;  %v2979_v21 = vrot.slane %v2965_v29, %v10297_v47 }
 0x433   : > { %v1962_v7 = vcombine.low %v1938_v4, %v1954_v5  ;;  %v1963_v8 = vcombine.high %v1938_v4, %v1954_v5  ;;  %v1964_v10 = vcombine.low %v10401_v6, %v10404_v9  ;;  %v1965_v11 = vcombine.high %v10401_v6, %v10404_v9 }
 0x434   : > { %v2984_v35 = vcombine.low %v2956_v30, %v2963_v31  ;;  %v8271_v36 = vcombine.high %v2956_v30, %v2963_v31  ;;  %v3000_v37 = vcombine.low %v2972_v32, %v2979_v21  ;;  %v8272_v38 = vcombine.high %v2972_v32, %v2979_v21 }
 0x435   : > { %8588 = vmatpush3.msra.mxu0 %v1962_v7  ;;  %8593 = vmatpush3.msra.mxu1 %v1963_v8 }
 0x436   : > { %8597 = vmatprep.subr.mxu0 %v9775_v28  ;;  %8602 = vmatprep.subr.mxu1 %v9775_v28  ;;  %v10427_v43 = vrot.slane %v2984_v35, %v10295_v40  ;;  %v10430_v44 = vrot.slane %v8271_v36, %v10295_v40  ;;  %v10433_v45 = vrot.slane %v3000_v37, %v10295_v40 }
 0x437   : > { %v10436_v46 = vrot.slane %v8272_v38, %v10295_v40 }
 0x438   : > { %v3016_v50 = vcombine.low %v10427_v43, %v10430_v44  ;;  %v3017_v25 = vcombine.high %v10427_v43, %v10430_v44 }
 0x439   : > { %v3032_v52 = vcombine.low %v10433_v45, %v10436_v46  ;;  %v3033_v26 = vcombine.high %v10433_v45, %v10436_v46 }
 0x43a   : > { %v3024_v63 = vrot.slane %v3016_v50, %v10297_v47  ;;  %v3031_v36 = vrot.slane %v3017_v25, %v10297_v47 }
 0x43b   : > { %v3040_v0 = vrot.slane %v3032_v52, %v10297_v47  ;;  %v3047_v6 = vrot.slane %v3033_v26, %v10297_v47 }
 0x43d   : > { %v3048_v14 = vcombine.low %v3024_v63, %v3040_v0  ;;  %v3049_v32 = vcombine.high %v3024_v63, %v3040_v0  ;;  %v3051_v43 = vcombine.high %v3031_v36, %v3047_v6 }
 0x43e   : > { %2764 = vrot.lane.b32.xlu1 %v10272_v16, %s9774_s21 }
 0x448   : > { %2767 = vrot.lane.b32.xlu0 %v10272_v16, %s9773_s17 }
 0x4b2   : > { %v2297_v33 = vpop.xlane.xlu1 %2296 }
 0x4b3   : > { %9103 = vrcp.f32 %v2297_v33 }
 0x4b6   : > { %v2303_v41 = vpop.xlane.xlu1 %2302 }
 0x4b7   : > { %9105 = vrcp.f32 %v2303_v41  ;;  %v2300_v42 = vpop.xlane.xlu0 %2299 }
 0x4b8   : > { %9107 = vrcp.f32 %v2300_v42  ;;  %v3050_v42 = vcombine.low %v3031_v36, %v3047_v6 }
 0x4ba   : > { %v2765_v48 = vpop.permute.xlu1 %2764 }
 0x4bb   : > { %v2306_v49 = vpop.xlane.xlu0 %2305  ;;  %v2770_v53 = vcombine.low %v10272_v16, %v2765_v48  ;;  %v2771_v55 = vcombine.high %v10272_v16, %v2765_v48 }
 0x4bc   : > { %9109 = vrcp.f32 %v2306_v49 }
 0x4bd   : > { %v2778_v1 = vrot.slane %v2770_v53, %v10295_v40  ;;  %v2785_v2 = vrot.slane %v2771_v55, %v10295_v40 }
 0x4bf   : > { %v2768_v56 = vpop.permute.xlu0 %2767 }
 0x4c0   : > { %v9104_v57 = vpop.eup %9103  ;;  %v2786_v58 = vcombine.low %v2762_v34, %v2768_v56  ;;  %v2787_v59 = vcombine.high %v2762_v34, %v2768_v56 }
 0x4c1   : > { %v2308_v61 = vmul.f32 %v9104_v57, %v10374_v39 }
 0x4c2   : > { %v2794_v3 = vrot.slane %v2786_v58, %v10295_v40  ;;  %v2801_v4 = vrot.slane %v2787_v59, %v10295_v40 }
 0x4c3   : > { %8590 = vmatmul.mubr.msk.f32.vlgmr.msra.gmra.mxu0 %vm1966_vm2, %v2308_v61 }
 0x4c4   : > { %v9106_v16 = vpop.eup %9105  ;;  %v2802_v5 = vcombine.low %v2778_v1, %v2794_v3  ;;  %v2803_v7 = vcombine.high %v2778_v1, %v2794_v3  ;;  %v2818_v8 = vcombine.low %v2785_v2, %v2801_v4  ;;  %v2819_v12 = vcombine.high %v2785_v2, %v2801_v4  ;;  %8598 = vmatpush3.msra.mxu0 %v1964_v10 }
 0x4c5   : > { %v9108_v39 = vpop.eup %9107  ;;  %8599 = vmatprep.mubr.msk.f32.mxu0 %vm9776_vm1, %v9775_v28  ;;  %8607 = vmatprep.subr.mxu0 %v9775_v28  ;;  %v2312_v13 = vmul.f32 %v9106_v16, %v10382_v51 }
 0x4c6   : > { %v2810_v15 = vrot.slane %v2802_v5, %v10297_v47  ;;  %v2817_v17 = vrot.slane %v2803_v7, %v10297_v47  ;;  %v2826_v18 = vrot.slane %v2818_v8, %v10297_v47  ;;  %v2833_v19 = vrot.slane %v2819_v12, %v10297_v47 }
 0x4c7   : > { %v2310_v20 = vmul.f32 %v9108_v39, %v10384_v54  ;;  %8600 = vmatmul.mubr.msk.f32.vlgmr.msra.gmra.mxu0 %vm1966_vm2, %v2312_v13 }
 0x4c8   : > { %v2838_v10 = vcombine.low %v2810_v15, %v2817_v17  ;;  %v8269_v22 = vcombine.high %v2810_v15, %v2817_v17  ;;  %v2854_v23 = vcombine.low %v2826_v18, %v2833_v19  ;;  %v8270_v24 = vcombine.high %v2826_v18, %v2833_v19  ;;  %8608 = vmatpush3.xpose.msk.msra.mxu0 %vm1966_vm2, %v3048_v14 }
 0x4c9   : > { %v9110_v51 = vpop.eup %9109  ;;  %8595 = vmatmul.mubr.msk.f32.vlgmr.msra.gmra.mxu1 %vm1966_vm2, %v2310_v20  ;;  %8609 = vmatprep.mubr.msk.f32.mxu0 %vm9776_vm1, %v9775_v28 }
 0x4ca   : > { %v2845_v54 = vrot.slane %v2838_v10, %v10295_v40  ;;  %v2853_v27 = vrot.slane %v8269_v22, %v10295_v40  ;;  %v2861_v29 = vrot.slane %v2854_v23, %v10295_v40  ;;  %v2869_v30 = vrot.slane %v8270_v24, %v10295_v40  ;;  %8603 = vmatpush3.msra.mxu1 %v1965_v11 }
 0x4cb   : > { %8604 = vmatprep.mubr.msk.f32.mxu1 %vm9776_vm1, %v9775_v28  ;;  %8612 = vmatprep.subr.mxu1 %v9775_v28  ;;  %v2314_v31 = vmul.f32 %v9110_v51, %v10394_v62 }
 0x4cc   : > { %v2870_v21 = vcombine.low %v2845_v54, %v2853_v27  ;;  %v2871_v33 = vcombine.high %v2845_v54, %v2853_v27  ;;  %v2886_v34 = vcombine.low %v2861_v29, %v2869_v30  ;;  %v2887_v35 = vcombine.high %v2861_v29, %v2869_v30  ;;  %8617 = vmatprep.subr.mxu0 %v9775_v28 }
 0x4cd   : > { %8605 = vmatmul.mubr.msk.f32.vlgmr.msra.gmra.mxu1 %vm1966_vm2, %v2314_v31 }
 0x4ce   : > { %8613 = vmatpush3.xpose.msk.msra.mxu1 %vm1966_vm2, %v3049_v32  ;;  %8614 = vmatprep.mubr.msk.f32.mxu1 %vm9776_vm1, %v9775_v28  ;;  %v2878_v62 = vrot.slane %v2870_v21, %v10297_v47  ;;  %v2894_v9 = vrot.slane %v2886_v34, %v10297_v47  ;;  %v2885_v38 = vrot.slane %v2871_v33, %v10297_v47 }
 0x4cf   : > { %8622 = vmatprep.subr.mxu1 %v9775_v28  ;;  %v2901_v41 = vrot.slane %v2887_v35, %v10297_v47 }
 0x4d0   : > { %v2902_v11 = vcombine.low %v2878_v62, %v2894_v9  ;;  %v2903_v37 = vcombine.high %v2878_v62, %v2894_v9 }
 0x4d1   : > { %v2904_v44 = vcombine.low %v2885_v38, %v2901_v41  ;;  %v2905_v45 = vcombine.high %v2885_v38, %v2901_v41 }
 0x4d2   : > { %8610 = vmatmul.mubr.msk.f32.vlgmr.msra.gmra.mxu0 %vm1966_vm2, %v2902_v11  ;;  %8615 = vmatmul.mubr.msk.f32.vlgmr.msra.gmra.mxu1 %vm1966_vm2, %v2903_v37 }
 0x4d3   : > { %8618 = vmatpush3.xpose.msk.msra.mxu0 %vm1966_vm2, %v3050_v42  ;;  %8623 = vmatpush3.xpose.msk.msra.mxu1 %vm1966_vm2, %v3051_v43 }
 0x4d4   : > { %8619 = vmatprep.mubr.msk.f32.mxu0 %vm9776_vm1, %v9775_v28  ;;  %8624 = vmatprep.mubr.msk.f32.mxu1 %vm9776_vm1, %v9775_v28 }
 0x4d5   : > { %8627 = vmatprep.subr.mxu0 %v9775_v28  ;;  %8632 = vmatprep.subr.mxu1 %v9775_v28 }
 0x4d6   : > { %8620 = vmatmul.mubr.msk.f32.vlgmr.msra.gmra.mxu0 %vm1966_vm2, %v2904_v44  ;;  %8625 = vmatmul.mubr.msk.f32.vlgmr.msra.gmra.mxu1 %vm1966_vm2, %v2905_v45 }
 0x4d7   : > { %8629 = vmatprep.mubr.msk.f32.mxu0 %vm9776_vm1, %v9775_v28  ;;  %8634 = vmatprep.mubr.msk.f32.mxu1 %vm9776_vm1, %v9775_v28 }
 0x583   : > { %v2384_v46 = vpop.f32.mrf.mxu0 }
 0x585   : > { %v8591_v48 = vpop.f32.mrf.mxu0 }
 0x587   : > { %v2530_v49 = vpop.f32.mrf.mxu0 }
 0x588   : > { %v2607_v50 = vcombine.low %v2384_v46, %v2530_v49  ;;  %v2608_v52 = vcombine.high %v2384_v46, %v2530_v49 }
 0x589   : > { %v2457_v53 = vpop.f32.mrf.mxu1  ;;  %v8601_v55 = vpop.f32.mrf.mxu0 }
 0x58a   : > { %v2615_v63 = vrot.slane %v2607_v50, %v10295_v40  ;;  %v2622_v0 = vrot.slane %v2608_v52, %v10295_v40 }
 0x58b   : > { %v8596_v56 = vpop.f32.mrf.mxu1 }
 0x58d   : > { %v2603_v57 = vpop.f32.mrf.mxu1 }
 0x58e   : > { %v2623_v58 = vcombine.low %v2457_v53, %v2603_v57  ;;  %v2624_v59 = vcombine.high %v2457_v53, %v2603_v57 }
 0x58f   : > { %v8606_v61 = vpop.f32.mrf.mxu1 }
 0x590   : > { %v2631_v1 = vrot.slane %v2623_v58, %v10295_v40  ;;  %v2638_v2 = vrot.slane %v2624_v59, %v10295_v40 }
 0x592   : > { %v2639_v3 = vcombine.low %v2615_v63, %v2631_v1  ;;  %v2640_v4 = vcombine.high %v2615_v63, %v2631_v1  ;;  %v2655_v16 = vcombine.low %v2622_v0, %v2638_v2  ;;  %v2656_v5 = vcombine.high %v2622_v0, %v2638_v2  ;;  %v3270_v7 = vpop.f32.mrf.mxu0  ;;  %v3346_v8 = vpop.f32.mrf.mxu1 }
 0x593   : > { %v3502_v12 = vsel %vm1966_vm2, %v3270_v7, -inf  ;;  %v3505_v39 = vsel %vm1966_vm2, %v3346_v8, -inf }
 0x594   : > { %v2647_v13 = vrot.slane %v2639_v3, %v10297_v47  ;;  %v2654_v14 = vrot.slane %v2640_v4, %v10297_v47  ;;  %v2663_v15 = vrot.slane %v2655_v16, %v10297_v47  ;;  %v2670_v17 = vrot.slane %v2656_v5, %v10297_v47  ;;  %3503 = vmax.xlane.f32.xlu1 %v3502_v12  ;;  %v8611_v18 = vpop.f32.mrf.mxu0  ;;  %v8616_v19 = vpop.f32.mrf.mxu1 }
 0x595   : > { %3506 = vmax.xlane.f32.xlu0 %v3505_v39 }
 0x596   : > { %v2675_v20 = vcombine.low %v2647_v13, %v2654_v14  ;;  %v8267_v10 = vcombine.high %v2647_v13, %v2654_v14  ;;  %v2691_v22 = vcombine.low %v2663_v15, %v2670_v17  ;;  %v8268_v23 = vcombine.high %v2663_v15, %v2670_v17  ;;  %v3422_v24 = vpop.f32.mrf.mxu0  ;;  %v3498_v51 = vpop.f32.mrf.mxu1 }
 0x597   : > { %v3508_v25 = vsel %vm1966_vm2, %v3422_v24, -inf  ;;  %v3511_v26 = vsel %vm1966_vm2, %v3498_v51, -inf }
 0x598   : > { %v8621_v54 = vpop.f32.mrf.mxu0  ;;  %3512 = vmax.xlane.f32.xlu1 %v3511_v26  ;;  %v8626_v27 = vpop.f32.mrf.mxu1  ;;  %v2682_v29 = vrot.slane %v2675_v20, %v10295_v40  ;;  %v2690_v30 = vrot.slane %v8267_v10, %v10295_v40  ;;  %v2698_v31 = vrot.slane %v2691_v22, %v10295_v40  ;;  %v2706_v32 = vrot.slane %v8268_v23, %v10295_v40 }
 0x599   : > { %3509 = vmax.xlane.f32.xlu0 %v3508_v25 }
 0x59a   : > { %v2707_v21 = vcombine.low %v2682_v29, %v2690_v30  ;;  %v2723_v33 = vcombine.low %v2698_v31, %v2706_v32  ;;  %v2708_v34 = vcombine.high %v2682_v29, %v2690_v30  ;;  %v2724_v35 = vcombine.high %v2698_v31, %v2706_v32 }
 0x59c   : > { %v10529_v36 = vrot.slane %v2707_v21, %v10297_v47  ;;  %v10532_v6 = vrot.slane %v2723_v33, %v10297_v47  ;;  %v2722_v62 = vrot.slane %v2708_v34, %v10297_v47  ;;  %v2738_v9 = vrot.slane %v2724_v35, %v10297_v47 }
 0x59e   : > { %v2740_v11 = vcombine.high %v10529_v36, %v10532_v6  ;;  %v2741_v37 = vcombine.low %v2722_v62, %v2738_v9  ;;  %v2742_v38 = vcombine.high %v2722_v62, %v2738_v9  ;;  %v2739_v41 = vcombine.low %v10529_v36, %v10532_v6  ;;  %v3992_v36 = vld [vmem:[#allocation16 + $0x18] sm:$0xff] }
 0x61d   : > { %v3504_v42 = vpop.xlane.xlu1 %3503 }
 0x61e   : > { %v3514_v43 = vsub.f32 %v3270_v7, %v3504_v42  ;;  %v3507_v44 = vpop.xlane.xlu0 %3506 }
 0x61f   : > { %v3515_v45 = vsub.f32 %v3346_v8, %v3507_v44 }
 0x620   : > { %v3518_v46 = vmul.f32 1.442695, %v3514_v43 }
 0x621   : > { %v3520_v48 = vmul.f32 1.442695, %v3515_v45  ;;  %v3513_v61 = vpop.xlane.xlu1 %3512 }
 0x622   : > { %9111 = vpow2.f32 %v3518_v46  ;;  %v3510_v49 = vpop.xlane.xlu0 %3509  ;;  %v3517_v63 = vsub.f32 %v3498_v51, %v3513_v61 }
 0x623   : > { %9113 = vpow2.f32 %v3520_v48  ;;  %v3516_v50 = vsub.f32 %v3422_v24, %v3510_v49 }
 0x624   : > { %v3524_v0 = vmul.f32 1.442695, %v3517_v63 }
 0x625   : > { %v3522_v52 = vmul.f32 1.442695, %v3516_v50 }
 0x627   : > { %9115 = vpow2.f32 %v3522_v52 }
 0x628   : > { %9117 = vpow2.f32 %v3524_v0 }
 0x62f   : > { %v10540_v53 = vpop.eup %9111 }
 0x630   : > { %v10542_v55 = vpop.eup %9113  ;;  %v3526_v56 = vsel %vm1966_vm2, %v10540_v53, 0.0 }
 0x631   : > { %3527 = vadd.xlane.f32.xlu0 %v3526_v56  ;;  %v3529_v57 = vsel %vm1966_vm2, %v10542_v55, 0.0 }
 0x632   : > { %3530 = vadd.xlane.f32.xlu1 %v3529_v57 }
 0x634   : > { %v10548_v58 = vpop.eup %9115 }
 0x635   : > { %v3532_v59 = vsel %vm1966_vm2, %v10548_v58, 0.0  ;;  %v10557_v1 = vpop.eup %9117 }
 0x636   : > { %3533 = vadd.xlane.f32.xlu0 %v3532_v59  ;;  %v3535_v2 = vsel %vm1966_vm2, %v10557_v1, 0.0 }
 0x643   : > { %3056 = vrot.lane.b32.xlu1 %v10353_v60, %s9774_s21 }
 0x64c   : > { %3053 = vrot.lane.b32.xlu0 %v10353_v60, %s9772_s6 }
 0x650   : > { %2744 = vrot.lane.b32.xlu0 %v2740_v11, %s9779_s7 }
 0x667   : > { %3536 = vadd.xlane.f32.xlu1 %v3535_v2 }
 0x678   : > { %3059 = vrot.lane.b32.xlu1 %v10353_v60, %s9773_s17 }
 0x67c   : > { %2748 = vrot.lane.b32.xlu1 %v2741_v37, %s9780_s20 }
 0x680   : > { %2752 = vrot.lane.b32.xlu1 %v2742_v38, %s9781_s19 }
 0x6ba   : > { %v3528_v4 = vpop.xlane.xlu0 %3527 }
 0x6bb   : > { %v3531_v3 = vpop.xlane.xlu1 %3530  ;;  %9119 = vrcp.f32 %v3528_v4 }
 0x6bc   : > { %9121 = vrcp.f32 %v3531_v3 }
 0x6bf   : > { %v3057_v16 = vpop.permute.xlu1 %3056  ;;  %v3534_v5 = vpop.xlane.xlu0 %3533 }
 0x6c0   : > { %v3062_v8 = vcombine.low %v10353_v60, %v3057_v16  ;;  %v3063_v12 = vcombine.high %v10353_v60, %v3057_v16  ;;  %9123 = vrcp.f32 %v3534_v5 }
 0x6c2   : > { %v3070_v17 = vrot.slane %v3062_v8, %v10295_v40  ;;  %v3077_v18 = vrot.slane %v3063_v12, %v10295_v40 }
 0x6c3   : > { %v3054_v39 = vpop.permute.xlu0 %3053 }
 0x6c7   : > { %v2745_v57 = vpop.permute.xlu0 %2744 }
 0x6c8   : > { %v9120_v11 = vpop.eup %9119 }
 0x6c9   : > { %v9122_v37 = vpop.eup %9121  ;;  %v3539_v50 = vmul.f32 %v9120_v11, %v10540_v53  ;;  %v2755_v53 = vsel %vm1966_vm2, %v2739_v41, %v2745_v57 }
 0x6ca   : > { %v3541_v52 = vmul.f32 %v9122_v37, %v10542_v55 }
 0x6cd   : > { %v9124_v46 = vpop.eup %9123 }
 0x6ce   : > { %v3543_v55 = vmul.f32 %v9124_v46, %v10548_v58 }
 0x6f0   : > { %v3537_v7 = vpop.xlane.xlu1 %3536 }
 0x6f1   : > { %9125 = vrcp.f32 %v3537_v7 }
 0x6f4   : > { %v3060_v13 = vpop.permute.xlu1 %3059 }
 0x6f5   : > { %v3078_v14 = vcombine.low %v3054_v39, %v3060_v13  ;;  %v3079_v15 = vcombine.high %v3054_v39, %v3060_v13 }
 0x6f7   : > { %v3086_v19 = vrot.slane %v3078_v14, %v10295_v40  ;;  %v3093_v20 = vrot.slane %v3079_v15, %v10295_v40 }
 0x6f8   : > { %v2749_v38 = vpop.permute.xlu1 %2748 }
 0x6f9   : > { %v3094_v10 = vcombine.low %v3070_v17, %v3086_v19  ;;  %v3095_v22 = vcombine.high %v3070_v17, %v3086_v19  ;;  %v3110_v23 = vcombine.low %v3077_v18, %v3093_v20  ;;  %v3111_v24 = vcombine.high %v3077_v18, %v3093_v20 }
 0x6fa   : > { %v2757_v2 = vsel %vm2756_vm3, %v2755_v53, %v2749_v38 }
 0x6fb   : > { %v3102_v60 = vrot.slane %v3094_v10, %v10297_v47  ;;  %v3109_v51 = vrot.slane %v3095_v22, %v10297_v47  ;;  %v3118_v25 = vrot.slane %v3110_v23, %v10297_v47  ;;  %v3125_v26 = vrot.slane %v3111_v24, %v10297_v47  ;;  %v3991_v23 = vld [vmem:[#allocation16 + $0x10] sm:$0xff]  ;;  %v3990_v24 = vld [vmem:[#allocation16 + $0x8] sm:$0xff] }
 0x6fc   : > { %v2753_v63 = vpop.permute.xlu1 %2752 }
 0x6fd   : > { %v3130_v54 = vcombine.low %v3102_v60, %v3109_v51  ;;  %v8273_v27 = vcombine.high %v3102_v60, %v3109_v51  ;;  %v3146_v29 = vcombine.low %v3118_v25, %v3125_v26  ;;  %v8274_v30 = vcombine.high %v3118_v25, %v3125_v26 }
 0x6fe   : > { %v9126_v56 = vpop.eup %9125  ;;  %v2759_v3 = vsel %vm2758_vm4, %v2757_v2, %v2753_v63  ;;  %v9171_v2 = vld [vmem:[%s10258_s2 + $0x8] sm:$0xff] }
 0x6ff   : > { %v3137_v31 = vrot.slane %v3130_v54, %v10295_v40  ;;  %v3145_v32 = vrot.slane %v8273_v27, %v10295_v40  ;;  %v3153_v21 = vrot.slane %v3146_v29, %v10295_v40  ;;  %v3161_v33 = vrot.slane %v8274_v30, %v10295_v40 }
 0x700   : > { %v3545_v0 = vmul.f32 %v9126_v56, %v10557_v1 }
 0x701   : > { %v3162_v34 = vcombine.low %v3137_v31, %v3145_v32  ;;  %v3178_v35 = vcombine.low %v3153_v21, %v3161_v33  ;;  %v3163_v62 = vcombine.high %v3137_v31, %v3145_v32  ;;  %v3179_v9 = vcombine.high %v3153_v21, %v3161_v33  ;;  %v3989_v31 = vld [vmem:[#allocation16] sm:$0xff] }
 0x703   : > { %v3170_v42 = vrot.slane %v3162_v34, %v10297_v47  ;;  %v3186_v43 = vrot.slane %v3178_v35, %v10297_v47  ;;  %v3177_v44 = vrot.slane %v3163_v62, %v10297_v47  ;;  %v3193_v45 = vrot.slane %v3179_v9, %v10297_v47 }
 0x705   : > { %v3194_v48 = vcombine.low %v3170_v42, %v3186_v43  ;;  %v3195_v49 = vcombine.high %v3170_v42, %v3186_v43  ;;  %v3196_v59 = vcombine.low %v3177_v44, %v3193_v45  ;;  %v3197_v61 = vcombine.high %v3177_v44, %v3193_v45 }
 0x707   : > { %8628 = vmatpush3.msra.mxu0 %v3194_v48  ;;  %8633 = vmatpush3.msra.mxu1 %v3195_v49 }
 0x708   : > { %8630 = vmatmul.mubr.msk.f32.vlgmr.msra.gmra.mxu0 %vm1966_vm2, %v3539_v50  ;;  %8635 = vmatmul.mubr.msk.f32.vlgmr.msra.gmra.mxu1 %vm1966_vm2, %v3541_v52 }
 0x709   : > { %8637 = vmatprep.subr.mxu0 %v9775_v28  ;;  %8642 = vmatprep.subr.mxu1 %v9775_v28 }
 0x70a   : > { %8638 = vmatpush3.msra.mxu0 %v3196_v59  ;;  %8643 = vmatpush3.msra.mxu1 %v3197_v61  ;;  %v8289_v61 = vld [vmem:[#allocation17] ss:$0 sm:$0xff] }
 0x70b   : > { %8639 = vmatprep.mubr.msk.f32.mxu0 %vm9776_vm1, %v9775_v28  ;;  %8644 = vmatprep.mubr.msk.f32.mxu1 %vm9776_vm1, %v9775_v28 }
 0x70c   : > { %8640 = vmatmul.mubr.msk.f32.vlgmr.msra.gmra.mxu0 %vm1966_vm2, %v3543_v55  ;;  %8645 = vmatmul.mubr.msk.f32.vlgmr.msra.gmra.mxu1 %vm1966_vm2, %v3545_v0 }
 0x70d   : > { %8655 = vmatprep.mubr.msk.f32.mxu0 %vm1268_vm0, %v2759_v3  ;;  %8647 = vmatprep.subr.mxu0 %v3992_v36 }
 0x70e   : > { %8648 = vmatpush3.msra.mxu0 %v3992_v36 }
 0x70f   : > { %8649 = vmatprep.subr.mxu0 %v3991_v23 }
 0x710   : > { %8650 = vmatpush3.msra.mxu0 %v3991_v23 }
 0x711   : > { %8651 = vmatprep.subr.mxu0 %v3990_v24 }
 0x712   : > { %8652 = vmatpush3.msra.mxu0 %v3990_v24 }
 0x713   : > { %8653 = vmatprep.subr.mxu0 %v3989_v31 }
 0x714   : > { %8654 = vmatpush3.msra.mxu0 %v3989_v31 }
 0x7c8   : > { %v3615_v6 = vpop.f32.mrf.mxu0  ;;  %v3688_v41 = vpop.f32.mrf.mxu1 }
 0x7ca   : > { %v8631_v58 = vpop.f32.mrf.mxu0  ;;  %v8636_v1 = vpop.f32.mrf.mxu1 }
 0x7cb   : > { %v4229_v1 = vld [vmem:[#allocation22 + $0x18] sm:$0xff] }
 0x7cc   : > { %v3761_v4 = vpop.f32.mrf.mxu0  ;;  %v3834_v16 = vpop.f32.mrf.mxu1  ;;  %8669 = vmatprep.subr.mxu0 %v4229_v1 }
 0x7cd   : > { %v3838_v5 = vcombine.low %v3615_v6, %v3761_v4  ;;  %v3839_v7 = vcombine.high %v3615_v6, %v3761_v4  ;;  %v3854_v8 = vcombine.low %v3688_v41, %v3834_v16  ;;  %v3855_v12 = vcombine.high %v3688_v41, %v3834_v16  ;;  %v9172_v6 = vld [vmem:[%s10258_s2] sm:$0xff]  ;;  %s11426_s2 = sld [smem:[#allocation64_spill]] }
 0x7ce   : > { %v8641_v39 = vpop.f32.mrf.mxu0  ;;  %v8646_v13 = vpop.f32.mrf.mxu1  ;;  %v4228_v4 = vld [vmem:[#allocation22 + $0x10] sm:$0xff] }
 0x7cf   : > { %v3846_v14 = vrot.slane %v3838_v5, %v10295_v40  ;;  %v3853_v15 = vrot.slane %v3839_v7, %v10295_v40  ;;  %v3862_v17 = vrot.slane %v3854_v8, %v10295_v40  ;;  %v3869_v18 = vrot.slane %v3855_v12, %v10295_v40  ;;  %v10636_v16 = vld [vmem:[%s10633_s1] sm:$0xff]  ;;  %v4227_v7 = vld [vmem:[#allocation22 + $0x8] sm:$0xff]  ;;  %v10641_v12 = vld [vmem:[%s10633_s1 + $0x8] sm:$0xff] }
 0x7d0   : > { %v1251_v5 = vld [vmem:[%s10215_s11] sm:$0xff]  ;;  %v1252_v39 = vld [vmem:[%s10215_s11 + $0x8] sm:$0xff] }
 0x7d1   : > { %v3870_v19 = vcombine.low %v3846_v14, %v3862_v17  ;;  %v3871_v20 = vcombine.high %v3846_v14, %v3862_v17  ;;  %v3886_v10 = vcombine.low %v3853_v15, %v3869_v18  ;;  %v3887_v22 = vcombine.high %v3853_v15, %v3869_v18  ;;  %v4226_v13 = vld [vmem:[#allocation22] sm:$0xff] }
 0x7d2   : > { %v4222_v8 = vadd.f32 %v1251_v5, %v10636_v16  ;;  %v4223_v14 = vadd.f32 %v1252_v39, %v10641_v12 }
 0x7d3   : > { %v3878_v60 = vrot.slane %v3870_v19, %v10297_v47  ;;  %v3885_v51 = vrot.slane %v3871_v20, %v10297_v47  ;;  %v3894_v25 = vrot.slane %v3886_v10, %v10297_v47  ;;  %v3901_v26 = vrot.slane %v3887_v22, %v10297_v47 }
 0x7d5   : > { %v3906_v54 = vcombine.low %v3878_v60, %v3885_v51  ;;  %v8287_v27 = vcombine.high %v3878_v60, %v3885_v51  ;;  %v3922_v29 = vcombine.low %v3894_v25, %v3901_v26  ;;  %v8288_v30 = vcombine.high %v3894_v25, %v3901_v26  ;;  %v4133_v51 = vld [vmem:[#allocation19 + $0x18] sm:$0xff]  ;;  %v4132_v25 = vld [vmem:[#allocation19 + $0x10] sm:$0xff]  ;;  %v4131_v26 = vld [vmem:[#allocation19 + $0x8] sm:$0xff] }
 0x7d6   : > { %8658 = vmatprep.subr.mxu1 %v4133_v51 }
 0x7d7   : > { %v3913_v32 = vrot.slane %v3906_v54, %v10295_v40  ;;  %v3921_v21 = vrot.slane %v8287_v27, %v10295_v40  ;;  %v3929_v33 = vrot.slane %v3922_v29, %v10295_v40  ;;  %v3937_v34 = vrot.slane %v8288_v30, %v10295_v40  ;;  %8659 = vmatpush3.msra.mxu1 %v4133_v51  ;;  %v4130_v54 = vld [vmem:[#allocation19] sm:$0xff] }
 0x7d8   : > { %8660 = vmatprep.subr.mxu1 %v4132_v25  ;;  %v10650_v27 = vld [vmem:[#allocation23] ss:$0 sm:$0xff] }
 0x7d9   : > { %v3939_v35 = vcombine.high %v3913_v32, %v3921_v21  ;;  %v3955_v62 = vcombine.high %v3929_v33, %v3937_v34  ;;  %v3938_v9 = vcombine.low %v3913_v32, %v3921_v21  ;;  %v3954_v11 = vcombine.low %v3929_v33, %v3937_v34  ;;  %8661 = vmatpush3.msra.mxu1 %v4132_v25 }
 0x7da   : > { %8662 = vmatprep.subr.mxu1 %v4131_v26 }
 0x7db   : > { %v3953_v37 = vrot.slane %v3939_v35, %v10297_v47  ;;  %v3969_v38 = vrot.slane %v3955_v62, %v10297_v47  ;;  %v3946_v42 = vrot.slane %v3938_v9, %v10297_v47  ;;  %v3962_v43 = vrot.slane %v3954_v11, %v10297_v47  ;;  %8663 = vmatpush3.msra.mxu1 %v4131_v26 }
 0x7dc   : > { %8664 = vmatprep.subr.mxu1 %v4130_v54 }
 0x7dd   : > { %v3973_v44 = vcombine.high %v3953_v37, %v3969_v38  ;;  %v3971_v45 = vcombine.high %v3946_v42, %v3962_v43  ;;  %v3970_v46 = vcombine.low %v3946_v42, %v3962_v43  ;;  %v3972_v48 = vcombine.low %v3953_v37, %v3969_v38  ;;  %8665 = vmatpush3.msra.mxu1 %v4130_v54  ;;  %v8292_v37 = vld [vmem:[%s11421_s3] ss:$0 sm:$0xff] }
 0x7de   : > { %v8293_v42 = vld [vmem:[%s11422_s23] ss:$0 sm:$0xff]  ;;  %s7886_s23 = scalar_lea.sflag [#allocation4], %s10201_s25 }
 0x7df   : > { %3983 = vrot.lane.b32.xlu1 %v3973_v44, %s9781_s19  ;;  %3975 = vrot.lane.b32.xlu0 %v3971_v45, %s9779_s7 }
 0x7e3   : > { %3979 = vrot.lane.b32.xlu0 %v3972_v48, %s9780_s20 }
 0x851   : > { %v3976_v49 = vpop.permute.xlu0 %3975  ;;  %v3984_v56 = vpop.permute.xlu1 %3983 }
 0x852   : > { %v3986_v50 = vsel %vm1966_vm2, %v3970_v46, %v3976_v49  ;;  %v9173_v49 = vld [vmem:[%s10207_s12] sm:$0xff] }
 0x855   : > { %v3980_v52 = vpop.permute.xlu0 %3979 }
 0x856   : > { %v3987_v57 = vsel %vm2756_vm3, %v3986_v50, %v3980_v52 }
 0x857   : > { %v3988_v59 = vsel %vm2758_vm4, %v3987_v57, %v3984_v56  ;;  %v9174_v56 = vld [vmem:[%s10207_s12 + $0x8] sm:$0xff]  ;;  %s11423_s12 = sld [smem:[#allocation56_spill]] }
 0x858   : > { %8656 = vmatmul.mubr.msk.f32.vlgmr.msra.gmra.mxu0 %vm1268_vm0, %v3988_v59 }
 0x859   : > { %8670 = vmatpush3.msra.mxu0 %v4229_v1  ;;  %8677 = vmatprep.mubr.msk.f32.mxu0 %vm1268_vm0, %v4222_v8 }
 0x85a   : > { %8671 = vmatprep.subr.mxu0 %v4228_v4 }
 0x85b   : > { %8672 = vmatpush3.msra.mxu0 %v4228_v4 }
 0x85c   : > { %8673 = vmatprep.subr.mxu0 %v4227_v7 }
 0x85d   : > { %8674 = vmatpush3.msra.mxu0 %v4227_v7 }
 0x85e   : > { %8675 = vmatprep.subr.mxu0 %v4226_v13 }
 0x85f   : > { %8676 = vmatpush3.msra.mxu0 %v4226_v13 }
 0x860   : > { %8678 = vmatmul.mubr.msk.f32.vlgmr.msra.gmra.mxu0 %vm1268_vm0, %v4223_v14  ;;  %8697 = vmatprep.subr.mxu0 %v9775_v28 }
 0x918   : > { %v8657_v63 = vpop.f32.mrf.mxu0 }
 0x919   : > { %v4078_v53 = vadd.f32 %v8657_v63, %v8289_v61 }
 0x91a   : > { %v4072_v55 = vpop.f32.mrf.mxu0 }
 0x91b   : > { %v4073_v0 = vadd.f32 %v8289_v61, %v4072_v55  ;;  %v4082_v3 = vadd.f32 %v9171_v2, %v4078_v53 }
 0x91d   : > { %v4088_v36 = vsel %vm1268_vm0, %v4082_v3, 0.0  ;;  %v4081_v41 = vadd.f32 %v9172_v6, %v4073_v0 }
 0x91e   : > { %4089 = vadd.xlane.f32.xlu1 %v4088_v36 }
 0x91f   : > { %v4085_v58 = vsel %vm1268_vm0, %v4081_v41, 0.0 }
 0x920   : > { %4086 = vadd.xlane.f32.xlu0 %v4085_v58  ;;  %v8679_v29 = vpop.f32.mrf.mxu0 }
 0x921   : > { %v4321_v30 = vadd.f32 %v8679_v29, %v10650_v27 }
 0x922   : > { %v4315_v31 = vpop.f32.mrf.mxu0 }
 0x923   : > { %v4316_v32 = vadd.f32 %v10650_v27, %v4315_v31 }
 0x92f   : > { %4592 = vrot.lane.b32.xlu1 %v4321_v30, %s9772_s6 }
 0x933   : > { %4604 = vrot.lane.b32.xlu1 %v4321_v30, %s9773_s17 }
 0x937   : > { %4590 = vrot.lane.b32.xlu1 %v4316_v32, %s9772_s6 }
 0x93b   : > { %4602 = vrot.lane.b32.xlu1 %v4316_v32, %s9773_s17 }
 0x9a7   : > { %v4090_v15 = vpop.xlane.xlu1 %4089 }
 0x9a8   : > { %v4093_v17 = vmul.f32 0.03125, %v4090_v15 }
 0x9a9   : > { %v4087_v18 = vpop.xlane.xlu0 %4086 }
 0x9aa   : > { %v4092_v19 = vmul.f32 0.03125, %v4087_v18  ;;  %v4095_v20 = vsub.f32 %v4082_v3, %v4093_v17 }
 0x9ab   : > { %v4593_v59 = vpop.permute.xlu1 %4592 }
 0x9ac   : > { %v4094_v10 = vsub.f32 %v4081_v41, %v4092_v19  ;;  %v4097_v24 = vmul.f32 %v4095_v20, %v4095_v20 }
 0x9ae   : > { %v4096_v22 = vmul.f32 %v4094_v10, %v4094_v10  ;;  %v4101_v60 = vsel %vm1268_vm0, %v4097_v24, 0.0 }
 0x9af   : > { %v4605_v55 = vpop.permute.xlu1 %4604 }
 0x9b0   : > { %v4098_v23 = vsel %vm1268_vm0, %v4096_v22, 0.0  ;;  %v4692_v0 = vcombine.low %v4593_v59, %v4605_v55  ;;  %v4693_v2 = vcombine.high %v4593_v59, %v4605_v55  ;;  %v4336_v55 = vld [vmem:[#allocation25 + $0x10] sm:$0xff] }
 0x9b1   : > { %4099 = vadd.xlane.f32.xlu0 %v4098_v23 }
 0x9b2   : > { %v4700_v6 = vrot.slane %v4692_v0, %v10295_v40  ;;  %v4707_v41 = vrot.slane %v4693_v2, %v10295_v40  ;;  %v4335_v0 = vld [vmem:[#allocation25 + $0x8] sm:$0xff] }
 0x9b3   : > { %v4591_v1 = vpop.permute.xlu1 %4590 }
 0x9b5   : > { %4102 = vadd.xlane.f32.xlu0 %v4101_v60 }
 0x9b7   : > { %v4603_v18 = vpop.permute.xlu1 %4602 }
 0x9b8   : > { %v4624_v23 = vcombine.low %v4591_v1, %v4603_v18  ;;  %v4625_v24 = vcombine.high %v4591_v1, %v4603_v18 }
 0x9ba   : > { %v4639_v31 = vrot.slane %v4625_v24, %v10295_v40  ;;  %v1247_v24 = vld [vmem:[%s10633_s1 + $0x10] sm:$0xff] }
 0x9cb   : > { %4598 = vrot.lane.b32.xlu0 %v4321_v30, %s9774_s21 }
 0x9cf   : > { %4596 = vrot.lane.b32.xlu0 %v4316_v32, %s9774_s21 }
 0xa3a   : > { %v4100_v21 = vpop.xlane.xlu0 %4099 }
 0xa3b   : > { %v4104_v33 = vmul.f32 0.03125, %v4100_v21 }
 0xa3d   : > { %v4106_v34 = vadd.f32 1e-05, %v4104_v33 }
 0xa3e   : > { %v4103_v35 = vpop.xlane.xlu0 %4102 }
 0xa3f   : > { %9127 = vrsqrt.f32 %v4106_v34  ;;  %v4105_v62 = vmul.f32 0.03125, %v4103_v35 }
 0xa41   : > { %v4107_v9 = vadd.f32 1e-05, %v4105_v62 }
 0xa42   : > { %v4599_v61 = vpop.permute.xlu0 %4598 }
 0xa43   : > { %9129 = vrsqrt.f32 %v4107_v9  ;;  %v4676_v63 = vcombine.low %v4321_v30, %v4599_v61  ;;  %v4677_v53 = vcombine.high %v4321_v30, %v4599_v61  ;;  %v4632_v30 = vrot.slane %v4624_v23, %v10295_v40  ;;  %v4337_v61 = vld [vmem:[#allocation25 + $0x18] sm:$0xff] }
 0xa44   : > { %8683 = vmatprep.subr.mxu1 %v4337_v61 }
 0xa45   : > { %v4684_v3 = vrot.slane %v4676_v63, %v10295_v40  ;;  %v4691_v36 = vrot.slane %v4677_v53, %v10295_v40 }
 0xa46   : > { %v4597_v58 = vpop.permute.xlu0 %4596 }
 0xa47   : > { %v4708_v4 = vcombine.low %v4684_v3, %v4700_v6  ;;  %v4709_v5 = vcombine.high %v4684_v3, %v4700_v6  ;;  %v4725_v7 = vcombine.high %v4691_v36, %v4707_v41  ;;  %v4608_v8 = vcombine.low %v4316_v32, %v4597_v58 }
 0xa48   : > { %v4609_v39 = vcombine.high %v4316_v32, %v4597_v58 }
 0xa49   : > { %v4716_v13 = vrot.slane %v4708_v4, %v10297_v47  ;;  %v4723_v14 = vrot.slane %v4709_v5, %v10297_v47  ;;  %v4739_v17 = vrot.slane %v4725_v7, %v10297_v47  ;;  %v4616_v60 = vrot.slane %v4608_v8, %v10295_v40 }
 0xa4a   : > { %v4623_v51 = vrot.slane %v4609_v39, %v10295_v40 }
 0xa4b   : > { %v4812_v19 = vcombine.low %v4716_v13, %v4723_v14  ;;  %v4640_v33 = vcombine.low %v4616_v60, %v4632_v30  ;;  %v4641_v34 = vcombine.high %v4616_v60, %v4632_v30  ;;  %v1253_v60 = vld [vmem:[%s10215_s11 + $0x10] sm:$0xff] }
 0xa4c   : > { %v9128_v11 = vpop.eup %9127  ;;  %v4656_v35 = vcombine.low %v4623_v51, %v4639_v31  ;;  %v4657_v62 = vcombine.high %v4623_v51, %v4639_v31  ;;  %v4224_v51 = vadd.f32 %v1253_v60, %v1247_v24 }
 0xa4d   : > { %v4110_v38 = vmul.f32 %v9128_v11, %v4094_v10  ;;  %v4819_v25 = vrot.slane %v4812_v19, %v10295_v40  ;;  %v4648_v9 = vrot.slane %v4640_v33, %v10297_v47  ;;  %v4655_v11 = vrot.slane %v4641_v34, %v10297_v47  ;;  %v8294_v19 = vld [vmem:[#allocation20] ss:$0 sm:$0xff] }
 0xa4e   : > { %8680 = vmatprep.mubr.msk.f32.mxu0 %vm1268_vm0, %v4224_v51 }
 0xa4f   : > { %v4118_v43 = vmul.f32 %v8292_v37, %v4110_v38  ;;  %v4671_v38 = vrot.slane %v4657_v62, %v10297_v47 }
 0xa50   : > { %v9130_v44 = vpop.eup %9129 }
 0xa51   : > { %v4111_v45 = vmul.f32 %v9130_v44, %v4095_v20  ;;  %v10662_v46 = vadd.f32 %v8293_v42, %v4118_v43  ;;  %v8311_v20 = vcombine.high %v4716_v13, %v4723_v14  ;;  %v8309_v43 = vcombine.high %v4648_v9, %v4655_v11 }
 0xa53   : > { %v4119_v48 = vmul.f32 %v8292_v37, %v4111_v45  ;;  %v4128_v50 = vadd.f32 %v9173_v49, %v10662_v46  ;;  %v4827_v26 = vrot.slane %v8311_v20, %v10295_v40  ;;  %v4664_v37 = vrot.slane %v4656_v35, %v10297_v47 }
 0xa54   : > { %v4759_v49 = vrot.slane %v8309_v43, %v10295_v40 }
 0xa55   : > { %v10666_v52 = vadd.f32 %v8293_v42, %v4119_v48  ;;  %8666 = vmatprep.mubr.msk.f32.mxu1 %vm1268_vm0, %v4128_v50  ;;  %v4845_v32 = vcombine.high %v4819_v25, %v4827_v26  ;;  %v4744_v42 = vcombine.low %v4648_v9, %v4655_v11  ;;  %v4760_v44 = vcombine.low %v4664_v37, %v4671_v38 }
 0xa56   : > { %v8310_v45 = vcombine.high %v4664_v37, %v4671_v38  ;;  %v4844_v63 = vcombine.low %v4819_v25, %v4827_v26  ;;  %v1248_v25 = vld [vmem:[%s10633_s1 + $0x18] sm:$0xff]  ;;  %s7899_s1 = sshll.u32 %s1226_s28, 4  ;;  %s11294_s1 = int_to_ptr.vmem [resolvable:$true] %s7899_s1 }
 0xa57   : > { %v4129_v57 = vadd.f32 %v9174_v56, %v10666_v52  ;;  %v4751_v48 = vrot.slane %v4744_v42, %v10295_v40  ;;  %v4767_v50 = vrot.slane %v4760_v44, %v10295_v40  ;;  %v1254_v26 = vld [vmem:[%s10215_s11 + $0x18] sm:$0xff]  ;;  %s11424_s11 = sld [smem:[#allocation57_spill]]  ;;  %p9628_p11 = scmp.lt.s32.totalorder %s11294_s1, %s9626_s14 }
 0xa58   : > { %v4775_v56 = vrot.slane %v8310_v45, %v10295_v40  ;;  %v4852_v6 = vrot.slane %v4844_v63, %v10297_v47 }
 0xa59   : > { %8667 = vmatmul.mubr.msk.f32.vlgmr.msra.gmra.mxu1 %vm1268_vm0, %v4129_v57  ;;  %v4777_v57 = vcombine.high %v4751_v48, %v4759_v49  ;;  %v4776_v2 = vcombine.low %v4751_v48, %v4759_v49 }
 0xa5a   : > { %8691 = vmatprep.mubr.msk.f32.mxu1 %vm1268_vm0, %v10636_v16  ;;  %v4724_v16 = vcombine.low %v4691_v36, %v4707_v41  ;;  %v4793_v59 = vcombine.high %v4767_v50, %v4775_v56  ;;  %8684 = vmatpush3.msra.mxu1 %v4337_v61  ;;  %v4792_v3 = vcombine.low %v4767_v50, %v4775_v56  ;;  %v4334_v36 = vld [vmem:[#allocation25] sm:$0xff] }
 0xa5b   : > { %8685 = vmatprep.subr.mxu1 %v4336_v55  ;;  %v4784_v4 = vrot.slane %v4776_v2, %v10297_v47 }
 0xa5c   : > { %v4732_v15 = vrot.slane %v4724_v16, %v10297_v47  ;;  %8686 = vmatpush3.msra.mxu1 %v4336_v55  ;;  %v4800_v5 = vrot.slane %v4792_v3, %v10297_v47  ;;  %v10708_v16 = vrot.slane %v4845_v32, %v10297_v47  ;;  %v10719_v8 = vrot.slane %v4793_v59, %v10297_v47 }
 0xa5d   : > { %8687 = vmatprep.subr.mxu1 %v4335_v0 }
 0xa5e   : > { %v4828_v10 = vcombine.low %v4732_v15, %v4739_v17  ;;  %v8312_v22 = vcombine.high %v4732_v15, %v4739_v17  ;;  %8688 = vmatpush3.msra.mxu1 %v4335_v0  ;;  %v4808_v39 = vcombine.low %v4784_v4, %v4800_v5  ;;  %v4809_v13 = vcombine.high %v4784_v4, %v4800_v5 }
 0xa5f   : > { %8689 = vmatprep.subr.mxu1 %v4334_v36 }
 0xa60   : > { %v4835_v54 = vrot.slane %v4828_v10, %v10295_v40  ;;  %v4843_v29 = vrot.slane %v8312_v22, %v10295_v40  ;;  %8690 = vmatpush3.msra.mxu1 %v4334_v36 }
 0xa61   : > { %8704 = vmatprep.subr.mxu1 %v9775_v28  ;;  %8692 = vmatmul.mubr.msk.f32.vlgmr.msra.gmra.mxu1 %vm1268_vm0, %v10641_v12  ;;  %v10716_v12 = vrot.slane %v4777_v57, %v10297_v47 }
 0xa62   : > { %v4861_v21 = vcombine.high %v4835_v54, %v4843_v29  ;;  %v4860_v53 = vcombine.low %v4835_v54, %v4843_v29  ;;  %8694 = vmatprep.mubr.msk.f32.mxu1 %vm1268_vm0, %v1247_v24  ;;  %v4225_v54 = vadd.f32 %v1254_v26, %v1248_v25 }
 0xa63   : > { %v4810_v17 = vcombine.low %v10716_v12, %v10719_v8  ;;  %v4811_v18 = vcombine.high %v10716_v12, %v10719_v8 }
 0xa64   : > { %v4868_v41 = vrot.slane %v4860_v53, %v10297_v47  ;;  %v10713_v7 = vrot.slane %v4861_v21, %v10297_v47  ;;  %8681 = vmatmul.mubr.msk.f32.gmra.mxu0 %vm1268_vm0, %v4225_v54  ;;  %v10807_v54 = vld [vmem:[#allocation26] ss:$0 sm:$0xff] }
 0xa65   : > { %8695 = vmatmul.mubr.msk.f32.gmra.mxu1 %vm1268_vm0, %v1248_v25  ;;  %8701 = vmatprep.mubr.msk.f32.mxu0 %vm9776_vm1, %v9775_v28 }
 0xa66   : > { %v4876_v58 = vcombine.low %v4852_v6, %v4868_v41  ;;  %v4877_v1 = vcombine.high %v4852_v6, %v4868_v41  ;;  %v4878_v14 = vcombine.low %v10708_v16, %v10713_v7  ;;  %v4879_v15 = vcombine.high %v10708_v16, %v10713_v7  ;;  %8708 = vmatprep.mubr.msk.f32.mxu1 %vm9776_vm1, %v9775_v28 }
 0xa68   : > { %8698 = vmatpush3.xpose.msk.msra.mxu0 %vm1966_vm2, %v4876_v58  ;;  %8705 = vmatpush3.xpose.msk.msra.mxu1 %vm1966_vm2, %v4877_v1 }
 0xa69   : > { %8699 = vmatprep.subr.mxu0 %v9775_v28  ;;  %8706 = vmatprep.subr.mxu1 %v9775_v28 }
 0xa6c   : > { %8700 = vmatpush3.xpose.msk.msra.mxu0 %vm1966_vm2, %v4808_v39  ;;  %8707 = vmatpush3.xpose.msk.msra.mxu1 %vm1966_vm2, %v4809_v13 }
 0xa6d   : > { %8711 = vmatprep.subr.mxu0 %v9775_v28  ;;  %8718 = vmatprep.subr.mxu1 %v9775_v28 }
 0xb19   : > { %v8668_v20 = vpop.f32.mrf.mxu1 }
 0xb1a   : > { %v10733_v10 = vadd.f32 %v8668_v20, %v8294_v19 }
 0xb1b   : > { %v4213_v22 = vpop.f32.mrf.mxu1 }
 0xb1c   : > { %v4214_v23 = vadd.f32 %v8294_v19, %v4213_v22 }
 0xb1e   : > { %4446 = vrot.lane.b32.xlu1 %v4214_v23, %s9774_s21  ;;  %4443 = vrot.lane.b32.xlu0 %v4214_v23, %s9772_s6 }
 0xb21   : > { %v8693_v39 = vpop.f32.mrf.mxu1 }
 0xb22   : > { %4449 = vrot.lane.b32.xlu0 %v4214_v23, %s9773_s17 }
 0xb23   : > { %v4423_v12 = vpop.f32.mrf.mxu1 }
 0xb24   : > { %v8682_v13 = vpop.f32.mrf.mxu0 }
 0xb25   : > { %v10798_v8 = vpop.f32.mrf.mxu1 }
 0xb90   : > { %v4447_v29 = vpop.permute.xlu1 %4446  ;;  %v4444_v30 = vpop.permute.xlu0 %4443 }
 0xb91   : > { %v4452_v31 = vcombine.low %v4214_v23, %v4447_v29  ;;  %v4453_v32 = vcombine.high %v4214_v23, %v4447_v29  ;;  %v4429_v29 = vadd.f32 %v8693_v39, %v10807_v54 }
 0xb93   : > { %v4460_v35 = vrot.slane %v4452_v31, %v10295_v40  ;;  %v4467_v62 = vrot.slane %v4453_v32, %v10295_v40  ;;  %v10821_v31 = vadd.f32 %v8682_v13, %v10650_v27 }
 0xb94   : > { %v4450_v21 = vpop.permute.xlu0 %4449 }
 0xb95   : > { %v4468_v33 = vcombine.low %v4444_v30, %v4450_v21  ;;  %v4469_v34 = vcombine.high %v4444_v30, %v4450_v21  ;;  %v10814_v30 = vadd.f32 %v10807_v54, %v4423_v12 }
 0xb97   : > { %v4476_v9 = vrot.slane %v4468_v33, %v10295_v40  ;;  %v4483_v11 = vrot.slane %v4469_v34, %v10295_v40 }
 0xb99   : > { %v4484_v37 = vcombine.low %v4460_v35, %v4476_v9  ;;  %v4485_v38 = vcombine.high %v4460_v35, %v4476_v9  ;;  %v4500_v42 = vcombine.low %v4467_v62, %v4483_v11  ;;  %v4501_v43 = vcombine.high %v4467_v62, %v4483_v11 }
 0xb9b   : > { %v4492_v44 = vrot.slane %v4484_v37, %v10297_v47  ;;  %v4499_v45 = vrot.slane %v4485_v38, %v10297_v47  ;;  %v4508_v48 = vrot.slane %v4500_v42, %v10297_v47  ;;  %v4515_v49 = vrot.slane %v4501_v43, %v10297_v47 }
 0xb9d   : > { %v4520_v50 = vcombine.low %v4492_v44, %v4499_v45  ;;  %v8307_v56 = vcombine.high %v4492_v44, %v4499_v45  ;;  %v4536_v57 = vcombine.low %v4508_v48, %v4515_v49  ;;  %v8308_v59 = vcombine.high %v4508_v48, %v4515_v49 }
 0xb9f   : > { %v4527_v61 = vrot.slane %v4520_v50, %v10295_v40  ;;  %v4535_v63 = vrot.slane %v8307_v56, %v10295_v40  ;;  %v4543_v53 = vrot.slane %v4536_v57, %v10295_v40  ;;  %v4551_v55 = vrot.slane %v8308_v59, %v10295_v40 }
 0xba1   : > { %v4552_v0 = vcombine.low %v4527_v61, %v4535_v63  ;;  %v4568_v2 = vcombine.low %v4543_v53, %v4551_v55  ;;  %v4553_v6 = vcombine.high %v4527_v61, %v4535_v63  ;;  %v4569_v41 = vcombine.high %v4543_v53, %v4551_v55 }
 0xba3   : > { %v4560_v3 = vrot.slane %v4552_v0, %v10297_v47  ;;  %v4576_v36 = vrot.slane %v4568_v2, %v10297_v47  ;;  %v4567_v4 = vrot.slane %v4553_v6, %v10297_v47  ;;  %v4583_v5 = vrot.slane %v4569_v41, %v10297_v47 }
 0xba5   : > { %v4584_v58 = vcombine.low %v4560_v3, %v4576_v36  ;;  %v4585_v1 = vcombine.high %v4560_v3, %v4576_v36  ;;  %v4586_v16 = vcombine.low %v4567_v4, %v4583_v5  ;;  %v4587_v7 = vcombine.high %v4567_v4, %v4583_v5 }
 0xba7   : > { %8702 = vmatmul.mubr.msk.f32.vlgmr.msra.gmra.mxu0 %vm1966_vm2, %v4584_v58  ;;  %8709 = vmatmul.mubr.msk.f32.vlgmr.msra.gmra.mxu1 %vm1966_vm2, %v4585_v1 }
 0xba8   : > { %8712 = vmatpush3.xpose.msk.msra.mxu0 %vm1966_vm2, %v4878_v14  ;;  %8719 = vmatpush3.xpose.msk.msra.mxu1 %vm1966_vm2, %v4879_v15  ;;  %v10800_v14 = vpop.f32.mrf.mxu1  ;;  %v4325_v15 = vpop.f32.mrf.mxu0 }
 0xba9   : > { %8713 = vmatprep.subr.mxu0 %v9775_v28  ;;  %8720 = vmatprep.subr.mxu1 %v9775_v28  ;;  %v10826_v32 = vadd.f32 %v10650_v27, %v4325_v15 }
 0xbaa   : > { %8715 = vmatprep.mubr.msk.f32.mxu0 %vm9776_vm1, %v9775_v28  ;;  %8722 = vmatprep.mubr.msk.f32.mxu1 %vm9776_vm1, %v9775_v28 }
 0xbac   : > { %8714 = vmatpush3.xpose.msk.msra.mxu0 %vm1966_vm2, %v4810_v17  ;;  %8721 = vmatpush3.xpose.msk.msra.mxu1 %vm1966_vm2, %v4811_v18 }
 0xbad   : > { %8725 = vmatprep.subr.mxu0 %v9775_v28  ;;  %8732 = vmatprep.subr.mxu1 %v9775_v28 }
 0xbaf   : > { %8716 = vmatmul.mubr.msk.f32.vlgmr.msra.gmra.mxu0 %vm1966_vm2, %v4586_v16  ;;  %8723 = vmatmul.mubr.msk.f32.vlgmr.msra.gmra.mxu1 %vm1966_vm2, %v4587_v7 }
 0xbb0   : > { %8729 = vmatprep.mubr.msk.f32.mxu0 %vm9776_vm1, %v9775_v28  ;;  %8736 = vmatprep.mubr.msk.f32.mxu1 %vm9776_vm1, %v9775_v28 }
 0xc67   : > { %v5247_v17 = vpop.f32.mrf.mxu0  ;;  %v5326_v18 = vpop.f32.mrf.mxu1 }
 0xc68   : > { %v5491_v19 = vsel %vm2756_vm3, %v5326_v18, -inf  ;;  %v5488_v20 = vsel %vm2756_vm3, %v5247_v17, -inf }
 0xc69   : > { %5492 = vmax.xlane.f32.xlu0 %v5491_v19  ;;  %v8710_v22 = vpop.f32.mrf.mxu1  ;;  %5489 = vmax.xlane.f32.xlu1 %v5488_v20  ;;  %v8703_v23 = vpop.f32.mrf.mxu0 }
 0xc6f   : > { %v5405_v24 = vpop.f32.mrf.mxu0  ;;  %v10804_v60 = vpop.f32.mrf.mxu1 }
 0xc70   : > { %v5494_v51 = vsel %vm2756_vm3, %v5405_v24, -inf  ;;  %v5497_v21 = vsel %vm2756_vm3, %v10804_v60, -inf }
 0xc71   : > { %v8724_v25 = vpop.f32.mrf.mxu1  ;;  %5495 = vmax.xlane.f32.xlu0 %v5494_v51  ;;  %v8717_v26 = vpop.f32.mrf.mxu0 }
 0xc7a   : > { %4890 = vrot.lane.b32.xlu1 %v4429_v29, %s9774_s21 }
 0xc7e   : > { %4896 = vrot.lane.b32.xlu1 %v4429_v29, %s9773_s17 }
 0xc87   : > { %4884 = vrot.lane.b32.xlu0 %v4429_v29, %s9772_s6 }
 0xc8b   : > { %4882 = vrot.lane.b32.xlu0 %v10814_v30, %s9772_s6 }
 0xc8f   : > { %4894 = vrot.lane.b32.xlu0 %v10814_v30, %s9773_s17 }
 0xc93   : > { %6131 = vrot.lane.b32.xlu0 %v10821_v31, %s9774_s21 }
 0xc97   : > { %6123 = vrot.lane.b32.xlu0 %v10826_v32, %s9772_s6 }
 0xc9b   : > { %6135 = vrot.lane.b32.xlu0 %v10826_v32, %s9773_s17 }
 0xca2   : > { %5498 = vmax.xlane.f32.xlu1 %v5497_v21 }
 0xcb3   : > { %4888 = vrot.lane.b32.xlu1 %v10814_v30, %s9774_s21 }
 0xcb7   : > { %6125 = vrot.lane.b32.xlu1 %v10821_v31, %s9772_s6 }
 0xcbb   : > { %6137 = vrot.lane.b32.xlu1 %v10821_v31, %s9773_s17 }
 0xcbf   : > { %6129 = vrot.lane.b32.xlu1 %v10826_v32, %s9774_s21 }
 0xcc3   : > { %5976 = vrot.lane.b32.xlu1 %v10733_v10, %s9772_s6 }
 0xcf2   : > { %v5493_v27 = vpop.xlane.xlu0 %5492  ;;  %v5490_v33 = vpop.xlane.xlu1 %5489 }
 0xcf3   : > { %v5501_v34 = vsub.f32 %v5326_v18, %v5493_v27  ;;  %v5500_v35 = vsub.f32 %v5247_v17, %v5490_v33 }
 0xcf5   : > { %v5506_v62 = vmul.f32 1.442695, %v5501_v34  ;;  %v5504_v9 = vmul.f32 1.442695, %v5500_v35 }
 0xcf6   : > { %v4891_v11 = vpop.permute.xlu1 %4890 }
 0xcf7   : > { %9131 = vpow2.f32 %v5506_v62  ;;  %v4968_v42 = vcombine.low %v4429_v29, %v4891_v11  ;;  %v4969_v43 = vcombine.high %v4429_v29, %v4891_v11 }
 0xcf8   : > { %9133 = vpow2.f32 %v5504_v9 }
 0xcf9   : > { %v4976_v56 = vrot.slane %v4968_v42, %v10295_v40  ;;  %v4983_v57 = vrot.slane %v4969_v43, %v10295_v40 }
 0xcfa   : > { %v5496_v37 = vpop.xlane.xlu0 %5495  ;;  %v4897_v45 = vpop.permute.xlu1 %4896 }
 0xcfb   : > { %v5502_v38 = vsub.f32 %v5405_v24, %v5496_v37 }
 0xcfd   : > { %v5508_v44 = vmul.f32 1.442695, %v5502_v38 }
 0xcfe   : > { %v4885_v48 = vpop.permute.xlu0 %4884 }
 0xcff   : > { %9135 = vpow2.f32 %v5508_v44  ;;  %v4984_v49 = vcombine.low %v4885_v48, %v4897_v45  ;;  %v4985_v50 = vcombine.high %v4885_v48, %v4897_v45 }
 0xd01   : > { %v4992_v59 = vrot.slane %v4984_v49, %v10295_v40  ;;  %v4999_v61 = vrot.slane %v4985_v50, %v10295_v40 }
 0xd02   : > { %v4883_v35 = vpop.permute.xlu0 %4882 }
 0xd03   : > { %v5000_v63 = vcombine.low %v4976_v56, %v4992_v59  ;;  %v5001_v53 = vcombine.high %v4976_v56, %v4992_v59  ;;  %v5016_v55 = vcombine.low %v4983_v57, %v4999_v61  ;;  %v5017_v0 = vcombine.high %v4983_v57, %v4999_v61 }
 0xd04   : > { %v10848_v2 = vpop.eup %9131 }
 0xd05   : > { %v10850_v3 = vpop.eup %9133  ;;  %v5008_v36 = vrot.slane %v5000_v63, %v10297_v47  ;;  %v5015_v6 = vrot.slane %v5001_v53, %v10297_v47  ;;  %v5024_v41 = vrot.slane %v5016_v55, %v10297_v47  ;;  %v5031_v58 = vrot.slane %v5017_v0, %v10297_v47 }
 0xd06   : > { %v5515_v1 = vsel %vm2756_vm3, %v10848_v2, 0.0  ;;  %v5512_v4 = vsel %vm2756_vm3, %v10850_v3, 0.0  ;;  %v4895_v62 = vpop.permute.xlu0 %4894 }
 0xd07   : > { %v5104_v5 = vcombine.low %v5008_v36, %v5015_v6  ;;  %v8315_v16 = vcombine.high %v5008_v36, %v5015_v6  ;;  %v5120_v7 = vcombine.low %v5024_v41, %v5031_v58  ;;  %v8316_v39 = vcombine.high %v5024_v41, %v5031_v58  ;;  %5516 = vadd.xlane.f32.xlu1 %v5515_v1 }
 0xd08   : > { %5513 = vadd.xlane.f32.xlu0 %v5512_v4  ;;  %v4916_v37 = vcombine.low %v4883_v35, %v4895_v62  ;;  %v4917_v38 = vcombine.high %v4883_v35, %v4895_v62 }
 0xd09   : > { %v5111_v12 = vrot.slane %v5104_v5, %v10295_v40  ;;  %v5119_v13 = vrot.slane %v8315_v16, %v10295_v40  ;;  %v5127_v15 = vrot.slane %v5120_v7, %v10295_v40  ;;  %v5135_v17 = vrot.slane %v8316_v39, %v10295_v40 }
 0xd0a   : > { %v4924_v48 = vrot.slane %v4916_v37, %v10295_v40  ;;  %v4931_v49 = vrot.slane %v4917_v38, %v10295_v40 }
 0xd0b   : > { %v5136_v18 = vcombine.low %v5111_v12, %v5119_v13  ;;  %v5152_v19 = vcombine.low %v5127_v15, %v5135_v17  ;;  %v5137_v22 = vcombine.high %v5111_v12, %v5119_v13  ;;  %v5153_v23 = vcombine.high %v5127_v15, %v5135_v17 }
 0xd0c   : > { %v10864_v20 = vpop.eup %9135 }
 0xd0d   : > { %v5518_v24 = vsel %vm2756_vm3, %v10864_v20, 0.0  ;;  %v5144_v51 = vrot.slane %v5136_v18, %v10297_v47  ;;  %v5160_v25 = vrot.slane %v5152_v19, %v10297_v47  ;;  %v10871_v26 = vrot.slane %v5137_v22, %v10297_v47 }
 0xd0e   : > { %5519 = vadd.xlane.f32.xlu0 %v5518_v24  ;;  %v10874_v29 = vrot.slane %v5153_v23, %v10297_v47 }
 0xd0f   : > { %v5168_v21 = vcombine.low %v5144_v51, %v5160_v25  ;;  %v5169_v27 = vcombine.high %v5144_v51, %v5160_v25 }
 0xd10   : > { %v5170_v33 = vcombine.low %v10871_v26, %v10874_v29  ;;  %v5171_v34 = vcombine.high %v10871_v26, %v10874_v29 }
 0xd11   : > { %8726 = vmatpush3.msra.mxu0 %v5168_v21  ;;  %8733 = vmatpush3.msra.mxu1 %v5169_v27  ;;  %v6132_v27 = vpop.permute.xlu0 %6131 }
 0xd12   : > { %8727 = vmatprep.subr.mxu0 %v9775_v28  ;;  %8734 = vmatprep.subr.mxu1 %v9775_v28  ;;  %v6209_v38 = vcombine.low %v10821_v31, %v6132_v27 }
 0xd15   : > { %v6124_v62 = vpop.permute.xlu0 %6123 }
 0xd24   : > { %5979 = vrot.lane.b32.xlu0 %v10733_v10, %s9774_s21 }
 0xd2b   : > { %v5499_v9 = vpop.xlane.xlu1 %5498 }
 0xd2c   : > { %v5503_v11 = vsub.f32 %v10804_v60, %v5499_v9 }
 0xd2e   : > { %v5510_v42 = vmul.f32 1.442695, %v5503_v11 }
 0xd2f   : > { %v4889_v43 = vpop.permute.xlu1 %4888 }
 0xd30   : > { %9137 = vpow2.f32 %v5510_v42  ;;  %v4900_v44 = vcombine.low %v10814_v30, %v4889_v43  ;;  %v4901_v45 = vcombine.high %v10814_v30, %v4889_v43  ;;  %v6210_v42 = vcombine.high %v10821_v31, %v6132_v27  ;;  %v6136_v43 = vpop.permute.xlu0 %6135 }
 0xd32   : > { %v4908_v50 = vrot.slane %v4900_v44, %v10295_v40  ;;  %v4915_v56 = vrot.slane %v4901_v45, %v10295_v40 }
 0xd33   : > { %v6126_v21 = vpop.permute.xlu1 %6125 }
 0xd34   : > { %v4932_v57 = vcombine.low %v4908_v50, %v4924_v48  ;;  %v4933_v59 = vcombine.high %v4908_v50, %v4924_v48  ;;  %v4948_v60 = vcombine.low %v4915_v56, %v4931_v49  ;;  %v4949_v61 = vcombine.high %v4915_v56, %v4931_v49 }
 0xd35   : > { %v6217_v49 = vrot.slane %v6209_v38, %v10295_v40  ;;  %v6224_v50 = vrot.slane %v6210_v42, %v10295_v40 }
 0xd36   : > { %v4940_v63 = vrot.slane %v4932_v57, %v10297_v47  ;;  %v4947_v53 = vrot.slane %v4933_v59, %v10297_v47  ;;  %v4956_v55 = vrot.slane %v4948_v60, %v10297_v47  ;;  %v4963_v30 = vrot.slane %v4949_v61, %v10297_v47 }
 0xd37   : > { %v6138_v35 = vpop.permute.xlu1 %6137  ;;  %v6157_v57 = vcombine.low %v6124_v62, %v6136_v43  ;;  %v6158_v59 = vcombine.high %v6124_v62, %v6136_v43 }
 0xd38   : > { %v5036_v0 = vcombine.low %v4940_v63, %v4947_v53  ;;  %v8313_v36 = vcombine.high %v4940_v63, %v4947_v53  ;;  %v5052_v6 = vcombine.low %v4956_v55, %v4963_v30  ;;  %v8314_v41 = vcombine.high %v4956_v55, %v4963_v30 }
 0xd39   : > { %v6225_v9 = vcombine.low %v6126_v21, %v6138_v35  ;;  %v6226_v11 = vcombine.high %v6126_v21, %v6138_v35 }
 0xd3a   : > { %v5043_v1 = vrot.slane %v5036_v0, %v10295_v40  ;;  %v5051_v4 = vrot.slane %v8313_v36, %v10295_v40  ;;  %v5059_v16 = vrot.slane %v5052_v6, %v10295_v40  ;;  %v5067_v7 = vrot.slane %v8314_v41, %v10295_v40 }
 0xd3b   : > { %v6130_v37 = vpop.permute.xlu1 %6129  ;;  %v6233_v44 = vrot.slane %v6225_v9, %v10295_v40  ;;  %v6240_v45 = vrot.slane %v6226_v11, %v10295_v40  ;;  %v6165_v0 = vrot.slane %v6157_v57, %v10295_v40  ;;  %v6172_v36 = vrot.slane %v6158_v59, %v10295_v40 }
 0xd3c   : > { %v5068_v39 = vcombine.low %v5043_v1, %v5051_v4  ;;  %v5084_v12 = vcombine.low %v5059_v16, %v5067_v7  ;;  %v5069_v17 = vcombine.high %v5043_v1, %v5051_v4  ;;  %v5085_v18 = vcombine.high %v5059_v16, %v5067_v7 }
 0xd3d   : > { %v10895_v58 = vpop.eup %9137  ;;  %v6141_v48 = vcombine.low %v10826_v32, %v6130_v37  ;;  %v6142_v56 = vcombine.high %v10826_v32, %v6130_v37  ;;  %v6241_v61 = vcombine.low %v6217_v49, %v6233_v44  ;;  %v6242_v63 = vcombine.high %v6217_v49, %v6233_v44 }
 0xd3e   : > { %v5521_v5 = vsel %vm2756_vm3, %v10895_v58, 0.0  ;;  %v5076_v13 = vrot.slane %v5068_v39, %v10297_v47  ;;  %v5092_v15 = vrot.slane %v5084_v12, %v10297_v47  ;;  %v10906_v23 = vrot.slane %v5069_v17, %v10297_v47 }
 0xd3f   : > { %5522 = vadd.xlane.f32.xlu1 %v5521_v5  ;;  %v10909_v24 = vrot.slane %v5085_v18, %v10297_v47  ;;  %v10927_v60 = vpop.permute.xlu1 %5976  ;;  %v6257_v31 = vcombine.low %v6224_v50, %v6240_v45  ;;  %v6258_v53 = vcombine.high %v6224_v50, %v6240_v45  ;;  %v6149_v55 = vrot.slane %v6141_v48, %v10295_v40 }
 0xd40   : > { %v5100_v19 = vcombine.low %v5076_v13, %v5092_v15  ;;  %v5101_v22 = vcombine.high %v5076_v13, %v5092_v15  ;;  %v6156_v30 = vrot.slane %v6142_v56, %v10295_v40  ;;  %v6249_v41 = vrot.slane %v6241_v61, %v10297_v47 }
 0xd41   : > { %v5102_v51 = vcombine.low %v10906_v23, %v10909_v24  ;;  %v5103_v25 = vcombine.high %v10906_v23, %v10909_v24  ;;  %v6256_v32 = vrot.slane %v6242_v63, %v10297_v47  ;;  %v6265_v1 = vrot.slane %v6257_v31, %v10297_v47 }
 0xd42   : > { %8728 = vmatpush3.msra.mxu0 %v5100_v19  ;;  %8735 = vmatpush3.msra.mxu1 %v5101_v22  ;;  %v6272_v5 = vrot.slane %v6258_v53, %v10297_v47  ;;  %v6173_v16 = vcombine.low %v6149_v55, %v6165_v0  ;;  %v6174_v7 = vcombine.high %v6149_v55, %v6165_v0 }
 0xd43   : > { %8739 = vmatprep.subr.mxu0 %v9775_v28  ;;  %8746 = vmatprep.subr.mxu1 %v9775_v28  ;;  %v6189_v39 = vcombine.low %v6156_v30, %v6172_v36  ;;  %v6190_v12 = vcombine.high %v6156_v30, %v6172_v36  ;;  %v6345_v13 = vcombine.low %v6249_v41, %v6256_v32 }
 0xd44   : > { %v8339_v15 = vcombine.high %v6249_v41, %v6256_v32  ;;  %v6361_v17 = vcombine.low %v6265_v1, %v6272_v5  ;;  %v8340_v18 = vcombine.high %v6265_v1, %v6272_v5  ;;  %v6181_v19 = vrot.slane %v6173_v16, %v10297_v47 }
 0xd45   : > { %v6188_v22 = vrot.slane %v6174_v7, %v10297_v47  ;;  %v6197_v21 = vrot.slane %v6189_v39, %v10297_v47  ;;  %v6204_v27 = vrot.slane %v6190_v12, %v10297_v47  ;;  %v10942_v62 = vrot.slane %v6345_v13, %v10295_v40 }
 0xd46   : > { %v10945_v9 = vrot.slane %v8339_v15, %v10295_v40  ;;  %v10948_v11 = vrot.slane %v6361_v17, %v10295_v40  ;;  %v10951_v37 = vrot.slane %v8340_v18, %v10295_v40 }
 0xd47   : > { %v6277_v38 = vcombine.low %v6181_v19, %v6188_v22  ;;  %v8337_v42 = vcombine.high %v6181_v19, %v6188_v22  ;;  %v6293_v43 = vcombine.low %v6197_v21, %v6204_v27  ;;  %v8338_v44 = vcombine.high %v6197_v21, %v6204_v27 }
 0xd48   : > { %v6377_v48 = vcombine.low %v10942_v62, %v10945_v9  ;;  %v6393_v49 = vcombine.low %v10948_v11, %v10951_v37  ;;  %v6378_v21 = vcombine.high %v10942_v62, %v10945_v9  ;;  %v6394_v27 = vcombine.high %v10948_v11, %v10951_v37 }
 0xd49   : > { %v10958_v50 = vrot.slane %v6277_v38, %v10295_v40  ;;  %v10961_v57 = vrot.slane %v8337_v42, %v10295_v40  ;;  %v10964_v59 = vrot.slane %v6293_v43, %v10295_v40  ;;  %v10967_v61 = vrot.slane %v8338_v44, %v10295_v40 }
 0xd4a   : > { %v10977_v53 = vrot.slane %v6377_v48, %v10297_v47  ;;  %v6392_v11 = vrot.slane %v6378_v21, %v10297_v47  ;;  %v6408_v37 = vrot.slane %v6394_v27, %v10297_v47 }
 0xd4b   : > { %v6309_v55 = vcombine.low %v10958_v50, %v10961_v57  ;;  %v6325_v30 = vcombine.low %v10964_v59, %v10967_v61  ;;  %v6310_v62 = vcombine.high %v10958_v50, %v10961_v57  ;;  %v6326_v9 = vcombine.high %v10964_v59, %v10967_v61 }
 0xd50   : > { %5982 = vrot.lane.b32.xlu1 %v10733_v10, %s9773_s17 }
 0xd90   : > { %v5517_v6 = vpop.xlane.xlu1 %5516 }
 0xd91   : > { %9139 = vrcp.f32 %v5517_v6  ;;  %v5514_v4 = vpop.xlane.xlu0 %5513 }
 0xd92   : > { %9141 = vrcp.f32 %v5514_v4 }
 0xd97   : > { %v5520_v35 = vpop.xlane.xlu0 %5519 }
 0xd98   : > { %9143 = vrcp.f32 %v5520_v35 }
 0xd9b   : > { %v5980_v23 = vpop.permute.xlu0 %5979 }
 0xd9e   : > { %v9140_v45 = vpop.eup %9139 }
 0xd9f   : > { %v9142_v56 = vpop.eup %9141  ;;  %v5527_v63 = vmul.f32 %v9140_v45, %v10848_v2  ;;  %v6401_v2 = vrot.slane %v6393_v49, %v10297_v47 }
 0xda0   : > { %v5525_v31 = vmul.f32 %v9142_v56, %v10850_v3 }
 0xda1   : > { %8737 = vmatmul.mubr.msk.f32.vlgmr.msra.gmra.mxu1 %vm2756_vm3, %v5527_v63  ;;  %v6409_v29 = vcombine.low %v10977_v53, %v6401_v2  ;;  %v6410_v49 = vcombine.high %v10977_v53, %v6401_v2  ;;  %v6411_v63 = vcombine.low %v6392_v11, %v6408_v37  ;;  %v6324_v53 = vrot.slane %v6310_v62, %v10297_v47 }
 0xda2   : > { %8730 = vmatmul.mubr.msk.f32.vlgmr.msra.gmra.mxu0 %vm2756_vm3, %v5525_v31  ;;  %8747 = vmatpush3.msra.mxu1 %v5171_v34  ;;  %v11006_v34 = vrot.slane %v6325_v30, %v10297_v47  ;;  %v6412_v30 = vcombine.high %v6392_v11, %v6408_v37 }
 0xda3   : > { %8740 = vmatpush3.msra.mxu0 %v5170_v33  ;;  %8748 = vmatprep.subr.mxu1 %v9775_v28  ;;  %v11003_v33 = vrot.slane %v6309_v55, %v10297_v47  ;;  %v6340_v55 = vrot.slane %v6326_v9, %v10297_v47 }
 0xda4   : > { %8741 = vmatprep.subr.mxu0 %v9775_v28  ;;  %8749 = vmatpush3.msra.mxu1 %v5103_v25  ;;  %v5986_v25 = vcombine.high %v10733_v10, %v5980_v23 }
 0xda5   : > { %v9144_v3 = vpop.eup %9143  ;;  %8742 = vmatpush3.msra.mxu0 %v5102_v51  ;;  %8743 = vmatprep.mubr.msk.f32.mxu0 %vm9776_vm1, %v9775_v28  ;;  %v5985_v51 = vcombine.low %v10733_v10, %v5980_v23  ;;  %v6342_v59 = vcombine.high %v11003_v33, %v11006_v34 }
 0xda6   : > { %8753 = vmatprep.subr.mxu0 %v9775_v28  ;;  %v5529_v26 = vmul.f32 %v9144_v3, %v10864_v20  ;;  %8750 = vmatprep.mubr.msk.f32.mxu1 %vm9776_vm1, %v9775_v28  ;;  %v6341_v20 = vcombine.low %v11003_v33, %v11006_v34  ;;  %v6000_v32 = vrot.slane %v5986_v25, %v10295_v40 }
 0xda7   : > { %8760 = vmatprep.subr.mxu1 %v9775_v28  ;;  %v5993_v41 = vrot.slane %v5985_v51, %v10295_v40 }
 0xda8   : > { %8744 = vmatmul.mubr.msk.f32.vlgmr.msra.gmra.mxu0 %vm2756_vm3, %v5529_v26  ;;  %v6343_v26 = vcombine.low %v6324_v53, %v6340_v55 }
 0xda9   : > { %8754 = vmatpush3.xpose.msk.msra.mxu0 %vm1966_vm2, %v6409_v29  ;;  %8757 = vmatprep.mubr.msk.f32.mxu0 %vm9776_vm1, %v9775_v28  ;;  %v6344_v29 = vcombine.high %v6324_v53, %v6340_v55 }
 0xdaa   : > { %8755 = vmatprep.subr.mxu0 %v9775_v28 }
 0xdad   : > { %8756 = vmatpush3.xpose.msk.msra.mxu0 %vm1966_vm2, %v6341_v20 }
 0xdae   : > { %8767 = vmatprep.subr.mxu0 %v9775_v28 }
 0xdc8   : > { %v5523_v24 = vpop.xlane.xlu1 %5522 }
 0xdc9   : > { %9145 = vrcp.f32 %v5523_v24 }
 0xdcc   : > { %v5983_v0 = vpop.permute.xlu1 %5982 }
 0xdcd   : > { %v6001_v36 = vcombine.low %v10927_v60, %v5983_v0  ;;  %v6002_v6 = vcombine.high %v10927_v60, %v5983_v0 }
 0xdcf   : > { %v6009_v1 = vrot.slane %v6001_v36, %v10295_v40  ;;  %v6016_v4 = vrot.slane %v6002_v6, %v10295_v40 }
 0xdd1   : > { %v6017_v5 = vcombine.low %v5993_v41, %v6009_v1  ;;  %v6018_v16 = vcombine.high %v5993_v41, %v6009_v1  ;;  %v6033_v7 = vcombine.low %v6000_v32, %v6016_v4  ;;  %v6034_v39 = vcombine.high %v6000_v32, %v6016_v4 }
 0xdd3   : > { %v6025_v12 = vrot.slane %v6017_v5, %v10297_v47  ;;  %v6032_v10 = vrot.slane %v6018_v16, %v10297_v47  ;;  %v6041_v13 = vrot.slane %v6033_v7, %v10297_v47  ;;  %v6048_v60 = vrot.slane %v6034_v39, %v10297_v47 }
 0xdd5   : > { %v6053_v15 = vcombine.low %v6025_v12, %v6032_v10  ;;  %v8335_v17 = vcombine.high %v6025_v12, %v6032_v10  ;;  %v6069_v18 = vcombine.low %v6041_v13, %v6048_v60  ;;  %v8336_v19 = vcombine.high %v6041_v13, %v6048_v60 }
 0xdd6   : > { %v9146_v22 = vpop.eup %9145 }
 0xdd7   : > { %v6060_v35 = vrot.slane %v6053_v15, %v10295_v40  ;;  %v6068_v38 = vrot.slane %v8335_v17, %v10295_v40  ;;  %v6076_v42 = vrot.slane %v6069_v18, %v10295_v40  ;;  %v6084_v43 = vrot.slane %v8336_v19, %v10295_v40 }
 0xdd8   : > { %v5531_v44 = vmul.f32 %v9146_v22, %v10895_v58 }
 0xdd9   : > { %v6085_v45 = vcombine.low %v6060_v35, %v6068_v38  ;;  %v6101_v48 = vcombine.low %v6076_v42, %v6084_v43  ;;  %v6086_v50 = vcombine.high %v6060_v35, %v6068_v38  ;;  %v6102_v57 = vcombine.high %v6076_v42, %v6084_v43 }
 0xdda   : > { %8751 = vmatmul.mubr.msk.f32.vlgmr.msra.gmra.mxu1 %vm2756_vm3, %v5531_v44 }
 0xddb   : > { %8761 = vmatpush3.xpose.msk.msra.mxu1 %vm1966_vm2, %v6410_v49  ;;  %v6093_v58 = vrot.slane %v6085_v45, %v10297_v47  ;;  %v6109_v56 = vrot.slane %v6101_v48, %v10297_v47  ;;  %8764 = vmatprep.mubr.msk.f32.mxu1 %vm9776_vm1, %v9775_v28  ;;  %v6100_v2 = vrot.slane %v6086_v50, %v10297_v47 }
 0xddc   : > { %8762 = vmatprep.subr.mxu1 %v9775_v28  ;;  %v6116_v3 = vrot.slane %v6102_v57, %v10297_v47 }
 0xddd   : > { %v6117_v61 = vcombine.low %v6093_v58, %v6109_v56  ;;  %v6118_v31 = vcombine.high %v6093_v58, %v6109_v56 }
 0xdde   : > { %v6119_v33 = vcombine.low %v6100_v2, %v6116_v3  ;;  %v6120_v34 = vcombine.high %v6100_v2, %v6116_v3 }
 0xddf   : > { %8763 = vmatpush3.xpose.msk.msra.mxu1 %vm1966_vm2, %v6342_v59  ;;  %8758 = vmatmul.mubr.msk.f32.vlgmr.msra.gmra.mxu0 %vm1966_vm2, %v6117_v61 }
 0xde0   : > { %8768 = vmatpush3.xpose.msk.msra.mxu0 %vm1966_vm2, %v6411_v63  ;;  %8774 = vmatprep.subr.mxu1 %v9775_v28 }
 0xde1   : > { %8769 = vmatprep.subr.mxu0 %v9775_v28  ;;  %8771 = vmatprep.mubr.msk.f32.mxu0 %vm9776_vm1, %v9775_v28 }
 0xde2   : > { %8765 = vmatmul.mubr.msk.f32.vlgmr.msra.gmra.mxu1 %vm1966_vm2, %v6118_v31 }
 0xde3   : > { %8775 = vmatpush3.xpose.msk.msra.mxu1 %vm1966_vm2, %v6412_v30  ;;  %8778 = vmatprep.mubr.msk.f32.mxu1 %vm9776_vm1, %v9775_v28 }
 0xde4   : > { %8770 = vmatpush3.xpose.msk.msra.mxu0 %vm1966_vm2, %v6343_v26  ;;  %8776 = vmatprep.subr.mxu1 %v9775_v28 }
 0xde5   : > { %8781 = vmatprep.subr.mxu0 %v9775_v28 }
 0xde7   : > { %8777 = vmatpush3.xpose.msk.msra.mxu1 %vm1966_vm2, %v6344_v29  ;;  %8772 = vmatmul.mubr.msk.f32.vlgmr.msra.gmra.mxu0 %vm1966_vm2, %v6119_v33 }
 0xde8   : > { %8788 = vmatprep.subr.mxu1 %v9775_v28  ;;  %8785 = vmatprep.mubr.msk.f32.mxu0 %vm9776_vm1, %v9775_v28 }
 0xdea   : > { %8779 = vmatmul.mubr.msk.f32.vlgmr.msra.gmra.mxu1 %vm1966_vm2, %v6120_v34 }
 0xdeb   : > { %8792 = vmatprep.mubr.msk.f32.mxu1 %vm9776_vm1, %v9775_v28 }
 0xe61   : > { %v5674_v20 = vpop.f32.mrf.mxu1 }
 0xe62   : > { %v5601_v23 = vpop.f32.mrf.mxu0 }
 0xe63   : > { %v8738_v24 = vpop.f32.mrf.mxu1 }
 0xe64   : > { %v8731_v51 = vpop.f32.mrf.mxu0 }
 0xe68   : > { %v5747_v25 = vpop.f32.mrf.mxu0 }
 0xe69   : > { %v5824_v0 = vcombine.low %v5601_v23, %v5747_v25  ;;  %v5825_v36 = vcombine.high %v5601_v23, %v5747_v25  ;;  %v11123_v23 = vadd.f32 %v10807_v54, %v10800_v14 }
 0xe6a   : > { %v8745_v6 = vpop.f32.mrf.mxu0 }
 0xe6b   : > { %v5832_v5 = vrot.slane %v5824_v0, %v10295_v40  ;;  %v5839_v16 = vrot.slane %v5825_v36, %v10295_v40 }
 0xe9a   : > { %v5820_v41 = vpop.f32.mrf.mxu1 }
 0xe9b   : > { %v5840_v32 = vcombine.low %v5674_v20, %v5820_v41  ;;  %v5841_v1 = vcombine.high %v5674_v20, %v5820_v41  ;;  %v4439_v20 = vadd.f32 %v10798_v8, %v10807_v54 }
 0xe9c   : > { %v8752_v4 = vpop.f32.mrf.mxu1 }
 0xe9d   : > { %v5848_v7 = vrot.slane %v5840_v32, %v10295_v40  ;;  %v5855_v39 = vrot.slane %v5841_v1, %v10295_v40 }
 0xe9f   : > { %v5856_v12 = vcombine.low %v5832_v5, %v5848_v7  ;;  %v5857_v10 = vcombine.high %v5832_v5, %v5848_v7  ;;  %v5872_v13 = vcombine.low %v5839_v16, %v5855_v39  ;;  %v5873_v60 = vcombine.high %v5839_v16, %v5855_v39  ;;  %v6780_v15 = vpop.f32.mrf.mxu0 }
 0xea0   : > { %v7021_v17 = vsel %vm2756_vm3, %v6780_v15, -inf }
 0xea1   : > { %v5864_v18 = vrot.slane %v5856_v12, %v10297_v47  ;;  %v5871_v19 = vrot.slane %v5857_v10, %v10297_v47  ;;  %v5880_v22 = vrot.slane %v5872_v13, %v10297_v47  ;;  %v5887_v21 = vrot.slane %v5873_v60, %v10297_v47  ;;  %7022 = vmax.xlane.f32.xlu0 %v7021_v17  ;;  %v8759_v27 = vpop.f32.mrf.mxu0 }
 0xea2   : > { %v6859_v35 = vpop.f32.mrf.mxu1 }
 0xea3   : > { %v5892_v38 = vcombine.low %v5864_v18, %v5871_v19  ;;  %v8333_v42 = vcombine.high %v5864_v18, %v5871_v19  ;;  %v5908_v43 = vcombine.low %v5880_v22, %v5887_v21  ;;  %v8334_v44 = vcombine.high %v5880_v22, %v5887_v21 }
 0xea4   : > { %v7024_v45 = vsel %vm2756_vm3, %v6859_v35, -inf  ;;  %v8766_v48 = vpop.f32.mrf.mxu1 }
 0xea5   : > { %7025 = vmax.xlane.f32.xlu1 %v7024_v45  ;;  %v5899_v49 = vrot.slane %v5892_v38, %v10295_v40  ;;  %v5907_v62 = vrot.slane %v8333_v42, %v10295_v40  ;;  %v5915_v9 = vrot.slane %v5908_v43, %v10295_v40  ;;  %v5923_v11 = vrot.slane %v8334_v44, %v10295_v40 }
 0xea7   : > { %v6938_v37 = vpop.f32.mrf.mxu0  ;;  %v5925_v58 = vcombine.high %v5899_v49, %v5907_v62  ;;  %v5941_v56 = vcombine.high %v5915_v9, %v5923_v11  ;;  %v5924_v50 = vcombine.low %v5899_v49, %v5907_v62  ;;  %v5940_v57 = vcombine.low %v5915_v9, %v5923_v11 }
 0xea8   : > { %v7027_v59 = vsel %vm2756_vm3, %v6938_v37, -inf }
 0xea9   : > { %7028 = vmax.xlane.f32.xlu0 %v7027_v59  ;;  %v8773_v61 = vpop.f32.mrf.mxu0  ;;  %v11097_v63 = vrot.slane %v5925_v58, %v10297_v47  ;;  %v11100_v31 = vrot.slane %v5941_v56, %v10297_v47  ;;  %v11103_v53 = vrot.slane %v5924_v50, %v10297_v47  ;;  %v11106_v55 = vrot.slane %v5940_v57, %v10297_v47 }
 0xeaa   : > { %v7017_v30 = vpop.f32.mrf.mxu1 }
 0xeab   : > { %v5958_v2 = vcombine.low %v11097_v63, %v11100_v31  ;;  %v5959_v3 = vcombine.high %v11097_v63, %v11100_v31  ;;  %v5957_v26 = vcombine.high %v11103_v53, %v11106_v55  ;;  %v7030_v33 = vsel %vm2756_vm3, %v7017_v30, -inf }
 0xeac   : > { %v8780_v29 = vpop.f32.mrf.mxu1  ;;  %v5956_v34 = vcombine.low %v11103_v53, %v11106_v55 }
 0xead   : > { %7031 = vmax.xlane.f32.xlu0 %v7030_v33 }
 0xeb6   : > { %6417 = vrot.lane.b32.xlu1 %v4439_v20, %s9772_s6 }
 0xeba   : > { %6429 = vrot.lane.b32.xlu1 %v4439_v20, %s9773_s17 }
 0xebe   : > { %6415 = vrot.lane.b32.xlu1 %v11123_v23, %s9772_s6  ;;  %s11427_s6 = sld [smem:[#allocation59_spill]] }
 0xec3   : > { %6423 = vrot.lane.b32.xlu0 %v4439_v20, %s9774_s21 }
 0xf2a   : > { %v7023_v24 = vpop.xlane.xlu0 %7022 }
 0xf2b   : > { %v7033_v51 = vsub.f32 %v6780_v15, %v7023_v24 }
 0xf2d   : > { %v7037_v25 = vmul.f32 1.442695, %v7033_v51 }
 0xf2e   : > { %v7026_v0 = vpop.xlane.xlu1 %7025 }
 0xf2f   : > { %9147 = vpow2.f32 %v7037_v25  ;;  %v7034_v36 = vsub.f32 %v6859_v35, %v7026_v0 }
 0xf31   : > { %v7039_v8 = vmul.f32 1.442695, %v7034_v36 }
 0xf32   : > { %v6418_v6 = vpop.permute.xlu1 %6417  ;;  %v7029_v41 = vpop.xlane.xlu0 %7028 }
 0xf33   : > { %9149 = vpow2.f32 %v7039_v8  ;;  %v7035_v32 = vsub.f32 %v6938_v37, %v7029_v41 }
 0xf35   : > { %v7041_v1 = vmul.f32 1.442695, %v7035_v32 }
 0xf36   : > { %v6430_v4 = vpop.permute.xlu1 %6429  ;;  %v7032_v14 = vpop.xlane.xlu0 %7031 }
 0xf37   : > { %9151 = vpow2.f32 %v7041_v1  ;;  %v7036_v54 = vsub.f32 %v7017_v30, %v7032_v14  ;;  %v6517_v5 = vcombine.low %v6418_v6, %v6430_v4  ;;  %v6518_v16 = vcombine.high %v6418_v6, %v6430_v4 }
 0xf39   : > { %v7043_v7 = vmul.f32 1.442695, %v7036_v54  ;;  %v6525_v60 = vrot.slane %v6517_v5, %v10295_v40  ;;  %v6532_v15 = vrot.slane %v6518_v16, %v10295_v40 }
 0xf3a   : > { %v6424_v39 = vpop.permute.xlu0 %6423  ;;  %v6416_v1 = vpop.permute.xlu1 %6415 }
 0xf3b   : > { %9153 = vpow2.f32 %v7043_v7  ;;  %v6501_v12 = vcombine.low %v4439_v20, %v6424_v39  ;;  %v6502_v10 = vcombine.high %v4439_v20, %v6424_v39 }
 0xf3c   : > { %v11128_v13 = vpop.eup %9147 }
 0xf3d   : > { %v6509_v17 = vrot.slane %v6501_v12, %v10295_v40  ;;  %v6516_v18 = vrot.slane %v6502_v10, %v10295_v40  ;;  %v7045_v19 = vsel %vm2756_vm3, %v11128_v13, 0.0 }
 0xf3e   : > { %7046 = vadd.xlane.f32.xlu1 %v7045_v19 }
 0xf3f   : > { %v6533_v22 = vcombine.low %v6509_v17, %v6525_v60  ;;  %v6534_v21 = vcombine.high %v6509_v17, %v6525_v60  ;;  %v6549_v27 = vcombine.low %v6516_v18, %v6532_v15  ;;  %v6550_v35 = vcombine.high %v6516_v18, %v6532_v15 }
 0xf40   : > { %v11136_v38 = vpop.eup %9149 }
 0xf41   : > { %v6541_v42 = vrot.slane %v6533_v22, %v10297_v47  ;;  %v6548_v43 = vrot.slane %v6534_v21, %v10297_v47  ;;  %v6557_v44 = vrot.slane %v6549_v27, %v10297_v47  ;;  %v6564_v45 = vrot.slane %v6550_v35, %v10297_v47 }
 0xf42   : > { %v7048_v48 = vsel %vm2756_vm3, %v11136_v38, 0.0 }
 0xf43   : > { %v6637_v49 = vcombine.low %v6541_v42, %v6548_v43  ;;  %v8343_v62 = vcombine.high %v6541_v42, %v6548_v43  ;;  %v6653_v9 = vcombine.low %v6557_v44, %v6564_v45  ;;  %v8344_v11 = vcombine.high %v6557_v44, %v6564_v45  ;;  %7049 = vadd.xlane.f32.xlu0 %v7048_v48 }
 0xf44   : > { %v11144_v37 = vpop.eup %9151 }
 0xf45   : > { %v6644_v58 = vrot.slane %v6637_v49, %v10295_v40  ;;  %v6652_v56 = vrot.slane %v8343_v62, %v10295_v40  ;;  %v6660_v50 = vrot.slane %v6653_v9, %v10295_v40  ;;  %v6668_v57 = vrot.slane %v8344_v11, %v10295_v40 }
 0xf46   : > { %v7051_v59 = vsel %vm2756_vm3, %v11144_v37, 0.0 }
 0xf47   : > { %7052 = vadd.xlane.f32.xlu1 %v7051_v59  ;;  %v6669_v61 = vcombine.low %v6644_v58, %v6652_v56  ;;  %v6685_v30 = vcombine.low %v6660_v50, %v6668_v57  ;;  %v6670_v29 = vcombine.high %v6644_v58, %v6652_v56  ;;  %v6686_v33 = vcombine.high %v6660_v50, %v6668_v57 }
 0xf48   : > { %v11152_v20 = vpop.eup %9153 }
 0xf49   : > { %v7054_v24 = vsel %vm2756_vm3, %v11152_v20, 0.0  ;;  %v6677_v51 = vrot.slane %v6669_v61, %v10297_v47  ;;  %v6693_v25 = vrot.slane %v6685_v30, %v10297_v47  ;;  %v11159_v0 = vrot.slane %v6670_v29, %v10297_v47 }
 0xf4a   : > { %7055 = vadd.xlane.f32.xlu0 %v7054_v24  ;;  %v11162_v36 = vrot.slane %v6686_v33, %v10297_v47 }
 0xf4b   : > { %v6701_v8 = vcombine.low %v6677_v51, %v6693_v25  ;;  %v6702_v6 = vcombine.high %v6677_v51, %v6693_v25 }
 0xf4c   : > { %v6703_v41 = vcombine.low %v11159_v0, %v11162_v36  ;;  %v6704_v32 = vcombine.high %v11159_v0, %v11162_v36  ;;  %v7511_v36 = vld [vmem:[%s11423_s12 + $0x18] sm:$0xff] }
 0xf4d   : > { %8782 = vmatpush3.msra.mxu0 %v6701_v8  ;;  %8789 = vmatpush3.msra.mxu1 %v6702_v6 }
 0xf4e   : > { %8783 = vmatprep.subr.mxu0 %v9775_v28  ;;  %8790 = vmatprep.subr.mxu1 %v9775_v28 }
 0xf58   : > { %6427 = vrot.lane.b32.xlu1 %v11123_v23, %s9773_s17  ;;  %s11428_s17 = sld [smem:[#allocation61_spill]] }
 0xf5c   : > { %5965 = vrot.lane.b32.xlu1 %v5958_v2, %s9780_s20 }
 0xf60   : > { %5969 = vrot.lane.b32.xlu1 %v5959_v3, %s9781_s19  ;;  %6421 = vrot.lane.b32.xlu0 %v11123_v23, %s9774_s21  ;;  %s11429_s21 = sld [smem:[#allocation65_spill]] }
 0xf64   : > { %5961 = vrot.lane.b32.xlu0 %v5957_v26, %s9779_s7 }
 0xfc7   : > { %v7047_v4 = vpop.xlane.xlu1 %7046 }
 0xfc8   : > { %9155 = vrcp.f32 %v7047_v4 }
 0xfcc   : > { %v7050_v14 = vpop.xlane.xlu0 %7049 }
 0xfcd   : > { %9157 = vrcp.f32 %v7050_v14 }
 0xfd0   : > { %v7053_v54 = vpop.xlane.xlu1 %7052 }
 0xfd1   : > { %9159 = vrcp.f32 %v7053_v54 }
 0xfd3   : > { %v7056_v5 = vpop.xlane.xlu0 %7055 }
 0xfd4   : > { %v6428_v16 = vpop.permute.xlu1 %6427  ;;  %9161 = vrcp.f32 %v7056_v5 }
 0xfd5   : > { %v6449_v2 = vcombine.low %v6416_v1, %v6428_v16  ;;  %v6450_v7 = vcombine.high %v6416_v1, %v6428_v16  ;;  %v9156_v11 = vpop.eup %9155 }
 0xfd6   : > { %v7058_v33 = vmul.f32 %v9156_v11, %v11128_v13 }
 0xfd7   : > { %v6422_v39 = vpop.permute.xlu0 %6421  ;;  %v6457_v3 = vrot.slane %v6449_v2, %v10295_v40  ;;  %v6464_v12 = vrot.slane %v6450_v7, %v10295_v40 }
 0xfd8   : > { %v6433_v63 = vcombine.low %v11123_v23, %v6422_v39  ;;  %v6434_v31 = vcombine.high %v11123_v23, %v6422_v39  ;;  %v5966_v6 = vpop.permute.xlu1 %5965 }
 0xfda   : > { %v6441_v26 = vrot.slane %v6433_v63, %v10295_v40  ;;  %v6448_v10 = vrot.slane %v6434_v31, %v10295_v40  ;;  %v9158_v50 = vpop.eup %9157 }
 0xfdb   : > { %v5962_v61 = vpop.permute.xlu0 %5961  ;;  %v7060_v24 = vmul.f32 %v9158_v50, %v11136_v38 }
 0xfdc   : > { %v6465_v60 = vcombine.low %v6441_v26, %v6457_v3  ;;  %v6466_v15 = vcombine.high %v6441_v26, %v6457_v3  ;;  %v6481_v17 = vcombine.low %v6448_v10, %v6464_v12  ;;  %v6482_v18 = vcombine.high %v6448_v10, %v6464_v12  ;;  %v5970_v4 = vpop.permute.xlu1 %5969 }
 0xfdd   : > { %v5972_v1 = vsel %vm1966_vm2, %v5956_v34, %v5962_v61 }
 0xfde   : > { %v6473_v19 = vrot.slane %v6465_v60, %v10297_v47  ;;  %v6480_v22 = vrot.slane %v6466_v15, %v10297_v47  ;;  %v6489_v23 = vrot.slane %v6481_v17, %v10297_v47  ;;  %v6496_v21 = vrot.slane %v6482_v18, %v10297_v47  ;;  %v9160_v8 = vpop.eup %9159  ;;  %v7510_v18 = vld [vmem:[%s11423_s12 + $0x10] sm:$0xff] }
 0xfdf   : > { %v5973_v55 = vsel %vm2756_vm3, %v5972_v1, %v5966_v6  ;;  %v7062_v38 = vmul.f32 %v9160_v8, %v11144_v37 }
 0xfe0   : > { %v6569_v27 = vcombine.low %v6473_v19, %v6480_v22  ;;  %v8341_v35 = vcombine.high %v6473_v19, %v6480_v22  ;;  %v6585_v42 = vcombine.low %v6489_v23, %v6496_v21  ;;  %v8342_v43 = vcombine.high %v6489_v23, %v6496_v21  ;;  %v7509_v19 = vld [vmem:[%s11423_s12 + $0x8] sm:$0xff] }
 0xfe1   : > { %v9162_v13 = vpop.eup %9161  ;;  %v5974_v0 = vsel %vm2758_vm4, %v5973_v55, %v5970_v4 }
 0xfe2   : > { %v6576_v44 = vrot.slane %v6569_v27, %v10295_v40  ;;  %v6584_v45 = vrot.slane %v8341_v35, %v10295_v40  ;;  %v6592_v48 = vrot.slane %v6585_v42, %v10295_v40  ;;  %v6600_v49 = vrot.slane %v8342_v43, %v10295_v40 }
 0xfe4   : > { %v6601_v62 = vcombine.low %v6576_v44, %v6584_v45  ;;  %v6617_v9 = vcombine.low %v6592_v48, %v6600_v49  ;;  %v6602_v58 = vcombine.high %v6576_v44, %v6584_v45  ;;  %v6618_v56 = vcombine.high %v6592_v48, %v6600_v49 }
 0xfe6   : > { %v6609_v57 = vrot.slane %v6601_v62, %v10297_v47  ;;  %v6625_v59 = vrot.slane %v6617_v9, %v10297_v47  ;;  %v6616_v51 = vrot.slane %v6602_v58, %v10297_v47  ;;  %v6632_v25 = vrot.slane %v6618_v56, %v10297_v47  ;;  %v7508_v9 = vld [vmem:[%s11423_s12] sm:$0xff] }
 0xfe8   : > { %v6633_v30 = vcombine.low %v6609_v57, %v6625_v59  ;;  %v6634_v29 = vcombine.high %v6609_v57, %v6625_v59  ;;  %v6635_v53 = vcombine.low %v6616_v51, %v6632_v25  ;;  %v6636_v34 = vcombine.high %v6616_v51, %v6632_v25 }
 0xfea   : > { %8784 = vmatpush3.msra.mxu0 %v6633_v30  ;;  %8791 = vmatpush3.msra.mxu1 %v6634_v29 }
 0xfeb   : > { %8786 = vmatmul.mubr.msk.f32.vlgmr.msra.gmra.mxu0 %vm2756_vm3, %v7058_v33  ;;  %8793 = vmatmul.mubr.msk.f32.vlgmr.msra.gmra.mxu1 %vm2756_vm3, %v7060_v24 }
 0xfec   : > { %8795 = vmatprep.subr.mxu0 %v9775_v28  ;;  %8802 = vmatprep.subr.mxu1 %v9775_v28 }
 0xfed   : > { %8796 = vmatpush3.msra.mxu0 %v6703_v41  ;;  %8803 = vmatpush3.msra.mxu1 %v6704_v32  ;;  %v7064_v41 = vmul.f32 %v9162_v13, %v11152_v20 }
 0xfee   : > { %8797 = vmatprep.subr.mxu0 %v9775_v28  ;;  %8804 = vmatprep.subr.mxu1 %v9775_v28 }
 0xfef   : > { %8798 = vmatpush3.msra.mxu0 %v6635_v53  ;;  %8799 = vmatprep.mubr.msk.f32.mxu0 %vm9776_vm1, %v9775_v28 }
 0xff0   : > { %8805 = vmatpush3.msra.mxu1 %v6636_v34  ;;  %8806 = vmatprep.mubr.msk.f32.mxu1 %vm9776_vm1, %v9775_v28 }
 0xff1   : > { %8800 = vmatmul.mubr.msk.f32.vlgmr.msra.gmra.mxu0 %vm2756_vm3, %v7062_v38  ;;  %8807 = vmatmul.mubr.msk.f32.vlgmr.msra.gmra.mxu1 %vm2756_vm3, %v7064_v41 }
 0xff2   : > { %8817 = vmatprep.mubr.msk.f32.mxu0 %vm1268_vm0, %v5974_v0  ;;  %8809 = vmatprep.subr.mxu0 %v7511_v36 }
 0xff3   : > { %8810 = vmatpush3.msra.mxu0 %v7511_v36 }
 0xff4   : > { %8811 = vmatprep.subr.mxu0 %v7510_v18 }
 0xff5   : > { %8812 = vmatpush3.msra.mxu0 %v7510_v18 }
 0xff6   : > { %8813 = vmatprep.subr.mxu0 %v7509_v19 }
 0xff7   : > { %8814 = vmatpush3.msra.mxu0 %v7509_v19 }
 0xff8   : > { %8815 = vmatprep.subr.mxu0 %v7508_v9 }
 0xff9   : > { %8816 = vmatpush3.msra.mxu0 %v7508_v9  ;;  %v7741_v9 = vld [vmem:[%s11425_s8 + $0x8] sm:$0xff] }
0x10ab   : > { %v7134_v32 = vpop.f32.mrf.mxu0  ;;  %v7207_v37 = vpop.f32.mrf.mxu1 }
0x10ad   : > { %v8787_v14 = vpop.f32.mrf.mxu0  ;;  %v8794_v20 = vpop.f32.mrf.mxu1 }
0x10b1   : > { %v7280_v54 = vpop.f32.mrf.mxu0  ;;  %v7353_v5 = vpop.f32.mrf.mxu1 }
0x10b2   : > { %v7357_v28 = vcombine.low %v7134_v32, %v7280_v54  ;;  %v7358_v16 = vcombine.high %v7134_v32, %v7280_v54  ;;  %v7373_v2 = vcombine.low %v7207_v37, %v7353_v5  ;;  %v7374_v7 = vcombine.high %v7207_v37, %v7353_v5 }
0x10b3   : > { %v8801_v39 = vpop.f32.mrf.mxu0  ;;  %v8808_v63 = vpop.f32.mrf.mxu1 }
0x10b4   : > { %v7365_v31 = vrot.slane %v7357_v28, %v10295_v40  ;;  %v7372_v3 = vrot.slane %v7358_v16, %v10295_v40  ;;  %v7381_v12 = vrot.slane %v7373_v2, %v10295_v40  ;;  %v7388_v26 = vrot.slane %v7374_v7, %v10295_v40  ;;  %v7648_v7 = vld [vmem:[#allocation28 + $0x10] sm:$0xff]  ;;  %v7647_v39 = vld [vmem:[#allocation28 + $0x8] sm:$0xff]  ;;  %v7646_v63 = vld [vmem:[#allocation28] sm:$0xff] }
0x10b6   : > { %v7389_v10 = vcombine.low %v7365_v31, %v7381_v12  ;;  %v7390_v60 = vcombine.high %v7365_v31, %v7381_v12  ;;  %v7405_v15 = vcombine.low %v7372_v3, %v7388_v26  ;;  %v7406_v17 = vcombine.high %v7372_v3, %v7388_v26  ;;  %v7747_v31 = vld [vmem:[%s11425_s8 + $0x38] sm:$0xff]  ;;  %v7746_v3 = vld [vmem:[%s11425_s8 + $0x30] sm:$0xff]  ;;  %v7745_v12 = vld [vmem:[%s11425_s8 + $0x28] sm:$0xff] }
0x10b7   : > { %8831 = vmatprep.subr.mxu0 %v7747_v31  ;;  %v7744_v26 = vld [vmem:[%s11425_s8 + $0x20] sm:$0xff] }
0x10b8   : > { %v7397_v22 = vrot.slane %v7389_v10, %v10297_v47  ;;  %v7404_v23 = vrot.slane %v7390_v60, %v10297_v47  ;;  %v7413_v21 = vrot.slane %v7405_v15, %v10297_v47  ;;  %v7420_v27 = vrot.slane %v7406_v17, %v10297_v47 }
0x10ba   : > { %v7425_v35 = vcombine.low %v7397_v22, %v7404_v23  ;;  %v8361_v42 = vcombine.high %v7397_v22, %v7404_v23  ;;  %v7441_v43 = vcombine.low %v7413_v21, %v7420_v27  ;;  %v8362_v44 = vcombine.high %v7413_v21, %v7420_v27  ;;  %v8366_v23 = vld [vmem:[%s11426_s2] ss:$0 sm:$0xff]  ;;  %s9627_s2 = scalar_lea.vmem %s9626_s14, 512 }
0x10bb   : > { %v8367_v27 = vld [vmem:[%s9927_s5] ss:$0 sm:$0xff] }
0x10bc   : > { %v7432_v45 = vrot.slane %v7425_v35, %v10295_v40  ;;  %v7440_v48 = vrot.slane %v8361_v42, %v10295_v40  ;;  %v7448_v49 = vrot.slane %v7441_v43, %v10295_v40  ;;  %v7456_v62 = vrot.slane %v8362_v44, %v10295_v40 }
0x10be   : > { %v7458_v11 = vcombine.high %v7432_v45, %v7440_v48  ;;  %v7474_v58 = vcombine.high %v7448_v49, %v7456_v62  ;;  %v7457_v56 = vcombine.low %v7432_v45, %v7440_v48  ;;  %v7473_v50 = vcombine.low %v7448_v49, %v7456_v62  ;;  %v7743_v49 = vld [vmem:[%s11425_s8 + $0x18] sm:$0xff]  ;;  %v7742_v62 = vld [vmem:[%s11425_s8 + $0x10] sm:$0xff] }
0x10c0   : > { %v7472_v57 = vrot.slane %v7458_v11, %v10297_v47  ;;  %v7488_v59 = vrot.slane %v7474_v58, %v10297_v47  ;;  %v7465_v61 = vrot.slane %v7457_v56, %v10297_v47  ;;  %v7481_v30 = vrot.slane %v7473_v50, %v10297_v47  ;;  %v8363_v47 = vld [vmem:[%s11424_s11] ss:$0 sm:$0xff]  ;;  %s9621_s11 = scalar_lea.vmem %s11294_s1, 256 }
0x10c1   : > { %v7740_v11 = vld [vmem:[%s11425_s8] sm:$0xff]  ;;  %p9622_p5 = scmp.ne.s32.totalorder %s11294_s1, %s9621_s11  ;;  %p9629_p10 = scmp.lt.s32.totalorder %s9627_s2, %s9621_s11 }
0x10c2   : > { %v7492_v29 = vcombine.high %v7472_v57, %v7488_v59  ;;  %v7490_v33 = vcombine.high %v7465_v61, %v7481_v30  ;;  %v7489_v24 = vcombine.low %v7465_v61, %v7481_v30  ;;  %v7491_v40 = vcombine.low %v7472_v57, %v7488_v59  ;;  %v8368_v58 = vld [vmem:[%s11427_s6] ss:$0 sm:$0xff] }
0x10c3   : > { %p9623_p3 = pnand %p9622_p5, %p11432_p1  ;;  %p9630_p13 = por %p9629_p10, %p9628_p11 }
0x10c4   : > { %7502 = vrot.lane.b32.xlu1 %v7492_v29, %s9781_s19  ;;  %7494 = vrot.lane.b32.xlu0 %v7490_v33, %s9779_s7  ;;  %v8371_v29 = vld [vmem:[%s11428_s17] ss:$0 sm:$0xff]  ;;  %s11431_s19 = sld [smem:[#allocation67_spill]] }
0x10c5   : > { %p9624_p6 = pneg %p9623_p3 }
0x10c7   : > { %p9631_p9 = pnand %p9630_p13, %p9624_p6 }
0x10c8   : > { %7498 = vrot.lane.b32.xlu0 %v7491_v40, %s9780_s20  ;;  %s11430_s20 = sld [smem:[#allocation66_spill]] }
0x10ca   : > { %s11291_s3 = scalar_lea.hbm %s11431_s19, %s8385_s24 }
0x1136   : > { %v7495_v51 = vpop.permute.xlu0 %7494  ;;  %v7503_v6 = vpop.permute.xlu1 %7502 }
0x1137   : > { %v7505_v25 = vsel %vm1966_vm2, %v7489_v24, %v7495_v51 }
0x113a   : > { %v7499_v8 = vpop.permute.xlu0 %7498 }
0x113b   : > { %v7506_v1 = vsel %vm2756_vm3, %v7505_v25, %v7499_v8 }
0x113c   : > { %v7507_v13 = vsel %vm2758_vm4, %v7506_v1, %v7503_v6 }
0x113d   : > { %8818 = vmatmul.mubr.msk.f32.vlgmr.msra.gmra.mxu0 %vm1268_vm0, %v7507_v13 }
0x113e   : > { %8832 = vmatpush3.msra.mxu0 %v7747_v31 }
0x113f   : > { %8833 = vmatprep.subr.mxu0 %v7746_v3 }
0x1140   : > { %8834 = vmatpush3.msra.mxu0 %v7746_v3 }
0x1141   : > { %8835 = vmatprep.subr.mxu0 %v7745_v12 }
0x1142   : > { %8836 = vmatpush3.msra.mxu0 %v7745_v12 }
0x1143   : > { %8837 = vmatprep.subr.mxu0 %v7744_v26 }
0x1144   : > { %8838 = vmatpush3.msra.mxu0 %v7744_v26 }
0x1145   : > { %8839 = vmatprep.subr.mxu0 %v7743_v49 }
0x1146   : > { %8840 = vmatpush3.msra.mxu0 %v7743_v49 }
0x1147   : > { %8841 = vmatprep.subr.mxu0 %v7742_v62 }
0x1148   : > { %8842 = vmatpush3.msra.mxu0 %v7742_v62 }
0x1149   : > { %8843 = vmatprep.subr.mxu0 %v7741_v9 }
0x114a   : > { %8844 = vmatpush3.msra.mxu0 %v7741_v9 }
0x114b   : > { %8845 = vmatprep.subr.mxu0 %v7740_v11 }
0x114c   : > { %8846 = vmatpush3.msra.mxu0 %v7740_v11 }
0x11fd   : > { %v8819_v53 = vpop.f32.mrf.mxu0 }
0x11fe   : > { %v7597_v55 = vadd.f32 %v8819_v53, %v8363_v47 }
0x11ff   : > { %v7591_v34 = vpop.f32.mrf.mxu0 }
0x1200   : > { %v7592_v38 = vadd.f32 %v8363_v47, %v7591_v34  ;;  %v7601_v41 = vadd.f32 %v7597_v55, %v10666_v52 }
0x1202   : > { %v7607_v4 = vsel %vm1268_vm0, %v7601_v41, 0.0  ;;  %v7600_v0 = vadd.f32 %v7592_v38, %v10662_v46  ;;  %v7649_v46 = vld [vmem:[#allocation28 + $0x18] sm:$0xff] }
0x1203   : > { %7608 = vadd.xlane.f32.xlu1 %v7607_v4  ;;  %8820 = vmatprep.subr.mxu1 %v7649_v46 }
0x1204   : > { %v7604_v36 = vsel %vm1268_vm0, %v7600_v0, 0.0  ;;  %8821 = vmatpush3.msra.mxu1 %v7649_v46  ;;  %v8375_v46 = vld [vmem:[%s11430_s20] ss:$0 sm:$0xff] }
0x1205   : > { %7605 = vadd.xlane.f32.xlu0 %v7604_v36  ;;  %8822 = vmatprep.subr.mxu1 %v7648_v7 }
0x1206   : > { %8823 = vmatpush3.msra.mxu1 %v7648_v7 }
0x1207   : > { %8824 = vmatprep.subr.mxu1 %v7647_v39 }
0x1208   : > { %8825 = vmatpush3.msra.mxu1 %v7647_v39 }
0x1209   : > { %8826 = vmatprep.subr.mxu1 %v7646_v63 }
0x120a   : > { %8827 = vmatpush3.msra.mxu1 %v7646_v63 }
0x128c   : > { %v7609_v32 = vpop.xlane.xlu1 %7608 }
0x128d   : > { %v7611_v37 = vmul.f32 0.03125, %v7609_v32 }
0x128e   : > { %v7606_v14 = vpop.xlane.xlu0 %7605 }
0x128f   : > { %v7610_v20 = vmul.f32 0.03125, %v7606_v14  ;;  %v7613_v54 = vsub.f32 %v7601_v41, %v7611_v37 }
0x1291   : > { %v7612_v5 = vsub.f32 %v7600_v0, %v7610_v20  ;;  %v7615_v2 = vmul.f32 %v7613_v54, %v7613_v54 }
0x1293   : > { %v7614_v28 = vmul.f32 %v7612_v5, %v7612_v5  ;;  %v7619_v52 = vsel %vm1268_vm0, %v7615_v2, 0.0 }
0x1295   : > { %v7616_v16 = vsel %vm1268_vm0, %v7614_v28, 0.0 }
0x1296   : > { %7617 = vadd.xlane.f32.xlu0 %v7616_v16  ;;  %v8374_v16 = vld [vmem:[%s11429_s21] ss:$0 sm:$0xff] }
0x129a   : > { %7620 = vadd.xlane.f32.xlu0 %v7619_v52 }
0x131f   : > { %v7618_v10 = vpop.xlane.xlu0 %7617 }
0x1320   : > { %v7622_v60 = vmul.f32 0.03125, %v7618_v10 }
0x1322   : > { %v7624_v15 = vadd.f32 1e-05, %v7622_v60 }
0x1323   : > { %v7621_v17 = vpop.xlane.xlu0 %7620 }
0x1324   : > { %9163 = vrsqrt.f32 %v7624_v15  ;;  %v7623_v18 = vmul.f32 0.03125, %v7621_v17 }
0x1326   : > { %v7625_v19 = vadd.f32 1e-05, %v7623_v18 }
0x1328   : > { %9165 = vrsqrt.f32 %v7625_v19 }
0x1331   : > { %v9164_v22 = vpop.eup %9163 }
0x1332   : > { %v7628_v21 = vmul.f32 %v9164_v22, %v7612_v5 }
0x1334   : > { %v7636_v35 = vmul.f32 %v8366_v23, %v7628_v21 }
0x1335   : > { %v9166_v42 = vpop.eup %9165 }
0x1336   : > { %v7629_v43 = vmul.f32 %v9166_v42, %v7613_v54  ;;  %v7644_v44 = vadd.f32 %v8367_v27, %v7636_v35 }
0x1338   : > { %v7637_v45 = vmul.f32 %v8366_v23, %v7629_v43  ;;  %8828 = vmatprep.mubr.msk.f32.mxu1 %vm1268_vm0, %v7644_v44 }
0x133a   : > { %v7645_v48 = vadd.f32 %v8367_v27, %v7637_v45 }
0x133c   : > { %8829 = vmatmul.mubr.msk.f32.vlgmr.msra.gmra.mxu1 %vm1268_vm0, %v7645_v48 }
0x13fc   : > { %v8830_v56 = vpop.f32.mrf.mxu1 }
0x13fd   : > { %v7735_v50 = vadd.f32 %v8830_v56, %v8368_v58 }
0x13fe   : > { %v7729_v57 = vpop.f32.mrf.mxu1 }
0x13ff   : > { %v7730_v59 = vadd.f32 %v8368_v58, %v7729_v57  ;;  %v7739_v30 = vmax.f32 %v7735_v50, 0.0 }
0x1401   : > { %v7738_v61 = vmax.f32 %v7730_v59, 0.0 }
0x1403   : > { %8847 = vmatprep.mubr.msk.f32.mxu0 %vm7755_vm5, %v7738_v61 }
0x1404   : > { %8848 = vmatmul.mubr.msk.f32.vlgmr.msra.gmra.mxu0 %vm7755_vm5, %v7739_v30 }
0x14c4   : > { %v8849_v33 = vpop.f32.mrf.mxu0 }
0x14c5   : > { %v7834_v24 = vadd.f32 %v8849_v33, %v8371_v29 }
0x14c6   : > { %v7828_v40 = vpop.f32.mrf.mxu0 }
0x14c7   : > { %v7838_v51 = vadd.f32 %v7834_v24, %v7645_v48  ;;  %v7829_v25 = vadd.f32 %v8371_v29, %v7828_v40 }
0x14c9   : > { %v7837_v8 = vadd.f32 %v7829_v25, %v7644_v44  ;;  %v7844_v6 = vsel %vm1268_vm0, %v7838_v51, 0.0 }
0x14ca   : > { %7845 = vadd.xlane.f32.xlu0 %v7844_v6 }
0x14cb   : > { %v7841_v1 = vsel %vm1268_vm0, %v7837_v8, 0.0 }
0x14cc   : > { %7842 = vadd.xlane.f32.xlu1 %v7841_v1 }
0x1553   : > { %v7846_v13 = vpop.xlane.xlu0 %7845 }
0x1554   : > { %v7848_v47 = vmul.f32 0.03125, %v7846_v13 }
0x1555   : > { %v7843_v53 = vpop.xlane.xlu1 %7842 }
0x1556   : > { %v7850_v55 = vsub.f32 %v7838_v51, %v7848_v47  ;;  %v7847_v34 = vmul.f32 0.03125, %v7843_v53 }
0x1558   : > { %v7849_v38 = vsub.f32 %v7837_v8, %v7847_v34  ;;  %v7852_v41 = vmul.f32 %v7850_v55, %v7850_v55 }
0x155a   : > { %v7856_v4 = vsel %vm1268_vm0, %v7852_v41, 0.0  ;;  %v7851_v0 = vmul.f32 %v7849_v38, %v7849_v38 }
0x155b   : > { %7857 = vadd.xlane.f32.xlu0 %v7856_v4 }
0x155c   : > { %v7853_v36 = vsel %vm1268_vm0, %v7851_v0, 0.0 }
0x155d   : > { %7854 = vadd.xlane.f32.xlu1 %v7853_v36 }
0x15e4   : > { %v7858_v32 = vpop.xlane.xlu0 %7857 }
0x15e5   : > { %v7860_v37 = vmul.f32 0.03125, %v7858_v32 }
0x15e6   : > { %v7855_v14 = vpop.xlane.xlu1 %7854 }
0x15e7   : > { %v7862_v20 = vadd.f32 1e-05, %v7860_v37  ;;  %v7859_v54 = vmul.f32 0.03125, %v7855_v14 }
0x15e9   : > { %9167 = vrsqrt.f32 %v7862_v20  ;;  %v7861_v5 = vadd.f32 1e-05, %v7859_v54 }
0x15eb   : > { %9169 = vrsqrt.f32 %v7861_v5 }
0x15f6   : > { %v9168_v28 = vpop.eup %9167 }
0x15f7   : > { %v7866_v2 = vmul.f32 %v9168_v28, %v7850_v55 }
0x15f8   : > { %v9170_v52 = vpop.eup %9169 }
0x15f9   : > { %v7874_v7 = vmul.f32 %v8374_v16, %v7866_v2  ;;  %v7865_v39 = vmul.f32 %v9170_v52, %v7849_v38 }
0x15fb   : > { %v7882_v63 = vadd.f32 %v8375_v46, %v7874_v7  ;;  %v7873_v31 = vmul.f32 %v8374_v16, %v7865_v39 }
0x15fd   : > { %v7881_v3 = vadd.f32 %v8375_v46, %v7873_v31  ;;  %7884 = vst.msk [vmem:[%s1226_s28 + $0x8] sm:$0xff] %vm1268_vm0, %v7882_v63 }
0x15ff   : > { %7883 = vst.msk [vmem:[%s1226_s28] sm:$0xff] %vm1268_vm0, %v7881_v3 }
0x1600   : > { %9634 = shalt.err (!%p9631_p9)
}
0x1601   : > { %s9635_s6 = scalar_lea.hbm %s11291_s3, 256  ;;  %s9639_s17 = scalar_lea.hbm %s11431_s19, 512 }
0x1602   : > { %p9636_p4 = scmp.ne.s32.totalorder %s11291_s3, %s9635_s6  ;;  %p9640_p8 = scmp.lt.s32.totalorder %s11291_s3, %s11431_s19 }
0x1603   : > { %p9641_p12 = scmp.lt.s32.totalorder %s9639_s17, %s9635_s6 }
0x1604   : > { %p9637_p0 = pnand %p9636_p4, %p11432_p1 }
0x1605   : > { %p9642_p2 = por %p9641_p12, %p9640_p8 }
0x1606   : > { %p9638_p7 = pneg %p9637_p0 }
0x1608   : > { %p9643_p5 = pnand %p9642_p2, %p9638_p7 }
0x160a   : > { %9646 = shalt.err (!%p9643_p5)
}
0x160b   : > { %s9783_s21 = smov 128  }
0x160c   : > { %8914 = dma.vmem_to_hbm [thread:$0]  (%p11432_p1), %s11294_s1, 256, %s11291_s3, %s7886_s23, %s9783_s21, %s9783_s21, %s9779_s7  }
0x160d PF: > { %s7914_s20 = sand.u32 1, %s9709_s15   ;;  %p11433_p3 = scmp.ne.s32.totalorder %s11397_s13, 0 }
0x160e   : > { %p11434_p6 = scmp.ge.s32.totalorder %s9721_s0, 2  ;;  %s7915_s24 = scalar_lea.sflag [#allocation4], %s7914_s20 }
0x1610   : > { %p8970_p11 = pnand %p11434_p6, %p11433_p3 }
0x1612   : > { %p8971_p10 = pneg %p8970_p11 }
0x1614   : > { %9704 = dma.done.wait (%p8971_p10), %s7915_s24, 256  }
0x1615   : > { %9706 = vsyncadd (%p8971_p10), %s7915_s24, 4294967040  ;;  %p84_p13 = scmp.ge.s32.totalorder %s10098_s22, 4   ;;  %s11435_s15 = smov %s9713_s16 }
0x1616   : > { %s11436_s16 = smov %s9717_s18  ;;  %s11437_s18 = smov %s10110_s9 }
0x1617   : > { %s11438_s0 = smov %s10098_s22  ;;  %86 = sbr.rel (!%p84_p13) target bundleno = 78 (0x4e), region = 294 }
0x161c   :  { %7920 = vsyncpa [#allocation3], 1 }
0x161d   :  { %7922 = vsyncpa [#allocation3 + $0x1], 1 }
0x161e   :  { %7923 = vsyncpa [#allocation6], 1 }
0x161f   :  { %7925 = vsyncpa [#allocation6 + $0x1], 1 }
0x1620   :  { %7926 = vsyncpa [#allocation9], 1 }
0x1621   :  { %7927 = vsyncpa [#allocation12], 1 }
0x1622   :  { %7928 = vsyncpa [#allocation15], 1 }
0x1623   :  { %7929 = vsyncpa [#allocation18], 1 }
0x1624   :  { %7930 = vsyncpa [#allocation21], 1 }
0x1625   :  { %7931 = vsyncpa [#allocation24], 1 }
0x1626   :  { %7932 = vsyncpa [#allocation27], 1 }
0x1627   :  { %7933 = vsyncpa [#allocation4], 1 }
0x1628   :  { %7935 = vsyncpa [#allocation4 + $0x1], 1 }

</bundles_post_ra>
